<compile_context>
chip_gen: v6e
topology: v6e:2x2x1
jax: 0.10.0
libtpu: 0.0.40
codegen_flags: <defaults>
</compile_context>

<pallas_src>
import functools

import jax
import jax.numpy as jnp
import numpy as np
from jax.experimental import pallas as pl
from jax.experimental.pallas import tpu as pltpu


# ----------------------------------------------------------------------------- helpers
def _round_up(x, m):
    return ((x + m - 1) // m) * m


def _pad2(x, rows, cols):
    out = jnp.zeros((rows, cols), x.dtype)
    return out.at[:x.shape[0], :x.shape[1]].set(x)


def _pad_gate_cols(w, d, d_pad, n):
    """(in, n*d) -> (in, n*d_pad): each of the n column segments zero-padded to d_pad lanes."""
    out = jnp.zeros((w.shape[0], n * d_pad), w.dtype)
    for g in range(n):
        out = out.at[:, g * d_pad:g * d_pad + d].set(w[:, g * d:(g + 1) * d])
    return out


def _probe_kernel(x_ref, w_ref, o_ref):
    o_ref[...] = x_ref[...] + w_ref[...]


@functools.lru_cache(maxsize=None)
def _buffered1_supported():
    """Probe whether pipeline_mode=pl.Buffered(1) works on this jax/libtpu (VMEM lever)."""
    if not hasattr(pl, "Buffered"):
        return False
    try:
        x = jnp.zeros((16, 128), jnp.float32)
        w = jnp.zeros((8, 128), jnp.float32)
        out = pl.pallas_call(
            _probe_kernel,
            out_shape=jax.ShapeDtypeStruct((16, 128), jnp.float32),
            grid=(2,),
            in_specs=[pl.BlockSpec((8, 128), lambda i: (i, 0)),
                      pl.BlockSpec((8, 128), lambda i: (0, 0),
                                   pipeline_mode=pl.Buffered(1))],
            out_specs=pl.BlockSpec((8, 128), lambda i: (i, 0)))(x, w)
        jax.block_until_ready(out)
        return True
    except Exception:
        return False


def _inv_spec(block_shape, index_map, single_buffer):
    """BlockSpec for a strictly grid-invariant operand: single VMEM buffer if supported."""
    if single_buffer:
        return pl.BlockSpec(block_shape, index_map, pipeline_mode=pl.Buffered(1))
    return pl.BlockSpec(block_shape, index_map)


# ----------------------------------------------------------------------------- recurrent kernel
def _decoder_step_kernel(
    bst_ref,            # SMEM (T,) int32   batch_size_t per step (captions sorted desc)
    enc_ref,            # (BB, P_pad, E_pad) bf16  image features (zero padded)
    emb_ref,            # (1, BB, EMB_pad)   bf16  current-step caption embeddings
    w_ea_ref, b_ea_ref,       # encoder_att: (E_pad, A_pad) bf16, (1, A_pad) f32
    w_fa_ref, b_fa_ref,       # full_att:    (1, A_pad) f32,  (1, 1) f32
    w_init_ref, b_init_ref,   # fused init_h|init_c: (E_pad, 2*D_pad) bf16, (1, 2*D_pad) f32
    w_hf_ref, b_hf_ref,       # fused dec_att|f_beta|lstm_hh: (D_pad, HF) bf16, (1, HF) f32
    w_ie_ref,                 # lstm W_ih (embedding side): (EMB_pad, 4*D_pad) bf16
    w_ia_ref,                 # lstm W_ih (awe side):       (E_pad, 4*D_pad) bf16
    b_i_ref,                  # lstm b_ih: (1, 4*D_pad) f32
    h_out_ref,          # out (1, BB, D_pad) f32
    alpha_ref,          # out (1, BB, P_pad) f32
    h_sc, c_sc,         # VMEM (BB, D_pad) f32 carried hidden / cell state
    att1_sc,            # VMEM (BB, P_pad, A_pad) f32 hoisted time-invariant enc_att projection
    *, num_pixels,
):
    f32, bf16 = jnp.float32, jnp.bfloat16
    b = pl.program_id(0)
    t = pl.program_id(1)
    enc = enc_ref[...]                                   # (BB, P_pad, E_pad) bf16
    BB, P_pad, E_pad = enc.shape
    D_pad = h_sc.shape[1]
    A_pad = w_ea_ref.shape[1]

    # init_hidden_state + hoisted attention projection (once per batch block)
    @pl.when(t == 0)
    def _init():
        mean_enc = (jnp.sum(enc.astype(f32), axis=1) * (1.0 / num_pixels)).astype(bf16)
        hc0 = jnp.dot(mean_enc, w_init_ref[...],
                      preferred_element_type=f32) + b_init_ref[...]          # (BB, 2*D_pad)
        h_sc[...] = hc0[:, :D_pad]
        c_sc[...] = hc0[:, D_pad:]
        att1_sc[...] = (jnp.dot(enc.reshape(BB * P_pad, E_pad), w_ea_ref[...],
                                preferred_element_type=f32)
                        .reshape(BB, P_pad, A_pad) + b_ea_ref[...])

    h = h_sc[...]                                        # (BB, D_pad) f32
    c = c_sc[...]

    # --------------------------------------- fused h-driven projections: [att2 | gate | hh]
    hf = jnp.dot(h.astype(bf16), w_hf_ref[...],
                 preferred_element_type=f32) + b_hf_ref[...]
    att2 = hf[:, :A_pad]                                 # decoder_att(h)
    gate = jax.nn.sigmoid(hf[:, A_pad:A_pad + E_pad])    # sigmoid(f_beta(h)), f32
    hh = hf[:, A_pad + E_pad:]                           # h @ W_hh + b_hh

    # --------------------------------------- AttentionModule
    att = jnp.maximum(att1_sc[...] + att2[:, None, :], 0.0)          # (BB, P_pad, A_pad)
    scores = jnp.sum(att * w_fa_ref[...].reshape(1, 1, A_pad), axis=2) + b_fa_ref[...]
    pix = jax.lax.broadcasted_iota(jnp.int32, (1, P_pad), 1)
    scores = jnp.where(pix < num_pixels, scores, -1e30)              # mask padded pixels
    m = jnp.max(scores, axis=1, keepdims=True)
    ex = jnp.exp(scores - m)
    alpha = ex * pl.reciprocal(jnp.sum(ex, axis=1, keepdims=True), approx=True)

    # attention-weighted encoding as a batched MXU matmul (alternative: VPU mul + reduce)
    awe = jnp.einsum('bkp,bpe->bke', alpha.reshape(BB, 1, P_pad).astype(bf16), enc,
                     preferred_element_type=f32).reshape(BB, E_pad)
    awe = gate * awe

    # --------------------------------------- LSTMCell([emb_t, awe], (h, c)); split input matmul
    emb_t = emb_ref[0]                                   # (BB, EMB_pad) bf16
    gates = (jnp.dot(emb_t, w_ie_ref[...], preferred_element_type=f32)
             + jnp.dot(awe.astype(bf16), w_ia_ref[...], preferred_element_type=f32)
             + b_i_ref[...] + hh)                        # (BB, 4*D_pad) — torch order i,f,g,o
    i_g = jax.nn.sigmoid(gates[:, 0 * D_pad:1 * D_pad])
    f_g = jax.nn.sigmoid(gates[:, 1 * D_pad:2 * D_pad])
    g_g = jnp.tanh(gates[:, 2 * D_pad:3 * D_pad])
    o_g = jax.nn.sigmoid(gates[:, 3 * D_pad:4 * D_pad])
    c_new = f_g * c + i_g * g_g
    h_new = o_g * jnp.tanh(c_new)

    # active rows form a prefix (captions sorted descending): row < batch_size_t
    bst_t = bst_ref[t]
    row = jax.lax.broadcasted_iota(jnp.int32, (BB, 1), 0) + b * BB
    active = row < bst_t

    h_out_ref[0] = h_new
    alpha_ref[0] = jnp.where(active, alpha, 0.0)
    h_sc[...] = h_new
    c_sc[...] = c_new


# ----------------------------------------------------------------------------- fc (vocab) kernel
def _fc_kernel(h_ref, m_ref, w_ref, b_ref, o_ref):
    # h_ref: (TR, D_pad) f32; m_ref: (TR, 1) f32; w_ref: (D_pad, TV) bf16; b/o: (.., TV)
    y = jnp.dot(h_ref[...].astype(jnp.bfloat16), w_ref[...],
                preferred_element_type=jnp.float32) + b_ref[...]
    o_ref[...] = m_ref[...] * y


# ----------------------------------------------------------------------------- wrapper
def decoder_with_attention_forward(params, encoder_out, encoded_captions, caption_lens):
    """Mirrors DecoderWithAttention.forward; returns
    (predictions, encoded_captions_sorted, decode_lens, alphas, sort_idx)."""
    f32, bf16 = jnp.float32, jnp.bfloat16

    B = encoder_out.shape[0]
    E = encoder_out.shape[-1]
    enc = encoder_out.reshape(B, -1, E)                  # (B, P, E)
    P = enc.shape[1]

    # sort by caption length, descending (glue, as in the PyTorch module)
    lens = caption_lens[:, 0].astype(jnp.int32)
    sort_idx = jnp.argsort(-lens)
    lens_sorted = lens[sort_idx]
    enc = enc[sort_idx]
    caps_sorted = encoded_captions[sort_idx]
    embeddings = params["W_emb"][caps_sorted]            # (B, L, EMB) embedding gather (glue)

    decode_lens = lens_sorted - 1
    T = int(jax.device_get(jnp.max(decode_lens)))        # host-static trip count

    D = params["W_init_h"].shape[1]
    A = params["W_enc_att"].shape[1]
    EMB = params["W_emb"].shape[1]
    V = params["W_fc"].shape[1]

    # ------------------------------------------------------------- lane-aligned padded dims
    A_pad = _round_up(A, 128)
    E_pad = _round_up(E, 128)
    D_pad = _round_up(D, 128)
    EMB_pad = _round_up(EMB, 128)
    P_pad = _round_up(P, 128)
    HF = A_pad + E_pad + 4 * D_pad

    use_buf1 = _buffered1_supported()
    inv_buf = 1 if use_buf1 else 2

    # ------------------------------------------------------------- batch block (BB) selection
    def recurrent_vmem_bytes(bb):
        byt = 2 * bb * P_pad * E_pad * 2                                   # enc (bf16, 2 buffers)
        byt += 2 * bb * EMB_pad * 2                                        # emb (bf16, 2 buffers)
        w_b = (E_pad * A_pad + E_pad * 2 * D_pad + D_pad * HF
               + EMB_pad * 4 * D_pad + E_pad * 4 * D_pad) * 2              # bf16 weights
        s_b = (2 * A_pad + 1 + 2 * D_pad + HF + 4 * D_pad) * 4             # f32 biases / w_fa
        byt += inv_buf * (w_b + s_b)
        byt += 2 * 4 * (bb * D_pad + bb * P_pad)                           # h/alpha out blocks
        byt += 4 * (2 * bb * D_pad + bb * P_pad * A_pad)                   # h/c/att1 scratch
        byt += 4 * (2 * bb * P_pad * A_pad + bb * P_pad * E_pad)           # large f32 temporaries
        return byt

    B8 = _round_up(B, 8)
    BB_TARGET = 128                       # MXU row-width target
    if B8 < 32:
        BB = B8                           # too small to split across TensorCores
    elif B8 <= 2 * BB_TARGET:
        BB = _round_up((B8 + 1) // 2, 8)  # two blocks -> both v7x cores stay busy (NB >= 2)
    else:
        BB = BB_TARGET
    VMEM_BUDGET = 40 << 20                # headroom under v7x's 64 MiB physical VMEM
    while BB > 8 and recurrent_vmem_bytes(BB) > VMEM_BUDGET:
        BB -= 8
    B_pad = _round_up(B8, BB)
    NB = B_pad // BB

    # ------------------------------------------------------------- padded inputs
    enc_pad = jnp.zeros((B_pad, P_pad, E_pad), bf16).at[:B, :P, :E].set(enc.astype(bf16))
    emb_tmajor = jnp.transpose(embeddings, (1, 0, 2))[:T]                  # (T, B, EMB)
    emb_pad = jnp.zeros((T, B_pad, EMB_pad), bf16).at[:, :B, :EMB].set(emb_tmajor.astype(bf16))

    dl_pad = jnp.zeros((B_pad,), jnp.int32).at[:B].set(decode_lens)
    t_range = jnp.arange(T, dtype=jnp.int32)
    bst_per_t = jnp.sum(dl_pad[None, :] > t_range[:, None], axis=1).astype(jnp.int32)  # (T,)

    # ------------------------------------------------------------- fused / padded weights (bf16)
    # Every gate/segment boundary is padded to a 128-lane multiple with zero weights & biases,
    # so padded lanes of h/c/awe stay exactly zero through the recurrence.
    W_ea = _pad2(params["W_enc_att"], E_pad, A_pad).astype(bf16)
    b_ea = _pad2(params["b_enc_att"], 1, A_pad)
    w_fa = _pad2(params["w_full_att"], 1, A_pad)
    b_fa = params["b_full_att"]

    W_init = _pad2(
        _pad_gate_cols(jnp.concatenate([params["W_init_h"], params["W_init_c"]], axis=1),
                       D, D_pad, 2), E_pad, 2 * D_pad).astype(bf16)
    b_init = _pad_gate_cols(jnp.concatenate([params["b_init_h"], params["b_init_c"]], axis=1),
                            D, D_pad, 2)

    W_hf = _pad2(jnp.concatenate(
        [_pad2(params["W_dec_att"], D, A_pad),
         _pad2(params["W_f_beta"], D, E_pad),
         _pad_gate_cols(params["W_lstm_hh"], D, D_pad, 4)], axis=1), D_pad, HF).astype(bf16)
    b_hf = jnp.concatenate(
        [_pad2(params["b_dec_att"], 1, A_pad),
         _pad2(params["b_f_beta"], 1, E_pad),
         _pad_gate_cols(params["b_lstm_hh"], D, D_pad, 4)], axis=1)

    W_ie = _pad2(_pad_gate_cols(params["W_lstm_ih_emb"], D, D_pad, 4),
                 EMB_pad, 4 * D_pad).astype(bf16)
    W_ia = _pad2(_pad_gate_cols(params["W_lstm_ih_enc"], D, D_pad, 4),
                 E_pad, 4 * D_pad).astype(bf16)
    b_i = _pad_gate_cols(params["b_lstm_ih"], D, D_pad, 4)

    TV = 256                                             # vocab tile: fills v6e/v7x 256-wide MXU
    V_pad = _round_up(V, TV)
    W_fc = _pad2(params["W_fc"], D_pad, V_pad).astype(bf16)
    b_fc = _pad2(params["b_fc"], 1, V_pad)

    # ------------------------------------------------------------- recurrent pallas_call
    c2 = lambda b, t, s: (0, 0)
    inv = functools.partial(_inv_spec, single_buffer=use_buf1)
    vmem_rec = min(max(int(recurrent_vmem_bytes(BB) * 1.5), 32 << 20), 60 << 20)

    grid_spec = pltpu.PrefetchScalarGridSpec(
        num_scalar_prefetch=1,
        grid=(NB, T),
        in_specs=[
            # enc varies along the parallel batch axis -> keep default double buffer
            pl.BlockSpec((BB, P_pad, E_pad), lambda b, t, s: (b, 0, 0)),
            pl.BlockSpec((1, BB, EMB_pad), lambda b, t, s: (t, b, 0)),      # per-step embeddings
            inv((E_pad, A_pad), c2), inv((1, A_pad), c2),                   # encoder_att
            inv((1, A_pad), c2), inv((1, 1), c2),                           # full_att
            inv((E_pad, 2 * D_pad), c2), inv((1, 2 * D_pad), c2),           # init h|c (fused)
            inv((D_pad, HF), c2), inv((1, HF), c2),                         # dec_att|f_beta|hh
            inv((EMB_pad, 4 * D_pad), c2),                                  # W_ih (emb side)
            inv((E_pad, 4 * D_pad), c2),                                    # W_ih (awe side)
            inv((1, 4 * D_pad), c2),                                        # b_ih
        ],
        out_specs=[
            pl.BlockSpec((1, BB, D_pad), lambda b, t, s: (t, b, 0)),        # h per step
            pl.BlockSpec((1, BB, P_pad), lambda b, t, s: (t, b, 0)),        # alpha per step
        ],
        scratch_shapes=[pltpu.VMEM((BB, D_pad), jnp.float32),
                        pltpu.VMEM((BB, D_pad), jnp.float32),
                        pltpu.VMEM((BB, P_pad, A_pad), jnp.float32)],
    )

    h_seq, alphas_pad = pl.pallas_call(
        functools.partial(_decoder_step_kernel, num_pixels=P),
        out_shape=(jax.ShapeDtypeStruct((T, B_pad, D_pad), jnp.float32),
                   jax.ShapeDtypeStruct((T, B_pad, P_pad), jnp.float32)),
        grid_spec=grid_spec,
        compiler_params=pltpu.CompilerParams(
            dimension_semantics=("parallel", "arbitrary"),
            vmem_limit_bytes=vmem_rec),
    )(bst_per_t, enc_pad, emb_pad, W_ea, b_ea, w_fa, b_fa,
      W_init, b_init, W_hf, b_hf, W_ie, W_ia, b_i)

    # ------------------------------------------------------------- vocab projection (fc)
    # 2-D tiled GEMM: rows (T*B_pad) x vocab, both axes parallel (megacore-splittable).
    R = T * B_pad
    TR = 256 if _round_up(R, 8) >= 256 else _round_up(R, 8)
    R_pad = _round_up(R, TR)
    h_flat = jnp.zeros((R_pad, D_pad), f32).at[:R].set(h_seq.reshape(R, D_pad))
    mask = (dl_pad[None, :] > t_range[:, None]).astype(f32).reshape(R, 1)   # torch zero-init preds
    mask_pad = jnp.zeros((R_pad, 1), f32).at[:R].set(mask)

    fc_bytes = 2 * (TR * D_pad * 4 + TR * 4 + D_pad * TV * 2 + TV * 4 + 2 * TR * TV * 4)
    preds_flat = pl.pallas_call(
        _fc_kernel,
        out_shape=jax.ShapeDtypeStruct((R_pad, V_pad), jnp.float32),
        grid_spec=pltpu.PrefetchScalarGridSpec(
            num_scalar_prefetch=0,
            grid=(R_pad // TR, V_pad // TV),
            in_specs=[pl.BlockSpec((TR, D_pad), lambda r, v: (r, 0)),
                      pl.BlockSpec((TR, 1), lambda r, v: (r, 0)),
                      pl.BlockSpec((D_pad, TV), lambda r, v: (0, v)),
                      pl.BlockSpec((1, TV), lambda r, v: (0, v))],
            out_specs=pl.BlockSpec((TR, TV), lambda r, v: (r, v))),
        compiler_params=pltpu.CompilerParams(
            dimension_semantics=("parallel", "parallel"),
            vmem_limit_bytes=min(max(int(fc_bytes * 1.5), 16 << 20), 60 << 20)),
    )(h_flat, mask_pad, W_fc, b_fc)

    predictions = jnp.transpose(preds_flat[:R].reshape(T, B_pad, V_pad)[:, :B, :V], (1, 0, 2))
    alphas = jnp.transpose(alphas_pad[:, :B, :P], (1, 0, 2))
    return predictions, caps_sorted, decode_lens, alphas, sort_idx


# ----------------------------------------------------------------------------- params
def init_params(key, attention_dim, embed_dim, decoder_dim, vocab_size, encoder_dim):
    ks = jax.random.split(key, 20)
    u = lambda k, shape, s=0.1: jax.random.uniform(k, shape, jnp.float32, -s, s)
    A, EMB, D, V, E = attention_dim, embed_dim, decoder_dim, vocab_size, encoder_dim
    return {
        "W_emb": u(ks[0], (V, EMB)),
        "W_init_h": u(ks[1], (E, D)), "b_init_h": u(ks[2], (1, D)),
        "W_init_c": u(ks[3], (E, D)), "b_init_c": u(ks[4], (1, D)),
        "W_enc_att": u(ks[5], (E, A)), "b_enc_att": u(ks[6], (1, A)),
        "W_dec_att": u(ks[7], (D, A)), "b_dec_att": u(ks[8], (1, A)),
        "w_full_att": u(ks[9], (1, A)), "b_full_att": jnp.zeros((1, 1), jnp.float32),
        "W_f_beta": u(ks[10], (D, E)), "b_f_beta": u(ks[11], (1, E)),
        "W_lstm_ih_emb": u(ks[12], (EMB, 4 * D)),
        "W_lstm_ih_enc": u(ks[13], (E, 4 * D)),
        "b_lstm_ih": u(ks[14], (1, 4 * D)),
        "W_lstm_hh": u(ks[15], (D, 4 * D)),
        "b_lstm_hh": u(ks[16], (1, 4 * D)),
        "W_fc": u(ks[17], (D, V)), "b_fc": jnp.zeros((1, V), jnp.float32),
    }


# ----------------------------------------------------------------------------- pure-JAX reference
def reference_forward(p, enc, emb, decode_lens, T):
    mean_enc = enc.mean(axis=1)
    h = mean_enc @ p["W_init_h"] + p["b_init_h"]
    c = mean_enc @ p["W_init_c"] + p["b_init_c"]
    D = h.shape[1]
    preds_all, alphas_all = [], []
    for t in range(T):
        att1 = enc @ p["W_enc_att"] + p["b_enc_att"]
        att2 = h @ p["W_dec_att"] + p["b_dec_att"]
        att = jnp.maximum(att1 + att2[:, None, :], 0.0)
        scores = jnp.sum(att * p["w_full_att"].reshape(1, 1, -1), axis=2) + p["b_full_att"]
        alpha = jax.nn.softmax(scores, axis=1)
        awe = jnp.sum(enc * alpha[:, :, None], axis=1)
        gate = jax.nn.sigmoid(h @ p["W_f_beta"] + p["b_f_beta"])
        awe = gate * awe
        gates = (emb[:, t, :] @ p["W_lstm_ih_emb"] + awe @ p["W_lstm_ih_enc"]
                 + p["b_lstm_ih"] + h @ p["W_lstm_hh"] + p["b_lstm_hh"])
        i_g = jax.nn.sigmoid(gates[:, 0 * D:1 * D])
        f_g = jax.nn.sigmoid(gates[:, 1 * D:2 * D])
        g_g = jnp.tanh(gates[:, 2 * D:3 * D])
        o_g = jax.nn.sigmoid(gates[:, 3 * D:4 * D])
        c = f_g * c + i_g * g_g
        h = o_g * jnp.tanh(c)
        pr = h @ p["W_fc"] + p["b_fc"]
        active = (decode_lens > t)[:, None]
        preds_all.append(jnp.where(active, pr, 0.0))
        alphas_all.append(jnp.where(active, alpha, 0.0))
    return jnp.stack(preds_all, axis=1), jnp.stack(alphas_all, axis=1)


# ----------------------------------------------------------------------------- main
if __name__ == "__main__":
    B, H, W, E = 4, 4, 4, 32          # batch, spatial, encoder_dim -> num_pixels = 16
    A, EMB, D, V = 32, 16, 32, 48     # attention_dim, embed_dim, decoder_dim, vocab_size
    L = 8                             # max caption length

    key = jax.random.PRNGKey(0)
    k_enc, k_cap, k_par = jax.random.split(key, 3)
    encoder_out = jax.random.normal(k_enc, (B, H, W, E), jnp.float32)
    encoded_captions = jax.random.randint(k_cap, (B, L), 0, V).astype(jnp.int32)
    caption_lens = jnp.array([[8], [6], [7], [5]], dtype=jnp.int32)

    params = init_params(k_par, A, EMB, D, V, E)

    preds, caps_sorted, decode_lens, alphas, sort_idx = decoder_with_attention_forward(
        params, encoder_out, encoded_captions, caption_lens)
    jax.block_until_ready((preds, alphas, caps_sorted, decode_lens, sort_idx))

    # numerical check against pure-JAX (f32) reference
    enc_flat = encoder_out.reshape(B, -1, E)
    lens = caption_lens[:, 0]
    si = jnp.argsort(-lens)
    enc_s = enc_flat[si]
    caps_s = encoded_captions[si]
    emb_s = params["W_emb"][caps_s]
    dls = lens[si] - 1
    T = int(jax.device_get(jnp.max(dls)))
    ref_p, ref_a = reference_forward(params, enc_s, emb_s, dls, T)
    np.testing.assert_allclose(np.asarray(preds), np.asarray(ref_p), rtol=2e-2, atol=2e-2)
    np.testing.assert_allclose(np.asarray(alphas), np.asarray(ref_a), rtol=2e-2, atol=2e-2)

    print("KERNEL_OK")
</pallas_src>

<mosaic_0001>
module attributes {stable_mosaic.version = 11 : i64} {
  func.func @_probe_kernel(%arg0: i32, %arg1: memref<8x128xf32, #tpu.memory_space<vmem>>, %arg2: memref<8x128xf32, #tpu.memory_space<vmem>>, %arg3: memref<8x128xf32, #tpu.memory_space<vmem>>) attributes {dimension_semantics = [#tpu.dimension_semantics<arbitrary>], iteration_bounds = array<i64: 2>, scalar_prefetch = 0 : i64, scratch_operands = 0 : i64, tpu.core_type = #tpu.core_type<tc>, window_params = [{transform_indices = @transform_0, window_bounds = array<i64: 8, 128>}, {pipeline_mode = #tpu.pipeline_mode<synchronous>, transform_indices = @transform_1, window_bounds = array<i64: 8, 128>}, {transform_indices = @transform_2, window_bounds = array<i64: 8, 128>}]} {
    %c0 = arith.constant 0 : index
    %c0_0 = arith.constant 0 : index
    %0 = vector.load %arg1[%c0, %c0_0] : memref<8x128xf32, #tpu.memory_space<vmem>>, vector<8x128xf32>
    %c0_1 = arith.constant 0 : index
    %c0_2 = arith.constant 0 : index
    %1 = vector.load %arg2[%c0_1, %c0_2] : memref<8x128xf32, #tpu.memory_space<vmem>>, vector<8x128xf32>
    %2 = arith.addf %0, %1 : vector<8x128xf32>
    %c0_3 = arith.constant 0 : index
    %c0_4 = arith.constant 0 : index
    %3 = vector.load %arg3[%c0_3, %c0_4] : memref<8x128xf32, #tpu.memory_space<vmem>>, vector<8x128xf32>
    tpu.vector_store %arg3[%c0_3, %c0_4], %2 {strides = array<i32>} : memref<8x128xf32, #tpu.memory_space<vmem>>, vector<8x128xf32>,
    return
  }
  func.func @transform_0(%arg0: i32) -> (i32, i32) {
    %c0_i32 = arith.constant 0 : i32
    %c0_i32_0 = arith.constant 0 : i32
    return %arg0, %c0_i32 : i32, i32
  }
  func.func @transform_1(%arg0: i32) -> (i32, i32) {
    %c0_i32 = arith.constant 0 : i32
    %c0_i32_0 = arith.constant 0 : i32
    %c0_i32_1 = arith.constant 0 : i32
    return %c0_i32, %c0_i32_0 : i32, i32
  }
  func.func @transform_2(%arg0: i32) -> (i32, i32) {
    %c0_i32 = arith.constant 0 : i32
    %c0_i32_0 = arith.constant 0 : i32
    return %arg0, %c0_i32 : i32, i32
  }
}

module attributes {stable_mosaic.version = 11 : i64} {
  func.func @_decoder_step_kernel(%arg0: i32, %arg1: i32, %arg2: memref<7xi32, #tpu.memory_space<smem>>, %arg3: memref<8x128x128xbf16, #tpu.memory_space<vmem>>, %arg4: memref<1x8x128xbf16, #tpu.memory_space<vmem>>, %arg5: memref<128x128xbf16, #tpu.memory_space<vmem>>, %arg6: memref<1x128xf32, #tpu.memory_space<vmem>>, %arg7: memref<1x128xf32, #tpu.memory_space<vmem>>, %arg8: memref<1x1xf32, #tpu.memory_space<vmem>>, %arg9: memref<128x256xbf16, #tpu.memory_space<vmem>>, %arg10: memref<1x256xf32, #tpu.memory_space<vmem>>, %arg11: memref<128x768xbf16, #tpu.memory_space<vmem>>, %arg12: memref<1x768xf32, #tpu.memory_space<vmem>>, %arg13: memref<128x512xbf16, #tpu.memory_space<vmem>>, %arg14: memref<128x512xbf16, #tpu.memory_space<vmem>>, %arg15: memref<1x512xf32, #tpu.memory_space<vmem>>, %arg16: memref<1x8x128xf32, #tpu.memory_space<vmem>>, %arg17: memref<1x8x128xf32, #tpu.memory_space<vmem>>, %arg18: memref<8x128xf32, #tpu.memory_space<vmem>>, %arg19: memref<8x128xf32, #tpu.memory_space<vmem>>, %arg20: memref<8x128x128xf32, #tpu.memory_space<vmem>>) attributes {dimension_semantics = [#tpu.dimension_semantics<parallel>, #tpu.dimension_semantics<arbitrary>], iteration_bounds = array<i64: 1, 7>, scalar_prefetch = 1 : i64, scratch_operands = 3 : i64, tpu.core_type = #tpu.core_type<tc>, window_params = [{transform_indices = @transform_0, window_bounds = array<i64: 8, 128, 128>}, {transform_indices = @transform_1, window_bounds = array<i64: 1, 8, 128>}, {pipeline_mode = #tpu.pipeline_mode<synchronous>, transform_indices = @transform_2, window_bounds = array<i64: 128, 128>}, {pipeline_mode = #tpu.pipeline_mode<synchronous>, transform_indices = @transform_3, window_bounds = array<i64: 1, 128>}, {pipeline_mode = #tpu.pipeline_mode<synchronous>, transform_indices = @transform_4, window_bounds = array<i64: 1, 128>}, {pipeline_mode = #tpu.pipeline_mode<synchronous>, transform_indices = @transform_5, window_bounds = array<i64: 1, 1>}, {pipeline_mode = #tpu.pipeline_mode<synchronous>, transform_indices = @transform_6, window_bounds = array<i64: 128, 256>}, {pipeline_mode = #tpu.pipeline_mode<synchronous>, transform_indices = @transform_7, window_bounds = array<i64: 1, 256>}, {pipeline_mode = #tpu.pipeline_mode<synchronous>, transform_indices = @transform_8, window_bounds = array<i64: 128, 768>}, {pipeline_mode = #tpu.pipeline_mode<synchronous>, transform_indices = @transform_9, window_bounds = array<i64: 1, 768>}, {pipeline_mode = #tpu.pipeline_mode<synchronous>, transform_indices = @transform_10, window_bounds = array<i64: 128, 512>}, {pipeline_mode = #tpu.pipeline_mode<synchronous>, transform_indices = @transform_11, window_bounds = array<i64: 128, 512>}, {pipeline_mode = #tpu.pipeline_mode<synchronous>, transform_indices = @transform_12, window_bounds = array<i64: 1, 512>}, {transform_indices = @transform_13, window_bounds = array<i64: 1, 8, 128>}, {transform_indices = @transform_14, window_bounds = array<i64: 1, 8, 128>}]} {
    %c0 = arith.constant 0 : index
    %c0_0 = arith.constant 0 : index
    %c0_1 = arith.constant 0 : index
    %0 = vector.load %arg3[%c0, %c0_0, %c0_1] : memref<8x128x128xbf16, #tpu.memory_space<vmem>>, vector<8x128x128xbf16>
    %c0_i32 = arith.constant 0 : i32
    %1 = arith.cmpi eq, %arg1, %c0_i32 : i32
    %2 = arith.extui %1 : i1 to i32
    %c0_i32_2 = arith.constant 0 : i32
    %3 = arith.cmpi ne, %2, %c0_i32_2 : i32
    scf.if %3 {
      %113 = arith.extf %0 : vector<8x128x128xbf16> to vector<8x128x128xf32>
      %cst_50 = arith.constant dense<0.000000e+00> : vector<8x128xf32>
      %114 = vector.multi_reduction <add>, %113, %cst_50 [1] : vector<8x128x128xf32> to vector<8x128xf32>
      %cst_51 = arith.constant 6.250000e-02 : f32
      %115 = vector.broadcast %cst_51 : f32 to vector<8x128xf32>
      %116 = arith.mulf %114, %115 : vector<8x128xf32>
      %117 = arith.truncf %116 : vector<8x128xf32> to vector<8x128xbf16>
      %c0_52 = arith.constant 0 : index
      %c0_53 = arith.constant 0 : index
      %118 = vector.load %arg9[%c0_52, %c0_53] : memref<128x256xbf16, #tpu.memory_space<vmem>>, vector<128x256xbf16>
      %cst_54 = arith.constant dense<0.000000e+00> : vector<8x256xf32>
      %119 = tpu.matmul %117, %118, %cst_54 {dimension_numbers = #tpu.dot_dimension_numbers<[1], [0], [0], [1], [0, 0, 1, 1], [], []>} : vector<8x128xbf16>, vector<128x256xbf16>, vector<8x256xf32> -> vector<8x256xf32>
      %c0_55 = arith.constant 0 : index
      %c0_56 = arith.constant 0 : index
      %120 = vector.load %arg10[%c0_55, %c0_56] : memref<1x256xf32, #tpu.memory_space<vmem>>, vector<1x256xf32>
      %121 = vector.broadcast %120 : vector<1x256xf32> to vector<8x256xf32>
      %122 = arith.addf %119, %121 : vector<8x256xf32>
      %123 = vector.extract_strided_slice %122 {offsets = [0, 0], sizes = [8, 128], strides = [1, 1]} : vector<8x256xf32> to vector<8x128xf32>
      %c0_57 = arith.constant 0 : index
      %c0_58 = arith.constant 0 : index
      %124 = vector.load %arg18[%c0_57, %c0_58] : memref<8x128xf32, #tpu.memory_space<vmem>>, vector<8x128xf32>
      tpu.vector_store %arg18[%c0_57, %c0_58], %123 {strides = array<i32>} : memref<8x128xf32, #tpu.memory_space<vmem>>, vector<8x128xf32>,
      %125 = vector.extract_strided_slice %122 {offsets = [0, 128], sizes = [8, 128], strides = [1, 1]} : vector<8x256xf32> to vector<8x128xf32>
      %c0_59 = arith.constant 0 : index
      %c0_60 = arith.constant 0 : index
      %126 = vector.load %arg19[%c0_59, %c0_60] : memref<8x128xf32, #tpu.memory_space<vmem>>, vector<8x128xf32>
      tpu.vector_store %arg19[%c0_59, %c0_60], %125 {strides = array<i32>} : memref<8x128xf32, #tpu.memory_space<vmem>>, vector<8x128xf32>,
      %127 = vector.shape_cast %0 : vector<8x128x128xbf16> to vector<1024x128xbf16>
      %c0_61 = arith.constant 0 : index
      %c0_62 = arith.constant 0 : index
      %128 = vector.load %arg5[%c0_61, %c0_62] : memref<128x128xbf16, #tpu.memory_space<vmem>>, vector<128x128xbf16>
      %cst_63 = arith.constant dense<0.000000e+00> : vector<1024x128xf32>
      %129 = tpu.matmul %127, %128, %cst_63 {dimension_numbers = #tpu.dot_dimension_numbers<[1], [0], [0], [1], [0, 0, 1, 1], [], []>} : vector<1024x128xbf16>, vector<128x128xbf16>, vector<1024x128xf32> -> vector<1024x128xf32>
      %130 = vector.shape_cast %129 : vector<1024x128xf32> to vector<8x128x128xf32>
      %c0_64 = arith.constant 0 : index
      %c0_65 = arith.constant 0 : index
      %131 = vector.load %arg6[%c0_64, %c0_65] : memref<1x128xf32, #tpu.memory_space<vmem>>, vector<1x128xf32>
      %132 = vector.shape_cast %131 : vector<1x128xf32> to vector<1x1x128xf32>
      %133 = vector.broadcast %132 : vector<1x1x128xf32> to vector<8x128x128xf32>
      %134 = arith.addf %130, %133 : vector<8x128x128xf32>
      %c0_66 = arith.constant 0 : index
      %c0_67 = arith.constant 0 : index
      %c0_68 = arith.constant 0 : index
      %135 = vector.load %arg20[%c0_66, %c0_67, %c0_68] : memref<8x128x128xf32, #tpu.memory_space<vmem>>, vector<8x128x128xf32>
      tpu.vector_store %arg20[%c0_66, %c0_67, %c0_68], %134 {strides = array<i32>} : memref<8x128x128xf32, #tpu.memory_space<vmem>>, vector<8x128x128xf32>,
    } else {
    }
    %c0_3 = arith.constant 0 : index
    %c0_4 = arith.constant 0 : index
    %4 = vector.load %arg18[%c0_3, %c0_4] : memref<8x128xf32, #tpu.memory_space<vmem>>, vector<8x128xf32>
    %c0_5 = arith.constant 0 : index
    %c0_6 = arith.constant 0 : index
    %5 = vector.load %arg19[%c0_5, %c0_6] : memref<8x128xf32, #tpu.memory_space<vmem>>, vector<8x128xf32>
    %6 = arith.truncf %4 : vector<8x128xf32> to vector<8x128xbf16>
    %c0_7 = arith.constant 0 : index
    %c0_8 = arith.constant 0 : index
    %7 = vector.load %arg11[%c0_7, %c0_8] : memref<128x768xbf16, #tpu.memory_space<vmem>>, vector<128x768xbf16>
    %cst = arith.constant dense<0.000000e+00> : vector<8x768xf32>
    %8 = tpu.matmul %6, %7, %cst {dimension_numbers = #tpu.dot_dimension_numbers<[1], [0], [0], [1], [0, 0, 1, 1], [], []>} : vector<8x128xbf16>, vector<128x768xbf16>, vector<8x768xf32> -> vector<8x768xf32>
    %c0_9 = arith.constant 0 : index
    %c0_10 = arith.constant 0 : index
    %9 = vector.load %arg12[%c0_9, %c0_10] : memref<1x768xf32, #tpu.memory_space<vmem>>, vector<1x768xf32>
    %10 = vector.broadcast %9 : vector<1x768xf32> to vector<8x768xf32>
    %11 = arith.addf %8, %10 : vector<8x768xf32>
    %12 = vector.extract_strided_slice %11 {offsets = [0, 0], sizes = [8, 128], strides = [1, 1]} : vector<8x768xf32> to vector<8x128xf32>
    %13 = vector.extract_strided_slice %11 {offsets = [0, 128], sizes = [8, 128], strides = [1, 1]} : vector<8x768xf32> to vector<8x128xf32>
    %14 = arith.negf %13 : vector<8x128xf32>
    %15 = math.exp %14 : vector<8x128xf32>
    %cst_11 = arith.constant 1.000000e+00 : f32
    %16 = vector.broadcast %cst_11 : f32 to vector<8x128xf32>
    %17 = arith.addf %16, %15 : vector<8x128xf32>
    %18 = arith.divf %16, %17 : vector<8x128xf32>
    %19 = vector.extract_strided_slice %11 {offsets = [0, 256], sizes = [8, 512], strides = [1, 1]} : vector<8x768xf32> to vector<8x512xf32>
    %c0_12 = arith.constant 0 : index
    %c0_13 = arith.constant 0 : index
    %c0_14 = arith.constant 0 : index
    %20 = vector.load %arg20[%c0_12, %c0_13, %c0_14] : memref<8x128x128xf32, #tpu.memory_space<vmem>>, vector<8x128x128xf32>
    %21 = vector.shape_cast %12 : vector<8x128xf32> to vector<8x1x128xf32>
    %22 = vector.broadcast %21 : vector<8x1x128xf32> to vector<8x128x128xf32>
    %23 = arith.addf %20, %22 : vector<8x128x128xf32>
    %cst_15 = arith.constant 0.000000e+00 : f32
    %24 = vector.broadcast %cst_15 : f32 to vector<8x128x128xf32>
    %25 = arith.maximumf %23, %24 : vector<8x128x128xf32>
    %c0_16 = arith.constant 0 : index
    %c0_17 = arith.constant 0 : index
    %26 = vector.load %arg7[%c0_16, %c0_17] : memref<1x128xf32, #tpu.memory_space<vmem>>, vector<1x128xf32>
    %27 = vector.shape_cast %26 : vector<1x128xf32> to vector<1x1x128xf32>
    %28 = vector.broadcast %27 : vector<1x1x128xf32> to vector<8x128x128xf32>
    %29 = arith.mulf %25, %28 : vector<8x128x128xf32>
    %cst_18 = arith.constant dense<0.000000e+00> : vector<8x128xf32>
    %30 = vector.multi_reduction <add>, %29, %cst_18 [2] : vector<8x128x128xf32> to vector<8x128xf32>
    %c0_19 = arith.constant 0 : index
    %c0_20 = arith.constant 0 : index
    %31 = vector.load %arg8[%c0_19, %c0_20] : memref<1x1xf32, #tpu.memory_space<vmem>>, vector<1x1xf32>
    %32 = vector.broadcast %31 : vector<1x1xf32> to vector<8x128xf32>
    %33 = arith.addf %30, %32 : vector<8x128xf32>
    %34 = tpu.iota {dimensions = array<i32: 1>} : vector<1x128xi32>
    %c16_i32 = arith.constant 16 : i32
    %35 = vector.broadcast %c16_i32 : i32 to vector<1x128xi32>
    %36 = arith.cmpi slt, %34, %35 : vector<1x128xi32>
    %cst_21 = arith.constant -1.000000e+30 : f32
    %37 = vector.shape_cast %36 : vector<1x128xi1> to vector<1x128xi1>
    %38 = vector.broadcast %37 : vector<1x128xi1> to vector<8x128xi1>
    %39 = vector.broadcast %cst_21 : f32 to vector<8x128xf32>
    %40 = arith.select %38, %33, %39 : vector<8x128xi1>, vector<8x128xf32>
    %cst_22 = arith.constant dense<0xFF800000> : vector<8xf32>
    %41 = vector.multi_reduction <maximumf>, %40, %cst_22 [1] : vector<8x128xf32> to vector<8xf32>
    %42 = vector.shape_cast %41 : vector<8xf32> to vector<8x1xf32>
    %43 = vector.broadcast %42 : vector<8x1xf32> to vector<8x128xf32>
    %44 = arith.subf %40, %43 : vector<8x128xf32>
    %45 = math.exp %44 : vector<8x128xf32>
    %cst_23 = arith.constant dense<0.000000e+00> : vector<8xf32>
    %46 = vector.multi_reduction <add>, %45, %cst_23 [1] : vector<8x128xf32> to vector<8xf32>
    %47 = vector.shape_cast %46 : vector<8xf32> to vector<8x1xf32>
    %48 = tpu.reciprocal %47 {approx = true} : vector<8x1xf32> -> vector<8x1xf32>
    %49 = vector.broadcast %48 : vector<8x1xf32> to vector<8x128xf32>
    %50 = arith.mulf %45, %49 : vector<8x128xf32>
    %51 = vector.shape_cast %50 : vector<8x128xf32> to vector<8x1x128xf32>
    %52 = arith.truncf %51 : vector<8x1x128xf32> to vector<8x1x128xbf16>
    "tpu.trace_start"() <{level = 10 : i32, message = "bkp,bpe->bke"}> : () -> ()
    %cst_24 = arith.constant dense<0.000000e+00> : vector<8x1x128xf32>
    %53 = tpu.matmul %52, %0, %cst_24 {dimension_numbers = #tpu.dot_dimension_numbers<[2], [1], [1], [2], [0, 0, 0, 1, 1, 2], [0], [0]>} : vector<8x1x128xbf16>, vector<8x128x128xbf16>, vector<8x1x128xf32> -> vector<8x1x128xf32>
    "tpu.trace_stop"() : () -> ()
    %54 = vector.shape_cast %53 : vector<8x1x128xf32> to vector<8x128xf32>
    %55 = arith.mulf %18, %54 : vector<8x128xf32>
    %c0_25 = arith.constant 0 : index
    %c0_26 = arith.constant 0 : index
    %c0_27 = arith.constant 0 : index
    %56 = vector.load %arg4[%c0_25, %c0_26, %c0_27] : memref<1x8x128xbf16, #tpu.memory_space<vmem>>, vector<1x8x128xbf16>
    %57 = vector.shape_cast %56 : vector<1x8x128xbf16> to vector<8x128xbf16>
    %c0_28 = arith.constant 0 : index
    %c0_29 = arith.constant 0 : index
    %58 = vector.load %arg13[%c0_28, %c0_29] : memref<128x512xbf16, #tpu.memory_space<vmem>>, vector<128x512xbf16>
    %cst_30 = arith.constant dense<0.000000e+00> : vector<8x512xf32>
    %59 = tpu.matmul %57, %58, %cst_30 {dimension_numbers = #tpu.dot_dimension_numbers<[1], [0], [0], [1], [0, 0, 1, 1], [], []>} : vector<8x128xbf16>, vector<128x512xbf16>, vector<8x512xf32> -> vector<8x512xf32>
    %60 = arith.truncf %55 : vector<8x128xf32> to vector<8x128xbf16>
    %c0_31 = arith.constant 0 : index
    %c0_32 = arith.constant 0 : index
    %61 = vector.load %arg14[%c0_31, %c0_32] : memref<128x512xbf16, #tpu.memory_space<vmem>>, vector<128x512xbf16>
    %cst_33 = arith.constant dense<0.000000e+00> : vector<8x512xf32>
    %62 = tpu.matmul %60, %61, %cst_33 {dimension_numbers = #tpu.dot_dimension_numbers<[1], [0], [0], [1], [0, 0, 1, 1], [], []>} : vector<8x128xbf16>, vector<128x512xbf16>, vector<8x512xf32> -> vector<8x512xf32>
    %63 = arith.addf %59, %62 : vector<8x512xf32>
    %c0_34 = arith.constant 0 : index
    %c0_35 = arith.constant 0 : index
    %64 = vector.load %arg15[%c0_34, %c0_35] : memref<1x512xf32, #tpu.memory_space<vmem>>, vector<1x512xf32>
    %65 = vector.broadcast %64 : vector<1x512xf32> to vector<8x512xf32>
    %66 = arith.addf %63, %65 : vector<8x512xf32>
    %67 = arith.addf %66, %19 : vector<8x512xf32>
    %68 = vector.extract_strided_slice %67 {offsets = [0, 0], sizes = [8, 128], strides = [1, 1]} : vector<8x512xf32> to vector<8x128xf32>
    %69 = arith.negf %68 : vector<8x128xf32>
    %70 = math.exp %69 : vector<8x128xf32>
    %cst_36 = arith.constant 1.000000e+00 : f32
    %71 = vector.broadcast %cst_36 : f32 to vector<8x128xf32>
    %72 = arith.addf %71, %70 : vector<8x128xf32>
    %73 = arith.divf %71, %72 : vector<8x128xf32>
    %74 = vector.extract_strided_slice %67 {offsets = [0, 128], sizes = [8, 128], strides = [1, 1]} : vector<8x512xf32> to vector<8x128xf32>
    %75 = arith.negf %74 : vector<8x128xf32>
    %76 = math.exp %75 : vector<8x128xf32>
    %cst_37 = arith.constant 1.000000e+00 : f32
    %77 = vector.broadcast %cst_37 : f32 to vector<8x128xf32>
    %78 = arith.addf %77, %76 : vector<8x128xf32>
    %79 = arith.divf %77, %78 : vector<8x128xf32>
    %80 = vector.extract_strided_slice %67 {offsets = [0, 256], sizes = [8, 128], strides = [1, 1]} : vector<8x512xf32> to vector<8x128xf32>
    %81 = math.tanh %80 : vector<8x128xf32>
    %82 = vector.extract_strided_slice %67 {offsets = [0, 384], sizes = [8, 128], strides = [1, 1]} : vector<8x512xf32> to vector<8x128xf32>
    %83 = arith.negf %82 : vector<8x128xf32>
    %84 = math.exp %83 : vector<8x128xf32>
    %cst_38 = arith.constant 1.000000e+00 : f32
    %85 = vector.broadcast %cst_38 : f32 to vector<8x128xf32>
    %86 = arith.addf %85, %84 : vector<8x128xf32>
    %87 = arith.divf %85, %86 : vector<8x128xf32>
    %88 = arith.mulf %79, %5 : vector<8x128xf32>
    %89 = arith.mulf %73, %81 : vector<8x128xf32>
    %90 = arith.addf %88, %89 : vector<8x128xf32>
    %91 = math.tanh %90 : vector<8x128xf32>
    %92 = arith.mulf %87, %91 : vector<8x128xf32>
    %93 = arith.index_cast %arg1 : i32 to index
    %94 = memref.load %arg2[%93] : memref<7xi32, #tpu.memory_space<smem>>
    %95 = tpu.iota {dimensions = array<i32: 0>} : vector<8x1xi32>
    %c8_i32 = arith.constant 8 : i32
    %96 = arith.muli %arg0, %c8_i32 : i32
    %97 = vector.broadcast %96 : i32 to vector<8x1xi32>
    %98 = arith.addi %95, %97 : vector<8x1xi32>
    %99 = vector.broadcast %94 : i32 to vector<8x1xi32>
    %100 = arith.cmpi slt, %98, %99 : vector<8x1xi32>
    %c0_39 = arith.constant 0 : index
    %c0_40 = arith.constant 0 : index
    %c0_41 = arith.constant 0 : index
    %101 = vector.load %arg16[%c0_39, %c0_40, %c0_41] : memref<1x8x128xf32, #tpu.memory_space<vmem>>, vector<1x8x128xf32>
    %102 = vector.shape_cast %101 : vector<1x8x128xf32> to vector<8x128xf32>
    %103 = vector.shape_cast %92 : vector<8x128xf32> to vector<1x8x128xf32>
    tpu.vector_store %arg16[%c0_39, %c0_40, %c0_41], %103 {strides = array<i32>} : memref<1x8x128xf32, #tpu.memory_space<vmem>>, vector<1x8x128xf32>,
    %cst_42 = arith.constant 0.000000e+00 : f32
    %104 = vector.shape_cast %100 : vector<8x1xi1> to vector<8x1xi1>
    %105 = vector.broadcast %104 : vector<8x1xi1> to vector<8x128xi1>
    %106 = vector.broadcast %cst_42 : f32 to vector<8x128xf32>
    %107 = arith.select %105, %50, %106 : vector<8x128xi1>, vector<8x128xf32>
    %c0_43 = arith.constant 0 : index
    %c0_44 = arith.constant 0 : index
    %c0_45 = arith.constant 0 : index
    %108 = vector.load %arg17[%c0_43, %c0_44, %c0_45] : memref<1x8x128xf32, #tpu.memory_space<vmem>>, vector<1x8x128xf32>
    %109 = vector.shape_cast %108 : vector<1x8x128xf32> to vector<8x128xf32>
    %110 = vector.shape_cast %107 : vector<8x128xf32> to vector<1x8x128xf32>
    tpu.vector_store %arg17[%c0_43, %c0_44, %c0_45], %110 {strides = array<i32>} : memref<1x8x128xf32, #tpu.memory_space<vmem>>, vector<1x8x128xf32>,
    %c0_46 = arith.constant 0 : index
    %c0_47 = arith.constant 0 : index
    %111 = vector.load %arg18[%c0_46, %c0_47] : memref<8x128xf32, #tpu.memory_space<vmem>>, vector<8x128xf32>
    tpu.vector_store %arg18[%c0_46, %c0_47], %92 {strides = array<i32>} : memref<8x128xf32, #tpu.memory_space<vmem>>, vector<8x128xf32>,
    %c0_48 = arith.constant 0 : index
    %c0_49 = arith.constant 0 : index
    %112 = vector.load %arg19[%c0_48, %c0_49] : memref<8x128xf32, #tpu.memory_space<vmem>>, vector<8x128xf32>
    tpu.vector_store %arg19[%c0_48, %c0_49], %90 {strides = array<i32>} : memref<8x128xf32, #tpu.memory_space<vmem>>, vector<8x128xf32>,
    return
  }
  func.func @transform_0(%arg0: i32, %arg1: i32, %arg2: memref<7xi32, #tpu.memory_space<smem>>) -> (i32, i32, i32) {
    %c0_i32 = arith.constant 0 : i32
    %c0_i32_0 = arith.constant 0 : i32
    %c0_i32_1 = arith.constant 0 : i32
    return %arg0, %c0_i32, %c0_i32_0 : i32, i32, i32
  }
  func.func @transform_1(%arg0: i32, %arg1: i32, %arg2: memref<7xi32, #tpu.memory_space<smem>>) -> (i32, i32, i32) {
    %c0_i32 = arith.constant 0 : i32
    %c0_i32_0 = arith.constant 0 : i32
    return %arg1, %arg0, %c0_i32 : i32, i32, i32
  }
  func.func @transform_2(%arg0: i32, %arg1: i32, %arg2: memref<7xi32, #tpu.memory_space<smem>>) -> (i32, i32) {
    %c0_i32 = arith.constant 0 : i32
    %c0_i32_0 = arith.constant 0 : i32
    %c0_i32_1 = arith.constant 0 : i32
    return %c0_i32, %c0_i32_0 : i32, i32
  }
  func.func @transform_3(%arg0: i32, %arg1: i32, %arg2: memref<7xi32, #tpu.memory_space<smem>>) -> (i32, i32) {
    %c0_i32 = arith.constant 0 : i32
    %c0_i32_0 = arith.constant 0 : i32
    %c0_i32_1 = arith.constant 0 : i32
    return %c0_i32, %c0_i32_0 : i32, i32
  }
  func.func @transform_4(%arg0: i32, %arg1: i32, %arg2: memref<7xi32, #tpu.memory_space<smem>>) -> (i32, i32) {
    %c0_i32 = arith.constant 0 : i32
    %c0_i32_0 = arith.constant 0 : i32
    %c0_i32_1 = arith.constant 0 : i32
    return %c0_i32, %c0_i32_0 : i32, i32
  }
  func.func @transform_5(%arg0: i32, %arg1: i32, %arg2: memref<7xi32, #tpu.memory_space<smem>>) -> (i32, i32) {
    %c0_i32 = arith.constant 0 : i32
    %c0_i32_0 = arith.constant 0 : i32
    %c0_i32_1 = arith.constant 0 : i32
    return %c0_i32, %c0_i32_0 : i32, i32
  }
  func.func @transform_6(%arg0: i32, %arg1: i32, %arg2: memref<7xi32, #tpu.memory_space<smem>>) -> (i32, i32) {
    %c0_i32 = arith.constant 0 : i32
    %c0_i32_0 = arith.constant 0 : i32
    %c0_i32_1 = arith.constant 0 : i32
    return %c0_i32, %c0_i32_0 : i32, i32
  }
  func.func @transform_7(%arg0: i32, %arg1: i32, %arg2: memref<7xi32, #tpu.memory_space<smem>>) -> (i32, i32) {
    %c0_i32 = arith.constant 0 : i32
    %c0_i32_0 = arith.constant 0 : i32
    %c0_i32_1 = arith.constant 0 : i32
    return %c0_i32, %c0_i32_0 : i32, i32
  }
  func.func @transform_8(%arg0: i32, %arg1: i32, %arg2: memref<7xi32, #tpu.memory_space<smem>>) -> (i32, i32) {
    %c0_i32 = arith.constant 0 : i32
    %c0_i32_0 = arith.constant 0 : i32
    %c0_i32_1 = arith.constant 0 : i32
    return %c0_i32, %c0_i32_0 : i32, i32
  }
  func.func @transform_9(%arg0: i32, %arg1: i32, %arg2: memref<7xi32, #tpu.memory_space<smem>>) -> (i32, i32) {
    %c0_i32 = arith.constant 0 : i32
    %c0_i32_0 = arith.constant 0 : i32
    %c0_i32_1 = arith.constant 0 : i32
    return %c0_i32, %c0_i32_0 : i32, i32
  }
  func.func @transform_10(%arg0: i32, %arg1: i32, %arg2: memref<7xi32, #tpu.memory_space<smem>>) -> (i32, i32) {
    %c0_i32 = arith.constant 0 : i32
    %c0_i32_0 = arith.constant 0 : i32
    %c0_i32_1 = arith.constant 0 : i32
    return %c0_i32, %c0_i32_0 : i32, i32
  }
  func.func @transform_11(%arg0: i32, %arg1: i32, %arg2: memref<7xi32, #tpu.memory_space<smem>>) -> (i32, i32) {
    %c0_i32 = arith.constant 0 : i32
    %c0_i32_0 = arith.constant 0 : i32
    %c0_i32_1 = arith.constant 0 : i32
    return %c0_i32, %c0_i32_0 : i32, i32
  }
  func.func @transform_12(%arg0: i32, %arg1: i32, %arg2: memref<7xi32, #tpu.memory_space<smem>>) -> (i32, i32) {
    %c0_i32 = arith.constant 0 : i32
    %c0_i32_0 = arith.constant 0 : i32
    %c0_i32_1 = arith.constant 0 : i32
    return %c0_i32, %c0_i32_0 : i32, i32
  }
  func.func @transform_13(%arg0: i32, %arg1: i32, %arg2: memref<7xi32, #tpu.memory_space<smem>>) -> (i32, i32, i32) {
    %c0_i32 = arith.constant 0 : i32
    %c0_i32_0 = arith.constant 0 : i32
    return %arg1, %arg0, %c0_i32 : i32, i32, i32
  }
  func.func @transform_14(%arg0: i32, %arg1: i32, %arg2: memref<7xi32, #tpu.memory_space<smem>>) -> (i32, i32, i32) {
    %c0_i32 = arith.constant 0 : i32
    %c0_i32_0 = arith.constant 0 : i32
    return %arg1, %arg0, %c0_i32 : i32, i32, i32
  }
}

</mosaic_0001>

<bundles_post_ra>
// kernel: tpu_custom_call.1
= control target key start
LH: loop header
LB: loop body
LE: loop exit
PB: predicated region body
PF: predicated region fallthrough
CT: control target
= control target key end

     0   :  { %7 = vsyncpa [#allocation3], 0  ;;  %s649_s0 = inlined_call_operand.hbm [shape: f32[16,128], index: 0, kind: input, shape index: {}]   ;;  %s650_s1 = inlined_call_operand.hbm [shape: f32[8,128], index: 1, kind: input, shape index: {}]   ;;  %s651_s2 = inlined_call_operand.hbm [shape: f32[16,128], index: 2, kind: output, shape index: {}]  }
   0x1   :  { %9 = vsyncpa [#allocation3 + $0x1], 0 }
   0x2   :  { %10 = vsyncpa [#allocation6], 0 }
   0x3   :  { %11 = vsyncpa [#allocation4], 0 }
   0x4   :  { %13 = vsyncpa [#allocation4 + $0x1], 0  ;;  %s483_s9 = smov 0   ;;  %s485_s10 = smov 0  }
   0x5   :  { %s487_s11 = smov 0   ;;  %s489_s12 = smov 0  }
   0x6 LB: > { %s504_s13 = sadd.s32 4294967295, %s463_s12   ;;  %s270_s14 = sadd.s32 4294967294, %s463_s12   ;;  %s463_s12 = sphi %s489_s12, %s674_s12   ;;  %s459_s11 = sphi %s487_s11, %s673_s11   ;;  %s455_s10 = sphi %s485_s10, %s672_s10   ;;  %s451_s9 = sphi %s483_s9, %s671_s9  }
   0x7   : > { %p39_p0 = scmp.ne.s32.totalorder %s455_s10, %s451_s9  ;;  %p652_p1 = scmp.eq.s32.totalorder %s504_s13, 0 }
   0x8   : > { %p90_p3 = scmp.eq.s32.totalorder %s270_s14, 1  ;;  %p271_p5 = scmp.ge.s32.totalorder %s463_s12, 1 }
   0x9   : > { %p513_p4 = por %p652_p1, %p39_p0  ;;  %p97_p7 = scmp.lt.s32.totalorder %s463_s12, 3 }
   0xa   : > { %p518_p6 = por %p90_p3, %p39_p0  ;;  %s465_s18 = smov [#allocation5]  }
   0xb   : > { %s656_s15 = scalar_select %p513_p4, 1, 0 }
   0xc   : > { %s657_s16 = scalar_select %p518_p6, 1, 0 }
   0xd   : > { %p523_p8 = pnand %p271_p5, %p97_p7  ;;  %s110_s19 = sshll.u32 %s465_s18, 4  ;;  %s111_s19 = int_to_ptr.vmem [resolvable:$true] %s110_s19 }
   0xe   : > { %s531_s20 = sadd.s32 1, %s463_s12   ;;  %s26_s24 = sadd.s32 1, %s459_s11 }
   0xf   : > { %s658_s17 = scalar_select %p523_p8, 1, 0 }
  0x10   : > { %p292_p10 = pneg %p523_p8  ;;  %s23_s22 = ssub.s32 %s463_s12, %s531_s20 }
  0x11   : > { %p541_p12 = scmp.eq.s32.totalorder %s23_s22, 0  ;;  %p33_p13 = scmp.ne.s32.totalorder %s459_s11, %s455_s10 }
  0x12   : > { %p535_p11 = pnand %p292_p10, %p652_p1  ;;  %s352_s25 = scalar_lea.vmem %s111_s19, 128 }
  0x13   : > { %p353_p3 = scmp.ne.s32.totalorder %s111_s19, %s352_s25  ;;  %p360_p9 = scmp.lt.s32.totalorder %s111_s19, %s111_s19 }
  0x14   : > { %p343_p0 = pneg %p535_p11  ;;  %p361_p2 = scmp.lt.s32.totalorder %s352_s25, %s352_s25 }
  0x16   : > { %p355_p5 = pnand %p353_p3, %p343_p0  ;;  %p362_p10 = por %p361_p2, %p360_p9 }
  0x18   : > { %p356_p7 = pneg %p355_p5 }
  0x1a   : > { %p363_p1 = pnand %p362_p10, %p356_p7 }
  0x1c   : > { %366 = shalt.err (!%p363_p1)
}
  0x1d   : > { %295 = dma.hbm_to_vmem [thread:$0]  (!%p535_p11), %s650_s1, 128, %s111_s19, [#allocation6]  }
  0x1e   : > { %s558_s28 = scalar_select %p541_p12, %s459_s11, %s26_s24  }
  0x1f   : > { %p34_p1 = scmp.eq.s32.totalorder %s463_s12, 0  ;;  %p661_p2 = scmp.eq.s32.totalorder %s504_s13, 1 }
  0x20   : > { %p305_p0 = scmp.lt.s32.totalorder %s463_s12, 2  ;;  %s121_s30 = sand.u32 1, %s459_s11  }
  0x21   : > { %p566_p9 = por %p661_p2, %p33_p13  ;;  %p35_p3 = por %p34_p1, %p33_p13 }
  0x22   : > { %s274_s3 = sshll.u32 %s121_s30, 3  ;;  %s275_s4 = sshll.u32 %s463_s12, 7 }
  0x23   : > { %s662_s29 = scalar_select %p566_p9, 1, 0 }
  0x24   : > { %s579_s7 = scalar_lea.hbm %s649_s0, %s275_s4  ;;  %s125_s8 = scalar_lea.vmem [#allocation2], %s274_s3 }
  0x25   : > { %s132_s14 = sshll.u32 %s125_s8, 4  ;;  %p581_p11 = pnand %p305_p0, %p35_p3  ;;  %s133_s14 = int_to_ptr.vmem [resolvable:$true] %s132_s14 }
  0x26   : > { %s122_s19 = scalar_lea.sflag [#allocation3], %s121_s30  ;;  %s367_s21 = scalar_lea.hbm %s579_s7, 128 }
  0x27   : > { %p368_p12 = scmp.ne.s32.totalorder %s579_s7, %s367_s21  ;;  %p369_p13 = pneg %p581_p11 }
  0x28   : > { %s372_s24 = scalar_lea.hbm %s649_s0, 256  ;;  %p373_p10 = scmp.lt.s32.totalorder %s579_s7, %s649_s0 }
  0x29   : > { %p370_p5 = pnand %p369_p13, %p368_p12  ;;  %p374_p1 = scmp.lt.s32.totalorder %s372_s24, %s367_s21 }
  0x2b   : > { %p371_p7 = pneg %p370_p5  ;;  %p375_p2 = por %p374_p1, %p373_p10 }
  0x2d   : > { %p376_p0 = pnand %p375_p2, %p371_p7 }
  0x2f   : > { %379 = shalt.err (!%p376_p0)
}
  0x30   : > { %s380_s27 = scalar_lea.vmem %s133_s14, 128  ;;  %s466_s30 = smov [#allocation2]  }
  0x31   : > { %p381_p3 = scmp.ne.s32.totalorder %s133_s14, %s380_s27  ;;  %s385_s3 = sshll.u32 %s466_s30, 4  ;;  %s386_s3 = int_to_ptr.vmem [resolvable:$false] %s385_s3 }
  0x32   : > { %s387_s4 = scalar_lea.vmem %s386_s3, 256  ;;  %p388_p12 = scmp.lt.s32.totalorder %s133_s14, %s386_s3 }
  0x33   : > { %p383_p6 = pnand %p381_p3, %p369_p13  ;;  %p389_p5 = scmp.lt.s32.totalorder %s387_s4, %s380_s27 }
  0x35   : > { %p384_p9 = pneg %p383_p6  ;;  %p390_p4 = por %p389_p5, %p388_p12 }
  0x37   : > { %p391_p8 = pnand %p390_p4, %p384_p9 }
  0x39   : > { %394 = shalt.err (!%p391_p8)
}
  0x3a   : > { %299 = dma.hbm_to_vmem [thread:$0]  (!%p581_p11), %s579_s7, 128, %s133_s14, %s122_s19  }
  0x3b   : > { %p664_p7 = scmp.ne.s32.totalorder %s658_s17, 0 }
  0x3c   : > { %s602_s5 = sand.u32 (!%p664_p7), 1, %s455_s10   ;;  %p665_p6 = scmp.ne.s32.totalorder (!%p664_p7), %s656_s15, 0 }
  0x3d   : > { %141 = sbr.rel (%p664_p7) target bundleno = 95 (0x5f), region = 28  ;;  %s277_s6 = sshll.u32 (!%p664_p7), %s602_s5, 3 }
  0x3e   : > { %s144_s8 = scalar_lea.sflag (!%p664_p7), [#allocation3], %s602_s5  ;;  %s147_s21 = scalar_lea.vmem (!%p664_p7), [#allocation2], %s277_s6 }
  0x42   : > { %438 = dma.done.wait (%p665_p6), %s144_s8, 128  }
  0x43   : > { %440 = vsyncadd (%p665_p6), %s144_s8, 4294967168  ;;  %p666_p4 = scmp.eq.s32.totalorder %s504_s13, 0 }
  0x45   : > { %442 = dma.done.wait (%p666_p4), [#allocation6], 128   ;;  %p667_p8 = pmov %p666_p4 }
  0x46   : > { %s171_s17 = scalar_lea.vmem [#allocation7], %s277_s6  ;;  %s281_s14 = sshll.u32 %s504_s13, 7  ;;  %v172_v0 = vld [vmem:[%s147_s21] sm:$0xff]  ;;  %v173_v1 = vld [vmem:[#allocation5] sm:$0xff] }
  0x47   : > { %444 = vsyncadd (%p667_p8), [#allocation6], 4294967168  ;;  %s190_s7 = sshll.u32 %s171_s17, 4  ;;  %v174_v2 = vadd.f32 %v173_v1, %v172_v0  ;;  %s188_s15 = scalar_lea.hbm %s651_s2, %s281_s14  ;;  %s191_s7 = int_to_ptr.vmem [resolvable:$true] %s190_s7 }
  0x48   : > { %s177_s22 = scalar_lea.sflag [#allocation4], %s602_s5  ;;  %s395_s23 = scalar_lea.vmem %s191_s7, 128 }
  0x49   : > { %175 = vst [vmem:[%s171_s17] sm:$0xff] %v174_v2  ;;  %p396_p9 = scmp.ne.s32.totalorder %s191_s7, %s395_s23  ;;  %p668_p11 = scmp.ne.s32.totalorder %s662_s29, 0 }
  0x4a   : > { %s467_s24 = smov [#allocation7]  }
  0x4b   : > { %p397_p13 = pnand %p396_p9, %p668_p11  ;;  %s399_s25 = sshll.u32 %s467_s24, 4  ;;  %s400_s25 = int_to_ptr.vmem [resolvable:$false] %s399_s25 }
  0x4c   : > { %s401_s26 = scalar_lea.vmem %s400_s25, 256  ;;  %p402_p1 = scmp.lt.s32.totalorder %s191_s7, %s400_s25 }
  0x4d   : > { %p398_p10 = pneg %p397_p13  ;;  %p403_p2 = scmp.lt.s32.totalorder %s401_s26, %s395_s23 }
  0x4f   : > { %p404_p0 = por %p403_p2, %p402_p1 }
  0x51   : > { %p405_p3 = pnand %p404_p0, %p398_p10 }
  0x53   : > { %408 = shalt.err (!%p405_p3)
}
  0x54   : > { %s409_s13 = scalar_lea.hbm %s188_s15, 128  ;;  %s413_s3 = scalar_lea.hbm %s651_s2, 256 }
  0x55   : > { %p410_p12 = scmp.ne.s32.totalorder %s188_s15, %s409_s13  ;;  %p414_p6 = scmp.lt.s32.totalorder %s188_s15, %s651_s2 }
  0x56   : > { %p415_p4 = scmp.lt.s32.totalorder %s413_s3, %s409_s13 }
  0x57   : > { %p411_p5 = pnand %p410_p12, %p668_p11 }
  0x58   : > { %p416_p8 = por %p415_p4, %p414_p6 }
  0x59   : > { %p412_p7 = pneg %p411_p5 }
  0x5b   : > { %p417_p9 = pnand %p416_p8, %p412_p7 }
  0x5d   : > { %420 = shalt.err (!%p417_p9)
}
  0x5e   : > { %290 = dma.vmem_to_hbm [thread:$0]  (%p668_p11), %s191_s7, 128, %s188_s15, %s177_s22  }
  0x5f PF: > { %s202_s6 = sand.u32 1, %s451_s9   ;;  %p669_p13 = scmp.ne.s32.totalorder %s657_s16, 0 }
  0x60   : > { %p670_p10 = scmp.ge.s32.totalorder %s463_s12, 2  ;;  %s203_s8 = scalar_lea.sflag [#allocation4], %s202_s6 }
  0x62   : > { %p301_p1 = pnand %p670_p10, %p669_p13 }
  0x64   : > { %p302_p2 = pneg %p301_p1 }
  0x66   : > { %446 = dma.done.wait (%p302_p2), %s203_s8, 128  }
  0x67   : > { %448 = vsyncadd (%p302_p2), %s203_s8, 4294967168  ;;  %p16_p0 = scmp.ge.s32.totalorder %s531_s20, 4   ;;  %s671_s9 = smov %s455_s10 }
  0x68   : > { %s672_s10 = smov %s459_s11  ;;  %s673_s11 = smov %s558_s28 }
  0x69   : > { %s674_s12 = smov %s531_s20  ;;  %18 = sbr.rel (!%p16_p0) target bundleno = 6 (0x6), region = 77 }
  0x6e   :  { %208 = vsyncpa [#allocation3], 1 }
  0x6f   :  { %210 = vsyncpa [#allocation3 + $0x1], 1 }
  0x70   :  { %211 = vsyncpa [#allocation6], 1 }
  0x71   :  { %212 = vsyncpa [#allocation4], 1 }
  0x72   :  { %214 = vsyncpa [#allocation4 + $0x1], 1 }

// kernel: tpu_custom_call.1
= control target key start
LH: loop header
LB: loop body
LE: loop exit
PB: predicated region body
PF: predicated region fallthrough
CT: control target
= control target key end

     0   :  { %s7977_s18 = smov [#allocation6]   ;;  %s10439_s0 = inlined_call_operand.hbm [shape: s32[7], index: 0, kind: input, shape index: {}]   ;;  %s10440_s1 = inlined_call_operand.hbm [shape: bf16[8,128,128], index: 1, kind: input, shape index: {}]   ;;  %s10441_s2 = inlined_call_operand.hbm [shape: bf16[7,8,128], index: 2, kind: input, shape index: {}]   ;;  %s10442_s3 = inlined_call_operand.hbm [shape: bf16[128,128], index: 3, kind: input, shape index: {}]   ;;  %s10443_s4 = inlined_call_operand.hbm [shape: f32[1,128], index: 4, kind: input, shape index: {}]   ;;  %s10444_s5 = inlined_call_operand.hbm [shape: f32[1,128], index: 5, kind: input, shape index: {}]   ;;  %s10445_s7 = inlined_call_operand.hbm [shape: bf16[128,256], index: 7, kind: input, shape index: {}]   ;;  %s10446_s8 = inlined_call_operand.vmem [shape: f32[1,256], index: 8, kind: input, shape index: {}]   ;;  %s10447_s9 = inlined_call_operand.hbm [shape: bf16[128,768], index: 9, kind: input, shape index: {}]   ;;  %s10448_s10 = inlined_call_operand.vmem [shape: f32[1,768], index: 10, kind: input, shape index: {}]   ;;  %s10449_s11 = inlined_call_operand.hbm [shape: bf16[128,512], index: 11, kind: input, shape index: {}]   ;;  %s10450_s12 = inlined_call_operand.hbm [shape: bf16[128,512], index: 12, kind: input, shape index: {}]   ;;  %s10451_s13 = inlined_call_operand.vmem [shape: f32[1,512], index: 13, kind: input, shape index: {}]   ;;  %s10452_s14 = inlined_call_operand.hbm [shape: f32[7,8,128], index: 14, kind: output, shape index: {0}]   ;;  %s10453_s15 = inlined_call_operand.hbm [shape: f32[7,8,128], index: 15, kind: output, shape index: {1}]   ;;  %s10454_s6 = inlined_call_operand.<no memory space> [shape: f32[1,1], index: 6, kind: input, shape index: {}]  }
   0x1   :  { %10657 = sst [smem:[#allocation167_spill]] %s10440_s1  ;;  %v23_v0 = vstv %s10454_s6 }
   0x2   :  { %10658 = sst [smem:[#allocation168_spill]] %s10442_s3  ;;  %24 = vst [vmem:[#allocation7] sm:$0x1] %v23_v0 }
   0x3   :  { %10659 = sst [smem:[#allocation169_spill]] %s10443_s4 }
   0x4   :  { %10660 = sst [smem:[#allocation170_spill]] %s10444_s5 }
   0x5   :  { %10661 = sst [smem:[#allocation171_spill]] %s10445_s7 }
   0x6   :  { %10662 = sst [smem:[#allocation172_spill]] %s10447_s9 }
   0x7   :  { %10663 = sst [smem:[#allocation173_spill]] %s10448_s10 }
   0x8   :  { %10664 = sst [smem:[#allocation174_spill]] %s10451_s13 }
   0x9   :  { %10665 = sst [smem:[#allocation175_spill]] %s10452_s14 }
   0xa   :  { %10666 = sst [smem:[#allocation176_spill]] %s10453_s15 }
   0xb   :  { %22 = dma.hbm_to_smem %s10439_s0, 16, %s7977_s18, [#allocation5] }
   0xc   :  { %7919 = dma.done.wait [#allocation5], 16 }
   0xd   :  { %7920 = vsyncadd [#allocation5], 4294967280 }
   0xe   :  { %26 = sfence }
   0xf   :  { %27 = vsyncpa [#allocation9], 0 }
  0x10   :  { %28 = vsyncpa [#allocation12], 0 }
  0x11   :  { %30 = vsyncpa [#allocation12 + $0x1], 0 }
  0x12   :  { %31 = vsyncpa [#allocation15], 0 }
  0x13   :  { %32 = vsyncpa [#allocation18], 0 }
  0x14   :  { %33 = vsyncpa [#allocation21], 0 }
  0x15   :  { %34 = vsyncpa [#allocation10], 0 }
  0x16   :  { %36 = vsyncpa [#allocation10 + $0x1], 0 }
  0x17   :  { %37 = vsyncpa [#allocation25], 0 }
  0x18   :  { %39 = vsyncpa [#allocation25 + $0x1], 0  ;;  %s8088_s23 = smov 0   ;;  %s8090_s0 = smov 0  }
  0x19   :  { %s8092_s24 = smov 0   ;;  %s8094_s6 = smov 0  }
  0x1a   :  { %s8096_s25 = smov 0   ;;  %s8098_s26 = smov 0  }
  0x1b LB: > { %s8119_s27 = sadd.s32 4294967295, %s7975_s26   ;;  %p6443_p0 = scmp.ge.s32.totalorder %s7975_s26, 1  ;;  %s7975_s26 = sphi %s8098_s26, %s45_s26   ;;  %s7971_s25 = sphi %s8096_s25, %s11341_s25   ;;  %s7967_s6 = sphi %s8094_s6, %s11340_s6   ;;  %s7963_s24 = sphi %s8092_s24, %s11339_s24   ;;  %s7959_s0 = sphi %s8090_s0, %s11338_s0   ;;  %s7955_s23 = sphi %s8088_s23, %s11337_s23  }
  0x1c   : > { %p10461_p1 = scmp.eq.s32.totalorder %s8119_s27, 0  ;;  %p403_p2 = scmp.lt.s32.totalorder %s7975_s26, 8 }
  0x1d   : > { %s7978_s29 = smov [#allocation13]   ;;  %s7979_s16 = smov [#allocation14]  }
  0x1e   : > { %p8124_p3 = pnand %p6443_p0, %p403_p2  ;;  %s432_s30 = sshll.u32 %s7978_s29, 4  ;;  %s433_s30 = int_to_ptr.vmem [resolvable:$true] %s432_s30 }
  0x1f   : > { %s446_s17 = sshll.u32 %s7979_s16, 4  ;;  %s7980_s19 = smov [#allocation17]   ;;  %s447_s17 = int_to_ptr.vmem [resolvable:$true] %s446_s17 }
  0x20   : > { %s10667_s28 = scalar_select %p8124_p3, 1, 0 }
  0x21   : > { %p7247_p4 = pneg %p8124_p3  ;;  %s470_s20 = sshll.u32 %s7980_s19, 4  ;;  %s8136_s20 = int_to_ptr.vmem [resolvable:$true] %s470_s20 }
  0x22   : > { %s7618_s22 = scalar_lea.vmem %s433_s30, 1024  ;;  %p7626_p10 = scmp.lt.s32.totalorder %s433_s30, %s433_s30 }
  0x23   : > { %p8132_p5 = pnand %p7247_p4, %p10461_p1  ;;  %p7619_p7 = scmp.ne.s32.totalorder %s433_s30, %s7618_s22 }
  0x24   : > { %p7627_p11 = scmp.lt.s32.totalorder %s7618_s22, %s7618_s22 }
  0x25   : > { %p8140_p6 = pneg %p8132_p5 }
  0x26   : > { %p7628_p12 = por %p7627_p11, %p7626_p10 }
  0x27   : > { %p7621_p8 = pnand %p7619_p7, %p8140_p6 }
  0x29   : > { %p7622_p9 = pneg %p7621_p8 }
  0x2b   : > { %p7629_p13 = pnand %p7628_p12, %p7622_p9 }
  0x2d   : > { %7632 = shalt.err (!%p7629_p13)
}
  0x2e   : > { %s10458_s29 = smov 64   ;;  %s7982_s16 = smov 4  }
  0x2f   : > { %s10670_s3 = sld [smem:[#allocation168_spill]]  ;;  %s7644_s13 = scalar_lea.vmem %s447_s17, 16 }
  0x30   : > { %p7645_p0 = scmp.ne.s32.totalorder %s447_s17, %s7644_s13  ;;  %s7651_s22 = scalar_lea.vmem %s447_s17, 32 }
  0x31   : > { %p7652_p7 = scmp.lt.s32.totalorder %s447_s17, %s447_s17  ;;  %p7653_p8 = scmp.lt.s32.totalorder %s7651_s22, %s7644_s13 }
  0x32   : > { %p7647_p2 = pnand %p7645_p0, %p8140_p6 }
  0x33   : > { %p7654_p9 = por %p7653_p8, %p7652_p7 }
  0x34   : > { %p7648_p4 = pneg %p7647_p2 }
  0x35   : > { %7253 = dma.hbm_to_vmem [thread:$0]  (!%p8132_p5), %s10670_s3, 1024, %s433_s30, [#allocation12], %s10458_s29, %s10458_s29, %s7982_s16  }
  0x36   : > { %p7655_p10 = pnand %p7654_p9, %p7648_p4 }
  0x38   : > { %7658 = shalt.err (!%p7655_p10)
}
  0x39   : > { %s10671_s4 = sld [smem:[#allocation169_spill]]  ;;  %s7670_s14 = scalar_lea.vmem %s8136_s20, 2048 }
  0x3a   : > { %p7671_p11 = scmp.ne.s32.totalorder %s8136_s20, %s7670_s14  ;;  %p7678_p0 = scmp.lt.s32.totalorder %s8136_s20, %s8136_s20 }
  0x3b   : > { %p7679_p2 = scmp.lt.s32.totalorder %s7670_s14, %s7670_s14 }
  0x3c   : > { %p7673_p12 = pnand %p7671_p11, %p8140_p6 }
  0x3d   : > { %p7680_p4 = por %p7679_p2, %p7678_p0 }
  0x3e   : > { %p7674_p13 = pneg %p7673_p12 }
  0x3f   : > { %7256 = dma.hbm_to_vmem [thread:$0]  (!%p8132_p5), %s10671_s4, 16, %s447_s17, [#allocation15]  }
  0x40   : > { %p7681_p7 = pnand %p7680_p4, %p7674_p13 }
  0x42   : > { %7684 = shalt.err (!%p7681_p7)
}
  0x43   : > { %s7983_s13 = smov 128   ;;  %s7984_s10 = smov 8  }
  0x44   : > { %s10672_s7 = sld [smem:[#allocation171_spill]]  ;;  %s7985_s17 = smov [#allocation20]  }
  0x45   : > { %s502_s19 = sshll.u32 %s7985_s17, 4  ;;  %s503_s19 = int_to_ptr.vmem [resolvable:$true] %s502_s19 }
  0x46   : > { %s7696_s22 = scalar_lea.vmem %s503_s19, 4096  ;;  %p7704_p11 = scmp.lt.s32.totalorder %s503_s19, %s503_s19 }
  0x47   : > { %p7697_p8 = scmp.ne.s32.totalorder %s503_s19, %s7696_s22  ;;  %p7705_p12 = scmp.lt.s32.totalorder %s7696_s22, %s7696_s22 }
  0x49   : > { %p7699_p9 = pnand %p7697_p8, %p8140_p6  ;;  %p7706_p13 = por %p7705_p12, %p7704_p11 }
  0x4a   : > { %7262 = dma.hbm_to_vmem [thread:$0]  (!%p8132_p5), %s10672_s7, 2048, %s8136_s20, [#allocation18], %s7983_s13, %s7983_s13, %s7984_s10  }
  0x4b   : > { %p7700_p10 = pneg %p7699_p9 }
  0x4d   : > { %p7707_p0 = pnand %p7706_p13, %p7700_p10 }
  0x4f   : > { %7710 = shalt.err (!%p7707_p0)
}
  0x50   : > { %s10459_s14 = smov 256   ;;  %s10460_s29 = smov 16  }
  0x51   : > { %7268 = dma.hbm_to_vmem [thread:$0]  (!%p8132_p5), %s10449_s11, 4096, %s503_s19, [#allocation21], %s10459_s14, %s10459_s14, %s10460_s29  }
  0x52   : > { %s7988_s10 = smov [#allocation8]  }
  0x53   : > { %s419_s15 = sshll.u32 %s7988_s10, 4  ;;  %s420_s15 = int_to_ptr.vmem [resolvable:$true] %s419_s15 }
  0x54   : > { %s7722_s30 = scalar_lea.vmem %s420_s15, 8192  ;;  %p7730_p8 = scmp.lt.s32.totalorder %s420_s15, %s420_s15 }
  0x55   : > { %p7723_p2 = scmp.ne.s32.totalorder %s420_s15, %s7722_s30  ;;  %p7731_p9 = scmp.lt.s32.totalorder %s7722_s30, %s7722_s30 }
  0x57   : > { %p7725_p4 = pnand %p7723_p2, %p8140_p6  ;;  %p7732_p10 = por %p7731_p9, %p7730_p8 }
  0x59   : > { %p7726_p7 = pneg %p7725_p4 }
  0x5b   : > { %p7733_p11 = pnand %p7732_p10, %p7726_p7 }
  0x5d   : > { %7736 = shalt.err (!%p7733_p11)
}
  0x5e   : > { %s10673_s17 = smov 64   ;;  %s10674_s1 = sld [smem:[#allocation167_spill]] }
  0x5f   : > { %s7989_s20 = smov [#allocation16]   ;;  %s7990_s10 = smov [#allocation19]  }
  0x60   : > { %s457_s13 = sshll.u32 %s7989_s20, 4  ;;  %s486_s14 = sshll.u32 %s7990_s10, 4  ;;  %s458_s13 = int_to_ptr.vmem [resolvable:$true] %s457_s13  ;;  %s487_s14 = int_to_ptr.vmem [resolvable:$true] %s486_s14 }
  0x61   : > { %s7748_s29 = scalar_lea.vmem %s458_s13, 16  ;;  %s7755_s30 = scalar_lea.vmem %s458_s13, 32 }
  0x62   : > { %p7749_p12 = scmp.ne.s32.totalorder %s458_s13, %s7748_s29  ;;  %p7756_p2 = scmp.lt.s32.totalorder %s458_s13, %s458_s13 }
  0x63   : > { %p7757_p4 = scmp.lt.s32.totalorder %s7755_s30, %s7748_s29 }
  0x64   : > { %7250 = dma.hbm_to_vmem [thread:$0]  (!%p8132_p5), %s10674_s1, 8192, %s420_s15, [#allocation9], %s10673_s17, %s10673_s17, %s7982_s16  }
  0x65   : > { %p7751_p13 = pnand %p7749_p12, %p8140_p6  ;;  %p7758_p7 = por %p7757_p4, %p7756_p2 }
  0x67   : > { %p7752_p0 = pneg %p7751_p13 }
  0x69   : > { %p7759_p8 = pnand %p7758_p7, %p7752_p0 }
  0x6b   : > { %7762 = shalt.err (!%p7759_p8)
}
  0x6c   : > { %s10675_s5 = sld [smem:[#allocation170_spill]]  ;;  %s7774_s15 = scalar_lea.vmem %s487_s14, 6144 }
  0x6d   : > { %p7775_p9 = scmp.ne.s32.totalorder %s487_s14, %s7774_s15  ;;  %p7782_p12 = scmp.lt.s32.totalorder %s487_s14, %s487_s14 }
  0x6e   : > { %p7783_p13 = scmp.lt.s32.totalorder %s7774_s15, %s7774_s15 }
  0x6f   : > { %p7777_p10 = pnand %p7775_p9, %p8140_p6 }
  0x70   : > { %p7784_p1 = por %p7783_p13, %p7782_p12 }
  0x71   : > { %p7778_p11 = pneg %p7777_p10 }
  0x72   : > { %7259 = dma.hbm_to_vmem [thread:$0]  (!%p8132_p5), %s10675_s5, 16, %s458_s13, [#allocation15]  }
  0x73   : > { %p7785_p3 = pnand %p7784_p1, %p7778_p11 }
  0x75   : > { %7788 = shalt.err (!%p7785_p3)
}
  0x76   : > { %s7991_s29 = smov 384   ;;  %s7992_s17 = smov 24  }
  0x77   : > { %s10676_s9 = sld [smem:[#allocation172_spill]]  ;;  %s7993_s13 = smov [#allocation22]  }
  0x78   : > { %s515_s10 = sshll.u32 %s7993_s13, 4  ;;  %s516_s10 = int_to_ptr.vmem [resolvable:$true] %s515_s10 }
  0x79   : > { %s7800_s30 = scalar_lea.vmem %s516_s10, 4096  ;;  %p7808_p7 = scmp.lt.s32.totalorder %s516_s10, %s516_s10 }
  0x7a   : > { %p7801_p0 = scmp.ne.s32.totalorder %s516_s10, %s7800_s30  ;;  %p7809_p1 = scmp.lt.s32.totalorder %s7800_s30, %s7800_s30 }
  0x7c   : > { %p7803_p2 = pnand %p7801_p0, %p8140_p6  ;;  %p7810_p3 = por %p7809_p1, %p7808_p7 }
  0x7d   : > { %7265 = dma.hbm_to_vmem [thread:$0]  (!%p8132_p5), %s10676_s9, 6144, %s487_s14, [#allocation18], %s7991_s29, %s7991_s29, %s7992_s17  }
  0x7e   : > { %p7804_p4 = pneg %p7803_p2 }
  0x80   : > { %p7811_p8 = pnand %p7810_p3, %p7804_p4 }
  0x82   : > { %7814 = shalt.err (!%p7811_p8)
}
  0x83   : > { %s10677_s22 = smov 16   ;;  %s10678_s16 = smov 256  }
  0x84   : > { %7271 = dma.hbm_to_vmem [thread:$0]  (!%p8132_p5), %s10450_s12, 4096, %s516_s10, [#allocation21], %s10678_s16, %s10678_s16, %s10677_s22  }
  0x85   : > { %s6442_s18 = sadd.s32 4294967294, %s7975_s26   ;;  %s54_s21 = sadd.s32 1, %s7971_s25 }
  0x86   : > { %p55_p6 = scmp.ge.s32.totalorder %s54_s21, 7  ;;  %s92_s29 = sadd.s32 1, %s7963_s24 }
  0x87   : > { %p99_p9 = scmp.ne.s32.totalorder %s7963_s24, %s7959_s0  ;;  %p100_p10 = scmp.eq.s32.totalorder %s7975_s26, 0 }
  0x88   : > { %s11343_s21 = smov (%p55_p6, %s54_s21), 0  ;;  %p105_p12 = scmp.ne.s32.totalorder %s7959_s0, %s7955_s23 }
  0x89   : > { %p8225_p11 = por %p100_p10, %p99_p9  ;;  %s87_s19 = ssub.s32 %s7971_s25, %s11343_s21 }
  0x8a   : > { %p362_p5 = scmp.eq.s32.totalorder %s8119_s27, 6  ;;  %p90_p13 = scmp.eq.s32.totalorder %s87_s19, 0 }
  0x8b   : > { %p10680_p0 = scmp.eq.s32.totalorder %s8119_s27, 0  ;;  %p368_p7 = scmp.eq.s32.totalorder %s6442_s18, 6 }
  0x8c   : > { %p8240_p4 = por %p362_p5, %p99_p9  ;;  %p7291_p3 = scmp.lt.s32.totalorder %s7975_s26, 7 }
  0x8d   : > { %p8236_p2 = por %p10680_p0, %p105_p12  ;;  %p8247_p1 = por %p368_p7, %p105_p12 }
  0x8e   : > { %s8245_s10 = scalar_select %p90_p13, %s7963_s24, %s92_s29  }
  0x8f   : > { %s532_s22 = sand.u32 1, %s7975_s26   ;;  %s534_s16 = sand.u32 1, %s7963_s24  }
  0x90   : > { %s6453_s15 = sshll.u32 %s534_s16, 2  ;;  %s6454_s14 = sshll.u32 %s7971_s25, 6 }
  0x91   : > { %s542_s3 = scalar_lea.hbm %s10441_s2, %s6454_s14  ;;  %s536_s4 = scalar_lea.vmem [#allocation11], %s6453_s15 }
  0x92   : > { %s544_s5 = sshll.u32 %s536_s4, 4  ;;  %p8260_p8 = pnand %p7291_p3, %p8225_p11  ;;  %s545_s5 = int_to_ptr.vmem [resolvable:$true] %s544_s5 }
  0x93   : > { %s533_s29 = scalar_lea.sflag [#allocation12], %s532_s22  ;;  %s7828_s7 = scalar_lea.vmem %s545_s5, 64 }
  0x94   : > { %p7817_p6 = pneg %p8260_p8  ;;  %p7829_p9 = scmp.ne.s32.totalorder %s545_s5, %s7828_s7 }
  0x95   : > { %s7994_s16 = smov [#allocation11]  }
  0x96   : > { %p7831_p10 = pnand %p7829_p9, %p7817_p6  ;;  %s7833_s9 = sshll.u32 %s7994_s16, 4  ;;  %s7834_s9 = int_to_ptr.vmem [resolvable:$false] %s7833_s9 }
  0x97   : > { %s7835_s1 = scalar_lea.vmem %s7834_s9, 128  ;;  %p7836_p5 = scmp.lt.s32.totalorder %s545_s5, %s7834_s9 }
  0x98   : > { %p7832_p12 = pneg %p7831_p10  ;;  %p7837_p13 = scmp.lt.s32.totalorder %s7835_s1, %s7828_s7 }
  0x9a   : > { %p7838_p0 = por %p7837_p13, %p7836_p5 }
  0x9c   : > { %p7839_p7 = pnand %p7838_p0, %p7832_p12 }
  0x9e   : > { %7842 = shalt.err (!%p7839_p7)
}
  0x9f   : > { %7275 = dma.hbm_to_vmem [thread:$0]  (!%p8260_p8), %s542_s3, 64, %s545_s5, %s533_s29  }
  0xa0   : > { %p10685_p11 = scmp.ne.s32.totalorder %s10667_s28, 0 }
  0xa2   : > { %553 = sbr.rel (%p10685_p11) target bundleno = 2277 (0x8e5), region = 72 }
  0xa7   : > { %p10686_p3 = scmp.eq.s32.totalorder %s8119_s27, 0 }
  0xa9   : > { %7922 = dma.done.wait (%p10686_p3), [#allocation9], 8192   ;;  %p10687_p6 = pmov %p10686_p3 }
  0xaa   : > { %s559_s4 = sand.u32 1, %s8119_s27   ;;  %s8276_s7 = sand.u32 1, %s7959_s0  }
  0xab   : > { %7924 = vsyncadd (%p10687_p6), [#allocation9], 4294959104  ;;  %s6457_s9 = sshll.u32 %s8276_s7, 2  ;;  %s560_s17 = scalar_lea.sflag [#allocation12], %s559_s4 }
  0xac   : > { %s8279_s22 = scalar_lea.vmem [#allocation11], %s6457_s9 }
  0xad   : > { %7926 = dma.done.wait (%p8236_p2), %s560_s17, 64  }
  0xae   : > { %7928 = vsyncadd (%p8236_p2), %s560_s17, 4294967232  ;;  %p10688_p8 = pmov %p10686_p3 }
  0xaf   : > { %p10689_p9 = pmov %p10686_p3 }
  0xb0   : > { %7930 = dma.done.wait (%p10688_p8), [#allocation12], 1024  }
  0xb1   : > { %7932 = vsyncadd (%p10689_p9), [#allocation12], 4294966272  ;;  %p10690_p10 = pmov %p10686_p3 }
  0xb2   : > { %p10691_p12 = pmov %p10686_p3 }
  0xb3   : > { %7934 = dma.done.wait (%p10690_p10), [#allocation15], 32  }
  0xb4   : > { %7936 = vsyncadd (%p10691_p12), [#allocation15], 4294967264  ;;  %p10692_p5 = pmov %p10686_p3 }
  0xb5   : > { %p10693_p13 = pmov %p10686_p3 }
  0xb6   : > { %7938 = dma.done.wait (%p10692_p5), [#allocation18], 8192  }
  0xb7   : > { %7940 = vsyncadd (%p10693_p13), [#allocation18], 4294959104  ;;  %p10694_p2 = pmov %p10686_p3 }
  0xb9   : > { %7942 = dma.done.wait (%p10694_p2), [#allocation21], 8192   ;;  %p10695_p0 = pmov %p10694_p2 }
  0xba   : > { %s6465_s3 = sshll.u32 %s8276_s7, 3  ;;  %v8302_v1 = vld [vmem:[#allocation8] sm:$0xf]  ;;  %v8304_v2 = vld [vmem:[#allocation8 + $0x4] sm:$0xf]  ;;  %p6467_p7 = scmp.ne.s32.totalorder %s7967_s6, 0 }
  0xbb   : > { %7944 = vsyncadd (%p10695_p0), [#allocation21], 4294959104  ;;  %10696 = vst [vmem:[#allocation35_spill] sm:$0xff] %v8302_v1  ;;  %v8306_v3 = vld [vmem:[#allocation8 + $0x8] sm:$0xf]  ;;  %s8560_s5 = scalar_lea.vmem [#allocation23], %s6465_s3 }
  0xbc   : > { %10697 = vst [vmem:[#allocation36_spill] sm:$0xff] %v8306_v3  ;;  %v8308_v4 = vld [vmem:[#allocation8 + $0xc] sm:$0xf]  ;;  %v8310_v5 = vld [vmem:[#allocation8 + $0x10] sm:$0xf]  ;;  %s8564_s27 = scalar_lea.vmem [#allocation24], %s6465_s3 }
  0xbd   : > { %10698 = vst [vmem:[#allocation37_spill] sm:$0xff] %v8308_v4  ;;  %v8312_v6 = vld [vmem:[#allocation8 + $0x14] sm:$0xf]  ;;  %v8314_v7 = vld [vmem:[#allocation8 + $0x18] sm:$0xf] }
  0xbe   : > { %10699 = vst [vmem:[#allocation38_spill] sm:$0xff] %v8314_v7  ;;  %v8316_v8 = vld [vmem:[#allocation8 + $0x1c] sm:$0xf]  ;;  %v8318_v9 = vld [vmem:[#allocation8 + $0x20] sm:$0xf] }
  0xbf   : > { %10700 = vst [vmem:[#allocation39_spill] sm:$0xff] %v8316_v8  ;;  %10701 = vst [vmem:[#allocation40_spill] sm:$0xff] %v8318_v9  ;;  %v8320_v10 = vld [vmem:[#allocation8 + $0x24] sm:$0xf]  ;;  %v8322_v11 = vld [vmem:[#allocation8 + $0x28] sm:$0xf] }
  0xc0   : > { %10702 = vst [vmem:[#allocation41_spill] sm:$0xff] %v8320_v10  ;;  %10703 = vst [vmem:[#allocation42_spill] sm:$0xff] %v8322_v11  ;;  %v8324_v12 = vld [vmem:[#allocation8 + $0x2c] sm:$0xf]  ;;  %v8326_v13 = vld [vmem:[#allocation8 + $0x30] sm:$0xf] }
  0xc1   : > { %10704 = vst [vmem:[#allocation43_spill] sm:$0xff] %v8324_v12  ;;  %10705 = vst [vmem:[#allocation44_spill] sm:$0xff] %v8326_v13  ;;  %v8328_v14 = vld [vmem:[#allocation8 + $0x34] sm:$0xf]  ;;  %v8330_v15 = vld [vmem:[#allocation8 + $0x38] sm:$0xf] }
  0xc2   : > { %10706 = vst [vmem:[#allocation45_spill] sm:$0xff] %v8328_v14  ;;  %10707 = vst [vmem:[#allocation46_spill] sm:$0xff] %v8330_v15  ;;  %v8332_v16 = vld [vmem:[#allocation8 + $0x3c] sm:$0xf]  ;;  %v8334_v17 = vld [vmem:[#allocation8 + $0x40] sm:$0xf] }
  0xc3   : > { %10708 = vst [vmem:[#allocation47_spill] sm:$0xff] %v8332_v16  ;;  %10709 = vst [vmem:[#allocation48_spill] sm:$0xff] %v8334_v17  ;;  %v8336_v18 = vld [vmem:[#allocation8 + $0x44] sm:$0xf]  ;;  %v8338_v19 = vld [vmem:[#allocation8 + $0x48] sm:$0xf] }
  0xc4   : > { %10710 = vst [vmem:[#allocation49_spill] sm:$0xff] %v8336_v18  ;;  %10711 = vst [vmem:[#allocation50_spill] sm:$0xff] %v8338_v19  ;;  %v8340_v20 = vld [vmem:[#allocation8 + $0x4c] sm:$0xf]  ;;  %v8342_v21 = vld [vmem:[#allocation8 + $0x50] sm:$0xf] }
  0xc5   : > { %10712 = vst [vmem:[#allocation51_spill] sm:$0xff] %v8340_v20  ;;  %10713 = vst [vmem:[#allocation52_spill] sm:$0xff] %v8342_v21  ;;  %v8344_v22 = vld [vmem:[#allocation8 + $0x54] sm:$0xf]  ;;  %v8346_v23 = vld [vmem:[#allocation8 + $0x58] sm:$0xf] }
  0xc6   : > { %10714 = vst [vmem:[#allocation53_spill] sm:$0xff] %v8344_v22  ;;  %10715 = vst [vmem:[#allocation54_spill] sm:$0xff] %v8346_v23  ;;  %v8348_v24 = vld [vmem:[#allocation8 + $0x5c] sm:$0xf]  ;;  %v8350_v25 = vld [vmem:[#allocation8 + $0x60] sm:$0xf] }
  0xc7   : > { %10716 = vst [vmem:[#allocation55_spill] sm:$0xff] %v8348_v24  ;;  %10717 = vst [vmem:[#allocation56_spill] sm:$0xff] %v8350_v25  ;;  %v8352_v26 = vld [vmem:[#allocation8 + $0x64] sm:$0xf]  ;;  %v8354_v27 = vld [vmem:[#allocation8 + $0x68] sm:$0xf] }
  0xc8   : > { %10718 = vst [vmem:[#allocation57_spill] sm:$0xff] %v8352_v26  ;;  %10719 = vst [vmem:[#allocation58_spill] sm:$0xff] %v8354_v27  ;;  %v8356_v28 = vld [vmem:[#allocation8 + $0x6c] sm:$0xf]  ;;  %v8358_v29 = vld [vmem:[#allocation8 + $0x70] sm:$0xf] }
  0xc9   : > { %10720 = vst [vmem:[#allocation59_spill] sm:$0xff] %v8356_v28  ;;  %10721 = vst [vmem:[#allocation60_spill] sm:$0xff] %v8358_v29  ;;  %v8360_v30 = vld [vmem:[#allocation8 + $0x74] sm:$0xf]  ;;  %v8362_v31 = vld [vmem:[#allocation8 + $0x78] sm:$0xf] }
  0xca   : > { %10722 = vst [vmem:[#allocation61_spill] sm:$0xff] %v8360_v30  ;;  %10723 = vst [vmem:[#allocation62_spill] sm:$0xff] %v8362_v31  ;;  %v8364_v32 = vld [vmem:[#allocation8 + $0x7c] sm:$0xf]  ;;  %v8366_v33 = vld [vmem:[#allocation8 + $0x80] sm:$0xf] }
  0xcb   : > { %10724 = vst [vmem:[#allocation63_spill] sm:$0xff] %v8364_v32  ;;  %10725 = vst [vmem:[#allocation64_spill] sm:$0xff] %v8366_v33  ;;  %v8368_v34 = vld [vmem:[#allocation8 + $0x84] sm:$0xf]  ;;  %v8370_v35 = vld [vmem:[#allocation8 + $0x88] sm:$0xf] }
  0xcc   : > { %10726 = vst [vmem:[#allocation65_spill] sm:$0xff] %v8368_v34  ;;  %10727 = vst [vmem:[#allocation66_spill] sm:$0xff] %v8370_v35  ;;  %v8372_v36 = vld [vmem:[#allocation8 + $0x8c] sm:$0xf]  ;;  %v8374_v37 = vld [vmem:[#allocation8 + $0x90] sm:$0xf] }
  0xcd   : > { %10728 = vst [vmem:[#allocation67_spill] sm:$0xff] %v8372_v36  ;;  %10729 = vst [vmem:[#allocation68_spill] sm:$0xff] %v8374_v37  ;;  %v8376_v38 = vld [vmem:[#allocation8 + $0x94] sm:$0xf]  ;;  %v8378_v39 = vld [vmem:[#allocation8 + $0x98] sm:$0xf] }
  0xce   : > { %10730 = vst [vmem:[#allocation69_spill] sm:$0xff] %v8376_v38  ;;  %10731 = vst [vmem:[#allocation70_spill] sm:$0xff] %v8378_v39  ;;  %v8380_v40 = vld [vmem:[#allocation8 + $0x9c] sm:$0xf]  ;;  %v8382_v41 = vld [vmem:[#allocation8 + $0xa0] sm:$0xf] }
  0xcf   : > { %10732 = vst [vmem:[#allocation71_spill] sm:$0xff] %v8380_v40  ;;  %10733 = vst [vmem:[#allocation72_spill] sm:$0xff] %v8382_v41  ;;  %v8384_v42 = vld [vmem:[#allocation8 + $0xa4] sm:$0xf]  ;;  %v8386_v43 = vld [vmem:[#allocation8 + $0xa8] sm:$0xf] }
  0xd0   : > { %10734 = vst [vmem:[#allocation73_spill] sm:$0xff] %v8384_v42  ;;  %10735 = vst [vmem:[#allocation74_spill] sm:$0xff] %v8386_v43  ;;  %v8388_v44 = vld [vmem:[#allocation8 + $0xac] sm:$0xf]  ;;  %v8390_v45 = vld [vmem:[#allocation8 + $0xb0] sm:$0xf] }
  0xd1   : > { %10736 = vst [vmem:[#allocation75_spill] sm:$0xff] %v8388_v44  ;;  %10737 = vst [vmem:[#allocation76_spill] sm:$0xff] %v8390_v45  ;;  %v8392_v46 = vld [vmem:[#allocation8 + $0xb4] sm:$0xf]  ;;  %v8394_v47 = vld [vmem:[#allocation8 + $0xb8] sm:$0xf] }
  0xd2   : > { %10738 = vst [vmem:[#allocation77_spill] sm:$0xff] %v8392_v46  ;;  %10739 = vst [vmem:[#allocation78_spill] sm:$0xff] %v8394_v47  ;;  %v8396_v48 = vld [vmem:[#allocation8 + $0xbc] sm:$0xf]  ;;  %v8398_v49 = vld [vmem:[#allocation8 + $0xc0] sm:$0xf] }
  0xd3   : > { %10740 = vst [vmem:[#allocation79_spill] sm:$0xff] %v8396_v48  ;;  %10741 = vst [vmem:[#allocation80_spill] sm:$0xff] %v8398_v49  ;;  %v8400_v50 = vld [vmem:[#allocation8 + $0xc4] sm:$0xf]  ;;  %v8402_v51 = vld [vmem:[#allocation8 + $0xc8] sm:$0xf] }
  0xd4   : > { %10742 = vst [vmem:[#allocation81_spill] sm:$0xff] %v8400_v50  ;;  %10743 = vst [vmem:[#allocation82_spill] sm:$0xff] %v8402_v51  ;;  %v8404_v52 = vld [vmem:[#allocation8 + $0xcc] sm:$0xf]  ;;  %v8406_v53 = vld [vmem:[#allocation8 + $0xd0] sm:$0xf] }
  0xd5   : > { %10744 = vst [vmem:[#allocation83_spill] sm:$0xff] %v8404_v52  ;;  %10745 = vst [vmem:[#allocation84_spill] sm:$0xff] %v8406_v53  ;;  %v8408_v54 = vld [vmem:[#allocation8 + $0xd4] sm:$0xf]  ;;  %v8410_v55 = vld [vmem:[#allocation8 + $0xd8] sm:$0xf] }
  0xd6   : > { %10746 = vst [vmem:[#allocation85_spill] sm:$0xff] %v8408_v54  ;;  %10747 = vst [vmem:[#allocation86_spill] sm:$0xff] %v8410_v55  ;;  %v8412_v56 = vld [vmem:[#allocation8 + $0xdc] sm:$0xf]  ;;  %v8414_v57 = vld [vmem:[#allocation8 + $0xe0] sm:$0xf] }
  0xd7   : > { %10748 = vst [vmem:[#allocation87_spill] sm:$0xff] %v8412_v56  ;;  %10749 = vst [vmem:[#allocation88_spill] sm:$0xff] %v8414_v57  ;;  %v8416_v58 = vld [vmem:[#allocation8 + $0xe4] sm:$0xf]  ;;  %v8418_v59 = vld [vmem:[#allocation8 + $0xe8] sm:$0xf] }
  0xd8   : > { %10750 = vst [vmem:[#allocation89_spill] sm:$0xff] %v8416_v58  ;;  %10751 = vst [vmem:[#allocation90_spill] sm:$0xff] %v8418_v59  ;;  %v8420_v60 = vld [vmem:[#allocation8 + $0xec] sm:$0xf]  ;;  %v8422_v61 = vld [vmem:[#allocation8 + $0xf0] sm:$0xf] }
  0xd9   : > { %10752 = vst [vmem:[#allocation91_spill] sm:$0xff] %v8420_v60  ;;  %10753 = vst [vmem:[#allocation92_spill] sm:$0xff] %v8422_v61  ;;  %v8424_v62 = vld [vmem:[#allocation8 + $0xf4] sm:$0xf]  ;;  %v8426_v63 = vld [vmem:[#allocation8 + $0xf8] sm:$0xf] }
  0xda   : > { %10754 = vst [vmem:[#allocation93_spill] sm:$0xff] %v8424_v62  ;;  %10755 = vst [vmem:[#allocation94_spill] sm:$0xff] %v8426_v63  ;;  %v8428_v0 = vld [vmem:[#allocation8 + $0xfc] sm:$0xf]  ;;  %v8430_v54 = vld [vmem:[#allocation8 + $0x100] sm:$0xf] }
  0xdb   : > { %10756 = vst [vmem:[#allocation95_spill] sm:$0xff] %v8428_v0  ;;  %10757 = vst [vmem:[#allocation96_spill] sm:$0xff] %v8430_v54  ;;  %v8432_v55 = vld [vmem:[#allocation8 + $0x104] sm:$0xf]  ;;  %v8434_v56 = vld [vmem:[#allocation8 + $0x108] sm:$0xf] }
  0xdc   : > { %10758 = vst [vmem:[#allocation97_spill] sm:$0xff] %v8432_v55  ;;  %10759 = vst [vmem:[#allocation98_spill] sm:$0xff] %v8434_v56  ;;  %v8436_v53 = vld [vmem:[#allocation8 + $0x10c] sm:$0xf]  ;;  %v8438_v52 = vld [vmem:[#allocation8 + $0x110] sm:$0xf] }
  0xdd   : > { %10760 = vst [vmem:[#allocation99_spill] sm:$0xff] %v8436_v53  ;;  %10761 = vst [vmem:[#allocation100_spill] sm:$0xff] %v8438_v52  ;;  %v8440_v51 = vld [vmem:[#allocation8 + $0x114] sm:$0xf]  ;;  %v8442_v50 = vld [vmem:[#allocation8 + $0x118] sm:$0xf] }
  0xde   : > { %10762 = vst [vmem:[#allocation101_spill] sm:$0xff] %v8440_v51  ;;  %10763 = vst [vmem:[#allocation102_spill] sm:$0xff] %v8442_v50  ;;  %v8444_v61 = vld [vmem:[#allocation8 + $0x11c] sm:$0xf]  ;;  %v8446_v62 = vld [vmem:[#allocation8 + $0x120] sm:$0xf] }
  0xdf   : > { %10764 = vst [vmem:[#allocation103_spill] sm:$0xff] %v8444_v61  ;;  %10765 = vst [vmem:[#allocation104_spill] sm:$0xff] %v8446_v62  ;;  %v8448_v63 = vld [vmem:[#allocation8 + $0x124] sm:$0xf]  ;;  %v8450_v0 = vld [vmem:[#allocation8 + $0x128] sm:$0xf] }
  0xe0   : > { %10766 = vst [vmem:[#allocation105_spill] sm:$0xff] %v8448_v63  ;;  %10767 = vst [vmem:[#allocation106_spill] sm:$0xff] %v8450_v0  ;;  %v8452_v54 = vld [vmem:[#allocation8 + $0x12c] sm:$0xf]  ;;  %v8454_v55 = vld [vmem:[#allocation8 + $0x130] sm:$0xf] }
  0xe1   : > { %10768 = vst [vmem:[#allocation107_spill] sm:$0xff] %v8452_v54  ;;  %10769 = vst [vmem:[#allocation108_spill] sm:$0xff] %v8454_v55  ;;  %v8456_v56 = vld [vmem:[#allocation8 + $0x134] sm:$0xf]  ;;  %v8458_v53 = vld [vmem:[#allocation8 + $0x138] sm:$0xf] }
  0xe2   : > { %10770 = vst [vmem:[#allocation109_spill] sm:$0xff] %v8456_v56  ;;  %10771 = vst [vmem:[#allocation110_spill] sm:$0xff] %v8458_v53  ;;  %v8460_v52 = vld [vmem:[#allocation8 + $0x13c] sm:$0xf]  ;;  %v8462_v51 = vld [vmem:[#allocation8 + $0x140] sm:$0xf] }
  0xe3   : > { %10772 = vst [vmem:[#allocation111_spill] sm:$0xff] %v8460_v52  ;;  %10773 = vst [vmem:[#allocation112_spill] sm:$0xff] %v8462_v51  ;;  %v8464_v50 = vld [vmem:[#allocation8 + $0x144] sm:$0xf]  ;;  %v8466_v61 = vld [vmem:[#allocation8 + $0x148] sm:$0xf] }
  0xe4   : > { %10774 = vst [vmem:[#allocation113_spill] sm:$0xff] %v8464_v50  ;;  %10775 = vst [vmem:[#allocation114_spill] sm:$0xff] %v8466_v61  ;;  %v8468_v62 = vld [vmem:[#allocation8 + $0x14c] sm:$0xf]  ;;  %v8470_v63 = vld [vmem:[#allocation8 + $0x150] sm:$0xf] }
  0xe5   : > { %10776 = vst [vmem:[#allocation115_spill] sm:$0xff] %v8468_v62  ;;  %10777 = vst [vmem:[#allocation116_spill] sm:$0xff] %v8470_v63  ;;  %v8472_v0 = vld [vmem:[#allocation8 + $0x154] sm:$0xf]  ;;  %v8474_v54 = vld [vmem:[#allocation8 + $0x158] sm:$0xf] }
  0xe6   : > { %10778 = vst [vmem:[#allocation117_spill] sm:$0xff] %v8472_v0  ;;  %10779 = vst [vmem:[#allocation118_spill] sm:$0xff] %v8474_v54  ;;  %v8476_v55 = vld [vmem:[#allocation8 + $0x15c] sm:$0xf]  ;;  %v8478_v56 = vld [vmem:[#allocation8 + $0x160] sm:$0xf] }
  0xe7   : > { %10780 = vst [vmem:[#allocation119_spill] sm:$0xff] %v8476_v55  ;;  %10781 = vst [vmem:[#allocation120_spill] sm:$0xff] %v8478_v56  ;;  %v8480_v53 = vld [vmem:[#allocation8 + $0x164] sm:$0xf]  ;;  %v8482_v52 = vld [vmem:[#allocation8 + $0x168] sm:$0xf] }
  0xe8   : > { %10782 = vst [vmem:[#allocation121_spill] sm:$0xff] %v8480_v53  ;;  %10783 = vst [vmem:[#allocation122_spill] sm:$0xff] %v8482_v52  ;;  %v8484_v51 = vld [vmem:[#allocation8 + $0x16c] sm:$0xf]  ;;  %v8486_v50 = vld [vmem:[#allocation8 + $0x170] sm:$0xf] }
  0xe9   : > { %10784 = vst [vmem:[#allocation123_spill] sm:$0xff] %v8484_v51  ;;  %10785 = vst [vmem:[#allocation124_spill] sm:$0xff] %v8486_v50  ;;  %v8488_v61 = vld [vmem:[#allocation8 + $0x174] sm:$0xf]  ;;  %v8490_v62 = vld [vmem:[#allocation8 + $0x178] sm:$0xf] }
  0xea   : > { %10786 = vst [vmem:[#allocation125_spill] sm:$0xff] %v8488_v61  ;;  %10787 = vst [vmem:[#allocation126_spill] sm:$0xff] %v8490_v62  ;;  %v8492_v63 = vld [vmem:[#allocation8 + $0x17c] sm:$0xf]  ;;  %v8494_v0 = vld [vmem:[#allocation8 + $0x180] sm:$0xf] }
  0xeb   : > { %10788 = vst [vmem:[#allocation127_spill] sm:$0xff] %v8492_v63  ;;  %10789 = vst [vmem:[#allocation128_spill] sm:$0xff] %v8494_v0  ;;  %v8496_v54 = vld [vmem:[#allocation8 + $0x184] sm:$0xf]  ;;  %v8498_v55 = vld [vmem:[#allocation8 + $0x188] sm:$0xf] }
  0xec   : > { %10790 = vst [vmem:[#allocation129_spill] sm:$0xff] %v8496_v54  ;;  %10791 = vst [vmem:[#allocation130_spill] sm:$0xff] %v8498_v55  ;;  %v8500_v56 = vld [vmem:[#allocation8 + $0x18c] sm:$0xf]  ;;  %v8502_v53 = vld [vmem:[#allocation8 + $0x190] sm:$0xf] }
  0xed   : > { %10792 = vst [vmem:[#allocation131_spill] sm:$0xff] %v8500_v56  ;;  %10793 = vst [vmem:[#allocation132_spill] sm:$0xff] %v8502_v53  ;;  %v8504_v52 = vld [vmem:[#allocation8 + $0x194] sm:$0xf]  ;;  %v8506_v51 = vld [vmem:[#allocation8 + $0x198] sm:$0xf] }
  0xee   : > { %10794 = vst [vmem:[#allocation133_spill] sm:$0xff] %v8504_v52  ;;  %10795 = vst [vmem:[#allocation134_spill] sm:$0xff] %v8506_v51  ;;  %v8508_v50 = vld [vmem:[#allocation8 + $0x19c] sm:$0xf]  ;;  %v8510_v61 = vld [vmem:[#allocation8 + $0x1a0] sm:$0xf] }
  0xef   : > { %10796 = vst [vmem:[#allocation135_spill] sm:$0xff] %v8508_v50  ;;  %10797 = vst [vmem:[#allocation136_spill] sm:$0xff] %v8510_v61  ;;  %v8512_v62 = vld [vmem:[#allocation8 + $0x1a4] sm:$0xf]  ;;  %v8514_v63 = vld [vmem:[#allocation8 + $0x1a8] sm:$0xf] }
  0xf0   : > { %10798 = vst [vmem:[#allocation137_spill] sm:$0xff] %v8512_v62  ;;  %10799 = vst [vmem:[#allocation138_spill] sm:$0xff] %v8514_v63  ;;  %v8516_v0 = vld [vmem:[#allocation8 + $0x1ac] sm:$0xf]  ;;  %v8518_v54 = vld [vmem:[#allocation8 + $0x1b0] sm:$0xf] }
  0xf1   : > { %10800 = vst [vmem:[#allocation139_spill] sm:$0xff] %v8516_v0  ;;  %10801 = vst [vmem:[#allocation140_spill] sm:$0xff] %v8518_v54  ;;  %v8520_v55 = vld [vmem:[#allocation8 + $0x1b4] sm:$0xf]  ;;  %v8522_v56 = vld [vmem:[#allocation8 + $0x1b8] sm:$0xf] }
  0xf2   : > { %10802 = vst [vmem:[#allocation141_spill] sm:$0xff] %v8520_v55  ;;  %10803 = vst [vmem:[#allocation142_spill] sm:$0xff] %v8522_v56  ;;  %v8524_v53 = vld [vmem:[#allocation8 + $0x1bc] sm:$0xf]  ;;  %v8526_v52 = vld [vmem:[#allocation8 + $0x1c0] sm:$0xf] }
  0xf3   : > { %10804 = vst [vmem:[#allocation143_spill] sm:$0xff] %v8524_v53  ;;  %10805 = vst [vmem:[#allocation144_spill] sm:$0xff] %v8526_v52  ;;  %v8528_v50 = vld [vmem:[#allocation8 + $0x1c4] sm:$0xf]  ;;  %v8530_v61 = vld [vmem:[#allocation8 + $0x1c8] sm:$0xf] }
  0xf4   : > { %10806 = vst [vmem:[#allocation145_spill] sm:$0xff] %v8528_v50  ;;  %10807 = vst [vmem:[#allocation146_spill] sm:$0xff] %v8530_v61  ;;  %v8532_v62 = vld [vmem:[#allocation8 + $0x1cc] sm:$0xf]  ;;  %v8534_v63 = vld [vmem:[#allocation8 + $0x1d0] sm:$0xf] }
  0xf5   : > { %10808 = vst [vmem:[#allocation147_spill] sm:$0xff] %v8532_v62  ;;  %10809 = vst [vmem:[#allocation148_spill] sm:$0xff] %v8534_v63  ;;  %v8536_v0 = vld [vmem:[#allocation8 + $0x1d4] sm:$0xf]  ;;  %v8538_v54 = vld [vmem:[#allocation8 + $0x1d8] sm:$0xf] }
  0xf6   : > { %10810 = vst [vmem:[#allocation149_spill] sm:$0xff] %v8536_v0  ;;  %10811 = vst [vmem:[#allocation150_spill] sm:$0xff] %v8538_v54  ;;  %v8540_v55 = vld [vmem:[#allocation8 + $0x1dc] sm:$0xf]  ;;  %v8542_v56 = vld [vmem:[#allocation8 + $0x1e0] sm:$0xf] }
  0xf7   : > { %10812 = vst [vmem:[#allocation151_spill] sm:$0xff] %v8540_v55  ;;  %10813 = vst [vmem:[#allocation152_spill] sm:$0xff] %v8542_v56  ;;  %v8544_v53 = vld [vmem:[#allocation8 + $0x1e4] sm:$0xf]  ;;  %v8546_v52 = vld [vmem:[#allocation8 + $0x1e8] sm:$0xf] }
  0xf8   : > { %10814 = vst [vmem:[#allocation153_spill] sm:$0xff] %v8544_v53  ;;  %10815 = vst [vmem:[#allocation154_spill] sm:$0xff] %v8546_v52  ;;  %v8548_v50 = vld [vmem:[#allocation8 + $0x1ec] sm:$0xf]  ;;  %v8550_v51 = vld [vmem:[#allocation8 + $0x1f0] sm:$0xf] }
  0xf9   : > { %10816 = vst [vmem:[#allocation155_spill] sm:$0xff] %v8548_v50  ;;  %10817 = vst [vmem:[#allocation156_spill] sm:$0xff] %v8550_v51  ;;  %v8552_v61 = vld [vmem:[#allocation8 + $0x1f4] sm:$0xf]  ;;  %v8554_v62 = vld [vmem:[#allocation8 + $0x1f8] sm:$0xf] }
  0xfa   : > { %10818 = vst [vmem:[#allocation157_spill] sm:$0xff] %v8552_v61  ;;  %10819 = vst [vmem:[#allocation158_spill] sm:$0xff] %v8554_v62  ;;  %v8556_v63 = vld [vmem:[#allocation8 + $0x1fc] sm:$0xf]  ;;  %774 = sbr.rel (%p6467_p7) target bundleno = 702 (0x2be), region = 112 }
  0xfb   : > { %10820 = vst [vmem:[#allocation159_spill] sm:$0xff] %v8556_v63 }
  0xff   : > { %v8567_v52 = vld [vmem:[#allocation13 + $0x38] sm:$0xff]   ;;  %v6512_v51 = vcombine.low %v8414_v57, %v8416_v58  ;;  %v8573_v62 = vld [vmem:[#allocation13 + $0x30] sm:$0xff]   ;;  %v7995_v63 = vmov 0   ;;  %v7379_v56 = vld [vmem:[#allocation17 + $0x60] ss:$8 sps:$4 sm:$0xff]   ;;  %v10903_v60 = vunpack.c.l.bf16 %v8302_v1  ;;  %v10906_v24 = vunpack.c.l.bf16 %v8336_v18 }
 0x100   : > { %10821 = vst [vmem:[#allocation160_spill] sm:$0xff] %v8573_v62  ;;  %1259 = vmatprep.mubr.bf16.mxu0 %v7995_v63  ;;  %7193 = vmatprep.subr.bf16.mxu1 %v8567_v52  ;;  %v7373_v54 = vld [vmem:[#allocation17 + $0x74] ss:$8 sps:$4 sm:$0xff]   ;;  %v7375_v50 = vld [vmem:[#allocation17 + $0x70] ss:$8 sps:$4 sm:$0xff]   ;;  %v10827_v32 = vld [vmem:[#allocation83_spill] sm:$0xff]  ;;  %v10907_v61 = vunpack.c.l.bf16 %v8366_v33  ;;  %v10908_v30 = vunpack.c.l.bf16 %v8368_v34  ;;  %v10918_v33 = vunpack.c.l.bf16 %v8338_v19 }
 0x101   : > { %6961 = vmatprep.mubr.bf16.mxu1 %v6512_v51  ;;  %7201 = vmatpush3.bf16.msra.mxu1 %v8567_v52  ;;  %v8590_v51 = vld [vmem:[#allocation13 + $0x28] sm:$0xff]   ;;  %v8610_v11 = vld [vmem:[#allocation13 + $0x20] sm:$0xff]   ;;  %v7383_v0 = vld [vmem:[#allocation17 + $0x50] ss:$8 sps:$4 sm:$0xff]   ;;  %vm1131_vm0 = vcmask 1041409   ;;  %vm1133_vm1 = vcmask 1042434  }
 0x102   : > { %7194 = vmatprep.subr.bf16.mxu1 %v8573_v62  ;;  %1227 = vmatprep.subr.bf16.mxu0 %v7373_v54  ;;  %10822 = vst [vmem:[#allocation161_spill] sm:$0xff] %v8590_v51  ;;  %v7377_v53 = vld [vmem:[#allocation17 + $0x64] ss:$8 sps:$4 sm:$0xff]   ;;  %10823 = vst [vmem:[#allocation162_spill] sm:$0xff] %v8610_v11  ;;  %v10825_v4 = vld [vmem:[#allocation81_spill] sm:$0xff]  ;;  %vm1135_vm2 = vcmask 1043459  }
 0x103   : > { %1228 = vmatpush1.bf16.msra.mxu0 %v7375_v50  ;;  %v7381_v50 = vld [vmem:[#allocation17 + $0x54] ss:$8 sps:$4 sm:$0xff]   ;;  %v10828_v15 = vld [vmem:[#allocation84_spill] sm:$0xff]  ;;  %v10832_v12 = vld [vmem:[#allocation91_spill] sm:$0xff]  ;;  %vm1137_vm3 = vcmask 1044484   ;;  %vm1139_vm4 = vcmask 1045509  }
 0x104   : > { %1229 = vmatprep.subr.bf16.mxu0 %v7377_v53  ;;  %v7389_v31 = vld [vmem:[#allocation17 + $0x34] ss:$8 sps:$4 sm:$0xff]   ;;  %v10838_v29 = vld [vmem:[#allocation96_spill] sm:$0xff]  ;;  %v10841_v28 = vld [vmem:[#allocation99_spill] sm:$0xff]  ;;  %v10904_v53 = vunpack.c.l.bf16 %v8304_v2  ;;  %vm1141_vm5 = vcmask 1046534   ;;  %vm1143_vm6 = vcmask 1047559  }
 0x105   : > { %7202 = vmatpush3.bf16.msra.mxu1 %v8573_v62  ;;  %v7385_v62 = vld [vmem:[#allocation17 + $0x44] ss:$8 sps:$4 sm:$0xff]   ;;  %v10839_v13 = vld [vmem:[#allocation97_spill] sm:$0xff]  ;;  %v10840_v44 = vld [vmem:[#allocation98_spill] sm:$0xff]  ;;  %v10911_v1 = vunpack.c.l.bf16 %v10838_v29 }
 0x106   : > { %7195 = vmatprep.subr.bf16.mxu1 %v8590_v51  ;;  %v7393_v27 = vld [vmem:[#allocation17 + $0x24] ss:$8 sps:$4 sm:$0xff]   ;;  %v7395_v54 = vld [vmem:[#allocation17 + $0x20] ss:$8 sps:$4 sm:$0xff]   ;;  %v10856_v45 = vld [vmem:[#allocation113_spill] sm:$0xff] }
 0x107   : > { %1230 = vmatpush1.bf16.msra.mxu0 %v7379_v56  ;;  %v7387_v56 = vld [vmem:[#allocation17 + $0x40] ss:$8 sps:$4 sm:$0xff]   ;;  %v10857_v42 = vld [vmem:[#allocation114_spill] sm:$0xff]  ;;  %v10873_v41 = vld [vmem:[#allocation129_spill] sm:$0xff] }
 0x108   : > { %1231 = vmatprep.subr.bf16.mxu0 %v7381_v50  ;;  %v8630_v50 = vld [vmem:[#allocation13 + $0x18] sm:$0xff]   ;;  %v10842_v58 = vld [vmem:[#allocation100_spill] sm:$0xff]  ;;  %v10858_v26 = vld [vmem:[#allocation115_spill] sm:$0xff]  ;;  %v872_v43 = vunpack.c.l.bf16 %v10873_v41 }
 0x109   : > { %7203 = vmatpush3.bf16.msra.mxu1 %v8590_v51  ;;  %10824 = vst [vmem:[#allocation163_spill] sm:$0xff] %v8630_v50  ;;  %v10826_v51 = vld [vmem:[#allocation82_spill] sm:$0xff]  ;;  %v10859_v14 = vld [vmem:[#allocation116_spill] sm:$0xff]  ;;  %v10875_v40 = vld [vmem:[#allocation131_spill] sm:$0xff] }
 0x10a   : > { %7196 = vmatprep.subr.bf16.mxu1 %v8610_v11  ;;  %v7397_v9 = vld [vmem:[#allocation17 + $0x14] ss:$8 sps:$4 sm:$0xff]   ;;  %v7399_v55 = vld [vmem:[#allocation17 + $0x10] ss:$8 sps:$4 sm:$0xff]   ;;  %v874_v8 = vunpack.c.l.bf16 %v10875_v40  ;;  %v7400_v48 = vld [vmem:[#allocation17 + $0x4] ss:$8 sps:$4 sm:$0xff]  }
 0x10b   : > { %1232 = vmatpush1.bf16.msra.mxu0 %v7383_v0  ;;  %v7391_v0 = vld [vmem:[#allocation17 + $0x30] ss:$8 sps:$4 sm:$0xff]   ;;  %v10876_v46 = vld [vmem:[#allocation132_spill] sm:$0xff]  ;;  %v10891_v39 = vld [vmem:[#allocation147_spill] sm:$0xff] }
 0x10c   : > { %1233 = vmatprep.subr.bf16.mxu0 %v7385_v62  ;;  %v8650_v62 = vld [vmem:[#allocation13 + $0x10] sm:$0xff]   ;;  %v10874_v47 = vld [vmem:[#allocation130_spill] sm:$0xff]  ;;  %v890_v40 = vunpack.c.l.bf16 %v10891_v39 }
 0x10d   : > { %7204 = vmatpush3.bf16.msra.mxu1 %v8610_v11  ;;  %10833 = vst [vmem:[#allocation164_spill] sm:$0xff] %v8650_v62  ;;  %v873_v25 = vunpack.c.l.bf16 %v10874_v47  ;;  %v10888_v10 = vld [vmem:[#allocation144_spill] sm:$0xff]  ;;  %v10890_v57 = vld [vmem:[#allocation146_spill] sm:$0xff]  ;;  %v10893_v63 = vld [vmem:[#allocation149_spill] sm:$0xff] }
 0x10e   : > { %7197 = vmatprep.subr.bf16.mxu1 %v8630_v50  ;;  %v889_v47 = vunpack.c.l.bf16 %v10890_v57  ;;  %v10892_v23 = vld [vmem:[#allocation148_spill] sm:$0xff]  ;;  %v10894_v11 = vld [vmem:[#allocation150_spill] sm:$0xff]  ;;  %v10899_v57 = vld [vmem:[#allocation155_spill] sm:$0xff] }
 0x10f   : > { %1234 = vmatpush1.bf16.msra.mxu0 %v7387_v56  ;;  %v10855_v56 = vld [vmem:[#allocation112_spill] sm:$0xff]  ;;  %v891_v7 = vunpack.c.l.bf16 %v10892_v23  ;;  %v10901_v38 = vld [vmem:[#allocation157_spill] sm:$0xff]  ;;  %v10909_v23 = vunpack.c.l.bf16 %v8398_v49  ;;  %v11005_v19 = vld [vmem:[#allocation42_spill] sm:$0xff] }
 0x110   : > { %1235 = vmatprep.subr.bf16.mxu0 %v7389_v31  ;;  %v8670_v31 = vld [vmem:[#allocation13 + $0x8] sm:$0xff]   ;;  %v10916_v49 = vunpack.c.l.bf16 %v10855_v56  ;;  %v10924_v56 = vunpack.c.l.bf16 %v10857_v42 }
 0x111   : > { %7205 = vmatpush3.bf16.msra.mxu1 %v8630_v50  ;;  %10850 = vst [vmem:[#allocation165_spill] sm:$0xff] %v8670_v31  ;;  %v10900_v39 = vld [vmem:[#allocation156_spill] sm:$0xff]  ;;  %v903_v50 = vadd.f32 %v10904_v53, %v10903_v60  ;;  %v10912_v60 = vunpack.c.l.bf16 %v10839_v13 }
 0x112   : > { %7198 = vmatprep.subr.bf16.mxu1 %v8650_v62 }
 0x113   : > { %1236 = vmatpush1.bf16.msra.mxu0 %v7391_v0  ;;  %v10872_v0 = vld [vmem:[#allocation128_spill] sm:$0xff]  ;;  %v987_v53 = vadd.f32 %v10912_v60, %v10911_v1  ;;  %v10919_v60 = vunpack.c.l.bf16 %v8370_v35 }
 0x114   : > { %1237 = vmatprep.subr.bf16.mxu0 %v7393_v27  ;;  %v8690_v27 = vld [vmem:[#allocation13] sm:$0xff]   ;;  %v871_v16 = vunpack.c.l.bf16 %v10872_v0  ;;  %v887_v0 = vunpack.c.l.bf16 %v10888_v10  ;;  %v10897_v10 = vld [vmem:[#allocation153_spill] sm:$0xff] }
 0x115   : > { %7206 = vmatpush3.bf16.msra.mxu1 %v8650_v62  ;;  %10867 = vst [vmem:[#allocation166_spill] sm:$0xff] %v8690_v27  ;;  %v10905_v62 = vunpack.c.l.bf16 %v8334_v17 }
 0x116   : > { %7199 = vmatprep.subr.bf16.mxu1 %v8670_v31 }
 0x117   : > { %1238 = vmatpush1.bf16.msra.mxu0 %v7395_v54  ;;  %v10889_v54 = vld [vmem:[#allocation145_spill] sm:$0xff] }
 0x118   : > { %1239 = vmatprep.subr.bf16.mxu0 %v7397_v9  ;;  %v888_v41 = vunpack.c.l.bf16 %v10889_v54  ;;  %v892_v9 = vunpack.c.l.bf16 %v10893_v63  ;;  %v10898_v54 = vld [vmem:[#allocation154_spill] sm:$0xff]  ;;  %v10910_v63 = vunpack.c.l.bf16 %v10825_v4  ;;  %v1029_v4 = vadd.f32 %v872_v43, %v871_v16 }
 0x119   : > { %7207 = vmatpush3.bf16.msra.mxu1 %v8670_v31  ;;  %v7402_v31 = vld [vmem:[#allocation17] ss:$8 sps:$4 sm:$0xff]   ;;  %v10925_v43 = vunpack.c.l.bf16 %v8340_v20 }
 0x11a   : > { %7200 = vmatprep.subr.bf16.mxu1 %v8690_v27  ;;  %v966_v22 = vadd.f32 %v10910_v63, %v10909_v23  ;;  %v10917_v23 = vunpack.c.l.bf16 %v10856_v45  ;;  %v1050_v16 = vadd.f32 %v888_v41, %v887_v0  ;;  %v10931_v41 = vunpack.c.l.bf16 %v8342_v21  ;;  %v11001_v21 = vld [vmem:[#allocation89_spill] sm:$0xff]  ;;  %v11019_v20 = vld [vmem:[#allocation43_spill] sm:$0xff] }
 0x11b   : > { %1240 = vmatpush1.bf16.msra.mxu0 %v7399_v55  ;;  %v10896_v55 = vld [vmem:[#allocation152_spill] sm:$0xff] }
 0x11c   : > { %1241 = vmatprep.subr.bf16.mxu0 %v7400_v48  ;;  %v945_v48 = vadd.f32 %v10908_v30, %v10907_v61  ;;  %v10915_v30 = vunpack.c.l.bf16 %v8306_v3  ;;  %v1008_v63 = vadd.f32 %v10917_v23, %v10916_v49  ;;  %v10922_v3 = vld [vmem:[#allocation37_spill] sm:$0xff]  ;;  %v1030_v49 = vadd.f32 %v1029_v4, %v873_v25 }
 0x11d   : > { %7208 = vmatpush3.bf16.msra.mxu1 %v8690_v27  ;;  %v924_v27 = vadd.f32 %v10906_v24, %v10905_v62  ;;  %v10914_v24 = vld [vmem:[#allocation159_spill] sm:$0xff]  ;;  %v10921_v62 = vunpack.c.l.bf16 %v10840_v44  ;;  %v10927_v23 = vunpack.c.l.bf16 %v10827_v32  ;;  %v1051_v25 = vadd.f32 %v1050_v16, %v889_v47  ;;  %v10938_v16 = vld [vmem:[#allocation53_spill] sm:$0xff] }
 0x11e   : > { %v904_v61 = vadd.f32 %v903_v50, %v10915_v30  ;;  %v946_v34 = vadd.f32 %v945_v48, %v10919_v60  ;;  %v10923_v50 = vunpack.c.l.bf16 %v10922_v3  ;;  %v1009_v45 = vadd.f32 %v1008_v63, %v10924_v56 }
 0x11f   : > { %1242 = vmatpush1.bf16.msra.mxu0 %v7402_v31  ;;  %v10913_v31 = vcombine.low %v8418_v59, %v10832_v12  ;;  %v925_v1 = vadd.f32 %v924_v27, %v10918_v33  ;;  %v988_v18 = vadd.f32 %v987_v53, %v10921_v62  ;;  %v10926_v27 = vunpack.c.l.bf16 %v8372_v36 }
 0x120   : > { %6889 = vmatprep.subr.bf16.mxu0 %v8567_v52  ;;  %v905_v30 = vadd.f32 %v904_v61, %v10923_v50  ;;  %v10928_v60 = vunpack.c.l.bf16 %v10841_v28  ;;  %v10929_v62 = vunpack.c.l.bf16 %v8310_v5  ;;  %v1031_v4 = vadd.f32 %v1030_v49, %v874_v8 }
 0x121   : > { %6962 = vmatmul.mubr.bf16.vlgmr.msra.gmra.mxu1 %v10913_v31  ;;  %v10920_v31 = vunpack.c.l.bf16 %v10826_v51  ;;  %v926_v33 = vadd.f32 %v925_v1, %v10925_v43  ;;  %v947_v48 = vadd.f32 %v946_v34, %v10926_v27  ;;  %v10932_v63 = vunpack.c.l.bf16 %v8374_v37 }
 0x122   : > { %v989_v53 = vadd.f32 %v988_v18, %v10928_v60  ;;  %v906_v61 = vadd.f32 %v905_v30, %v10929_v62  ;;  %v10933_v1 = vunpack.c.l.bf16 %v10828_v15  ;;  %v10934_v50 = vunpack.c.l.bf16 %v10842_v58 }
 0x123   : > { %v967_v17 = vadd.f32 %v966_v22, %v10920_v31  ;;  %v10930_v31 = vunpack.c.l.bf16 %v10858_v26  ;;  %v927_v0 = vadd.f32 %v926_v33, %v10931_v41  ;;  %v948_v34 = vadd.f32 %v947_v48, %v10932_v63  ;;  %v10940_v48 = vld [vmem:[#allocation69_spill] sm:$0xff] }
 0x124   : > { %v990_v18 = vadd.f32 %v989_v53, %v10934_v50  ;;  %v10935_v43 = vunpack.c.l.bf16 %v8312_v6  ;;  %v10936_v27 = vunpack.c.l.bf16 %v10859_v14  ;;  %v10937_v8 = vunpack.c.l.bf16 %v10876_v46  ;;  %v10944_v53 = vld [vmem:[#allocation101_spill] sm:$0xff] }
 0x125   : > { %v968_v22 = vadd.f32 %v967_v17, %v10927_v23  ;;  %v1010_v56 = vadd.f32 %v1009_v45, %v10930_v31  ;;  %v1052_v49 = vadd.f32 %v1051_v25, %v890_v40  ;;  %v10939_v33 = vunpack.c.l.bf16 %v10938_v16  ;;  %v11003_v16 = vld [vmem:[#allocation105_spill] sm:$0xff] }
 0x126   : > { %v907_v30 = vadd.f32 %v906_v61, %v10935_v43  ;;  %v1032_v47 = vadd.f32 %v1031_v4, %v10937_v8  ;;  %v10941_v60 = vunpack.c.l.bf16 %v10940_v48  ;;  %v10945_v63 = vunpack.c.l.bf16 %v10944_v53  ;;  %v10946_v61 = vld [vmem:[#allocation38_spill] sm:$0xff]  ;;  %v10950_v4 = vld [vmem:[#allocation133_spill] sm:$0xff] }
 0x127   : > { %v969_v17 = vadd.f32 %v968_v22, %v10933_v1  ;;  %v1011_v45 = vadd.f32 %v1010_v56, %v10936_v27  ;;  %v928_v23 = vadd.f32 %v927_v0, %v10939_v33  ;;  %v10942_v22 = vld [vmem:[#allocation85_spill] sm:$0xff]  ;;  %v10947_v50 = vunpack.c.l.bf16 %v10946_v61  ;;  %v10952_v0 = vld [vmem:[#allocation54_spill] sm:$0xff] }
 0x128   : > { %v949_v62 = vadd.f32 %v948_v34, %v10941_v60  ;;  %v10943_v31 = vunpack.c.l.bf16 %v10942_v22  ;;  %v991_v1 = vadd.f32 %v990_v18, %v10945_v63  ;;  %v10948_v56 = vld [vmem:[#allocation117_spill] sm:$0xff]  ;;  %v10951_v40 = vunpack.c.l.bf16 %v10950_v4  ;;  %v10954_v34 = vld [vmem:[#allocation70_spill] sm:$0xff] }
 0x129   : > { %v908_v43 = vadd.f32 %v907_v30, %v10947_v50  ;;  %v10949_v27 = vunpack.c.l.bf16 %v10948_v56  ;;  %v1053_v8 = vadd.f32 %v1052_v49, %v891_v7  ;;  %v10953_v33 = vunpack.c.l.bf16 %v10952_v0  ;;  %v10958_v18 = vld [vmem:[#allocation102_spill] sm:$0xff]  ;;  %v10960_v30 = vld [vmem:[#allocation39_spill] sm:$0xff]  ;;  %v10989_v4 = vld [vmem:[#allocation41_spill] sm:$0xff] }
 0x12a   : > { %v970_v41 = vadd.f32 %v969_v17, %v10943_v31  ;;  %v1033_v25 = vadd.f32 %v1032_v47, %v10951_v40  ;;  %v10955_v60 = vunpack.c.l.bf16 %v10954_v34  ;;  %v10956_v17 = vld [vmem:[#allocation86_spill] sm:$0xff]  ;;  %v10959_v63 = vunpack.c.l.bf16 %v10958_v18 }
 0x12b   : > { %v1012_v15 = vadd.f32 %v1011_v45, %v10949_v27  ;;  %v929_v51 = vadd.f32 %v928_v23, %v10953_v33  ;;  %v10957_v31 = vunpack.c.l.bf16 %v10956_v17  ;;  %v10961_v50 = vunpack.c.l.bf16 %v10960_v30  ;;  %v10962_v45 = vld [vmem:[#allocation118_spill] sm:$0xff]  ;;  %v10966_v23 = vld [vmem:[#allocation55_spill] sm:$0xff] }
 0x12c   : > { %v950_v22 = vadd.f32 %v949_v62, %v10955_v60  ;;  %v992_v37 = vadd.f32 %v991_v1, %v10959_v63  ;;  %v10963_v27 = vunpack.c.l.bf16 %v10962_v45  ;;  %v10964_v47 = vld [vmem:[#allocation134_spill] sm:$0xff]  ;;  %v1054_v40 = vadd.f32 %v1053_v8, %v892_v9  ;;  %v10968_v62 = vld [vmem:[#allocation71_spill] sm:$0xff] }
 0x12d   : > { %v971_v32 = vadd.f32 %v970_v41, %v10957_v31  ;;  %v909_v48 = vadd.f32 %v908_v43, %v10961_v50  ;;  %v10965_v7 = vunpack.c.l.bf16 %v10964_v47  ;;  %v10967_v33 = vunpack.c.l.bf16 %v10966_v23  ;;  %v10970_v41 = vld [vmem:[#allocation87_spill] sm:$0xff]  ;;  %v10974_v43 = vld [vmem:[#allocation40_spill] sm:$0xff] }
 0x12e   : > { %v1013_v35 = vadd.f32 %v1012_v15, %v10963_v27  ;;  %v10969_v60 = vunpack.c.l.bf16 %v10968_v62  ;;  %v10971_v31 = vunpack.c.l.bf16 %v10970_v41  ;;  %v10972_v1 = vld [vmem:[#allocation103_spill] sm:$0xff]  ;;  %v10975_v50 = vunpack.c.l.bf16 %v10974_v43  ;;  %v10983_v41 = vld [vmem:[#allocation72_spill] sm:$0xff] }
 0x12f   : > { %v1034_v49 = vadd.f32 %v1033_v25, %v10965_v7  ;;  %v930_v34 = vadd.f32 %v929_v51, %v10967_v33  ;;  %v10973_v63 = vunpack.c.l.bf16 %v10972_v1  ;;  %v10976_v15 = vld [vmem:[#allocation119_spill] sm:$0xff]  ;;  %v10980_v51 = vunpack.c.l.bf16 %v10894_v11  ;;  %v10981_v33 = vld [vmem:[#allocation56_spill] sm:$0xff] }
 0x130   : > { %v951_v17 = vadd.f32 %v950_v22, %v10969_v60  ;;  %v972_v36 = vadd.f32 %v971_v32, %v10971_v31  ;;  %v910_v46 = vadd.f32 %v909_v48, %v10975_v50  ;;  %v10977_v27 = vunpack.c.l.bf16 %v10976_v15  ;;  %v10978_v25 = vld [vmem:[#allocation135_spill] sm:$0xff]  ;;  %v10985_v62 = vld [vmem:[#allocation88_spill] sm:$0xff] }
 0x131   : > { %v993_v0 = vadd.f32 %v992_v37, %v10973_v63  ;;  %v10979_v9 = vunpack.c.l.bf16 %v10978_v25  ;;  %v1055_v7 = vadd.f32 %v1054_v40, %v10980_v51  ;;  %v10982_v22 = vunpack.c.l.bf16 %v10981_v33  ;;  %v10987_v23 = vld [vmem:[#allocation104_spill] sm:$0xff]  ;;  %v10995_v33 = vld [vmem:[#allocation151_spill] sm:$0xff] }
 0x132   : > { %v1014_v47 = vadd.f32 %v1013_v35, %v10977_v27  ;;  %v10984_v32 = vunpack.c.l.bf16 %v10983_v41  ;;  %v10986_v37 = vunpack.c.l.bf16 %v10985_v62  ;;  %v10988_v48 = vunpack.c.l.bf16 %v10987_v23  ;;  %v10991_v25 = vld [vmem:[#allocation120_spill] sm:$0xff]  ;;  %v10997_v41 = vld [vmem:[#allocation57_spill] sm:$0xff] }
 0x133   : > { %v1035_v8 = vadd.f32 %v1034_v49, %v10979_v9  ;;  %v931_v60 = vadd.f32 %v930_v34, %v10982_v22  ;;  %v10990_v35 = vunpack.c.l.bf16 %v10989_v4  ;;  %v10992_v49 = vunpack.c.l.bf16 %v10991_v25  ;;  %v10993_v11 = vld [vmem:[#allocation136_spill] sm:$0xff]  ;;  %v10999_v62 = vld [vmem:[#allocation73_spill] sm:$0xff]  ;;  %v11089_v25 = vld [vmem:[#allocation95_spill] sm:$0xff] }
 0x134   : > { %v952_v31 = vadd.f32 %v951_v17, %v10984_v32  ;;  %v973_v63 = vadd.f32 %v972_v36, %v10986_v37  ;;  %v994_v50 = vadd.f32 %v993_v0, %v10988_v48  ;;  %v10994_v40 = vunpack.c.l.bf16 %v10993_v11  ;;  %v11007_v11 = vld [vmem:[#allocation121_spill] sm:$0xff] }
 0x135   : > { %v911_v27 = vadd.f32 %v910_v46, %v10990_v35  ;;  %v1015_v9 = vadd.f32 %v1014_v47, %v10992_v49  ;;  %v10996_v34 = vunpack.c.l.bf16 %v10995_v33  ;;  %v10998_v17 = vunpack.c.l.bf16 %v10997_v41  ;;  %v11009_v33 = vld [vmem:[#allocation137_spill] sm:$0xff]  ;;  %v11017_v41 = vld [vmem:[#allocation106_spill] sm:$0xff] }
 0x136   : > { %v1036_v51 = vadd.f32 %v1035_v8, %v10994_v40  ;;  %v11000_v36 = vunpack.c.l.bf16 %v10999_v62  ;;  %v11002_v0 = vunpack.c.l.bf16 %v11001_v21  ;;  %v11004_v46 = vunpack.c.l.bf16 %v11003_v16  ;;  %v11012_v62 = vld [vmem:[#allocation58_spill] sm:$0xff] }
 0x137   : > { %v1056_v22 = vadd.f32 %v1055_v7, %v10996_v34  ;;  %v932_v32 = vadd.f32 %v931_v60, %v10998_v17  ;;  %v11006_v47 = vunpack.c.l.bf16 %v11005_v19  ;;  %v11008_v8 = vunpack.c.l.bf16 %v11007_v11  ;;  %v11014_v21 = vld [vmem:[#allocation74_spill] sm:$0xff]  ;;  %v11059_v19 = vld [vmem:[#allocation93_spill] sm:$0xff] }
 0x138   : > { %v953_v37 = vadd.f32 %v952_v31, %v11000_v36  ;;  %v974_v48 = vadd.f32 %v973_v63, %v11002_v0  ;;  %v995_v35 = vadd.f32 %v994_v50, %v11004_v46  ;;  %v11010_v7 = vunpack.c.l.bf16 %v11009_v33  ;;  %v11021_v33 = vld [vmem:[#allocation122_spill] sm:$0xff] }
 0x139   : > { %v912_v49 = vadd.f32 %v911_v27, %v11006_v47  ;;  %v1016_v40 = vadd.f32 %v1015_v9, %v11008_v8  ;;  %v11011_v60 = vunpack.c.l.bf16 %v10896_v55  ;;  %v11013_v31 = vunpack.c.l.bf16 %v11012_v62  ;;  %v11023_v55 = vld [vmem:[#allocation138_spill] sm:$0xff]  ;;  %v11031_v62 = vld [vmem:[#allocation107_spill] sm:$0xff] }
 0x13a   : > { %v1037_v34 = vadd.f32 %v1036_v51, %v11010_v7  ;;  %v11015_v63 = vunpack.c.l.bf16 %v11014_v21  ;;  %v11016_v50 = vunpack.c.l.bf16 %v8418_v59  ;;  %v11018_v27 = vunpack.c.l.bf16 %v11017_v41  ;;  %v11026_v21 = vld [vmem:[#allocation59_spill] sm:$0xff] }
 0x13b   : > { %v1057_v17 = vadd.f32 %v1056_v22, %v11011_v60  ;;  %v933_v36 = vadd.f32 %v932_v32, %v11013_v31  ;;  %v11020_v9 = vunpack.c.l.bf16 %v11019_v20  ;;  %v11022_v51 = vunpack.c.l.bf16 %v11021_v33  ;;  %v11028_v59 = vld [vmem:[#allocation75_spill] sm:$0xff]  ;;  %v11033_v33 = vld [vmem:[#allocation44_spill] sm:$0xff]  ;;  %v11074_v20 = vld [vmem:[#allocation94_spill] sm:$0xff] }
 0x13c   : > { %v954_v0 = vadd.f32 %v953_v37, %v11015_v63  ;;  %v975_v46 = vadd.f32 %v974_v48, %v11016_v50  ;;  %v996_v47 = vadd.f32 %v995_v35, %v11018_v27  ;;  %v11024_v22 = vunpack.c.l.bf16 %v11023_v55  ;;  %v11035_v55 = vld [vmem:[#allocation123_spill] sm:$0xff] }
 0x13d   : > { %v913_v8 = vadd.f32 %v912_v49, %v11020_v9  ;;  %v1017_v7 = vadd.f32 %v1016_v40, %v11022_v51  ;;  %v11025_v32 = vunpack.c.l.bf16 %v10897_v10  ;;  %v11027_v37 = vunpack.c.l.bf16 %v11026_v21  ;;  %v11037_v10 = vld [vmem:[#allocation139_spill] sm:$0xff]  ;;  %v11044_v21 = vld [vmem:[#allocation92_spill] sm:$0xff] }
 0x13e   : > { %v1038_v60 = vadd.f32 %v1037_v34, %v11024_v22  ;;  %v11029_v48 = vunpack.c.l.bf16 %v11028_v59  ;;  %v11030_v35 = vunpack.c.l.bf16 %v10832_v12  ;;  %v11032_v49 = vunpack.c.l.bf16 %v11031_v62  ;;  %v11040_v59 = vld [vmem:[#allocation60_spill] sm:$0xff] }
 0x13f   : > { %v1058_v31 = vadd.f32 %v1057_v17, %v11025_v32  ;;  %v934_v63 = vadd.f32 %v933_v36, %v11027_v37  ;;  %v11034_v40 = vunpack.c.l.bf16 %v11033_v33  ;;  %v11036_v34 = vunpack.c.l.bf16 %v11035_v55  ;;  %v11042_v12 = vld [vmem:[#allocation76_spill] sm:$0xff]  ;;  %v11048_v55 = vld [vmem:[#allocation45_spill] sm:$0xff] }
 0x140   : > { %v955_v50 = vadd.f32 %v954_v0, %v11029_v48  ;;  %v976_v27 = vadd.f32 %v975_v46, %v11030_v35  ;;  %v997_v9 = vadd.f32 %v996_v47, %v11032_v49  ;;  %v11038_v17 = vunpack.c.l.bf16 %v11037_v10  ;;  %v11046_v33 = vld [vmem:[#allocation108_spill] sm:$0xff] }
 0x141   : > { %v914_v51 = vadd.f32 %v913_v8, %v11034_v40  ;;  %v1018_v22 = vadd.f32 %v1017_v7, %v11036_v34  ;;  %v11039_v36 = vunpack.c.l.bf16 %v10898_v54  ;;  %v11041_v0 = vunpack.c.l.bf16 %v11040_v59  ;;  %v11050_v10 = vld [vmem:[#allocation124_spill] sm:$0xff]  ;;  %v11057_v59 = vld [vmem:[#allocation77_spill] sm:$0xff] }
 0x142   : > { %v1039_v32 = vadd.f32 %v1038_v60, %v11038_v17  ;;  %v11043_v46 = vunpack.c.l.bf16 %v11042_v12  ;;  %v11045_v47 = vunpack.c.l.bf16 %v11044_v21  ;;  %v11047_v8 = vunpack.c.l.bf16 %v11046_v33  ;;  %v11052_v54 = vld [vmem:[#allocation140_spill] sm:$0xff]  ;;  %v11055_v12 = vld [vmem:[#allocation61_spill] sm:$0xff] }
 0x143   : > { %v1059_v37 = vadd.f32 %v1058_v31, %v11039_v36  ;;  %v935_v48 = vadd.f32 %v934_v63, %v11041_v0  ;;  %v11049_v7 = vunpack.c.l.bf16 %v11048_v55  ;;  %v11051_v60 = vunpack.c.l.bf16 %v11050_v10  ;;  %v11061_v55 = vld [vmem:[#allocation109_spill] sm:$0xff]  ;;  %v11063_v10 = vld [vmem:[#allocation46_spill] sm:$0xff] }
 0x144   : > { %v956_v35 = vadd.f32 %v955_v50, %v11043_v46  ;;  %v977_v49 = vadd.f32 %v976_v27, %v11045_v47  ;;  %v998_v40 = vadd.f32 %v997_v9, %v11047_v8  ;;  %v11053_v31 = vunpack.c.l.bf16 %v11052_v54  ;;  %v11065_v54 = vld [vmem:[#allocation125_spill] sm:$0xff] }
 0x145   : > { %v915_v34 = vadd.f32 %v914_v51, %v11049_v7  ;;  %v1019_v17 = vadd.f32 %v1018_v22, %v11051_v60  ;;  %v11054_v63 = vunpack.c.l.bf16 %v10899_v57  ;;  %v11056_v50 = vunpack.c.l.bf16 %v11055_v12  ;;  %v11067_v57 = vld [vmem:[#allocation141_spill] sm:$0xff]  ;;  %v11072_v12 = vld [vmem:[#allocation78_spill] sm:$0xff] }
 0x146   : > { %v1040_v36 = vadd.f32 %v1039_v32, %v11053_v31  ;;  %v11058_v27 = vunpack.c.l.bf16 %v11057_v59  ;;  %v11060_v9 = vunpack.c.l.bf16 %v11059_v19  ;;  %v11062_v51 = vunpack.c.l.bf16 %v11061_v55  ;;  %v11070_v59 = vld [vmem:[#allocation62_spill] sm:$0xff] }
 0x147   : > { %v1060_v0 = vadd.f32 %v1059_v37, %v11054_v63  ;;  %v936_v46 = vadd.f32 %v935_v48, %v11056_v50  ;;  %v11064_v22 = vunpack.c.l.bf16 %v11063_v10  ;;  %v11066_v32 = vunpack.c.l.bf16 %v11065_v54  ;;  %v11076_v10 = vld [vmem:[#allocation110_spill] sm:$0xff]  ;;  %v11078_v54 = vld [vmem:[#allocation47_spill] sm:$0xff] }
 0x148   : > { %v957_v47 = vadd.f32 %v956_v35, %v11058_v27  ;;  %v978_v8 = vadd.f32 %v977_v49, %v11060_v9  ;;  %v999_v7 = vadd.f32 %v998_v40, %v11062_v51  ;;  %v11068_v37 = vunpack.c.l.bf16 %v11067_v57  ;;  %v11080_v57 = vld [vmem:[#allocation126_spill] sm:$0xff] }
 0x149   : > { %v916_v60 = vadd.f32 %v915_v34, %v11064_v22  ;;  %v1020_v31 = vadd.f32 %v1019_v17, %v11066_v32  ;;  %v11069_v48 = vunpack.c.l.bf16 %v10900_v39  ;;  %v11071_v35 = vunpack.c.l.bf16 %v11070_v59  ;;  %v11082_v39 = vld [vmem:[#allocation142_spill] sm:$0xff]  ;;  %v11087_v59 = vld [vmem:[#allocation79_spill] sm:$0xff] }
 0x14a   : > { %v1041_v63 = vadd.f32 %v1040_v36, %v11068_v37  ;;  %v11073_v49 = vunpack.c.l.bf16 %v11072_v12  ;;  %v11075_v40 = vunpack.c.l.bf16 %v11074_v20  ;;  %v11077_v34 = vunpack.c.l.bf16 %v11076_v10  ;;  %v11085_v12 = vld [vmem:[#allocation63_spill] sm:$0xff] }
 0x14b   : > { %v1061_v50 = vadd.f32 %v1060_v0, %v11069_v48  ;;  %v937_v27 = vadd.f32 %v936_v46, %v11071_v35  ;;  %v11079_v17 = vunpack.c.l.bf16 %v11078_v54  ;;  %v11081_v36 = vunpack.c.l.bf16 %v11080_v57  ;;  %v11091_v54 = vld [vmem:[#allocation111_spill] sm:$0xff] }
 0x14c   : > { %v958_v9 = vadd.f32 %v957_v47, %v11073_v49  ;;  %v979_v51 = vadd.f32 %v978_v8, %v11075_v40  ;;  %v1000_v22 = vadd.f32 %v999_v7, %v11077_v34  ;;  %v11083_v0 = vunpack.c.l.bf16 %v11082_v39 }
 0x14d   : > { %v917_v32 = vadd.f32 %v916_v60, %v11079_v17  ;;  %v1021_v37 = vadd.f32 %v1020_v31, %v11081_v36  ;;  %v11084_v46 = vunpack.c.l.bf16 %v10901_v38  ;;  %v11086_v47 = vunpack.c.l.bf16 %v11085_v12  ;;  %v11093_v31 = vld [vmem:[#allocation127_spill] sm:$0xff] }
 0x14e   : > { %v1042_v48 = vadd.f32 %v1041_v63, %v11083_v0  ;;  %v11088_v8 = vunpack.c.l.bf16 %v11087_v59  ;;  %v11090_v7 = vunpack.c.l.bf16 %v11089_v25  ;;  %v11092_v60 = vunpack.c.l.bf16 %v11091_v54  ;;  %v11095_v63 = vld [vmem:[#allocation143_spill] sm:$0xff] }
 0x14f   : > { %v1062_v35 = vadd.f32 %v1061_v50, %v11084_v46  ;;  %v938_v49 = vadd.f32 %v937_v27, %v11086_v47  ;;  %v918_v57 = vrot.slane %v917_v32, 4  ;;  %v11094_v36 = vunpack.c.l.bf16 %v11093_v31  ;;  %v11097_v50 = vld [vmem:[#allocation158_spill] sm:$0xff] }
 0x150   : > { %v959_v40 = vadd.f32 %v958_v9, %v11088_v8  ;;  %v980_v34 = vadd.f32 %v979_v51, %v11090_v7  ;;  %v1001_v17 = vadd.f32 %v1000_v22, %v11092_v60  ;;  %v11096_v0 = vunpack.c.l.bf16 %v11095_v63 }
 0x151   : > { %v1022_v39 = vadd.f32 %v1021_v37, %v11094_v36  ;;  %v11098_v46 = vunpack.c.l.bf16 %v11097_v50  ;;  %v939_v27 = vrot.slane %v938_v49, 4  ;;  %v919_v8 = vadd.f32 %v918_v57, %v917_v32 }
 0x152   : > { %v1043_v38 = vadd.f32 %v1042_v48, %v11096_v0  ;;  %v960_v47 = vrot.slane %v959_v40, 4  ;;  %v981_v59 = vrot.slane %v980_v34, 4  ;;  %v1002_v9 = vrot.slane %v1001_v17, 4 }
 0x153   : > { %v1063_v12 = vadd.f32 %v1062_v35, %v11098_v46  ;;  %v1023_v11 = vrot.slane %v1022_v39, 4  ;;  %v11099_v7 = vunpack.c.l.bf16 %v10914_v24  ;;  %v940_v60 = vadd.f32 %v939_v27, %v938_v49 }
 0x154   : > { %v1044_v51 = vrot.slane %v1043_v38, 4  ;;  %v961_v45 = vadd.f32 %v960_v47, %v959_v40  ;;  %v982_v31 = vadd.f32 %v981_v59, %v980_v34  ;;  %v1003_v37 = vadd.f32 %v1002_v9, %v1001_v17 }
 0x155   : > { %v1064_v22 = vadd.f32 %v1063_v12, %v11099_v7  ;;  %v920_v36 = vrot.slane %v919_v8, 2  ;;  %v1024_v63 = vadd.f32 %v1023_v11, %v1022_v39  ;;  %v941_v50 = vrot.slane %v940_v60, 2 }
 0x156   : > { %v1045_v48 = vadd.f32 %v1044_v51, %v1043_v38  ;;  %v962_v35 = vrot.slane %v961_v45, 2  ;;  %v983_v46 = vrot.slane %v982_v31, 2  ;;  %v1004_v15 = vrot.slane %v1003_v37, 2 }
 0x157   : > { %v1065_v0 = vrot.slane %v1064_v22, 4  ;;  %v921_v43 = vadd.f32 %v920_v36, %v919_v8  ;;  %v1025_v4 = vrot.slane %v1024_v63, 2  ;;  %v942_v61 = vadd.f32 %v941_v50, %v940_v60 }
 0x158   : > { %v1046_v57 = vrot.slane %v1045_v48, 2  ;;  %v963_v30 = vadd.f32 %v962_v35, %v961_v45  ;;  %v984_v24 = vadd.f32 %v983_v46, %v982_v31  ;;  %v1005_v12 = vadd.f32 %v1004_v15, %v1003_v37 }
 0x159   : > { %v1066_v32 = vadd.f32 %v1065_v0, %v1064_v22  ;;  %v922_v49 = vrot.slane %v921_v43, 1  ;;  %v1026_v40 = vadd.f32 %v1025_v4, %v1024_v63  ;;  %v943_v11 = vrot.slane %v942_v61, 1 }
 0x15a   : > { %v1047_v59 = vadd.f32 %v1046_v57, %v1045_v48  ;;  %v964_v38 = vrot.slane %v963_v30, 1  ;;  %v985_v39 = vrot.slane %v984_v24, 1  ;;  %v1006_v17 = vrot.slane %v1005_v12, 1 }
 0x15b   : > { %v1067_v34 = vrot.slane %v1066_v32, 2  ;;  %v923_v27 = vadd.f32 %v922_v49, %v921_v43  ;;  %v1027_v47 = vrot.slane %v1026_v40, 1  ;;  %v944_v51 = vadd.f32 %v943_v11, %v942_v61 }
 0x15c   : > { %v1048_v9 = vrot.slane %v1047_v59, 1  ;;  %v965_v7 = vadd.f32 %v964_v38, %v963_v30  ;;  %v986_v22 = vadd.f32 %v985_v39, %v984_v24  ;;  %v1007_v50 = vadd.f32 %v1006_v17, %v1005_v12 }
 0x15d   : > { %v1068_v8 = vadd.f32 %v1067_v34, %v1066_v32  ;;  %v1028_v45 = vadd.f32 %v1027_v47, %v1026_v40  ;;  %v1071_v60 = vmul.f32 0.0625, %v923_v27  ;;  %v1072_v4 = vmul.f32 0.0625, %v944_v51 }
 0x15e   : > { %v1049_v31 = vadd.f32 %v1048_v9, %v1047_v59  ;;  %v1073_v63 = vmul.f32 0.0625, %v965_v7  ;;  %v1074_v37 = vmul.f32 0.0625, %v986_v22  ;;  %v1075_v36 = vmul.f32 0.0625, %v1007_v50 }
 0x15f   : > { %v1069_v15 = vrot.slane %v1068_v8, 1  ;;  %v1076_v0 = vmul.f32 0.0625, %v1028_v45  ;;  %v1079_v46 = vpack.c.bf16 %v1071_v60, %v1071_v60  ;;  %v1080_v43 = vpack.c.bf16 %v1072_v4, %v1072_v4  ;;  %v11100_v60 = vld [vmem:[#allocation35_spill] sm:$0xff] }
 0x160   : > { %v1077_v35 = vmul.f32 0.0625, %v1049_v31  ;;  %v1081_v57 = vpack.c.bf16 %v1073_v63, %v1073_v63  ;;  %v1082_v49 = vpack.c.bf16 %v1074_v37, %v1074_v37  ;;  %v1083_v32 = vpack.c.bf16 %v1075_v36, %v1075_v36  ;;  %v11111_v36 = vld [vmem:[#allocation39_spill] sm:$0xff] }
 0x161   : > { %v1070_v48 = vadd.f32 %v1069_v15, %v1068_v8  ;;  %v1084_v30 = vpack.c.bf16 %v1076_v0, %v1076_v0  ;;  %v1123_v12 = vunpack.c.l.b16 %v1079_v46  ;;  %v1124_v40 = vunpack.c.l.b16 %v1080_v43  ;;  %v11115_v43 = vld [vmem:[#allocation119_spill] sm:$0xff] }
 0x162   : > { %v1085_v24 = vpack.c.bf16 %v1077_v35, %v1077_v35  ;;  %v1125_v59 = vunpack.c.l.b16 %v1081_v57  ;;  %v1126_v34 = vunpack.c.l.b16 %v1082_v49  ;;  %v1127_v38 = vunpack.c.l.b16 %v1083_v32  ;;  %v11114_v35 = vld [vmem:[#allocation40_spill] sm:$0xff]  ;;  %v11116_v57 = vld [vmem:[#allocation118_spill] sm:$0xff]  ;;  %v11117_v32 = vld [vmem:[#allocation121_spill] sm:$0xff] }
 0x163   : > { %v1078_v61 = vmul.f32 0.0625, %v1070_v48  ;;  %v1128_v39 = vunpack.c.l.b16 %v1084_v30  ;;  %v1132_v27 = vsel %vm1131_vm0, %v1124_v40, %v1123_v12  ;;  %v6514_v51 = vcombine.low %v11044_v21, %v11059_v19  ;;  %v11109_v21 = vld [vmem:[#allocation166_spill] sm:$0xff]  ;;  %v11123_v40 = vld [vmem:[#allocation123_spill] sm:$0xff] }
 0x164   : > { %v1129_v17 = vunpack.c.l.b16 %v1085_v24  ;;  %v1134_v9 = vsel %vm1133_vm1, %v1125_v59, %v1132_v27  ;;  %v6515_v7 = vcombine.low %v11074_v20, %v11089_v25  ;;  %v6516_v22 = vcombine.low %v10838_v29, %v10839_v13  ;;  %v11101_v20 = vld [vmem:[#allocation160_spill] sm:$0xff]  ;;  %v11102_v29 = vld [vmem:[#allocation161_spill] sm:$0xff]  ;;  %v11112_v48 = vld [vmem:[#allocation38_spill] sm:$0xff] }
 0x165   : > { %v1086_v11 = vpack.c.bf16 %v1078_v61, %v1078_v61  ;;  %v1136_v8 = vsel %vm1135_vm2, %v1126_v34, %v1134_v9  ;;  %6965 = vmatprep.mubr.bf16.mxu1 %v6514_v51  ;;  %v6484_v4 = vcombine.low %v11100_v60, %v8304_v2  ;;  %v6517_v19 = vcombine.low %v10840_v44, %v10841_v28  ;;  %v11103_v44 = vld [vmem:[#allocation162_spill] sm:$0xff]  ;;  %v11118_v61 = vld [vmem:[#allocation120_spill] sm:$0xff]  ;;  %v11129_v9 = vld [vmem:[#allocation49_spill] sm:$0xff] }
 0x166   : > { %v1138_v50 = vsel %vm1137_vm3, %v1127_v38, %v1136_v8  ;;  %6966 = vmatmul.mubr.bf16.gmra.mxu1 %v6515_v7  ;;  %v6518_v13 = vcombine.low %v10842_v58, %v10944_v53  ;;  %v6519_v25 = vcombine.low %v10958_v18, %v10972_v1  ;;  %v6520_v28 = vcombine.low %v10987_v23, %v11003_v16  ;;  %v11105_v18 = vld [vmem:[#allocation164_spill] sm:$0xff]  ;;  %v11106_v16 = vld [vmem:[#allocation165_spill] sm:$0xff]  ;;  %v11120_v30 = vld [vmem:[#allocation42_spill] sm:$0xff] }
 0x167   : > { %v1130_v47 = vunpack.c.l.b16 %v1086_v11  ;;  %v1140_v45 = vsel %vm1139_vm4, %v1128_v39, %v1138_v50  ;;  %6969 = vmatprep.mubr.bf16.mxu1 %v6516_v22  ;;  %v6521_v58 = vcombine.low %v11017_v41, %v11031_v62  ;;  %v6522_v53 = vcombine.low %v11046_v33, %v11061_v55  ;;  %v11107_v1 = vld [vmem:[#allocation113_spill] sm:$0xff]  ;;  %v11108_v41 = vld [vmem:[#allocation112_spill] sm:$0xff]  ;;  %v11124_v59 = vld [vmem:[#allocation122_spill] sm:$0xff] }
 0x168   : > { %v1142_v31 = vsel %vm1141_vm5, %v1129_v17, %v1140_v45  ;;  %v6523_v23 = vcombine.low %v11076_v10, %v11091_v54  ;;  %v6524_v62 = vcombine.low %v11108_v41, %v11107_v1  ;;  %v11110_v55 = vld [vmem:[#allocation36_spill] sm:$0xff]  ;;  %v6486_v37 = vcombine.low %v8310_v5, %v8312_v6  ;;  %v11125_v11 = vld [vmem:[#allocation125_spill] sm:$0xff]  ;;  %v11127_v17 = vld [vmem:[#allocation47_spill] sm:$0xff] }
 0x169   : > { %v1144_v15 = vsel %vm1143_vm6, %v1130_v47, %v1142_v31  ;;  %v6485_v33 = vcombine.low %v11110_v55, %v10922_v3  ;;  %v6525_v10 = vcombine.low %v10857_v42, %v10858_v26  ;;  %v6526_v54 = vcombine.low %v10859_v14, %v10948_v56  ;;  %v11113_v3 = vld [vmem:[#allocation41_spill] sm:$0xff]  ;;  %v11119_v42 = vld [vmem:[#allocation43_spill] sm:$0xff]  ;;  %v11122_v56 = vld [vmem:[#allocation44_spill] sm:$0xff] }
 0x16a   : > { %v1145_v63 = vpack.c.b16 %v1144_v15, %v1144_v15  ;;  %v6487_v0 = vcombine.low %v11112_v48, %v11111_v36  ;;  %v6488_v46 = vcombine.low %v11114_v35, %v11113_v3  ;;  %v6527_v49 = vcombine.low %v11116_v57, %v11115_v43  ;;  %v11121_v14 = vld [vmem:[#allocation45_spill] sm:$0xff]  ;;  %v11126_v38 = vld [vmem:[#allocation124_spill] sm:$0xff]  ;;  %v11128_v27 = vld [vmem:[#allocation46_spill] sm:$0xff] }
 0x16b   : > { %v6528_v26 = vcombine.low %v11118_v61, %v11117_v32  ;;  %v6489_v24 = vcombine.low %v11120_v30, %v11119_v42  ;;  %v6490_v12 = vcombine.low %v11122_v56, %v11121_v14  ;;  %v6529_v34 = vcombine.low %v11124_v59, %v11123_v40  ;;  %v11130_v8 = vld [vmem:[#allocation48_spill] sm:$0xff]  ;;  %v11131_v7 = vld [vmem:[#allocation127_spill] sm:$0xff]  ;;  %v11132_v22 = vld [vmem:[#allocation126_spill] sm:$0xff] }
 0x16c   : > { %1260 = vmatmul.mubr.bf16.vlgmr.msra.gmra.mxu0 %v1145_v63  ;;  %v6530_v39 = vcombine.low %v11126_v38, %v11125_v11  ;;  %v6491_v47 = vcombine.low %v11128_v27, %v11127_v17  ;;  %v6492_v51 = vcombine.low %v11130_v8, %v11129_v9  ;;  %v6531_v50 = vcombine.low %v11132_v22, %v11131_v7  ;;  %v11133_v45 = vld [vmem:[#allocation129_spill] sm:$0xff]  ;;  %v11134_v31 = vld [vmem:[#allocation128_spill] sm:$0xff]  ;;  %v11135_v60 = vld [vmem:[#allocation51_spill] sm:$0xff] }
 0x16d   : > { %6890 = vmatpush3.bf16.msra.mxu0 %v8567_v52  ;;  %6905 = vmatprep.mubr.bf16.mxu0 %v6484_v4  ;;  %v11104_v52 = vld [vmem:[#allocation163_spill] sm:$0xff]  ;;  %v6532_v15 = vcombine.low %v11134_v31, %v11133_v45  ;;  %v11136_v4 = vld [vmem:[#allocation50_spill] sm:$0xff]  ;;  %v11146_v1 = vld [vmem:[#allocation56_spill] sm:$0xff] }
 0x16e   : > { %6891 = vmatprep.subr.bf16.mxu0 %v11101_v20  ;;  %6970 = vmatmul.mubr.bf16.gmra.mxu1 %v6517_v19  ;;  %v6493_v63 = vcombine.low %v11136_v4, %v11135_v60  ;;  %v11137_v19 = vld [vmem:[#allocation53_spill] sm:$0xff]  ;;  %v11152_v36 = vld [vmem:[#allocation58_spill] sm:$0xff]  ;;  %v11154_v3 = vld [vmem:[#allocation60_spill] sm:$0xff] }
 0x16f   : > { %6973 = vmatprep.mubr.bf16.mxu1 %v6518_v13  ;;  %v11138_v13 = vld [vmem:[#allocation52_spill] sm:$0xff]  ;;  %v11156_v43 = vld [vmem:[#allocation138_spill] sm:$0xff] }
 0x170   : > { %v11158_v32 = vld [vmem:[#allocation140_spill] sm:$0xff]  ;;  %v11160_v42 = vld [vmem:[#allocation62_spill] sm:$0xff] }
 0x171   : > { %6892 = vmatpush3.bf16.msra.mxu0 %v11101_v20  ;;  %v6494_v20 = vcombine.low %v11138_v13, %v11137_v19  ;;  %v11162_v14 = vld [vmem:[#allocation64_spill] sm:$0xff]  ;;  %v11164_v40 = vld [vmem:[#allocation142_spill] sm:$0xff] }
 0x172   : > { %6893 = vmatprep.subr.bf16.mxu0 %v11102_v29  ;;  %v11166_v11 = vld [vmem:[#allocation144_spill] sm:$0xff]  ;;  %v11168_v17 = vld [vmem:[#allocation66_spill] sm:$0xff] }
 0x173   : > { %v11170_v9 = vld [vmem:[#allocation68_spill] sm:$0xff]  ;;  %v11172_v7 = vld [vmem:[#allocation146_spill] sm:$0xff] }
 0x174   : > { %v11174_v45 = vld [vmem:[#allocation148_spill] sm:$0xff]  ;;  %v11176_v60 = vld [vmem:[#allocation70_spill] sm:$0xff] }
 0x175   : > { %6894 = vmatpush3.bf16.msra.mxu0 %v11102_v29  ;;  %v11139_v29 = vld [vmem:[#allocation131_spill] sm:$0xff]  ;;  %v11178_v19 = vld [vmem:[#allocation72_spill] sm:$0xff] }
 0x176   : > { %6895 = vmatprep.subr.bf16.mxu0 %v11103_v44  ;;  %6974 = vmatmul.mubr.bf16.gmra.mxu1 %v6519_v25  ;;  %v11140_v25 = vld [vmem:[#allocation130_spill] sm:$0xff] }
 0x177   : > { %6977 = vmatprep.mubr.bf16.mxu1 %v6520_v28  ;;  %v6533_v28 = vcombine.low %v11140_v25, %v11139_v29  ;;  %v11180_v29 = vld [vmem:[#allocation150_spill] sm:$0xff] }
 0x179   : > { %6896 = vmatpush3.bf16.msra.mxu0 %v11103_v44  ;;  %v11141_v44 = vld [vmem:[#allocation133_spill] sm:$0xff] }
 0x17a   : > { %6897 = vmatprep.subr.bf16.mxu0 %v11104_v52 }
 0x17d   : > { %6898 = vmatpush3.bf16.msra.mxu0 %v11104_v52  ;;  %v11142_v52 = vld [vmem:[#allocation132_spill] sm:$0xff] }
 0x17e   : > { %6899 = vmatprep.subr.bf16.mxu0 %v11105_v18  ;;  %6978 = vmatmul.mubr.bf16.gmra.mxu1 %v6521_v58  ;;  %v6534_v58 = vcombine.low %v11142_v52, %v11141_v44  ;;  %v11182_v44 = vld [vmem:[#allocation152_spill] sm:$0xff] }
 0x17f   : > { %6981 = vmatprep.mubr.bf16.mxu1 %v6522_v53  ;;  %v11143_v53 = vld [vmem:[#allocation55_spill] sm:$0xff] }
 0x181   : > { %6900 = vmatpush3.bf16.msra.mxu0 %v11105_v18  ;;  %v11144_v18 = vld [vmem:[#allocation54_spill] sm:$0xff] }
 0x182   : > { %6901 = vmatprep.subr.bf16.mxu0 %v11106_v16 }
 0x185   : > { %6902 = vmatpush3.bf16.msra.mxu0 %v11106_v16  ;;  %v6495_v16 = vcombine.low %v11144_v18, %v11143_v53  ;;  %v11184_v53 = vld [vmem:[#allocation74_spill] sm:$0xff] }
 0x186   : > { %6903 = vmatprep.subr.bf16.mxu0 %v11109_v21  ;;  %6982 = vmatmul.mubr.bf16.gmra.mxu1 %v6523_v23  ;;  %v11145_v23 = vld [vmem:[#allocation57_spill] sm:$0xff] }
 0x187   : > { %6985 = vmatprep.mubr.bf16.mxu1 %v6524_v62  ;;  %v6496_v41 = vcombine.low %v11146_v1, %v11145_v23  ;;  %v11147_v62 = vld [vmem:[#allocation135_spill] sm:$0xff]  ;;  %v11186_v23 = vld [vmem:[#allocation76_spill] sm:$0xff] }
 0x189   : > { %6904 = vmatpush3.bf16.msra.mxu0 %v11109_v21  ;;  %v11148_v21 = vld [vmem:[#allocation134_spill] sm:$0xff] }
 0x18a   : > { %v6535_v55 = vcombine.low %v11148_v21, %v11147_v62  ;;  %v11188_v62 = vld [vmem:[#allocation154_spill] sm:$0xff] }
 0x18c   : > { %6906 = vmatmul.mubr.bf16.vlgmr.msra.gmra.mxu0 %v6485_v33  ;;  %v11149_v33 = vld [vmem:[#allocation137_spill] sm:$0xff] }
 0x18d   : > { %6909 = vmatprep.mubr.bf16.mxu0 %v6486_v37  ;;  %v11150_v37 = vld [vmem:[#allocation136_spill] sm:$0xff] }
 0x18e   : > { %6986 = vmatmul.mubr.bf16.gmra.mxu1 %v6525_v10  ;;  %v6536_v10 = vcombine.low %v11150_v37, %v11149_v33  ;;  %v11190_v33 = vld [vmem:[#allocation156_spill] sm:$0xff] }
 0x18f   : > { %6989 = vmatprep.mubr.bf16.mxu1 %v6526_v54  ;;  %v11151_v54 = vld [vmem:[#allocation59_spill] sm:$0xff] }
 0x190   : > { %v6497_v48 = vcombine.low %v11152_v36, %v11151_v54  ;;  %v11192_v54 = vld [vmem:[#allocation78_spill] sm:$0xff] }
 0x194   : > { %6910 = vmatmul.mubr.bf16.gmra.mxu0 %v6487_v0  ;;  %v11153_v0 = vld [vmem:[#allocation61_spill] sm:$0xff] }
 0x195   : > { %6913 = vmatprep.mubr.bf16.mxu0 %v6488_v46  ;;  %v6498_v35 = vcombine.low %v11154_v3, %v11153_v0  ;;  %v11155_v46 = vld [vmem:[#allocation139_spill] sm:$0xff]  ;;  %v11194_v0 = vld [vmem:[#allocation80_spill] sm:$0xff] }
 0x196   : > { %6990 = vmatmul.mubr.bf16.gmra.mxu1 %v6527_v49  ;;  %v6537_v57 = vcombine.low %v11156_v43, %v11155_v46  ;;  %v11157_v49 = vld [vmem:[#allocation141_spill] sm:$0xff]  ;;  %v11196_v46 = vld [vmem:[#allocation158_spill] sm:$0xff] }
 0x197   : > { %6993 = vmatprep.mubr.bf16.mxu1 %v6528_v26  ;;  %v6538_v61 = vcombine.low %v11158_v32, %v11157_v49  ;;  %v11159_v26 = vld [vmem:[#allocation63_spill] sm:$0xff]  ;;  %v11198_v49 = vld [vmem:[#allocation82_spill] sm:$0xff] }
 0x198   : > { %v6499_v30 = vcombine.low %v11160_v42, %v11159_v26  ;;  %v11200_v26 = vld [vmem:[#allocation84_spill] sm:$0xff] }
 0x19c   : > { %6914 = vmatmul.mubr.bf16.gmra.mxu0 %v6489_v24  ;;  %v11161_v24 = vld [vmem:[#allocation65_spill] sm:$0xff] }
 0x19d   : > { %6917 = vmatprep.mubr.bf16.mxu0 %v6490_v12  ;;  %v6500_v56 = vcombine.low %v11162_v14, %v11161_v24  ;;  %v11163_v12 = vld [vmem:[#allocation143_spill] sm:$0xff]  ;;  %v11202_v24 = vld [vmem:[#allocation86_spill] sm:$0xff] }
 0x19e   : > { %6994 = vmatmul.mubr.bf16.gmra.mxu1 %v6529_v34  ;;  %v6539_v59 = vcombine.low %v11164_v40, %v11163_v12  ;;  %v11165_v34 = vld [vmem:[#allocation145_spill] sm:$0xff] }
 0x19f   : > { %6997 = vmatprep.mubr.bf16.mxu1 %v6530_v39  ;;  %v6540_v38 = vcombine.low %v11166_v11, %v11165_v34  ;;  %v11167_v39 = vld [vmem:[#allocation67_spill] sm:$0xff] }
 0x1a0   : > { %v6501_v27 = vcombine.low %v11168_v17, %v11167_v39 }
 0x1a4   : > { %6918 = vmatmul.mubr.bf16.gmra.mxu0 %v6491_v47  ;;  %v11169_v47 = vld [vmem:[#allocation69_spill] sm:$0xff] }
 0x1a5   : > { %6921 = vmatprep.mubr.bf16.mxu0 %v6492_v51  ;;  %v6502_v8 = vcombine.low %v11170_v9, %v11169_v47  ;;  %v11171_v51 = vld [vmem:[#allocation147_spill] sm:$0xff] }
 0x1a6   : > { %6998 = vmatmul.mubr.bf16.gmra.mxu1 %v6531_v50  ;;  %v6541_v22 = vcombine.low %v11172_v7, %v11171_v51  ;;  %v11173_v50 = vld [vmem:[#allocation149_spill] sm:$0xff] }
 0x1a7   : > { %7001 = vmatprep.mubr.bf16.mxu1 %v6532_v15  ;;  %v6542_v31 = vcombine.low %v11174_v45, %v11173_v50  ;;  %v11175_v15 = vld [vmem:[#allocation71_spill] sm:$0xff] }
 0x1a8   : > { %v6503_v4 = vcombine.low %v11176_v60, %v11175_v15 }
 0x1ac   : > { %6922 = vmatmul.mubr.bf16.gmra.mxu0 %v6493_v63  ;;  %v11177_v63 = vld [vmem:[#allocation73_spill] sm:$0xff] }
 0x1ad   : > { %6925 = vmatprep.mubr.bf16.mxu0 %v6494_v20  ;;  %v6504_v13 = vcombine.low %v11178_v19, %v11177_v63  ;;  %v11179_v20 = vld [vmem:[#allocation151_spill] sm:$0xff] }
 0x1ae   : > { %7002 = vmatmul.mubr.bf16.gmra.mxu1 %v6533_v28  ;;  %v6543_v25 = vcombine.low %v11180_v29, %v11179_v20  ;;  %v11181_v28 = vld [vmem:[#allocation153_spill] sm:$0xff] }
 0x1af   : > { %7005 = vmatprep.mubr.bf16.mxu1 %v6534_v58  ;;  %v6544_v52 = vcombine.low %v11182_v44, %v11181_v28  ;;  %v11183_v58 = vld [vmem:[#allocation75_spill] sm:$0xff] }
 0x1b0   : > { %v6505_v18 = vcombine.low %v11184_v53, %v11183_v58 }
 0x1b4   : > { %6926 = vmatmul.mubr.bf16.gmra.mxu0 %v6495_v16  ;;  %v11185_v16 = vld [vmem:[#allocation77_spill] sm:$0xff] }
 0x1b5   : > { %6929 = vmatprep.mubr.bf16.mxu0 %v6496_v41  ;;  %v6506_v1 = vcombine.low %v11186_v23, %v11185_v16  ;;  %v11187_v41 = vld [vmem:[#allocation155_spill] sm:$0xff] }
 0x1b6   : > { %7006 = vmatmul.mubr.bf16.gmra.mxu1 %v6535_v55  ;;  %v6545_v21 = vcombine.low %v11188_v62, %v11187_v41  ;;  %v11189_v55 = vld [vmem:[#allocation157_spill] sm:$0xff] }
 0x1b7   : > { %7009 = vmatprep.mubr.bf16.mxu1 %v6536_v10  ;;  %v6546_v37 = vcombine.low %v11190_v33, %v11189_v55  ;;  %v11191_v10 = vld [vmem:[#allocation79_spill] sm:$0xff] }
 0x1b8   : > { %v6507_v36 = vcombine.low %v11192_v54, %v11191_v10 }
 0x1bc   : > { %6930 = vmatmul.mubr.bf16.gmra.mxu0 %v6497_v48  ;;  %v11193_v48 = vld [vmem:[#allocation81_spill] sm:$0xff] }
 0x1bd   : > { %6933 = vmatprep.mubr.bf16.mxu0 %v6498_v35  ;;  %v6508_v3 = vcombine.low %v11194_v0, %v11193_v48  ;;  %v11195_v35 = vld [vmem:[#allocation159_spill] sm:$0xff] }
 0x1be   : > { %7010 = vmatmul.mubr.bf16.gmra.mxu1 %v6537_v57  ;;  %v6547_v43 = vcombine.low %v11196_v46, %v11195_v35  ;;  %v11197_v57 = vld [vmem:[#allocation83_spill] sm:$0xff] }
 0x1bf   : > { %7013 = vmatprep.mubr.bf16.mxu1 %v6538_v61  ;;  %v6509_v32 = vcombine.low %v11198_v49, %v11197_v57  ;;  %v11199_v61 = vld [vmem:[#allocation85_spill] sm:$0xff] }
 0x1c0   : > { %v6510_v42 = vcombine.low %v11200_v26, %v11199_v61 }
 0x1c4   : > { %6934 = vmatmul.mubr.bf16.gmra.mxu0 %v6499_v30  ;;  %v11201_v30 = vld [vmem:[#allocation87_spill] sm:$0xff] }
 0x1c5   : > { %6937 = vmatprep.mubr.bf16.mxu0 %v6500_v56  ;;  %v6511_v14 = vcombine.low %v11202_v24, %v11201_v30  ;;  %v9111_v56 = vld [vmem:[#allocation14] ss:$0 sm:$0xff] }
 0x1c6   : > { %7014 = vmatmul.mubr.bf16.gmra.mxu1 %v6539_v59 }
 0x1c7   : > { %7017 = vmatprep.mubr.bf16.mxu1 %v6540_v38 }
 0x1cc   : > { %6938 = vmatmul.mubr.bf16.gmra.mxu0 %v6501_v27  ;;  %v1105_v27 = vlaneseq }
 0x1cd   : > { %6941 = vmatprep.mubr.bf16.mxu0 %v6502_v8  ;;  %v1103_v8 = vld [vmem:[%s10446_s8] sm:$0x3] }
 0x1ce   : > { %7018 = vmatmul.mubr.bf16.gmra.mxu1 %v6541_v22  ;;  %v1106_v47 = vshrl.u32 %v1105_v27, 7 }
 0x1cf   : > { %7021 = vmatprep.mubr.bf16.mxu1 %v6542_v31 }
 0x1d0   : > { %v1107_v9 = vsub.s32 0, %v1106_v47  ;;  %v1111_v51 = vsub.s32 1, %v1106_v47 }
 0x1d2   : > { %v1108_v22 = vrot.slane %v1103_v8, %v1107_v9  ;;  %v1112_v31 = vrot.slane %v1103_v8, %v1111_v51 }
 0x1d4   : > { %6942 = vmatmul.mubr.bf16.gmra.mxu0 %v6503_v4 }
 0x1d5   : > { %6945 = vmatprep.mubr.bf16.mxu0 %v6504_v13 }
 0x1d6   : > { %7022 = vmatmul.mubr.bf16.gmra.mxu1 %v6543_v25 }
 0x1d7   : > { %7025 = vmatprep.mubr.bf16.mxu1 %v6544_v52 }
 0x1dc   : > { %6946 = vmatmul.mubr.bf16.gmra.mxu0 %v6505_v18 }
 0x1dd   : > { %6949 = vmatprep.mubr.bf16.mxu0 %v6506_v1 }
 0x1de   : > { %7026 = vmatmul.mubr.bf16.gmra.mxu1 %v6545_v21 }
 0x1df   : > { %7029 = vmatprep.mubr.bf16.mxu1 %v6546_v37 }
 0x1e1   : > { %v6963_v12 = vpop.f32.mrf.mxu1 }
 0x1e2   : > { %v2328_v40 = vadd.f32 %v6963_v12, %v9111_v56 }
 0x1e3   : > { %v1976_v59 = vpop.f32.mrf.mxu1 }
 0x1e4   : > { %6950 = vmatmul.mubr.bf16.gmra.mxu0 %v6507_v36  ;;  %2456 = vst [vmem:[#allocation4 + $0x350] sm:$0xff] %v2328_v40  ;;  %v2326_v34 = vadd.f32 %v9111_v56, %v1976_v59 }
 0x1e5   : > { %6953 = vmatprep.mubr.bf16.mxu0 %v6508_v3  ;;  %v6964_v11 = vpop.f32.mrf.mxu1 }
 0x1e6   : > { %7030 = vmatmul.mubr.bf16.gmra.mxu1 %v6547_v43  ;;  %2454 = vst [vmem:[#allocation4 + $0x358] sm:$0xff] %v2326_v34  ;;  %v2329_v38 = vadd.f32 %v6964_v11, %v9111_v56 }
 0x1e7   : > { %v1979_v39 = vpop.f32.mrf.mxu1 }
 0x1e8   : > { %2457 = vst [vmem:[#allocation4 + $0x188] sm:$0xff] %v2329_v38  ;;  %v2327_v17 = vadd.f32 %v9111_v56, %v1979_v39 }
 0x1ea   : > { %2455 = vst [vmem:[#allocation4 + $0x268] sm:$0xff] %v2327_v17 }
 0x1ec   : > { %6954 = vmatmul.mubr.bf16.gmra.mxu0 %v6509_v32 }
 0x1ed   : > { %6957 = vmatprep.mubr.bf16.mxu0 %v6510_v42 }
 0x1f4   : > { %6958 = vmatmul.mubr.bf16.gmra.mxu0 %v6511_v14 }
 0x226   : > { %v6967_v7 = vpop.f32.mrf.mxu1 }
 0x227   : > { %v2332_v50 = vadd.f32 %v6967_v7, %v9111_v56 }
 0x228   : > { %v1992_v45 = vpop.f32.mrf.mxu1 }
 0x229   : > { %2460 = vst [vmem:[#allocation4 + $0x140] sm:$0xff] %v2332_v50  ;;  %v2330_v15 = vadd.f32 %v9111_v56, %v1992_v45 }
 0x22a   : > { %v6968_v4 = vpop.f32.mrf.mxu1 }
 0x22b   : > { %2458 = vst [vmem:[#allocation4 + $0x1d8] sm:$0xff] %v2330_v15  ;;  %v2333_v19 = vadd.f32 %v6968_v4, %v9111_v56 }
 0x22c   : > { %v1261_v60 = vpop.f32.mrf.mxu0  ;;  %v1995_v20 = vpop.f32.mrf.mxu1 }
 0x22d   : > { %v1262_v63 = vadd.f32 %v1261_v60, %v1108_v22  ;;  %2461 = vst [vmem:[#allocation4 + $0x2a8] sm:$0xff] %v2333_v19  ;;  %v2331_v25 = vadd.f32 %v9111_v56, %v1995_v20 }
 0x22e   : > { %v1263_v13 = vpop.f32.mrf.mxu0  ;;  %v6971_v44 = vpop.f32.mrf.mxu1 }
 0x22f   : > { %1268 = vst [vmem:[#allocation2] sm:$0xff] %v1262_v63  ;;  %v1264_v29 = vadd.f32 %v1263_v13, %v1112_v31  ;;  %2459 = vst [vmem:[#allocation4 + $0x30] sm:$0xff] %v2331_v25  ;;  %v2336_v52 = vadd.f32 %v6971_v44, %v9111_v56 }
 0x230   : > { %v1265_v28 = vpop.f32.mrf.mxu0  ;;  %v2008_v53 = vpop.f32.mrf.mxu1 }
 0x231   : > { %1269 = vst [vmem:[#allocation3] sm:$0xff] %v1264_v29  ;;  %2464 = vst [vmem:[#allocation4 + $0x318] sm:$0xff] %v2336_v52  ;;  %v2334_v18 = vadd.f32 %v9111_v56, %v2008_v53 }
 0x232   : > { %v1266_v58 = vpop.f32.mrf.mxu0  ;;  %v6972_v16 = vpop.f32.mrf.mxu1 }
 0x233   : > { %2462 = vst [vmem:[#allocation4 + $0x130] sm:$0xff] %v2334_v18  ;;  %v2337_v23 = vadd.f32 %v6972_v16, %v9111_v56 }
 0x234   : > { %v2011_v1 = vpop.f32.mrf.mxu1 }
 0x235   : > { %2465 = vst [vmem:[#allocation4 + $0x220] sm:$0xff] %v2337_v23  ;;  %v2335_v41 = vadd.f32 %v9111_v56, %v2011_v1 }
 0x236   : > { %v6975_v62 = vpop.f32.mrf.mxu1 }
 0x237   : > { %2463 = vst [vmem:[#allocation4 + $0x200] sm:$0xff] %v2335_v41  ;;  %v2340_v21 = vadd.f32 %v6975_v62, %v9111_v56 }
 0x238   : > { %v2024_v55 = vpop.f32.mrf.mxu1 }
 0x239   : > { %2468 = vst [vmem:[#allocation4 + $0xe0] sm:$0xff] %v2340_v21  ;;  %v2338_v33 = vadd.f32 %v9111_v56, %v2024_v55 }
 0x23a   : > { %v6976_v37 = vpop.f32.mrf.mxu1 }
 0x23b   : > { %2466 = vst [vmem:[#allocation4 + $0x70] sm:$0xff] %v2338_v33  ;;  %v2341_v10 = vadd.f32 %v6976_v37, %v9111_v56 }
 0x23c   : > { %v2027_v54 = vpop.f32.mrf.mxu1 }
 0x23d   : > { %2469 = vst [vmem:[#allocation4 + $0x178] sm:$0xff] %v2341_v10  ;;  %v2339_v36 = vadd.f32 %v9111_v56, %v2027_v54 }
 0x23e   : > { %v6979_v48 = vpop.f32.mrf.mxu1 }
 0x23f   : > { %2467 = vst [vmem:[#allocation4 + $0x300] sm:$0xff] %v2339_v36  ;;  %v2344_v0 = vadd.f32 %v6979_v48, %v9111_v56 }
 0x240   : > { %v2040_v3 = vpop.f32.mrf.mxu1 }
 0x241   : > { %2472 = vst [vmem:[#allocation4 + $0x3b8] sm:$0xff] %v2344_v0  ;;  %v2342_v35 = vadd.f32 %v9111_v56, %v2040_v3 }
 0x242   : > { %v6980_v46 = vpop.f32.mrf.mxu1 }
 0x243   : > { %2470 = vst [vmem:[#allocation4 + $0x328] sm:$0xff] %v2342_v35  ;;  %v2345_v43 = vadd.f32 %v6980_v46, %v9111_v56 }
 0x244   : > { %v2043_v57 = vpop.f32.mrf.mxu1 }
 0x245   : > { %2473 = vst [vmem:[#allocation4 + $0x2b8] sm:$0xff] %v2345_v43  ;;  %v2343_v49 = vadd.f32 %v9111_v56, %v2043_v57 }
 0x246   : > { %v6983_v32 = vpop.f32.mrf.mxu1 }
 0x247   : > { %2471 = vst [vmem:[#allocation4 + $0x260] sm:$0xff] %v2343_v49  ;;  %v2348_v61 = vadd.f32 %v6983_v32, %v9111_v56 }
 0x248   : > { %v2056_v26 = vpop.f32.mrf.mxu1 }
 0x249   : > { %2476 = vst [vmem:[#allocation4 + $0x20] sm:$0xff] %v2348_v61  ;;  %v2346_v42 = vadd.f32 %v9111_v56, %v2056_v26 }
 0x24a   : > { %v6984_v24 = vpop.f32.mrf.mxu1 }
 0x24b   : > { %2474 = vst [vmem:[#allocation4 + $0x248] sm:$0xff] %v2346_v42  ;;  %v2349_v12 = vadd.f32 %v6984_v24, %v9111_v56 }
 0x24c   : > { %v6907_v30 = vpop.f32.mrf.mxu0  ;;  %v2059_v59 = vpop.f32.mrf.mxu1 }
 0x24d   : > { %v2272_v14 = vadd.f32 %v6907_v30, %v9111_v56  ;;  %2477 = vst [vmem:[#allocation4 + $0xe8] sm:$0xff] %v2349_v12  ;;  %v2347_v11 = vadd.f32 %v9111_v56, %v2059_v59 }
 0x24e   : > { %v1752_v40 = vpop.f32.mrf.mxu0  ;;  %v6987_v39 = vpop.f32.mrf.mxu1 }
 0x24f   : > { %2400 = vst [vmem:[#allocation4 + $0xd8] sm:$0xff] %v2272_v14  ;;  %v2270_v34 = vadd.f32 %v9111_v56, %v1752_v40  ;;  %2475 = vst [vmem:[#allocation4 + $0x40] sm:$0xff] %v2347_v11  ;;  %v2352_v27 = vadd.f32 %v6987_v39, %v9111_v56 }
 0x250   : > { %v6908_v38 = vpop.f32.mrf.mxu0  ;;  %v2072_v9 = vpop.f32.mrf.mxu1 }
 0x251   : > { %2398 = vst [vmem:[#allocation4 + $0x2b0] sm:$0xff] %v2270_v34  ;;  %v2273_v17 = vadd.f32 %v6908_v38, %v9111_v56  ;;  %2480 = vst [vmem:[#allocation4 + $0x3c8] sm:$0xff] %v2352_v27  ;;  %v2350_v51 = vadd.f32 %v9111_v56, %v2072_v9 }
 0x252   : > { %v1755_v47 = vpop.f32.mrf.mxu0  ;;  %v6988_v22 = vpop.f32.mrf.mxu1 }
 0x253   : > { %2401 = vst [vmem:[#allocation4 + $0x18] sm:$0xff] %v2273_v17  ;;  %v2271_v8 = vadd.f32 %v9111_v56, %v1755_v47  ;;  %2478 = vst [vmem:[#allocation4 + $0x288] sm:$0xff] %v2350_v51  ;;  %v2353_v45 = vadd.f32 %v6988_v22, %v9111_v56 }
 0x254   : > { %v6911_v7 = vpop.f32.mrf.mxu0  ;;  %v2075_v15 = vpop.f32.mrf.mxu1 }
 0x255   : > { %2399 = vst [vmem:[#allocation4 + $0x3b0] sm:$0xff] %v2271_v8  ;;  %v2276_v50 = vadd.f32 %v6911_v7, %v9111_v56  ;;  %2481 = vst [vmem:[#allocation4 + $0x160] sm:$0xff] %v2353_v45  ;;  %v2351_v4 = vadd.f32 %v9111_v56, %v2075_v15 }
 0x256   : > { %v1768_v31 = vpop.f32.mrf.mxu0  ;;  %v6991_v19 = vpop.f32.mrf.mxu1 }
 0x257   : > { %2404 = vst [vmem:[#allocation4 + $0x330] sm:$0xff] %v2276_v50  ;;  %v2274_v60 = vadd.f32 %v9111_v56, %v1768_v31  ;;  %2479 = vst [vmem:[#allocation4 + $0x3a8] sm:$0xff] %v2351_v4  ;;  %v2356_v20 = vadd.f32 %v6991_v19, %v9111_v56 }
 0x258   : > { %v6912_v63 = vpop.f32.mrf.mxu0  ;;  %v2088_v25 = vpop.f32.mrf.mxu1 }
 0x259   : > { %2402 = vst [vmem:[#allocation4 + $0x50] sm:$0xff] %v2274_v60  ;;  %v2277_v13 = vadd.f32 %v6912_v63, %v9111_v56  ;;  %2484 = vst [vmem:[#allocation4 + $0x3d8] sm:$0xff] %v2356_v20  ;;  %v2354_v44 = vadd.f32 %v9111_v56, %v2088_v25 }
 0x25a   : > { %v1771_v29 = vpop.f32.mrf.mxu0  ;;  %v6992_v58 = vpop.f32.mrf.mxu1 }
 0x25b   : > { %2405 = vst [vmem:[#allocation4 + $0x48] sm:$0xff] %v2277_v13  ;;  %v2275_v28 = vadd.f32 %v9111_v56, %v1771_v29  ;;  %2482 = vst [vmem:[#allocation4 + $0x2c8] sm:$0xff] %v2354_v44  ;;  %v2357_v18 = vadd.f32 %v6992_v58, %v9111_v56 }
 0x25c   : > { %v6915_v52 = vpop.f32.mrf.mxu0  ;;  %v2091_v23 = vpop.f32.mrf.mxu1 }
 0x25d   : > { %2403 = vst [vmem:[#allocation4 + $0x368] sm:$0xff] %v2275_v28  ;;  %v2280_v53 = vadd.f32 %v6915_v52, %v9111_v56  ;;  %2485 = vst [vmem:[#allocation4 + $0x1e8] sm:$0xff] %v2357_v18  ;;  %v2355_v41 = vadd.f32 %v9111_v56, %v2091_v23 }
 0x25e   : > { %v1784_v16 = vpop.f32.mrf.mxu0  ;;  %v6995_v21 = vpop.f32.mrf.mxu1 }
 0x25f   : > { %2408 = vst [vmem:[#allocation4 + $0x118] sm:$0xff] %v2280_v53  ;;  %v2278_v1 = vadd.f32 %v9111_v56, %v1784_v16  ;;  %2483 = vst [vmem:[#allocation4 + $0x210] sm:$0xff] %v2355_v41  ;;  %v2360_v33 = vadd.f32 %v6995_v21, %v9111_v56 }
 0x260   : > { %v6916_v62 = vpop.f32.mrf.mxu0  ;;  %v2104_v10 = vpop.f32.mrf.mxu1 }
 0x261   : > { %2406 = vst [vmem:[#allocation4 + $0x380] sm:$0xff] %v2278_v1  ;;  %v2281_v55 = vadd.f32 %v6916_v62, %v9111_v56  ;;  %2488 = vst [vmem:[#allocation4 + $0x2d0] sm:$0xff] %v2360_v33  ;;  %v2358_v36 = vadd.f32 %v9111_v56, %v2104_v10 }
 0x262   : > { %v1787_v37 = vpop.f32.mrf.mxu0  ;;  %v6996_v0 = vpop.f32.mrf.mxu1 }
 0x263   : > { %2409 = vst [vmem:[#allocation4 + $0x98] sm:$0xff] %v2281_v55  ;;  %v2279_v54 = vadd.f32 %v9111_v56, %v1787_v37  ;;  %2486 = vst [vmem:[#allocation4 + $0x1b0] sm:$0xff] %v2358_v36  ;;  %v2361_v35 = vadd.f32 %v6996_v0, %v9111_v56 }
 0x264   : > { %v6919_v48 = vpop.f32.mrf.mxu0  ;;  %v2107_v43 = vpop.f32.mrf.mxu1 }
 0x265   : > { %2407 = vst [vmem:[#allocation4 + $0x110] sm:$0xff] %v2279_v54  ;;  %v2284_v3 = vadd.f32 %v6919_v48, %v9111_v56  ;;  %2489 = vst [vmem:[#allocation4 + $0x1d0] sm:$0xff] %v2361_v35  ;;  %v2359_v49 = vadd.f32 %v9111_v56, %v2107_v43 }
 0x266   : > { %v1800_v46 = vpop.f32.mrf.mxu0  ;;  %v6999_v61 = vpop.f32.mrf.mxu1 }
 0x267   : > { %2412 = vst [vmem:[#allocation4 + $0x108] sm:$0xff] %v2284_v3  ;;  %v2282_v57 = vadd.f32 %v9111_v56, %v1800_v46  ;;  %2487 = vst [vmem:[#allocation4 + $0x1c8] sm:$0xff] %v2359_v49  ;;  %v2364_v42 = vadd.f32 %v6999_v61, %v9111_v56 }
 0x268   : > { %v6920_v32 = vpop.f32.mrf.mxu0  ;;  %v2120_v24 = vpop.f32.mrf.mxu1 }
 0x269   : > { %2410 = vst [vmem:[#allocation4 + $0x320] sm:$0xff] %v2282_v57  ;;  %v2285_v26 = vadd.f32 %v6920_v32, %v9111_v56  ;;  %2492 = vst [vmem:[#allocation4 + $0x198] sm:$0xff] %v2364_v42  ;;  %v2362_v12 = vadd.f32 %v9111_v56, %v2120_v24 }
 0x26a   : > { %v1803_v30 = vpop.f32.mrf.mxu0  ;;  %v7000_v59 = vpop.f32.mrf.mxu1 }
 0x26b   : > { %2413 = vst [vmem:[#allocation4 + $0x60] sm:$0xff] %v2285_v26  ;;  %v2283_v14 = vadd.f32 %v9111_v56, %v1803_v30  ;;  %2490 = vst [vmem:[#allocation4 + $0x58] sm:$0xff] %v2362_v12  ;;  %v2365_v11 = vadd.f32 %v7000_v59, %v9111_v56 }
 0x26c   : > { %v6923_v40 = vpop.f32.mrf.mxu0  ;;  %v2123_v39 = vpop.f32.mrf.mxu1 }
 0x26d   : > { %2411 = vst [vmem:[#allocation4 + $0x150] sm:$0xff] %v2283_v14  ;;  %v2288_v34 = vadd.f32 %v6923_v40, %v9111_v56  ;;  %2493 = vst [vmem:[#allocation4 + $0x2e8] sm:$0xff] %v2365_v11  ;;  %v2363_v27 = vadd.f32 %v9111_v56, %v2123_v39 }
 0x26e   : > { %v1816_v38 = vpop.f32.mrf.mxu0  ;;  %v7003_v9 = vpop.f32.mrf.mxu1 }
 0x26f   : > { %2416 = vst [vmem:[#allocation4 + $0x338] sm:$0xff] %v2288_v34  ;;  %v2286_v17 = vadd.f32 %v9111_v56, %v1816_v38  ;;  %2491 = vst [vmem:[#allocation4 + $0x120] sm:$0xff] %v2363_v27  ;;  %v2368_v51 = vadd.f32 %v7003_v9, %v9111_v56 }
 0x270   : > { %v6924_v47 = vpop.f32.mrf.mxu0  ;;  %v2136_v22 = vpop.f32.mrf.mxu1 }
 0x271   : > { %2414 = vst [vmem:[#allocation4 + $0x2e0] sm:$0xff] %v2286_v17  ;;  %v2289_v8 = vadd.f32 %v6924_v47, %v9111_v56  ;;  %2496 = vst [vmem:[#allocation4 + $0x398] sm:$0xff] %v2368_v51  ;;  %v2366_v45 = vadd.f32 %v9111_v56, %v2136_v22 }
 0x272   : > { %v1819_v7 = vpop.f32.mrf.mxu0  ;;  %v7004_v15 = vpop.f32.mrf.mxu1 }
 0x273   : > { %2417 = vst [vmem:[#allocation4 + $0x340] sm:$0xff] %v2289_v8  ;;  %v2287_v50 = vadd.f32 %v9111_v56, %v1819_v7  ;;  %2494 = vst [vmem:[#allocation4 + $0x1f8] sm:$0xff] %v2366_v45  ;;  %v2369_v4 = vadd.f32 %v7004_v15, %v9111_v56 }
 0x274   : > { %v6927_v31 = vpop.f32.mrf.mxu0  ;;  %v2139_v19 = vpop.f32.mrf.mxu1 }
 0x275   : > { %2415 = vst [vmem:[#allocation4 + $0x388] sm:$0xff] %v2287_v50  ;;  %v2292_v60 = vadd.f32 %v6927_v31, %v9111_v56  ;;  %2497 = vst [vmem:[#allocation4 + $0x390] sm:$0xff] %v2369_v4  ;;  %v2367_v20 = vadd.f32 %v9111_v56, %v2139_v19 }
 0x276   : > { %v1832_v63 = vpop.f32.mrf.mxu0  ;;  %v7007_v25 = vpop.f32.mrf.mxu1 }
 0x277   : > { %2420 = vst [vmem:[#allocation4 + $0x1b8] sm:$0xff] %v2292_v60  ;;  %v2290_v13 = vadd.f32 %v9111_v56, %v1832_v63  ;;  %2495 = vst [vmem:[#allocation4 + $0x238] sm:$0xff] %v2367_v20  ;;  %v2372_v44 = vadd.f32 %v7007_v25, %v9111_v56 }
 0x278   : > { %v6928_v29 = vpop.f32.mrf.mxu0  ;;  %v2152_v58 = vpop.f32.mrf.mxu1 }
 0x279   : > { %2418 = vst [vmem:[#allocation4 + $0x80] sm:$0xff] %v2290_v13  ;;  %v2293_v28 = vadd.f32 %v6928_v29, %v9111_v56  ;;  %2500 = vst [vmem:[#allocation4 + $0x258] sm:$0xff] %v2372_v44  ;;  %v2370_v18 = vadd.f32 %v9111_v56, %v2152_v58 }
 0x27a   : > { %v1835_v52 = vpop.f32.mrf.mxu0  ;;  %v7008_v23 = vpop.f32.mrf.mxu1 }
 0x27b   : > { %2421 = vst [vmem:[#allocation4 + $0x168] sm:$0xff] %v2293_v28  ;;  %v2291_v53 = vadd.f32 %v9111_v56, %v1835_v52  ;;  %2498 = vst [vmem:[#allocation4 + $0x1a0] sm:$0xff] %v2370_v18  ;;  %v2373_v41 = vadd.f32 %v7008_v23, %v9111_v56 }
 0x27c   : > { %v6931_v16 = vpop.f32.mrf.mxu0  ;;  %v2155_v21 = vpop.f32.mrf.mxu1 }
 0x27d   : > { %2419 = vst [vmem:[#allocation4 + $0x1a8] sm:$0xff] %v2291_v53  ;;  %v2296_v1 = vadd.f32 %v6931_v16, %v9111_v56  ;;  %2501 = vst [vmem:[#allocation4 + $0x2d8] sm:$0xff] %v2373_v41  ;;  %v2371_v33 = vadd.f32 %v9111_v56, %v2155_v21 }
 0x27e   : > { %v1848_v62 = vpop.f32.mrf.mxu0  ;;  %v7011_v10 = vpop.f32.mrf.mxu1 }
 0x27f   : > { %2424 = vst [vmem:[#allocation4 + $0x290] sm:$0xff] %v2296_v1  ;;  %v2294_v55 = vadd.f32 %v9111_v56, %v1848_v62  ;;  %2499 = vst [vmem:[#allocation4 + $0xa8] sm:$0xff] %v2371_v33  ;;  %v2376_v36 = vadd.f32 %v7011_v10, %v9111_v56 }
 0x280   : > { %v6932_v37 = vpop.f32.mrf.mxu0  ;;  %v2168_v0 = vpop.f32.mrf.mxu1 }
 0x281   : > { %2422 = vst [vmem:[#allocation4 + $0x3e8] sm:$0xff] %v2294_v55  ;;  %v2297_v54 = vadd.f32 %v6932_v37, %v9111_v56  ;;  %2504 = vst [vmem:[#allocation4 + $0x170] sm:$0xff] %v2376_v36  ;;  %v2374_v35 = vadd.f32 %v9111_v56, %v2168_v0 }
 0x282   : > { %v1851_v48 = vpop.f32.mrf.mxu0  ;;  %v7012_v43 = vpop.f32.mrf.mxu1 }
 0x283   : > { %2425 = vst [vmem:[#allocation4 + $0x28] sm:$0xff] %v2297_v54  ;;  %v2295_v3 = vadd.f32 %v9111_v56, %v1851_v48  ;;  %2502 = vst [vmem:[#allocation4 + $0xf0] sm:$0xff] %v2374_v35  ;;  %v2377_v49 = vadd.f32 %v7012_v43, %v9111_v56 }
 0x284   : > { %v6935_v46 = vpop.f32.mrf.mxu0  ;;  %v2171_v61 = vpop.f32.mrf.mxu1 }
 0x285   : > { %2423 = vst [vmem:[#allocation4 + $0x2f8] sm:$0xff] %v2295_v3  ;;  %v2300_v57 = vadd.f32 %v6935_v46, %v9111_v56  ;;  %2505 = vst [vmem:[#allocation4 + $0x3d0] sm:$0xff] %v2377_v49  ;;  %v2375_v42 = vadd.f32 %v9111_v56, %v2171_v61 }
 0x286   : > { %v1864_v32 = vpop.f32.mrf.mxu0  ;;  %v7015_v24 = vpop.f32.mrf.mxu1 }
 0x287   : > { %2428 = vst [vmem:[#allocation4 + $0x1c0] sm:$0xff] %v2300_v57  ;;  %v2298_v26 = vadd.f32 %v9111_v56, %v1864_v32  ;;  %2503 = vst [vmem:[#allocation4 + $0x180] sm:$0xff] %v2375_v42  ;;  %v2380_v12 = vadd.f32 %v7015_v24, %v9111_v56 }
 0x288   : > { %v6936_v30 = vpop.f32.mrf.mxu0  ;;  %v2184_v59 = vpop.f32.mrf.mxu1 }
 0x289   : > { %2426 = vst [vmem:[#allocation4 + $0x138] sm:$0xff] %v2298_v26  ;;  %v2301_v14 = vadd.f32 %v6936_v30, %v9111_v56  ;;  %2508 = vst [vmem:[#allocation4 + $0xb8] sm:$0xff] %v2380_v12  ;;  %v2378_v11 = vadd.f32 %v9111_v56, %v2184_v59 }
 0x28a   : > { %v1867_v40 = vpop.f32.mrf.mxu0  ;;  %v7016_v39 = vpop.f32.mrf.mxu1 }
 0x28b   : > { %2429 = vst [vmem:[#allocation4 + $0x280] sm:$0xff] %v2301_v14  ;;  %v2299_v34 = vadd.f32 %v9111_v56, %v1867_v40  ;;  %2506 = vst [vmem:[#allocation4 + $0x250] sm:$0xff] %v2378_v11  ;;  %v2381_v27 = vadd.f32 %v7016_v39, %v9111_v56 }
 0x28c   : > { %v6939_v38 = vpop.f32.mrf.mxu0  ;;  %v2187_v9 = vpop.f32.mrf.mxu1 }
 0x28d   : > { %2427 = vst [vmem:[#allocation4 + $0xc0] sm:$0xff] %v2299_v34  ;;  %v2304_v17 = vadd.f32 %v6939_v38, %v9111_v56  ;;  %2509 = vst [vmem:[#allocation4 + $0x38] sm:$0xff] %v2381_v27  ;;  %v2379_v51 = vadd.f32 %v9111_v56, %v2187_v9 }
 0x28e   : > { %v1880_v47 = vpop.f32.mrf.mxu0  ;;  %v7019_v22 = vpop.f32.mrf.mxu1 }
 0x28f   : > { %2432 = vst [vmem:[#allocation4 + $0x158] sm:$0xff] %v2304_v17  ;;  %v2302_v8 = vadd.f32 %v9111_v56, %v1880_v47  ;;  %2507 = vst [vmem:[#allocation4 + $0x378] sm:$0xff] %v2379_v51  ;;  %v2384_v45 = vadd.f32 %v7019_v22, %v9111_v56 }
 0x290   : > { %v6940_v7 = vpop.f32.mrf.mxu0  ;;  %v2200_v15 = vpop.f32.mrf.mxu1 }
 0x291   : > { %2430 = vst [vmem:[#allocation4 + $0x100] sm:$0xff] %v2302_v8  ;;  %v2305_v50 = vadd.f32 %v6940_v7, %v9111_v56  ;;  %2512 = vst [vmem:[#allocation4 + $0x370] sm:$0xff] %v2384_v45  ;;  %v2382_v4 = vadd.f32 %v9111_v56, %v2200_v15 }
 0x292   : > { %v1883_v31 = vpop.f32.mrf.mxu0  ;;  %v7020_v19 = vpop.f32.mrf.mxu1 }
 0x293   : > { %2433 = vst [vmem:[#allocation4 + $0x3e0] sm:$0xff] %v2305_v50  ;;  %v2303_v60 = vadd.f32 %v9111_v56, %v1883_v31  ;;  %2510 = vst [vmem:[#allocation4 + $0x78] sm:$0xff] %v2382_v4  ;;  %v2385_v20 = vadd.f32 %v7020_v19, %v9111_v56 }
 0x294   : > { %v6943_v63 = vpop.f32.mrf.mxu0  ;;  %v2203_v25 = vpop.f32.mrf.mxu1 }
 0x295   : > { %2431 = vst [vmem:[#allocation4 + $0x3c0] sm:$0xff] %v2303_v60  ;;  %v2308_v13 = vadd.f32 %v6943_v63, %v9111_v56  ;;  %2513 = vst [vmem:[#allocation4 + $0xc8] sm:$0xff] %v2385_v20  ;;  %v2383_v44 = vadd.f32 %v9111_v56, %v2203_v25 }
 0x296   : > { %v1896_v29 = vpop.f32.mrf.mxu0  ;;  %v7023_v58 = vpop.f32.mrf.mxu1 }
 0x297   : > { %2436 = vst [vmem:[#allocation4 + $0x8] sm:$0xff] %v2308_v13  ;;  %v2306_v28 = vadd.f32 %v9111_v56, %v1896_v29  ;;  %2511 = vst [vmem:[#allocation4 + $0x308] sm:$0xff] %v2383_v44  ;;  %v2388_v18 = vadd.f32 %v7023_v58, %v9111_v56 }
 0x298   : > { %v6944_v52 = vpop.f32.mrf.mxu0  ;;  %v2216_v23 = vpop.f32.mrf.mxu1 }
 0x299   : > { %2434 = vst [vmem:[#allocation4 + $0x218] sm:$0xff] %v2306_v28  ;;  %v2309_v53 = vadd.f32 %v6944_v52, %v9111_v56  ;;  %2516 = vst [vmem:[#allocation4 + $0x228] sm:$0xff] %v2388_v18  ;;  %v2386_v41 = vadd.f32 %v9111_v56, %v2216_v23 }
 0x29a   : > { %v1899_v16 = vpop.f32.mrf.mxu0  ;;  %v7024_v21 = vpop.f32.mrf.mxu1 }
 0x29b   : > { %2437 = vst [vmem:[#allocation4 + $0x128] sm:$0xff] %v2309_v53  ;;  %v2307_v1 = vadd.f32 %v9111_v56, %v1899_v16  ;;  %2514 = vst [vmem:[#allocation4 + $0x278] sm:$0xff] %v2386_v41  ;;  %v2389_v33 = vadd.f32 %v7024_v21, %v9111_v56 }
 0x29c   : > { %v6947_v62 = vpop.f32.mrf.mxu0  ;;  %v2219_v10 = vpop.f32.mrf.mxu1 }
 0x29d   : > { %2435 = vst [vmem:[#allocation4 + $0x3f8] sm:$0xff] %v2307_v1  ;;  %v2312_v55 = vadd.f32 %v6947_v62, %v9111_v56  ;;  %2517 = vst [vmem:[#allocation4 + $0x348] sm:$0xff] %v2389_v33  ;;  %v2387_v36 = vadd.f32 %v9111_v56, %v2219_v10 }
 0x29e   : > { %v1912_v37 = vpop.f32.mrf.mxu0  ;;  %v7027_v0 = vpop.f32.mrf.mxu1 }
 0x29f   : > { %2440 = vst [vmem:[#allocation4 + $0xa0] sm:$0xff] %v2312_v55  ;;  %v2310_v54 = vadd.f32 %v9111_v56, %v1912_v37  ;;  %2515 = vst [vmem:[#allocation4 + $0x360] sm:$0xff] %v2387_v36  ;;  %v2392_v35 = vadd.f32 %v7027_v0, %v9111_v56 }
 0x2a0   : > { %v6948_v48 = vpop.f32.mrf.mxu0  ;;  %v2232_v43 = vpop.f32.mrf.mxu1 }
 0x2a1   : > { %2438 = vst [vmem:[#allocation4 + $0x2a0] sm:$0xff] %v2310_v54  ;;  %v2313_v3 = vadd.f32 %v6948_v48, %v9111_v56  ;;  %2520 = vst [vmem:[#allocation4 + $0x68] sm:$0xff] %v2392_v35  ;;  %v2390_v49 = vadd.f32 %v9111_v56, %v2232_v43 }
 0x2a2   : > { %v1915_v46 = vpop.f32.mrf.mxu0  ;;  %v7028_v61 = vpop.f32.mrf.mxu1 }
 0x2a3   : > { %2441 = vst [vmem:[#allocation4 + $0x2c0] sm:$0xff] %v2313_v3  ;;  %v2311_v57 = vadd.f32 %v9111_v56, %v1915_v46  ;;  %2518 = vst [vmem:[#allocation4 + $0x148] sm:$0xff] %v2390_v49  ;;  %v2393_v42 = vadd.f32 %v7028_v61, %v9111_v56 }
 0x2a4   : > { %v6951_v32 = vpop.f32.mrf.mxu0  ;;  %v2235_v24 = vpop.f32.mrf.mxu1 }
 0x2a5   : > { %2439 = vst [vmem:[#allocation4 + $0x3f0] sm:$0xff] %v2311_v57  ;;  %v2316_v26 = vadd.f32 %v6951_v32, %v9111_v56  ;;  %2521 = vst [vmem:[#allocation4] sm:$0xff] %v2393_v42  ;;  %v2391_v12 = vadd.f32 %v9111_v56, %v2235_v24 }
 0x2a6   : > { %v1928_v30 = vpop.f32.mrf.mxu0  ;;  %v7031_v59 = vpop.f32.mrf.mxu1 }
 0x2a7   : > { %2444 = vst [vmem:[#allocation4 + $0x1f0] sm:$0xff] %v2316_v26  ;;  %v2314_v14 = vadd.f32 %v9111_v56, %v1928_v30  ;;  %2519 = vst [vmem:[#allocation4 + $0xf8] sm:$0xff] %v2391_v12  ;;  %v2396_v11 = vadd.f32 %v7031_v59, %v9111_v56 }
 0x2a8   : > { %v6952_v40 = vpop.f32.mrf.mxu0  ;;  %v2248_v39 = vpop.f32.mrf.mxu1 }
 0x2a9   : > { %2442 = vst [vmem:[#allocation4 + $0xb0] sm:$0xff] %v2314_v14  ;;  %v2317_v34 = vadd.f32 %v6952_v40, %v9111_v56  ;;  %2524 = vst [vmem:[#allocation4 + $0x310] sm:$0xff] %v2396_v11  ;;  %v2394_v27 = vadd.f32 %v9111_v56, %v2248_v39 }
 0x2aa   : > { %v1931_v38 = vpop.f32.mrf.mxu0  ;;  %v7032_v9 = vpop.f32.mrf.mxu1 }
 0x2ab   : > { %2445 = vst [vmem:[#allocation4 + $0x10] sm:$0xff] %v2317_v34  ;;  %v2315_v17 = vadd.f32 %v9111_v56, %v1931_v38  ;;  %2522 = vst [vmem:[#allocation4 + $0x298] sm:$0xff] %v2394_v27  ;;  %v2397_v51 = vadd.f32 %v7032_v9, %v9111_v56 }
 0x2ac   : > { %v6955_v47 = vpop.f32.mrf.mxu0  ;;  %v2251_v22 = vpop.f32.mrf.mxu1 }
 0x2ad   : > { %2443 = vst [vmem:[#allocation4 + $0x1e0] sm:$0xff] %v2315_v17  ;;  %v2320_v8 = vadd.f32 %v6955_v47, %v9111_v56  ;;  %2525 = vst [vmem:[#allocation4 + $0x190] sm:$0xff] %v2397_v51  ;;  %v2395_v45 = vadd.f32 %v9111_v56, %v2251_v22 }
 0x2ae   : > { %v1944_v7 = vpop.f32.mrf.mxu0 }
 0x2af   : > { %2448 = vst [vmem:[#allocation4 + $0x90] sm:$0xff] %v2320_v8  ;;  %v2318_v50 = vadd.f32 %v9111_v56, %v1944_v7  ;;  %2523 = vst [vmem:[#allocation4 + $0x270] sm:$0xff] %v2395_v45 }
 0x2b0   : > { %v6956_v31 = vpop.f32.mrf.mxu0 }
 0x2b1   : > { %2446 = vst [vmem:[#allocation4 + $0x230] sm:$0xff] %v2318_v50  ;;  %v2321_v15 = vadd.f32 %v6956_v31, %v9111_v56 }
 0x2b2   : > { %v1947_v60 = vpop.f32.mrf.mxu0 }
 0x2b3   : > { %2449 = vst [vmem:[#allocation4 + $0x3a0] sm:$0xff] %v2321_v15  ;;  %v2319_v4 = vadd.f32 %v9111_v56, %v1947_v60 }
 0x2b4   : > { %v6959_v63 = vpop.f32.mrf.mxu0 }
 0x2b5   : > { %2447 = vst [vmem:[#allocation4 + $0x240] sm:$0xff] %v2319_v4  ;;  %v2324_v19 = vadd.f32 %v6959_v63, %v9111_v56 }
 0x2b6   : > { %v1960_v13 = vpop.f32.mrf.mxu0 }
 0x2b7   : > { %2452 = vst [vmem:[#allocation4 + $0x88] sm:$0xff] %v2324_v19  ;;  %v2322_v20 = vadd.f32 %v9111_v56, %v1960_v13 }
 0x2b8   : > { %v6960_v29 = vpop.f32.mrf.mxu0 }
 0x2b9   : > { %2450 = vst [vmem:[#allocation4 + $0x208] sm:$0xff] %v2322_v20  ;;  %v2325_v25 = vadd.f32 %v6960_v29, %v9111_v56 }
 0x2ba   : > { %v1963_v28 = vpop.f32.mrf.mxu0 }
 0x2bb   : > { %2453 = vst [vmem:[#allocation4 + $0x2f0] sm:$0xff] %v2325_v25  ;;  %v2323_v44 = vadd.f32 %v9111_v56, %v1963_v28 }
 0x2bd   : > { %2451 = vst [vmem:[#allocation4 + $0xd0] sm:$0xff] %v2323_v44 }
 0x2be PF: > { %v7405_v52 = vld [vmem:[#allocation19 + $0x154] ss:$24 sps:$4 sm:$0xff]   ;;  %v7407_v58 = vld [vmem:[#allocation19 + $0x150] ss:$24 sps:$4 sm:$0xff]   ;;  %v10653_v53 = vmov 0   ;;  %v2579_v35 = vlaneseq  ;;  %s11203_s19 = sld [smem:[#allocation173_spill]] }
 0x2bf   : > { %2881 = vmatprep.mubr.bf16.mxu0 %v10653_v53  ;;  %7403 = vset.pattern.permute.xlu1 %v10653_v53  ;;  %v7408_v18 = vld [vmem:[#allocation19 + $0x124] ss:$24 sps:$4 sm:$0xff]   ;;  %v7410_v16 = vld [vmem:[#allocation19 + $0x120] ss:$24 sps:$4 sm:$0xff]   ;;  %v7411_v23 = vld [vmem:[#allocation19 + $0xf4] ss:$24 sps:$4 sm:$0xff]  }
 0x2c0   : > { %2849 = vmatprep.subr.bf16.mxu0 %v7405_v52  ;;  %2922 = vmatprep.mubr.bf16.mxu1 %v10653_v53  ;;  %v7413_v56 = vld [vmem:[#allocation19 + $0xf0] ss:$24 sps:$4 sm:$0xff]   ;;  %v7414_v1 = vld [vmem:[#allocation19 + $0xc4] ss:$24 sps:$4 sm:$0xff]   ;;  %v7416_v41 = vld [vmem:[#allocation19 + $0xc0] ss:$24 sps:$4 sm:$0xff]  }
 0x2c1   : > { %2850 = vmatpush1.bf16.msra.mxu0 %v7407_v58  ;;  %7404 = vset.pattern.permute.xlu0 %v10653_v53  ;;  %v7417_v62 = vld [vmem:[#allocation19 + $0x94] ss:$24 sps:$4 sm:$0xff]   ;;  %v6607_v21 = vld [vmem:[#allocation7] ss:$0 sm:$0xff]  ;;  %v7420_v33 = vld [vmem:[#allocation19 + $0x64] ss:$24 sps:$4 sm:$0xff]  }
 0x2c2   : > { %2851 = vmatprep.subr.bf16.mxu0 %v7408_v18  ;;  %3850 = vperm.xlu1 %7403, %v6607_v21   ;;  %v7419_v55 = vld [vmem:[#allocation19 + $0x90] ss:$24 sps:$4 sm:$0xff]   ;;  %v7422_v37 = vld [vmem:[#allocation19 + $0x60] ss:$24 sps:$4 sm:$0xff]   ;;  %v7423_v10 = vld [vmem:[#allocation19 + $0x34] ss:$24 sps:$4 sm:$0xff]  }
 0x2c3   : > { %v7425_v54 = vld [vmem:[#allocation19 + $0x30] ss:$24 sps:$4 sm:$0xff]   ;;  %v7426_v36 = vld [vmem:[#allocation19 + $0x4] ss:$24 sps:$4 sm:$0xff]   ;;  %v7428_v48 = vld [vmem:[#allocation19] ss:$24 sps:$4 sm:$0xff]  }
 0x2c4   : > { %v2526_v0 = vld [vmem:[#allocation2] sm:$0xff]  ;;  %v9253_v46 = vshrl.u32 %v2579_v35, 7  ;;  %v7997_v43 = vmov 1966171168   ;;  %v2983_v17 = vld [vmem:[#allocation4 + $0x368] sm:$0xff]  ;;  %v2986_v8 = vld [vmem:[#allocation4 + $0x380] sm:$0xff] }
 0x2c5   : > { %2852 = vmatpush1.bf16.msra.mxu0 %v7410_v16  ;;  %v9248_v3 = vpack.c.bf16 %v2526_v0, %v2526_v0  ;;  %v3109_v57 = vunpack.c.l.s4 %v7997_v43  ;;  %v2577_v32 = vld [vmem:[%s11203_s19] sm:$0x3f]  ;;  %v2980_v51 = vld [vmem:[#allocation4 + $0xd8] sm:$0xff]  ;;  %v9280_v7 = vld [vmem:[#allocation16] ss:$0 sm:$0xff]  ;;  %vm4123_vm7 = vcmask 130112  }
 0x2c6   : > { %2853 = vmatprep.subr.bf16.mxu0 %v7411_v23  ;;  %v9256_v49 = vsub.s32 0, %v9253_v46  ;;  %v2982_v11 = vld [vmem:[#allocation4 + $0x50] sm:$0xff]  ;;  %v2989_v20 = vld [vmem:[#allocation4 + $0x98] sm:$0xff]  ;;  %v2990_v16 = vld [vmem:[#allocation4 + $0x320] sm:$0xff]  ;;  %vm4130_vm8 = vcmask 195712   ;;  %vm4137_vm9 = vcmask 261312  }
 0x2c7   : > { %v3110_v61 = vunpack.c.0.s8 %v3109_v57  ;;  %v2978_v38 = vld [vmem:[#allocation4 + $0x2b0] sm:$0xff]  ;;  %v2981_v29 = vld [vmem:[#allocation4 + $0x18] sm:$0xff]  ;;  %vm4144_vm10 = vcmask 326912   ;;  %vm4151_vm11 = vcmask 392512   ;;  %vm4158_vm12 = vcmask 458112   ;;  %s6199_s18 = sld [smem:[#allocation6 + %s7967_s6]] }
 0x2c8   : > { %v2582_v26 = vrot.slane %v2577_v32, %v9256_v49  ;;  %v2979_v27 = vld [vmem:[#allocation4 + $0x3b0] sm:$0xff]  ;;  %v2992_v32 = vld [vmem:[#allocation4 + $0x108] sm:$0xff]  ;;  %vm4165_vm13 = vcmask 523712   ;;  %vm4172_vm14 = vcmask 589312   ;;  %vm4179_vm15 = vcmask 654912   ;;  %s10656_s1 = sshll.u32 %s7967_s6, 7 }
 0x2c9   : > { %2854 = vmatpush1.bf16.msra.mxu0 %v7413_v56  ;;  %v9263_v42 = vsub.s32 %v3110_v61, %v9253_v46  ;;  %v2984_v23 = vld [vmem:[#allocation4 + $0x330] sm:$0xff]  ;;  %vm4186_vm0 = vcmask 720512   ;;  %vm4193_vm1 = vcmask 786112   ;;  %vm4200_vm2 = vcmask 851712   ;;  %s11333_s17 = sld [smem:[#allocation176_spill]]  ;;  %s6248_s28 = sshll.u32 %s8564_s27, 4  ;;  %s6249_s28 = int_to_ptr.vmem [resolvable:$true] %s6248_s28 }
 0x2ca   : > { %2855 = vmatprep.subr.bf16.mxu0 %v7414_v1  ;;  %v2987_v61 = vld [vmem:[#allocation4 + $0x110] sm:$0xff]  ;;  %vm4207_vm3 = vcmask 917312   ;;  %vm4214_vm4 = vcmask 982912   ;;  %vm4221_vm5 = vcmask 1048512   ;;  %vm10651_vm6 = vcmask 1041409   ;;  %s6220_s20 = scalar_lea.sflag [#allocation25], %s8276_s7 }
 0x2cb   : > { %s7843_s15 = scalar_lea.vmem %s6249_s28, 128  ;;  %s8000_s14 = smov [#allocation24]  }
 0x2cc   : > { %p7844_p11 = scmp.ne.s32.totalorder %s6249_s28, %s7843_s15 }
 0x2cd   : > { %2856 = vmatpush1.bf16.msra.mxu0 %v7416_v41 }
 0x2ce   : > { %2857 = vmatprep.subr.bf16.mxu0 %v7417_v62  ;;  %p7845_p3 = pnand %p7844_p11, %p8240_p4 }
 0x2cf   : > { %s6246_s3 = scalar_lea.hbm %s11333_s17, %s10656_s1 }
 0x2d0   : > { %p7846_p6 = pneg %p7845_p3 }
 0x2d1   : > { %2858 = vmatpush1.bf16.msra.mxu0 %v7419_v55 }
 0x2d2   : > { %2859 = vmatprep.subr.bf16.mxu0 %v7420_v33  ;;  %v2991_v33 = vld [vmem:[#allocation4 + $0x150] sm:$0xff] }
 0x2d5   : > { %2860 = vmatpush1.bf16.msra.mxu0 %v7422_v37  ;;  %v2985_v37 = vld [vmem:[#allocation4 + $0x48] sm:$0xff] }
 0x2d6   : > { %2861 = vmatprep.subr.bf16.mxu0 %v7423_v10 }
 0x2d9   : > { %2862 = vmatpush1.bf16.msra.mxu0 %v7425_v54 }
 0x2da   : > { %2863 = vmatprep.subr.bf16.mxu0 %v7426_v36 }
 0x2dd   : > { %2864 = vmatpush1.bf16.msra.mxu0 %v7428_v48 }
 0x2e0   : > { %2882 = vmatmul.mubr.bf16.vlgmr.msra.gmra.mxu0 %v9248_v3 }
 0x2e1   : > { %2963 = vmatprep.mubr.bf16.mxu0 %v10653_v53 }
 0x3a0   : > { %v2883_v30 = vpop.f32.mrf.mxu0 }
 0x3a1   : > { %v9265_v24 = vadd.f32 %v2883_v30, %v2582_v26 }
 0x3a2   : > { %v9267_v14 = vpop.f32.mrf.mxu0 }
 0x3a3   : > { %v3114_v12 = vrot.slane %v9265_v24, %v9263_v42 }
 0x3a4   : > { %v2887_v40 = vpop.f32.mrf.mxu0 }
 0x3a5   : > { %v9272_v59 = vrot.slane %v3114_v12, %v9263_v42  ;;  %v3122_v10 = vcombine.high %v3114_v12, %v3114_v12 }
 0x3a6   : > { %v2888_v34 = vpop.f32.mrf.mxu0 }
 0x3a7   : > { %v9276_v39 = vrot.slane %v9272_v59, %v9256_v49  ;;  %v9301_v26 = vrot.slane %v3122_v10, %v9263_v42  ;;  %v3152_v30 = vcombine.high %v9272_v59, %v9272_v59 }
 0x3a9   : > { %v3200_v47 = vadd.f32 %v9276_v39, %v2982_v11  ;;  %v3196_v9 = vadd.f32 %v9276_v39, %v2978_v38  ;;  %v3201_v45 = vadd.f32 %v9276_v39, %v2983_v17  ;;  %v3197_v31 = vadd.f32 %v9276_v39, %v2979_v27  ;;  %v2993_v27 = vld [vmem:[#allocation4 + $0x60] sm:$0xff] }
 0x3aa   : > { %v3204_v15 = vadd.f32 %v9276_v39, %v2986_v8  ;;  %v3198_v60 = vadd.f32 %v9276_v39, %v2980_v51  ;;  %v3207_v28 = vadd.f32 %v9276_v39, %v2989_v20  ;;  %v3199_v18 = vadd.f32 %v9276_v39, %v2981_v29 }
 0x3ab   : > { %v3328_v22 = vmax.f32 %v3200_v47, 0.0  ;;  %v3324_v50 = vmax.f32 %v3196_v9, 0.0  ;;  %v3329_v19 = vmax.f32 %v3201_v45, 0.0  ;;  %v3325_v13 = vmax.f32 %v3197_v31, 0.0  ;;  %v2988_v47 = vld [vmem:[#allocation4 + $0x118] sm:$0xff] }
 0x3ac   : > { %v3332_v25 = vmax.f32 %v3204_v15, 0.0  ;;  %v3326_v58 = vmax.f32 %v3198_v60, 0.0  ;;  %v3335_v56 = vmax.f32 %v3207_v28, 0.0  ;;  %v3208_v1 = vadd.f32 %v9276_v39, %v2990_v16  ;;  %v2994_v60 = vld [vmem:[#allocation4 + $0x2e0] sm:$0xff]  ;;  %v3012_v28 = vld [vmem:[#allocation4 + $0x158] sm:$0xff] }
 0x3ad   : > { %v3463_v4 = vmul.f32 %v9280_v7, %v3328_v22  ;;  %v3459_v63 = vmul.f32 %v9280_v7, %v3324_v50  ;;  %v3464_v44 = vmul.f32 %v9280_v7, %v3329_v19  ;;  %v3460_v52 = vmul.f32 %v9280_v7, %v3325_v13 }
 0x3ae   : > { %v3467_v41 = vmul.f32 %v9280_v7, %v3332_v25  ;;  %v3461_v62 = vmul.f32 %v9280_v7, %v3326_v58  ;;  %v3327_v21 = vmax.f32 %v3199_v18, 0.0  ;;  %v3202_v55 = vadd.f32 %v9276_v39, %v2984_v23 }
 0x3af   : > { %3595 = vadd.xlane.f32.xlu1 %v3463_v4  ;;  %3587 = vadd.xlane.f32.xlu0 %v3459_v63  ;;  %v3470_v54 = vmul.f32 %v9280_v7, %v3335_v56  ;;  %v3336_v36 = vmax.f32 %v3208_v1, 0.0  ;;  %v3209_v43 = vadd.f32 %v9276_v39, %v2991_v33  ;;  %v3203_v57 = vadd.f32 %v9276_v39, %v2985_v37  ;;  %v2998_v1 = vld [vmem:[#allocation4 + $0x80] sm:$0xff] }
 0x3b0   : > { %v3462_v48 = vmul.f32 %v9280_v7, %v3327_v21  ;;  %v3330_v0 = vmax.f32 %v3202_v55, 0.0  ;;  %v3210_v12 = vadd.f32 %v9276_v39, %v2992_v32  ;;  %v3205_v40 = vadd.f32 %v9276_v39, %v2987_v61 }
 0x3b1   : > { %v3471_v34 = vmul.f32 %v9280_v7, %v3336_v36  ;;  %v3337_v38 = vmax.f32 %v3209_v43, 0.0  ;;  %v3331_v17 = vmax.f32 %v3203_v57, 0.0  ;;  %v3107_v9 = vcombine.high %v9265_v24, %v9265_v24  ;;  %v3010_v24 = vld [vmem:[#allocation4 + $0x100] sm:$0xff] }
 0x3b2   : > { %v3465_v11 = vmul.f32 %v9280_v7, %v3330_v0  ;;  %v9313_v59 = vrot.slane %v9301_v26, %v9256_v49  ;;  %v9316_v8 = vrot.slane %v3152_v30, %v9256_v49  ;;  %v3338_v51 = vmax.f32 %v3210_v12, 0.0  ;;  %v3011_v36 = vld [vmem:[#allocation4 + $0x3c0] sm:$0xff] }
 0x3b3   : > { %3597 = vadd.xlane.f32.xlu1 %v3464_v44  ;;  %3589 = vadd.xlane.f32.xlu0 %v3460_v52  ;;  %v3211_v22 = vadd.f32 %v9276_v39, %v2993_v27  ;;  %v3472_v50 = vmul.f32 %v9280_v7, %v3337_v38  ;;  %v3466_v45 = vmul.f32 %v9280_v7, %v3331_v17  ;;  %v3333_v31 = vmax.f32 %v3205_v40, 0.0  ;;  %v2995_v44 = vld [vmem:[#allocation4 + $0x388] sm:$0xff]  ;;  %v2997_v12 = vld [vmem:[#allocation4 + $0x340] sm:$0xff] }
 0x3b4   : > { %v3206_v15 = vadd.f32 %v9276_v39, %v2988_v47  ;;  %v9323_v4 = vrot.slane %v3107_v9, %v9263_v42  ;;  %v3473_v63 = vmul.f32 %v9280_v7, %v3338_v51  ;;  %v3228_v29 = vadd.f32 %v9316_v8, %v3010_v24  ;;  %v2999_v40 = vld [vmem:[#allocation4 + $0x1a8] sm:$0xff]  ;;  %v3013_v9 = vld [vmem:[#allocation4 + $0x3e0] sm:$0xff]  ;;  %v3015_v51 = vld [vmem:[#allocation4 + $0x3f8] sm:$0xff] }
 0x3b5   : > { %v3339_v19 = vmax.f32 %v3211_v22, 0.0  ;;  %v3468_v13 = vmul.f32 %v9280_v7, %v3333_v31  ;;  %v3212_v25 = vadd.f32 %v9313_v59, %v2994_v60  ;;  %v3230_v58 = vadd.f32 %v9316_v8, %v3012_v28  ;;  %v3045_v60 = vld [vmem:[#allocation4 + $0x220] sm:$0xff] }
 0x3b6   : > { %v3334_v20 = vmax.f32 %v3206_v15, 0.0  ;;  %v9331_v39 = vrot.slane %v9323_v4, %v9263_v42  ;;  %v3356_v16 = vmax.f32 %v3228_v29, 0.0  ;;  %v3213_v56 = vadd.f32 %v9313_v59, %v2995_v44  ;;  %v3016_v44 = vld [vmem:[#allocation4 + $0x8] sm:$0xff] }
 0x3b7   : > { %3603 = vadd.xlane.f32.xlu1 %v3467_v41  ;;  %3591 = vadd.xlane.f32.xlu0 %v3461_v62  ;;  %v3474_v52 = vmul.f32 %v9280_v7, %v3339_v19  ;;  %v3340_v23 = vmax.f32 %v3212_v25, 0.0  ;;  %v2996_v41 = vld [vmem:[#allocation4 + $0x338] sm:$0xff]  ;;  %v3216_v21 = vadd.f32 %v9313_v59, %v2998_v1  ;;  %v3358_v10 = vmax.f32 %v3230_v58, 0.0 }
 0x3b8   : > { %v3469_v18 = vmul.f32 %v9280_v7, %v3334_v20  ;;  %v9339_v62 = vrot.slane %v9331_v39, %v9256_v49  ;;  %v3214_v55 = vadd.f32 %v9313_v59, %v2996_v41  ;;  %v3491_v33 = vmul.f32 %v9280_v7, %v3356_v16  ;;  %v3046_v41 = vld [vmem:[#allocation4 + $0x70] sm:$0xff] }
 0x3b9   : > { %v3475_v37 = vmul.f32 %v9280_v7, %v3340_v23  ;;  %v3344_v0 = vmax.f32 %v3216_v21, 0.0  ;;  %v3229_v43 = vadd.f32 %v9316_v8, %v3011_v36  ;;  %v3493_v57 = vmul.f32 %v9280_v7, %v3358_v10  ;;  %v3044_v21 = vld [vmem:[#allocation4 + $0x318] sm:$0xff] }
 0x3ba   : > { %v3342_v61 = vmax.f32 %v3214_v55, 0.0  ;;  %v3215_v27 = vadd.f32 %v9313_v59, %v2997_v12  ;;  %v3217_v47 = vadd.f32 %v9313_v59, %v2999_v40  ;;  %v3233_v24 = vadd.f32 %v9316_v8, %v3015_v51  ;;  %v3003_v40 = vld [vmem:[#allocation4 + $0x2f8] sm:$0xff]  ;;  %v3018_v51 = vld [vmem:[#allocation4 + $0x2a0] sm:$0xff] }
 0x3bb   : > { %3609 = vadd.xlane.f32.xlu1 %v3470_v54  ;;  %3593 = vadd.xlane.f32.xlu0 %v3462_v48  ;;  %v3341_v54 = vmax.f32 %v3213_v56, 0.0  ;;  %v3043_v48 = vld [vmem:[#allocation4 + $0x200] sm:$0xff]  ;;  %v3263_v19 = vadd.f32 %v9339_v62, %v3045_v60  ;;  %v3234_v58 = vadd.f32 %v9316_v8, %v3016_v44  ;;  %v3262_v36 = vadd.f32 %v9339_v62, %v3044_v21  ;;  %v3049_v21 = vld [vmem:[#allocation4 + $0x178] sm:$0xff] }
 0x3bc   : > { %v3261_v30 = vadd.f32 %v9339_v62, %v3043_v48  ;;  %v3477_v38 = vmul.f32 %v9280_v7, %v3342_v61  ;;  %v3343_v31 = vmax.f32 %v3215_v27, 0.0  ;;  %v3345_v15 = vmax.f32 %v3217_v47, 0.0  ;;  %v3002_v48 = vld [vmem:[#allocation4 + $0x3e8] sm:$0xff] }
 0x3bd   : > { %v3476_v32 = vmul.f32 %v9280_v7, %v3341_v54  ;;  %v3361_v28 = vmax.f32 %v3233_v24, 0.0  ;;  %v3391_v56 = vmax.f32 %v3263_v19, 0.0  ;;  %v3362_v55 = vmax.f32 %v3234_v58, 0.0  ;;  %v3047_v19 = vld [vmem:[#allocation4 + $0x300] sm:$0xff] }
 0x3be   : > { %v3389_v17 = vmax.f32 %v3261_v30, 0.0  ;;  %v3478_v20 = vmul.f32 %v9280_v7, %v3343_v31  ;;  %v3480_v29 = vmul.f32 %v9280_v7, %v3345_v15  ;;  %v3264_v54 = vadd.f32 %v9339_v62, %v3046_v41  ;;  %v3048_v58 = vld [vmem:[#allocation4 + $0xe0] sm:$0xff] }
 0x3bf   : > { %3611 = vadd.xlane.f32.xlu1 %v3471_v34  ;;  %3599 = vadd.xlane.f32.xlu0 %v3465_v11  ;;  %v3479_v34 = vmul.f32 %v9280_v7, %v3344_v0  ;;  %v3357_v11 = vmax.f32 %v3229_v43, 0.0  ;;  %v3496_v23 = vmul.f32 %v9280_v7, %v3361_v28  ;;  %v3000_v0 = vld [vmem:[#allocation4 + $0x1b8] sm:$0xff]  ;;  %v3497_v43 = vmul.f32 %v9280_v7, %v3362_v55  ;;  %v3020_v55 = vld [vmem:[#allocation4 + $0xa0] sm:$0xff] }
 0x3c0   : > { %v3390_v61 = vmax.f32 %v3262_v36, 0.0  ;;  %v3220_v30 = vadd.f32 %v9313_v59, %v3002_v48  ;;  %v3218_v12 = vadd.f32 %v9313_v59, %v3000_v0  ;;  %v3265_v44 = vadd.f32 %v9339_v62, %v3047_v19  ;;  %v3005_v0 = vld [vmem:[#allocation4 + $0x28] sm:$0xff]  ;;  %v3008_v19 = vld [vmem:[#allocation4 + $0x1c0] sm:$0xff] }
 0x3c1   : > { %v3492_v22 = vmul.f32 %v9280_v7, %v3357_v11  ;;  %v3221_v11 = vadd.f32 %v9313_v59, %v3003_v40  ;;  %v3266_v41 = vadd.f32 %v9339_v62, %v3048_v58 }
 0x3c2   : > { %v3525_v27 = vmul.f32 %v9280_v7, %v3390_v61  ;;  %v3348_v47 = vmax.f32 %v3220_v30, 0.0 }
 0x3c3   : > { %3613 = vadd.xlane.f32.xlu1 %v3472_v50  ;;  %3601 = vadd.xlane.f32.xlu0 %v3466_v45  ;;  %v3231_v50 = vadd.f32 %v9316_v8, %v3013_v9  ;;  %v3524_v45 = vmul.f32 %v9280_v7, %v3389_v17  ;;  %v3346_v9 = vmax.f32 %v3218_v12, 0.0  ;;  %v3349_v24 = vmax.f32 %v3221_v11, 0.0  ;;  %v3021_v11 = vld [vmem:[#allocation4 + $0x2c0] sm:$0xff] }
 0x3c4   : > { %v3483_v31 = vmul.f32 %v9280_v7, %v3348_v47  ;;  %v3394_v48 = vmax.f32 %v3266_v41, 0.0 }
 0x3c5   : > { %v3359_v25 = vmax.f32 %v3231_v50, 0.0  ;;  %v3236_v50 = vadd.f32 %v9316_v8, %v3018_v51  ;;  %v3481_v15 = vmul.f32 %v9280_v7, %v3346_v9  ;;  %v3239_v51 = vadd.f32 %v9316_v8, %v3021_v11 }
 0x3c6   : > { %v3529_v30 = vmul.f32 %v9280_v7, %v3394_v48 }
 0x3c7   : > { %3615 = vadd.xlane.f32.xlu1 %v3473_v63  ;;  %3605 = vadd.xlane.f32.xlu0 %v3468_v13  ;;  %v3042_v63 = vld [vmem:[#allocation4 + $0x130] sm:$0xff]  ;;  %v3494_v16 = vmul.f32 %v9280_v7, %v3359_v25 }
 0x3c8   : > { %v3260_v13 = vadd.f32 %v9339_v62, %v3042_v63  ;;  %v3004_v63 = vld [vmem:[#allocation4 + $0x290] sm:$0xff] }
 0x3c9   : > { %v3222_v28 = vadd.f32 %v9313_v59, %v3004_v63 }
 0x3ca   : > { %v3388_v1 = vmax.f32 %v3260_v13, 0.0  ;;  %v3364_v13 = vmax.f32 %v3236_v50, 0.0  ;;  %v3051_v50 = vld [vmem:[#allocation4 + $0x260] sm:$0xff] }
 0x3cb   : > { %3617 = vadd.xlane.f32.xlu1 %v3474_v52  ;;  %3607 = vadd.xlane.f32.xlu0 %v3469_v18  ;;  %v3014_v52 = vld [vmem:[#allocation4 + $0x218] sm:$0xff]  ;;  %v3269_v63 = vadd.f32 %v9339_v62, %v3051_v50 }
 0x3cc   : > { %v3232_v18 = vadd.f32 %v9316_v8, %v3014_v52  ;;  %v3523_v10 = vmul.f32 %v9280_v7, %v3388_v1  ;;  %v3019_v52 = vld [vmem:[#allocation4 + $0x3f0] sm:$0xff] }
 0x3cd   : > { %v3237_v1 = vadd.f32 %v9316_v8, %v3019_v52  ;;  %v3397_v58 = vmax.f32 %v3269_v63, 0.0 }
 0x3cf   : > { %3651 = vadd.xlane.f32.xlu0 %v3491_v33  ;;  %3619 = vadd.xlane.f32.xlu1 %v3475_v37  ;;  %v3360_v33 = vmax.f32 %v3232_v18, 0.0  ;;  %v3526_v37 = vmul.f32 %v9280_v7, %v3391_v56  ;;  %v3499_v18 = vmul.f32 %v9280_v7, %v3364_v13  ;;  %v3393_v56 = vmax.f32 %v3265_v44, 0.0  ;;  %v3022_v13 = vld [vmem:[#allocation4 + $0xb0] sm:$0xff] }
 0x3d0   : > { %v3365_v36 = vmax.f32 %v3237_v1, 0.0  ;;  %v3532_v41 = vmul.f32 %v9280_v7, %v3397_v58 }
 0x3d2   : > { %v3500_v61 = vmul.f32 %v9280_v7, %v3365_v36 }
 0x3d3   : > { %3655 = vadd.xlane.f32.xlu0 %v3493_v57  ;;  %3621 = vadd.xlane.f32.xlu1 %v3476_v32  ;;  %v3495_v57 = vmul.f32 %v9280_v7, %v3360_v33  ;;  %v3392_v32 = vmax.f32 %v3264_v54, 0.0  ;;  %v3267_v33 = vadd.f32 %v9339_v62, %v3049_v21  ;;  %v3528_v54 = vmul.f32 %v9280_v7, %v3393_v56 }
 0x3d5   : > { %v3527_v17 = vmul.f32 %v9280_v7, %v3392_v32  ;;  %v3395_v12 = vmax.f32 %v3267_v33, 0.0  ;;  %v3027_v33 = vld [vmem:[#allocation4 + $0x240] sm:$0xff] }
 0x3d7   : > { %3627 = vadd.xlane.f32.xlu0 %v3479_v34  ;;  %3623 = vadd.xlane.f32.xlu1 %v3477_v38  ;;  %v3001_v34 = vld [vmem:[#allocation4 + $0x168] sm:$0xff] }
 0x3d8   : > { %v3219_v38 = vadd.f32 %v9313_v59, %v3001_v34  ;;  %v3006_v34 = vld [vmem:[#allocation4 + $0x138] sm:$0xff] }
 0x3d9   : > { %v3224_v9 = vadd.f32 %v9313_v59, %v3006_v34 }
 0x3da   : > { %v3347_v60 = vmax.f32 %v3219_v38, 0.0 }
 0x3db   : > { %3653 = vadd.xlane.f32.xlu1 %v3492_v22  ;;  %3717 = vadd.xlane.f32.xlu0 %v3524_v45  ;;  %v3017_v22 = vld [vmem:[#allocation4 + $0x128] sm:$0xff] }
 0x3dc   : > { %v3235_v45 = vadd.f32 %v9316_v8, %v3017_v22  ;;  %v3482_v25 = vmul.f32 %v9280_v7, %v3347_v60  ;;  %v3007_v22 = vld [vmem:[#allocation4 + $0xc0] sm:$0xff] }
 0x3dd   : > { %v3225_v60 = vadd.f32 %v9313_v59, %v3007_v22 }
 0x3df   : > { %3625 = vadd.xlane.f32.xlu1 %v3478_v20  ;;  %3629 = vadd.xlane.f32.xlu0 %v3480_v29  ;;  %v3363_v20 = vmax.f32 %v3235_v45, 0.0  ;;  %v3484_v29 = vmul.f32 %v9280_v7, %v3349_v24  ;;  %v3367_v24 = vmax.f32 %v3239_v51, 0.0  ;;  %v3353_v52 = vmax.f32 %v3225_v60, 0.0 }
 0x3e1   : > { %v3502_v44 = vmul.f32 %v9280_v7, %v3367_v24  ;;  %v3488_v1 = vmul.f32 %v9280_v7, %v3353_v52  ;;  %v3058_v24 = vld [vmem:[#allocation4 + $0x288] sm:$0xff] }
 0x3e3   : > { %3657 = vadd.xlane.f32.xlu1 %v3494_v16  ;;  %3661 = vadd.xlane.f32.xlu0 %v3496_v23  ;;  %v3498_v16 = vmul.f32 %v9280_v7, %v3363_v20  ;;  %v3350_v23 = vmax.f32 %v3222_v28, 0.0  ;;  %v3154_v20 = vcombine.high %v9301_v26, %v9301_v26 }
 0x3e7   : > { %3721 = vadd.xlane.f32.xlu0 %v3526_v37  ;;  %3715 = vadd.xlane.f32.xlu1 %v3523_v10  ;;  %v3238_v37 = vadd.f32 %v9316_v8, %v3020_v55  ;;  %v3485_v10 = vmul.f32 %v9280_v7, %v3350_v23  ;;  %v9412_v23 = vrot.slane %v3154_v20, %v9256_v49 }
 0x3e9   : > { %v3366_v40 = vmax.f32 %v3238_v37, 0.0  ;;  %v3023_v37 = vld [vmem:[#allocation4 + $0x1e0] sm:$0xff] }
 0x3eb   : > { %3663 = vadd.xlane.f32.xlu0 %v3497_v43  ;;  %3659 = vadd.xlane.f32.xlu1 %v3495_v57  ;;  %v3050_v43 = vld [vmem:[#allocation4 + $0x328] sm:$0xff]  ;;  %v3223_v57 = vadd.f32 %v9313_v59, %v3005_v0  ;;  %v3501_v47 = vmul.f32 %v9280_v7, %v3366_v40  ;;  %v3245_v0 = vadd.f32 %v9412_v23, %v3027_v33 }
 0x3ec   : > { %v3268_v32 = vadd.f32 %v9339_v62, %v3050_v43  ;;  %v3241_v43 = vadd.f32 %v9316_v8, %v3023_v37 }
 0x3ed   : > { %v3351_v38 = vmax.f32 %v3223_v57, 0.0  ;;  %v3028_v57 = vld [vmem:[#allocation4 + $0x90] sm:$0xff] }
 0x3ee   : > { %v3369_v40 = vmax.f32 %v3241_v43, 0.0  ;;  %v3246_v34 = vadd.f32 %v9412_v23, %v3028_v57 }
 0x3ef   : > { %3723 = vadd.xlane.f32.xlu0 %v3527_v17  ;;  %3719 = vadd.xlane.f32.xlu1 %v3525_v27  ;;  %v3396_v17 = vmax.f32 %v3268_v32, 0.0  ;;  %v3530_v27 = vmul.f32 %v9280_v7, %v3395_v12  ;;  %v3486_v45 = vmul.f32 %v9280_v7, %v3351_v38  ;;  %v3053_v32 = vld [vmem:[#allocation4 + $0x2b8] sm:$0xff]  ;;  %v3373_v12 = vmax.f32 %v3245_v0, 0.0  ;;  %v3029_v38 = vld [vmem:[#allocation4 + $0x3a0] sm:$0xff] }
 0x3f0   : > { %v3271_v11 = vadd.f32 %v9339_v62, %v3053_v32  ;;  %v3504_v50 = vmul.f32 %v9280_v7, %v3369_v40  ;;  %v3059_v32 = vld [vmem:[#allocation4 + $0x3a8] sm:$0xff]  ;;  %v9461_v40 = vand.u32 127, %v2579_v35 }
 0x3f1   : > { %v3508_v22 = vmul.f32 %v9280_v7, %v3373_v12 }
 0x3f3   : > { %3635 = vadd.xlane.f32.xlu0 %v3483_v31  ;;  %3631 = vadd.xlane.f32.xlu1 %v3481_v15  ;;  %v3531_v31 = vmul.f32 %v9280_v7, %v3396_v17  ;;  %v3352_v15 = vmax.f32 %v3224_v9, 0.0  ;;  %v3024_v17 = vld [vmem:[#allocation4 + $0x1f0] sm:$0xff]  ;;  %v3247_v9 = vadd.f32 %v9412_v23, %v3029_v38 }
 0x3f4   : > { %v3242_v51 = vadd.f32 %v9316_v8, %v3024_v17 }
 0x3f5   : > { %v3487_v28 = vmul.f32 %v9280_v7, %v3352_v15  ;;  %v3054_v15 = vld [vmem:[#allocation4 + $0x248] sm:$0xff]  ;;  %v3375_v20 = vmax.f32 %v3247_v9, 0.0  ;;  %v9467_v9 = vpop.permute.xlu1 %3850 }
 0x3f6   : > { %v3272_v60 = vadd.f32 %v9339_v62, %v3054_v15 }
 0x3f7   : > { %3637 = vadd.xlane.f32.xlu0 %v3484_v29  ;;  %3633 = vadd.xlane.f32.xlu1 %v3482_v25  ;;  %v3226_v29 = vadd.f32 %v9313_v59, %v3008_v19  ;;  %v3240_v25 = vadd.f32 %v9316_v8, %v3022_v13  ;;  %v3510_v58 = vmul.f32 %v9280_v7, %v3375_v20 }
 0x3f9   : > { %v3354_v21 = vmax.f32 %v3226_v29, 0.0  ;;  %v3368_v55 = vmax.f32 %v3240_v25, 0.0  ;;  %v3370_v29 = vmax.f32 %v3242_v51, 0.0  ;;  %v3025_v25 = vld [vmem:[#allocation4 + $0x10] sm:$0xff] }
 0x3fa   : > { %v3033_v51 = vld [vmem:[#allocation4 + $0x2f0] sm:$0xff] }
 0x3fb   : > { %3667 = vadd.xlane.f32.xlu0 %v3499_v18  ;;  %3665 = vadd.xlane.f32.xlu1 %v3498_v16  ;;  %v3009_v18 = vld [vmem:[#allocation4 + $0x280] sm:$0xff]  ;;  %v3052_v16 = vld [vmem:[#allocation4 + $0x3b8] sm:$0xff]  ;;  %v3489_v48 = vmul.f32 %v9280_v7, %v3354_v21 }
 0x3fc   : > { %v3227_v56 = vadd.f32 %v9313_v59, %v3009_v18  ;;  %v3270_v26 = vadd.f32 %v9339_v62, %v3052_v16  ;;  %v3503_v59 = vmul.f32 %v9280_v7, %v3368_v55  ;;  %v3505_v18 = vmul.f32 %v9280_v7, %v3370_v29 }
 0x3fd   : > { %v3243_v16 = vadd.f32 %v9316_v8, %v3025_v25 }
 0x3fe   : > { %v3398_v36 = vmax.f32 %v3270_v26, 0.0  ;;  %v3055_v26 = vld [vmem:[#allocation4 + $0x40] sm:$0xff] }
 0x3ff   : > { %3639 = vadd.xlane.f32.xlu0 %v3485_v10  ;;  %3725 = vadd.xlane.f32.xlu1 %v3528_v54  ;;  %v3123_v10 = vcombine.high %v9323_v4, %v9323_v4  ;;  %v3355_v54 = vmax.f32 %v3227_v56, 0.0  ;;  %v3371_v55 = vmax.f32 %v3243_v16, 0.0  ;;  %v3273_v37 = vadd.f32 %v9339_v62, %v3055_v26 }
 0x400   : > { %v3533_v4 = vmul.f32 %v9280_v7, %v3398_v36  ;;  %v3032_v36 = vld [vmem:[#allocation4 + $0x88] sm:$0xff]  ;;  %v9487_v26 = vsub.s32 %v9461_v40, %v9253_v46 }
 0x401   : > { %v3401_v43 = vmax.f32 %v3273_v37, 0.0 }
 0x403   : > { %3669 = vadd.xlane.f32.xlu0 %v3500_v61  ;;  %3727 = vadd.xlane.f32.xlu1 %v3529_v30  ;;  %v9425_v61 = vrot.slane %v3123_v10, %v9263_v42  ;;  %v3490_v30 = vmul.f32 %v9280_v7, %v3355_v54  ;;  %v3026_v54 = vld [vmem:[#allocation4 + $0x230] sm:$0xff] }
 0x404   : > { %v3244_v8 = vadd.f32 %v9412_v23, %v3026_v54 }
 0x407   : > { %3729 = vadd.xlane.f32.xlu0 %v3530_v27  ;;  %3671 = vadd.xlane.f32.xlu1 %v3501_v47  ;;  %v3153_v27 = vcombine.high %v9331_v39, %v9331_v39  ;;  %v9435_v47 = vrot.slane %v9425_v61, %v9256_v49 }
 0x409   : > { %v9442_v39 = vrot.slane %v3153_v27, %v9256_v49  ;;  %v3276_v63 = vadd.f32 %v9435_v47, %v3058_v24  ;;  %v3277_v38 = vadd.f32 %v9435_v47, %v3059_v32  ;;  %v3030_v27 = vld [vmem:[#allocation4 + $0x208] sm:$0xff]  ;;  %v3251_v24 = vadd.f32 %v9412_v23, %v3033_v51 }
 0x40a   : > { %v3248_v35 = vadd.f32 %v9412_v23, %v3030_v27 }
 0x40b   : > { %3641 = vadd.xlane.f32.xlu0 %v3486_v45  ;;  %3731 = vadd.xlane.f32.xlu1 %v3531_v31  ;;  %v3374_v45 = vmax.f32 %v3246_v34, 0.0  ;;  %v3399_v31 = vmax.f32 %v3271_v11, 0.0  ;;  %v3404_v52 = vmax.f32 %v3276_v63, 0.0  ;;  %v3536_v34 = vmul.f32 %v9280_v7, %v3401_v43 }
 0x40c   : > { %v4146_v63 = vadd.s32 4294967256, %v9461_v40  ;;  %v3379_v16 = vmax.f32 %v3251_v24, 0.0 }
 0x40d   : > { %v3509_v19 = vmul.f32 %v9280_v7, %v3374_v45  ;;  %v3534_v13 = vmul.f32 %v9280_v7, %v3399_v31  ;;  %v3539_v21 = vmul.f32 %v9280_v7, %v3404_v52  ;;  %v3405_v31 = vmax.f32 %v3277_v38, 0.0  ;;  %v3075_v52 = vld [vmem:[#allocation4 + $0x238] sm:$0xff] }
 0x40f   : > { %3643 = vadd.xlane.f32.xlu0 %v3487_v28  ;;  %3673 = vadd.xlane.f32.xlu1 %v3502_v44  ;;  %v3074_v28 = vld [vmem:[#allocation4 + $0x1f8] sm:$0xff]  ;;  %v3400_v44 = vmax.f32 %v3272_v60, 0.0  ;;  %v3060_v60 = vld [vmem:[#allocation4 + $0x3c8] sm:$0xff] }
 0x410   : > { %v3292_v56 = vadd.f32 %v9442_v39, %v3074_v28  ;;  %v3376_v28 = vmax.f32 %v3248_v35, 0.0 }
 0x412   : > { %v3420_v33 = vmax.f32 %v3292_v56, 0.0 }
 0x413   : > { %3645 = vadd.xlane.f32.xlu0 %v3488_v1  ;;  %3733 = vadd.xlane.f32.xlu1 %v3532_v41  ;;  %v3076_v1 = vld [vmem:[#allocation4 + $0x398] sm:$0xff]  ;;  %v3535_v41 = vmul.f32 %v9280_v7, %v3400_v44  ;;  %v3278_v44 = vadd.f32 %v9435_v47, %v3060_v60 }
 0x414   : > { %v3294_v10 = vadd.f32 %v9442_v39, %v3076_v1  ;;  %v3555_v0 = vmul.f32 %v9280_v7, %v3420_v33  ;;  %v9490_v1 = vsub.s32 %v4146_v63, %v9253_v46 }
 0x416   : > { %v3422_v57 = vmax.f32 %v3294_v10, 0.0  ;;  %v3293_v10 = vadd.f32 %v9442_v39, %v3075_v52 }
 0x417   : > { %3647 = vadd.xlane.f32.xlu0 %v3489_v48  ;;  %3675 = vadd.xlane.f32.xlu1 %v3503_v59  ;;  %v3250_v48 = vadd.f32 %v9412_v23, %v3032_v36  ;;  %v3506_v59 = vmul.f32 %v9280_v7, %v3371_v55  ;;  %v3078_v55 = vld [vmem:[#allocation4 + $0x1a0] sm:$0xff] }
 0x418   : > { %v3557_v11 = vmul.f32 %v9280_v7, %v3422_v57  ;;  %v3514_v57 = vmul.f32 %v9280_v7, %v3379_v16  ;;  %v3421_v27 = vmax.f32 %v3293_v10, 0.0  ;;  %v3077_v10 = vld [vmem:[#allocation4 + $0x390] sm:$0xff] }
 0x419   : > { %v3378_v12 = vmax.f32 %v3250_v48, 0.0  ;;  %v3406_v48 = vmax.f32 %v3278_v44, 0.0  ;;  %v4153_v44 = vadd.s32 4294967248, %v9461_v40 }
 0x41b   : > { %3649 = vadd.xlane.f32.xlu0 %v3490_v30  ;;  %3735 = vadd.xlane.f32.xlu1 %v3533_v4  ;;  %v3062_v30 = vld [vmem:[#allocation4 + $0x2c8] sm:$0xff]  ;;  %v3372_v4 = vmax.f32 %v3244_v8, 0.0  ;;  %v3513_v45 = vmul.f32 %v9280_v7, %v3378_v12  ;;  %v3511_v8 = vmul.f32 %v9280_v7, %v3376_v28  ;;  %v3541_v35 = vmul.f32 %v9280_v7, %v3406_v48 }
 0x41c   : > { %v3280_v17 = vadd.f32 %v9435_v47, %v3062_v30  ;;  %v3296_v30 = vadd.f32 %v9442_v39, %v3078_v55  ;;  %v4195_v28 = vadd.s32 4294967200, %v9461_v40 }
 0x41e   : > { %v3408_v15 = vmax.f32 %v3280_v17, 0.0  ;;  %v3424_v63 = vmax.f32 %v3296_v30, 0.0 }
 0x41f   : > { %3685 = vadd.xlane.f32.xlu0 %v3508_v22  ;;  %3677 = vadd.xlane.f32.xlu1 %v3504_v50  ;;  %v3507_v22 = vmul.f32 %v9280_v7, %v3372_v4  ;;  %v4139_v50 = vadd.s32 4294967264, %v9461_v40  ;;  %v3034_v4 = vld [vmem:[#allocation4 + $0x358] sm:$0xff] }
 0x421   : > { %v9477_v20 = vsub.s32 %v4139_v50, %v9253_v46 }
 0x423   : > { %3687 = vadd.xlane.f32.xlu0 %v3509_v19  ;;  %3737 = vadd.xlane.f32.xlu1 %v3534_v13  ;;  %v3063_v19 = vld [vmem:[#allocation4 + $0x210] sm:$0xff]  ;;  %v4118_v13 = vadd.s32 4294967288, %v9461_v40 }
 0x424   : > { %v3281_v56 = vadd.f32 %v9435_v47, %v3063_v19  ;;  %v3061_v19 = vld [vmem:[#allocation4 + $0x160] sm:$0xff] }
 0x425   : > { %v9496_v37 = vsub.s32 %v4118_v13, %v9253_v46  ;;  %v3064_v13 = vld [vmem:[#allocation4 + $0x3d8] sm:$0xff]  ;;  %v3279_v55 = vadd.f32 %v9435_v47, %v3061_v19 }
 0x426   : > { %v3409_v32 = vmax.f32 %v3281_v56, 0.0 }
 0x427   : > { %3689 = vadd.xlane.f32.xlu0 %v3510_v58  ;;  %3679 = vadd.xlane.f32.xlu1 %v3505_v18  ;;  %v3540_v58 = vmul.f32 %v9280_v7, %v3405_v31  ;;  %v3543_v18 = vmul.f32 %v9280_v7, %v3408_v15  ;;  %v3252_v31 = vadd.f32 %v9412_v23, %v3034_v4 }
 0x428   : > { %v3544_v60 = vmul.f32 %v9280_v7, %v3409_v32  ;;  %v3035_v32 = vld [vmem:[#allocation4 + $0x268] sm:$0xff]  ;;  %v3295_v4 = vadd.f32 %v9442_v39, %v3077_v10 }
 0x42b   : > { %3739 = vadd.xlane.f32.xlu1 %v3535_v41  ;;  %3747 = vadd.xlane.f32.xlu0 %v3539_v21  ;;  %v4167_v41 = vadd.s32 4294967232, %v9461_v40  ;;  %v4125_v21 = vadd.s32 4294967280, %v9461_v40 }
 0x42d   : > { %v9505_v12 = vsub.s32 %v4167_v41, %v9253_v46 }
 0x42f   : > { %3681 = vadd.xlane.f32.xlu1 %v3506_v59  ;;  %3779 = vadd.xlane.f32.xlu0 %v3555_v0  ;;  %v4188_v59 = vadd.s32 4294967208, %v9461_v40  ;;  %v3031_v0 = vld [vmem:[#allocation4 + $0xd0] sm:$0xff] }
 0x430   : > { %v3249_v51 = vadd.f32 %v9412_v23, %v3031_v0  ;;  %v9542_v0 = vsub.s32 %v4195_v28, %v9253_v46  ;;  %v3065_v28 = vld [vmem:[#allocation4 + $0x1e8] sm:$0xff] }
 0x433   : > { %3741 = vadd.xlane.f32.xlu1 %v3536_v34  ;;  %3783 = vadd.xlane.f32.xlu0 %v3557_v11  ;;  %v9508_v34 = vsub.s32 %v4125_v21, %v9253_v46  ;;  %v4132_v11 = vadd.s32 4294967272, %v9461_v40  ;;  %v3380_v21 = vmax.f32 %v3252_v31, 0.0 }
 0x437   : > { %3683 = vadd.xlane.f32.xlu1 %v3507_v22  ;;  %3695 = vadd.xlane.f32.xlu0 %v3513_v45  ;;  %v9518_v45 = vsub.s32 %v4188_v59, %v9253_v46  ;;  %v3559_v59 = vmul.f32 %v9280_v7, %v3424_v63 }
 0x438   : > { %v9479_v29 = vpop.xlane.xlu1 %3595  ;;  %v3588_v25 = vpop.xlane.xlu0 %3587 }
 0x439   : > { %v3853_v33 = vadd.f32 %v9467_v9, %v3588_v25  ;;  %v9525_v25 = vsub.s32 %v4132_v11, %v9253_v46  ;;  %v3857_v16 = vadd.f32 %v9467_v9, %v9479_v29  ;;  %v9545_v29 = vsub.s32 %v4153_v44, %v9253_v46 }
 0x43b   : > { %3749 = vadd.xlane.f32.xlu1 %v3540_v58  ;;  %3755 = vadd.xlane.f32.xlu0 %v3543_v18  ;;  %v4117_v38 = vrot.slane %v3853_v33, %v9487_v26  ;;  %v3556_v58 = vmul.f32 %v9280_v7, %v3421_v27  ;;  %v3377_v18 = vmax.f32 %v3249_v51, 0.0  ;;  %v3282_v33 = vadd.f32 %v9435_v47, %v3064_v13 }
 0x43c   : > { %v3598_v54 = vpop.xlane.xlu1 %3597  ;;  %v3590_v36 = vpop.xlane.xlu0 %3589  ;;  %v4143_v11 = vrot.slane %v3857_v16, %v9477_v20  ;;  %v3515_v27 = vmul.f32 %v9280_v7, %v3380_v21  ;;  %v3407_v51 = vmax.f32 %v3279_v55, 0.0 }
 0x43d   : > { %v3854_v43 = vadd.f32 %v9467_v9, %v3590_v36  ;;  %v3858_v36 = vadd.f32 %v9467_v9, %v3598_v54  ;;  %v3512_v54 = vmul.f32 %v9280_v7, %v3377_v18  ;;  %v3423_v18 = vmax.f32 %v3295_v4, 0.0 }
 0x43e   : > { %v3542_v55 = vmul.f32 %v9280_v7, %v3407_v51 }
 0x43f   : > { %v4122_v17 = vrot.slane %v3854_v43, %v9496_v37  ;;  %3691 = vadd.xlane.f32.xlu1 %v3511_v8  ;;  %3697 = vadd.xlane.f32.xlu0 %v3514_v57  ;;  %v4202_v43 = vadd.s32 4294967192, %v9461_v40  ;;  %v4160_v57 = vadd.s32 4294967240, %v9461_v40 }
 0x440   : > { %v9514_v22 = vpop.xlane.xlu1 %3603  ;;  %v3592_v50 = vpop.xlane.xlu0 %3591 }
 0x441   : > { %v4124_v15 = vsel %vm4123_vm7, %v4122_v17, %v4117_v38  ;;  %v3855_v24 = vadd.f32 %v9467_v9, %v3592_v50  ;;  %v3410_v50 = vmax.f32 %v3282_v33, 0.0  ;;  %v9562_v19 = vsub.s32 %v4202_v43, %v9253_v46  ;;  %v3080_v43 = vld [vmem:[#allocation4 + $0x258] sm:$0xff] }
 0x442   : > { %v9565_v13 = vsub.s32 %v4160_v57, %v9253_v46  ;;  %v3861_v16 = vadd.f32 %v9467_v9, %v9514_v22  ;;  %v3036_v57 = vld [vmem:[#allocation4 + $0x350] sm:$0xff]  ;;  %v4216_v22 = vadd.s32 4294967176, %v9461_v40 }
 0x443   : > { %v4129_v52 = vrot.slane %v3855_v24, %v9508_v34  ;;  %3751 = vadd.xlane.f32.xlu1 %v3541_v35  ;;  %3757 = vadd.xlane.f32.xlu0 %v3544_v60  ;;  %v4150_v35 = vrot.slane %v3858_v36, %v9490_v1  ;;  %v3253_v24 = vadd.f32 %v9412_v23, %v3035_v32  ;;  %v3079_v60 = vld [vmem:[#allocation4 + $0xa8] sm:$0xff]  ;;  %v4209_v32 = vadd.s32 4294967184, %v9461_v40 }
 0x444   : > { %v9533_v56 = vpop.xlane.xlu1 %3609  ;;  %v3594_v41 = vpop.xlane.xlu0 %3593  ;;  %v3545_v33 = vmul.f32 %v9280_v7, %v3410_v50  ;;  %v3297_v10 = vadd.f32 %v9442_v39, %v3079_v60 }
 0x445   : > { %v4131_v8 = vsel %vm4130_vm8, %v4129_v52, %v4124_v15  ;;  %v3856_v48 = vadd.f32 %v9467_v9, %v3594_v41 }
 0x446   : > { %v3425_v50 = vmax.f32 %v3297_v10, 0.0  ;;  %v3082_v10 = vld [vmem:[#allocation4 + $0xf0] sm:$0xff] }
 0x447   : > { %v4136_v30 = vrot.slane %v3856_v48, %v9525_v25  ;;  %3781 = vadd.xlane.f32.xlu1 %v3556_v58  ;;  %3787 = vadd.xlane.f32.xlu0 %v3559_v59  ;;  %v4174_v58 = vadd.s32 4294967224, %v9461_v40  ;;  %v3381_v48 = vmax.f32 %v3253_v24, 0.0  ;;  %v3283_v59 = vadd.f32 %v9435_v47, %v3065_v28  ;;  %v3066_v24 = vld [vmem:[#allocation4 + $0x1b0] sm:$0xff]  ;;  %v9591_v28 = vld [vmem:[#allocation16] ss:$0 sm:$0xff] }
 0x448   : > { %v9553_v38 = vpop.xlane.xlu1 %3611  ;;  %v3600_v17 = vpop.xlane.xlu0 %3599 }
 0x449   : > { %v4138_v31 = vsel %vm4137_vm9, %v4136_v30, %v4131_v8  ;;  %v3859_v15 = vadd.f32 %v9467_v9, %v3600_v17  ;;  %v4181_v30 = vadd.s32 4294967216, %v9461_v40  ;;  %v9583_v4 = vsub.s32 %v4174_v58, %v9253_v46 }
 0x44a   : > { %v4145_v63 = vsel %vm4144_vm10, %v4143_v11, %v4138_v31  ;;  %v3558_v11 = vmul.f32 %v9280_v7, %v3423_v18  ;;  %v4171_v17 = vrot.slane %v3861_v16, %v9505_v12  ;;  %v3254_v31 = vadd.f32 %v9412_v23, %v3036_v57 }
 0x44b   : > { %v4152_v44 = vsel %vm4151_vm11, %v4150_v35, %v4145_v63  ;;  %v4157_v52 = vrot.slane %v3859_v15, %v9545_v29  ;;  %3693 = vadd.xlane.f32.xlu1 %v3512_v54  ;;  %3699 = vadd.xlane.f32.xlu0 %v3515_v27  ;;  %v3298_v35 = vadd.f32 %v9442_v39, %v3080_v43  ;;  %v3081_v15 = vld [vmem:[#allocation4 + $0x2d8] sm:$0xff]  ;;  %v3411_v7 = vmax.f32 %v3283_v59, 0.0 }
 0x44c   : > { %v3614_v41 = vpop.xlane.xlu1 %3613  ;;  %v3602_v21 = vpop.xlane.xlu0 %3601  ;;  %v9599_v18 = vsub.s32 %v4216_v22, %v9253_v46  ;;  %v9602_v16 = vsub.s32 %v4181_v30, %v9253_v46  ;;  %v3560_v59 = vmul.f32 %v9591_v28, %v3425_v50  ;;  %v3382_v57 = vmax.f32 %v3254_v31, 0.0 }
 0x44d   : > { %v4159_v36 = vsel %vm4158_vm12, %v4157_v52, %v4152_v44  ;;  %v3860_v8 = vadd.f32 %v9467_v9, %v3602_v21  ;;  %v3516_v44 = vmul.f32 %v9591_v28, %v3381_v48  ;;  %v9595_v52 = vsub.s32 %v4209_v32, %v9253_v46  ;;  %v3037_v32 = vld [vmem:[#allocation4 + $0x188] sm:$0xff] }
 0x44e   : > { %v3426_v43 = vmax.f32 %v3298_v35, 0.0  ;;  %v3865_v22 = vadd.f32 %v9467_v9, %v9553_v38  ;;  %v3255_v38 = vadd.f32 %v9412_v23, %v3037_v32 }
 0x44f   : > { %v4164_v54 = vrot.slane %v3860_v8, %v9565_v13  ;;  %3753 = vadd.xlane.f32.xlu1 %v3542_v55  ;;  %3759 = vadd.xlane.f32.xlu0 %v3545_v33  ;;  %v3299_v55 = vadd.f32 %v9442_v39, %v3081_v15  ;;  %v3284_v33 = vadd.f32 %v9435_v47, %v3066_v24 }
 0x450   : > { %v3616_v27 = vpop.xlane.xlu1 %3615  ;;  %v3606_v51 = vpop.xlane.xlu0 %3605 }
 0x451   : > { %v4166_v60 = vsel %vm4165_vm13, %v4164_v54, %v4159_v36  ;;  %v3862_v63 = vadd.f32 %v9467_v9, %v3606_v51  ;;  %v3864_v36 = vadd.f32 %v9467_v9, %v9533_v56  ;;  %v3300_v56 = vadd.f32 %v9442_v39, %v3082_v10 }
 0x452   : > { %v4173_v58 = vsel %vm4172_vm14, %v4171_v17, %v4166_v60  ;;  %v3866_v17 = vadd.f32 %v9467_v9, %v3614_v41  ;;  %v3867_v51 = vadd.f32 %v9467_v9, %v3616_v27  ;;  %v3427_v41 = vmax.f32 %v3299_v55, 0.0 }
 0x453   : > { %v4178_v21 = vrot.slane %v3862_v63, %v9583_v4  ;;  %3785 = vadd.xlane.f32.xlu1 %v3558_v11  ;;  %3701 = vadd.xlane.f32.xlu0 %v3516_v44  ;;  %v3546_v11 = vmul.f32 %v9591_v28, %v3411_v7  ;;  %v4192_v35 = vrot.slane %v3864_v36, %v9518_v45  ;;  %v3412_v60 = vmax.f32 %v3284_v33, 0.0  ;;  %v3083_v36 = vld [vmem:[#allocation4 + $0x180] sm:$0xff] }
 0x454   : > { %v3618_v8 = vpop.xlane.xlu1 %3617  ;;  %v3608_v48 = vpop.xlane.xlu0 %3607  ;;  %v4199_v63 = vrot.slane %v3865_v22, %v9542_v0  ;;  %v3561_v27 = vmul.f32 %v9591_v28, %v3426_v43  ;;  %v3517_v7 = vmul.f32 %v9591_v28, %v3382_v57  ;;  %v3428_v10 = vmax.f32 %v3300_v56, 0.0  ;;  %v3084_v56 = vld [vmem:[#allocation4 + $0x170] sm:$0xff] }
 0x455   : > { %v4180_v30 = vsel %vm4179_vm15, %v4178_v21, %v4173_v58  ;;  %v3863_v54 = vadd.f32 %v9467_v9, %v3608_v48  ;;  %v3868_v31 = vadd.f32 %v9467_v9, %v3618_v8  ;;  %v4206_v58 = vrot.slane %v3866_v17, %v9562_v19  ;;  %v3067_v48 = vld [vmem:[#allocation4 + $0x1c8] sm:$0xff] }
 0x456   : > { %v4213_v8 = vrot.slane %v3867_v51, %v9595_v52  ;;  %v3383_v33 = vmax.f32 %v3255_v38, 0.0  ;;  %v3562_v22 = vmul.f32 %v9591_v28, %v3427_v41  ;;  %v3285_v17 = vadd.f32 %v9435_v47, %v3067_v48  ;;  %v3038_v51 = vld [vmem:[#allocation4 + $0x1d8] sm:$0xff]  ;;  %v3085_v41 = vld [vmem:[#allocation4 + $0x3d0] sm:$0xff] }
 0x457   : > { %v4185_v50 = vrot.slane %v3863_v54, %v9602_v16  ;;  %3789 = vadd.xlane.f32.xlu1 %v3560_v59  ;;  %3761 = vadd.xlane.f32.xlu0 %v3546_v11  ;;  %v4220_v59 = vrot.slane %v3868_v31, %v9599_v18  ;;  %v3301_v11 = vadd.f32 %v9442_v39, %v3083_v36 }
 0x458   : > { %v3652_v15 = vpop.xlane.xlu0 %3651  ;;  %v3620_v24 = vpop.xlane.xlu1 %3619  ;;  %v3155_v38 = vcombine.high %v9425_v61, %v9425_v61  ;;  %v3413_v48 = vmax.f32 %v3285_v17, 0.0 }
 0x459   : > { %v4187_v44 = vsel %vm4186_vm0, %v4185_v50, %v4180_v30  ;;  %v3547_v30 = vmul.f32 %v9591_v28, %v3412_v60  ;;  %v3429_v36 = vmax.f32 %v3301_v11, 0.0 }
 0x45a   : > { %v4194_v21 = vsel %vm4193_vm1, %v4192_v35, %v4187_v44  ;;  %v3869_v35 = vadd.f32 %v9467_v9, %v3620_v24  ;;  %v3518_v24 = vmul.f32 %v9591_v28, %v3383_v33 }
 0x45b   : > { %v4201_v55 = vsel %vm4200_vm2, %v4199_v63, %v4194_v21  ;;  %3791 = vadd.xlane.f32.xlu1 %v3561_v27  ;;  %3703 = vadd.xlane.f32.xlu0 %v3517_v7  ;;  %v3563_v27 = vmul.f32 %v9591_v28, %v3428_v10  ;;  %v3302_v7 = vadd.f32 %v9442_v39, %v3084_v56  ;;  %v3068_v21 = vld [vmem:[#allocation4 + $0x2d0] sm:$0xff] }
 0x45c   : > { %v4208_v43 = vsel %vm4207_vm3, %v4206_v58, %v4201_v55  ;;  %v3656_v57 = vpop.xlane.xlu0 %3655  ;;  %v3622_v32 = vpop.xlane.xlu1 %3621  ;;  %v3256_v58 = vadd.f32 %v9412_v23, %v3038_v51  ;;  %v4226_v55 = vrot.slane %v3869_v35, %v9487_v26  ;;  %v3885_v10 = vadd.f32 %v9467_v9, %v3652_v15  ;;  %v3090_v51 = vld [vmem:[#allocation4 + $0x78] sm:$0xff] }
 0x45d   : > { %v3870_v54 = vadd.f32 %v9467_v9, %v3622_v32  ;;  %v4215_v50 = vsel %vm4214_vm4, %v4213_v8, %v4208_v43  ;;  %v9651_v8 = vrot.slane %v3155_v38, %v9256_v49  ;;  %v3286_v32 = vadd.f32 %v9435_v47, %v3068_v21 }
 0x45e   : > { %v9642_v31 = vsel %vm4221_vm5, %v4220_v59, %v4215_v50  ;;  %v3303_v59 = vadd.f32 %v9442_v39, %v3085_v41  ;;  %v3887_v33 = vadd.f32 %v9467_v9, %v3656_v57  ;;  %v3430_v17 = vmax.f32 %v3302_v7, 0.0 }
 0x45f   : > { %3793 = vadd.xlane.f32.xlu1 %v3562_v22  ;;  %3763 = vadd.xlane.f32.xlu0 %v3547_v30  ;;  %v4230_v60 = vrot.slane %v3870_v54, %v9496_v37  ;;  %v3039_v22 = vld [vmem:[#allocation4 + $0x30] sm:$0xff]  ;;  %v3384_v56 = vmax.f32 %v3256_v58, 0.0  ;;  %v3564_v38 = vmul.f32 %v9591_v28, %v3429_v36  ;;  %v3548_v35 = vmul.f32 %v9591_v28, %v3413_v48 }
 0x460   : > { %v3628_v63 = vpop.xlane.xlu0 %3627  ;;  %v3624_v44 = vpop.xlane.xlu1 %3623  ;;  %v3257_v41 = vadd.f32 %v9412_v23, %v3039_v22  ;;  %v4314_v7 = vrot.slane %v3887_v33, %v9508_v34  ;;  %v3414_v36 = vmax.f32 %v3286_v32, 0.0 }
 0x461   : > { %v3871_v61 = vadd.f32 %v9467_v9, %v3624_v44  ;;  %v4231_v30 = vsel %vm4123_vm7, %v4230_v60, %v4226_v55  ;;  %v4305_v44 = vrot.slane %v3885_v10, %v9487_v26  ;;  %v3431_v60 = vmax.f32 %v3303_v59, 0.0  ;;  %v3069_v59 = vld [vmem:[#allocation4 + $0x1d0] sm:$0xff] }
 0x462   : > { %v3873_v58 = vadd.f32 %v9467_v9, %v3628_v63  ;;  %v3385_v63 = vmax.f32 %v3257_v41, 0.0  ;;  %v3040_v41 = vld [vmem:[#allocation4 + $0x140] sm:$0xff] }
 0x463   : > { %v4235_v43 = vrot.slane %v3871_v61, %v9508_v34  ;;  %3795 = vadd.xlane.f32.xlu1 %v3563_v27  ;;  %3705 = vadd.xlane.f32.xlu0 %v3518_v24  ;;  %v3308_v27 = vadd.f32 %v9651_v8, %v3090_v51  ;;  %v3565_v24 = vmul.f32 %v9591_v28, %v3430_v17 }
 0x464   : > { %v3654_v54 = vpop.xlane.xlu1 %3653  ;;  %v3718_v11 = vpop.xlane.xlu0 %3717  ;;  %v4245_v32 = vrot.slane %v3873_v58, %v9477_v20 }
 0x465   : > { %v4236_v50 = vsel %vm4130_vm8, %v4235_v43, %v4231_v30  ;;  %v3886_v15 = vadd.f32 %v9467_v9, %v3654_v54  ;;  %v3519_v43 = vmul.f32 %v9591_v28, %v3384_v56  ;;  %v3041_v30 = vld [vmem:[#allocation4 + $0x2a8] sm:$0xff]  ;;  %v3436_v54 = vmax.f32 %v3308_v27, 0.0  ;;  %v3071_v27 = vld [vmem:[#allocation4 + $0x120] sm:$0xff] }
 0x466   : > { %v3287_v56 = vadd.f32 %v9435_v47, %v3069_v59  ;;  %v3101_v59 = vld [vmem:[#allocation4] sm:$0xff] }
 0x467   : > { %v4309_v57 = vrot.slane %v3886_v15, %v9496_v37  ;;  %3797 = vadd.xlane.f32.xlu1 %v3564_v38  ;;  %3765 = vadd.xlane.f32.xlu0 %v3548_v35  ;;  %v3566_v15 = vmul.f32 %v9591_v28, %v3431_v60  ;;  %v3549_v38 = vmul.f32 %v9591_v28, %v3414_v36 }
 0x468   : > { %v3626_v21 = vpop.xlane.xlu1 %3625  ;;  %v3630_v61 = vpop.xlane.xlu0 %3629 }
 0x469   : > { %v4310_v48 = vsel %vm4123_vm7, %v4309_v57, %v4305_v44  ;;  %v3872_v55 = vadd.f32 %v9467_v9, %v3626_v21  ;;  %v3874_v10 = vadd.f32 %v9467_v9, %v3630_v61  ;;  %v3918_v21 = vadd.f32 %v9467_v9, %v3718_v11 }
 0x46a   : > { %v4315_v22 = vsel %vm4130_vm8, %v4314_v7, %v4310_v48  ;;  %v3259_v7 = vadd.f32 %v9412_v23, %v3041_v30  ;;  %v3520_v48 = vmul.f32 %v9591_v28, %v3385_v63  ;;  %v3091_v63 = vld [vmem:[#allocation4 + $0x308] sm:$0xff] }
 0x46b   : > { %v4240_v33 = vrot.slane %v3872_v55, %v9525_v25  ;;  %3799 = vadd.xlane.f32.xlu1 %v3565_v24  ;;  %3707 = vadd.xlane.f32.xlu0 %v3519_v43  ;;  %v4250_v44 = vrot.slane %v3874_v10, %v9490_v1  ;;  %v3415_v55 = vmax.f32 %v3287_v56, 0.0  ;;  %v3258_v10 = vadd.f32 %v9412_v23, %v3040_v41 }
 0x46c   : > { %v3658_v17 = vpop.xlane.xlu1 %3657  ;;  %v3662_v51 = vpop.xlane.xlu0 %3661  ;;  %v3289_v43 = vadd.f32 %v9435_v47, %v3071_v27  ;;  %v3319_v23 = vadd.f32 %v9651_v8, %v3101_v59 }
 0x46d   : > { %v4241_v35 = vsel %vm4137_vm9, %v4240_v33, %v4236_v50  ;;  %v3888_v57 = vadd.f32 %v9467_v9, %v3658_v17  ;;  %v3070_v50 = vld [vmem:[#allocation4 + $0x58] sm:$0xff]  ;;  %v3571_v33 = vmul.f32 %v9591_v28, %v3436_v54  ;;  %v3890_v56 = vadd.f32 %v9467_v9, %v3662_v51 }
 0x46e   : > { %v4246_v58 = vsel %vm4144_vm10, %v4245_v32, %v4241_v35  ;;  %v3387_v32 = vmax.f32 %v3259_v7, 0.0  ;;  %v3288_v17 = vadd.f32 %v9435_v47, %v3070_v50  ;;  %v3417_v54 = vmax.f32 %v3289_v43, 0.0  ;;  %v3072_v7 = vld [vmem:[#allocation4 + $0x198] sm:$0xff] }
 0x46f   : > { %v9688_v60 = vsel %vm4151_vm11, %v4250_v44, %v4246_v58  ;;  %v4319_v61 = vrot.slane %v3888_v57, %v9525_v25  ;;  %3801 = vadd.xlane.f32.xlu1 %v3566_v15  ;;  %3767 = vadd.xlane.f32.xlu0 %v3549_v38  ;;  %v4467_v15 = vrot.slane %v3918_v21, %v9496_v37  ;;  %v3386_v57 = vmax.f32 %v3258_v10, 0.0 }
 0x470   : > { %v3722_v24 = vpop.xlane.xlu0 %3721  ;;  %v3716_v36 = vpop.xlane.xlu1 %3715  ;;  %v3550_v44 = vmul.f32 %v9591_v28, %v3415_v55  ;;  %v3522_v21 = vmul.f32 %v9591_v28, %v3387_v32  ;;  %v3416_v51 = vmax.f32 %v3288_v17, 0.0  ;;  %v4329_v55 = vrot.slane %v3890_v56, %v9490_v1 }
 0x471   : > { %v4320_v11 = vsel %vm4137_vm9, %v4319_v61, %v4315_v22  ;;  %v3917_v30 = vadd.f32 %v9467_v9, %v3716_v36  ;;  %v3309_v61 = vadd.f32 %v9651_v8, %v3091_v63  ;;  %v3447_v36 = vmax.f32 %v3319_v23, 0.0  ;;  %v3092_v23 = vld [vmem:[#allocation4 + $0x370] sm:$0xff]  ;;  %v3102_v63 = vld [vmem:[#allocation4 + $0x298] sm:$0xff] }
 0x472   : > { %v3920_v10 = vadd.f32 %v9467_v9, %v3722_v24 }
 0x473   : > { %v4463_v38 = vrot.slane %v3917_v30, %v9487_v26  ;;  %3709 = vadd.xlane.f32.xlu0 %v3520_v48  ;;  %3811 = vadd.xlane.f32.xlu1 %v3571_v33  ;;  %v3290_v48 = vadd.f32 %v9435_v47, %v3072_v7  ;;  %v3521_v30 = vmul.f32 %v9591_v28, %v3386_v57 }
 0x474   : > { %v3664_v35 = vpop.xlane.xlu0 %3663  ;;  %v3660_v22 = vpop.xlane.xlu1 %3659  ;;  %v3552_v33 = vmul.f32 %v9591_v28, %v3417_v54  ;;  %v3582_v7 = vmul.f32 %v9591_v28, %v3447_v36 }
 0x475   : > { %v4468_v41 = vsel %vm4123_vm7, %v4467_v15, %v4463_v38  ;;  %v3891_v27 = vadd.f32 %v9467_v9, %v3664_v35  ;;  %v3889_v58 = vadd.f32 %v9467_v9, %v3660_v22  ;;  %v3437_v35 = vmax.f32 %v3309_v61, 0.0 }
 0x476   : > { %v3551_v22 = vmul.f32 %v9591_v28, %v3416_v51 }
 0x477   : > { %v4324_v50 = vrot.slane %v3889_v58, %v9477_v20  ;;  %3769 = vadd.xlane.f32.xlu0 %v3550_v44  ;;  %3713 = vadd.xlane.f32.xlu1 %v3522_v21  ;;  %v4334_v32 = vrot.slane %v3891_v27, %v9545_v29  ;;  %v3310_v27 = vadd.f32 %v9651_v8, %v3092_v23  ;;  %v3093_v21 = vld [vmem:[#allocation4 + $0xc8] sm:$0xff]  ;;  %v3094_v23 = vld [vmem:[#allocation4 + $0x278] sm:$0xff] }
 0x478   : > { %v3724_v43 = vpop.xlane.xlu0 %3723  ;;  %v3720_v59 = vpop.xlane.xlu1 %3719  ;;  %v3320_v58 = vadd.f32 %v9651_v8, %v3102_v63  ;;  %v3089_v63 = vld [vmem:[#allocation4 + $0x38] sm:$0xff] }
 0x479   : > { %v4325_v15 = vsel %vm4144_vm10, %v4324_v50, %v4320_v11  ;;  %v3921_v38 = vadd.f32 %v9467_v9, %v3724_v43  ;;  %v3919_v17 = vadd.f32 %v9467_v9, %v3720_v59  ;;  %v4477_v11 = vrot.slane %v3920_v10, %v9525_v25  ;;  %v3088_v43 = vld [vmem:[#allocation4 + $0xb8] sm:$0xff] }
 0x47a   : > { %v4330_v56 = vsel %vm4151_vm11, %v4329_v55, %v4325_v15  ;;  %v3418_v55 = vmax.f32 %v3290_v48, 0.0  ;;  %v3572_v10 = vmul.f32 %v9591_v28, %v3437_v35  ;;  %v3448_v48 = vmax.f32 %v3320_v58, 0.0 }
 0x47b   : > { %v4472_v24 = vrot.slane %v3919_v17, %v9508_v34  ;;  %3711 = vadd.xlane.f32.xlu0 %v3521_v30  ;;  %3773 = vadd.xlane.f32.xlu1 %v3552_v33  ;;  %v9722_v44 = vsel %vm4158_vm12, %v4334_v32, %v4330_v56  ;;  %v4482_v61 = vrot.slane %v3921_v38, %v9477_v20  ;;  %v3438_v38 = vmax.f32 %v3310_v27, 0.0  ;;  %v3095_v27 = vld [vmem:[#allocation4 + $0x360] sm:$0xff] }
 0x47c   : > { %v3636_v57 = vpop.xlane.xlu0 %3635  ;;  %v3632_v54 = vpop.xlane.xlu1 %3631  ;;  %v3311_v33 = vadd.f32 %v9651_v8, %v3093_v21  ;;  %v3306_v17 = vadd.f32 %v9442_v39, %v3088_v43 }
 0x47d   : > { %v4473_v50 = vsel %vm4130_vm8, %v4472_v24, %v4468_v41  ;;  %v3875_v51 = vadd.f32 %v9467_v9, %v3632_v54  ;;  %v3877_v32 = vadd.f32 %v9467_v9, %v3636_v57  ;;  %v3312_v54 = vadd.f32 %v9651_v8, %v3094_v23 }
 0x47e   : > { %v4478_v59 = vsel %vm4137_vm9, %v4477_v11, %v4473_v50  ;;  %v3439_v57 = vmax.f32 %v3311_v33, 0.0  ;;  %v3583_v50 = vmul.f32 %v9591_v28, %v3448_v48 }
 0x47f   : > { %v4255_v30 = vrot.slane %v3875_v51, %v9545_v29  ;;  %3771 = vadd.xlane.f32.xlu0 %v3551_v22  ;;  %3833 = vadd.xlane.f32.xlu1 %v3582_v7  ;;  %v9735_v36 = vsel %vm4144_vm10, %v4482_v61, %v4478_v59  ;;  %v3553_v22 = vmul.f32 %v9591_v28, %v3418_v55  ;;  %v3434_v51 = vmax.f32 %v3306_v17, 0.0 }
 0x480   : > { %v3638_v41 = vpop.xlane.xlu0 %3637  ;;  %v3634_v15 = vpop.xlane.xlu1 %3633  ;;  %v3307_v7 = vadd.f32 %v9442_v39, %v3089_v63  ;;  %v4265_v58 = vrot.slane %v3877_v32, %v9505_v12  ;;  %v3573_v61 = vmul.f32 %v9591_v28, %v3438_v38  ;;  %v3313_v32 = vadd.f32 %v9651_v8, %v3095_v27 }
 0x481   : > { %v4256_v56 = vsel %vm4158_vm12, %v4255_v30, %v9688_v60  ;;  %v3878_v35 = vadd.f32 %v9467_v9, %v3638_v41  ;;  %v3876_v24 = vadd.f32 %v9467_v9, %v3634_v15  ;;  %v3105_v30 = vld [vmem:[#allocation4 + $0x190] sm:$0xff]  ;;  %v3574_v23 = vmul.f32 %v9591_v28, %v3439_v57 }
 0x482   : > { %v3440_v63 = vmax.f32 %v3312_v54, 0.0  ;;  %v3569_v27 = vmul.f32 %v9591_v28, %v3434_v51  ;;  %v3441_v54 = vmax.f32 %v3313_v32, 0.0 }
 0x483   : > { %v4260_v11 = vrot.slane %v3876_v24, %v9565_v13  ;;  %3813 = vadd.xlane.f32.xlu0 %v3572_v10  ;;  %3775 = vadd.xlane.f32.xlu1 %v3553_v22  ;;  %v4270_v55 = vrot.slane %v3878_v35, %v9583_v4  ;;  %v3323_v35 = vadd.f32 %v9651_v8, %v3105_v30 }
 0x484   : > { %v3668_v21 = vpop.xlane.xlu0 %3667  ;;  %v3666_v60 = vpop.xlane.xlu1 %3665 }
 0x485   : > { %v4261_v43 = vsel %vm4165_vm13, %v4260_v11, %v4256_v56  ;;  %v3893_v59 = vadd.f32 %v9467_v9, %v3668_v21  ;;  %v3892_v10 = vadd.f32 %v9467_v9, %v3666_v60  ;;  %v3435_v56 = vmax.f32 %v3307_v7, 0.0 }
 0x486   : > { %v4266_v33 = vsel %vm4172_vm14, %v4265_v58, %v4261_v43  ;;  %v3096_v58 = vld [vmem:[#allocation4 + $0x228] sm:$0xff] }
 0x487   : > { %v4344_v41 = vrot.slane %v3893_v59, %v9505_v12  ;;  %v4339_v15 = vrot.slane %v3892_v10, %v9565_v13  ;;  %3815 = vadd.xlane.f32.xlu0 %v3573_v61  ;;  %3835 = vadd.xlane.f32.xlu1 %v3583_v50  ;;  %v4271_v38 = vsel %vm4179_vm15, %v4270_v55, %v4266_v33  ;;  %v3451_v55 = vmax.f32 %v3323_v35, 0.0  ;;  %v3097_v33 = vld [vmem:[#allocation4 + $0x348] sm:$0xff] }
 0x488   : > { %v3640_v48 = vpop.xlane.xlu0 %3639  ;;  %v3726_v17 = vpop.xlane.xlu1 %3725  ;;  %v3570_v50 = vmul.f32 %v9591_v28, %v3435_v56  ;;  %v3314_v43 = vadd.f32 %v9651_v8, %v3096_v58 }
 0x489   : > { %v4340_v24 = vsel %vm4165_vm13, %v4339_v15, %v9722_v44  ;;  %v3879_v22 = vadd.f32 %v9467_v9, %v3640_v48  ;;  %v3922_v11 = vadd.f32 %v9467_v9, %v3726_v17  ;;  %v3575_v44 = vmul.f32 %v9591_v28, %v3440_v63 }
 0x48a   : > { %v4345_v21 = vsel %vm4172_vm14, %v4344_v41, %v4340_v24  ;;  %v3576_v17 = vmul.f32 %v9591_v28, %v3441_v54  ;;  %v3586_v35 = vmul.f32 %v9591_v28, %v3451_v55  ;;  %v3098_v24 = vld [vmem:[#allocation4 + $0x148] sm:$0xff] }
 0x48b   : > { %v4275_v60 = vrot.slane %v3879_v22, %v9602_v16  ;;  %v4487_v57 = vrot.slane %v3922_v11, %v9490_v1  ;;  %3817 = vadd.xlane.f32.xlu0 %v3574_v23  ;;  %3807 = vadd.xlane.f32.xlu1 %v3569_v27  ;;  %v3442_v23 = vmax.f32 %v3314_v43, 0.0  ;;  %v3099_v43 = vld [vmem:[#allocation4 + $0xf8] sm:$0xff] }
 0x48c   : > { %v3670_v7 = vpop.xlane.xlu0 %3669  ;;  %v3728_v61 = vpop.xlane.xlu1 %3727 }
 0x48d   : > { %v4276_v51 = vsel %vm4186_vm0, %v4275_v60, %v4271_v38  ;;  %v4488_v59 = vsel %vm4151_vm11, %v4487_v57, %v9735_v36  ;;  %v3894_v10 = vadd.f32 %v9467_v9, %v3670_v7  ;;  %v3923_v30 = vadd.f32 %v9467_v9, %v3728_v61 }
 0x48e   : > { %v3315_v38 = vadd.f32 %v9651_v8, %v3097_v33  ;;  %v3577_v57 = vmul.f32 %v9591_v28, %v3442_v23  ;;  %v3316_v7 = vadd.f32 %v9651_v8, %v3098_v24 }
 0x48f   : > { %v4492_v32 = vrot.slane %v3923_v30, %v9545_v29  ;;  %3819 = vadd.xlane.f32.xlu0 %v3575_v44  ;;  %3809 = vadd.xlane.f32.xlu1 %v3570_v50  ;;  %v4349_v41 = vrot.slane %v3894_v10, %v9583_v4 }
 0x490   : > { %v3730_v15 = vpop.xlane.xlu0 %3729  ;;  %v3672_v48 = vpop.xlane.xlu1 %3671  ;;  %v3443_v54 = vmax.f32 %v3315_v38, 0.0  ;;  %v3100_v38 = vld [vmem:[#allocation4 + $0x68] sm:$0xff] }
 0x491   : > { %v4493_v36 = vsel %vm4158_vm12, %v4492_v32, %v4488_v59  ;;  %v3924_v63 = vadd.f32 %v9467_v9, %v3730_v15  ;;  %v3895_v56 = vadd.f32 %v9467_v9, %v3672_v48  ;;  %v4350_v27 = vsel %vm4179_vm15, %v4349_v41, %v4345_v21 }
 0x492   : > { %v3578_v33 = vmul.f32 %v9591_v28, %v3443_v54  ;;  %v3444_v32 = vmax.f32 %v3316_v7, 0.0  ;;  %v3317_v41 = vadd.f32 %v9651_v8, %v3099_v43 }
 0x493   : > { %v4497_v22 = vrot.slane %v3924_v63, %v9565_v13  ;;  %v4354_v11 = vrot.slane %v3895_v56, %v9602_v16  ;;  %3821 = vadd.xlane.f32.xlu0 %v3576_v17  ;;  %3841 = vadd.xlane.f32.xlu1 %v3586_v35 }
 0x494   : > { %v3642_v58 = vpop.xlane.xlu0 %3641  ;;  %v3732_v60 = vpop.xlane.xlu1 %3731  ;;  %v3579_v24 = vmul.f32 %v9591_v28, %v3444_v32 }
 0x495   : > { %v4498_v61 = vsel %vm4165_vm13, %v4497_v22, %v4493_v36  ;;  %v4355_v44 = vsel %vm4186_vm0, %v4354_v11, %v4350_v27  ;;  %v3880_v50 = vadd.f32 %v9467_v9, %v3642_v58  ;;  %v3925_v55 = vadd.f32 %v9467_v9, %v3732_v60 }
 0x496   : > { %v3445_v22 = vmax.f32 %v3317_v41, 0.0  ;;  %v3318_v11 = vadd.f32 %v9651_v8, %v3100_v38 }
 0x497   : > { %v4280_v59 = vrot.slane %v3880_v50, %v9518_v45  ;;  %v4502_v21 = vrot.slane %v3925_v55, %v9505_v12  ;;  %3823 = vadd.xlane.f32.xlu0 %v3577_v57  ;;  %v3056_v57 = vld [vmem:[#allocation4 + $0x20] sm:$0xff] }
 0x498   : > { %v3644_v10 = vpop.xlane.xlu0 %3643  ;;  %v3674_v30 = vpop.xlane.xlu1 %3673  ;;  %v3580_v55 = vmul.f32 %v9591_v28, %v3445_v22  ;;  %v3446_v43 = vmax.f32 %v3318_v11, 0.0 }
 0x499   : > { %v4281_v15 = vsel %vm4193_vm1, %v4280_v59, %v4276_v51  ;;  %v4503_v48 = vsel %vm4172_vm14, %v4502_v21, %v4498_v61  ;;  %v3881_v17 = vadd.f32 %v9467_v9, %v3644_v10  ;;  %v3896_v23 = vadd.f32 %v9467_v9, %v3674_v30 }
 0x49a   : > { %v3274_v59 = vadd.f32 %v9339_v62, %v3056_v57 }
 0x49b   : > { %v4285_v36 = vrot.slane %v3881_v17, %v9542_v0  ;;  %v4359_v63 = vrot.slane %v3896_v23, %v9518_v45  ;;  %3825 = vadd.xlane.f32.xlu0 %v3578_v33  ;;  %v3086_v33 = vld [vmem:[#allocation4 + $0x250] sm:$0xff]  ;;  %v3581_v23 = vmul.f32 %v9591_v28, %v3446_v43 }
 0x49c   : > { %v3646_v56 = vpop.xlane.xlu0 %3645  ;;  %v3734_v35 = vpop.xlane.xlu1 %3733  ;;  %v3402_v38 = vmax.f32 %v3274_v59, 0.0 }
 0x49d   : > { %v4286_v51 = vsel %vm4200_vm2, %v4285_v36, %v4281_v15  ;;  %v4360_v27 = vsel %vm4193_vm1, %v4359_v63, %v4355_v44  ;;  %v3882_v58 = vadd.f32 %v9467_v9, %v3646_v56  ;;  %v3926_v60 = vadd.f32 %v9467_v9, %v3734_v35 }
 0x49e   : > { %v3304_v36 = vadd.f32 %v9442_v39, %v3086_v33 }
 0x49f   : > { %v4290_v54 = vrot.slane %v3882_v58, %v9562_v19  ;;  %v4507_v7 = vrot.slane %v3926_v60, %v9583_v4  ;;  %3827 = vadd.xlane.f32.xlu0 %v3579_v24  ;;  %v3057_v24 = vld [vmem:[#allocation4 + $0xe8] sm:$0xff]  ;;  %v3537_v60 = vmul.f32 %v9591_v28, %v3402_v38 }
 0x4a0   : > { %v3648_v61 = vpop.xlane.xlu0 %3647  ;;  %v3676_v50 = vpop.xlane.xlu1 %3675  ;;  %v3275_v57 = vadd.f32 %v9339_v62, %v3057_v24 }
 0x4a1   : > { %v4291_v21 = vsel %vm4207_vm3, %v4290_v54, %v4286_v51  ;;  %v4508_v44 = vsel %vm4179_vm15, %v4507_v7, %v4503_v48  ;;  %v3883_v10 = vadd.f32 %v9467_v9, %v3648_v61  ;;  %v3897_v30 = vadd.f32 %v9467_v9, %v3676_v50 }
 0x4a2   : > { %v3432_v61 = vmax.f32 %v3304_v36, 0.0 }
 0x4a3   : > { %v4295_v32 = vrot.slane %v3883_v10, %v9595_v52  ;;  %v4364_v41 = vrot.slane %v3897_v30, %v9542_v0  ;;  %3829 = vadd.xlane.f32.xlu0 %v3580_v55  ;;  %v3087_v55 = vld [vmem:[#allocation4 + $0x378] sm:$0xff]  ;;  %v3403_v10 = vmax.f32 %v3275_v57, 0.0 }
 0x4a4   : > { %v3650_v15 = vpop.xlane.xlu0 %3649  ;;  %v3736_v17 = vpop.xlane.xlu1 %3735  ;;  %v3567_v33 = vmul.f32 %v9591_v28, %v3432_v61 }
 0x4a5   : > { %v4296_v63 = vsel %vm4214_vm4, %v4295_v32, %v4291_v21  ;;  %v4365_v48 = vsel %vm4200_vm2, %v4364_v41, %v4360_v27  ;;  %v3884_v56 = vadd.f32 %v9467_v9, %v3650_v15  ;;  %v3927_v35 = vadd.f32 %v9467_v9, %v3736_v17  ;;  %v3073_v32 = vld [vmem:[#allocation4 + $0x2e8] sm:$0xff] }
 0x4a6   : > { %v3291_v17 = vadd.f32 %v9435_v47, %v3073_v32  ;;  %v3538_v36 = vmul.f32 %v9591_v28, %v3403_v10 }
 0x4a7   : > { %v4300_v22 = vrot.slane %v3884_v56, %v9599_v18  ;;  %v4512_v11 = vrot.slane %v3927_v35, %v9602_v16  ;;  %3831 = vadd.xlane.f32.xlu0 %v3581_v23 }
 0x4a8   : > { %v3686_v51 = vpop.xlane.xlu0 %3685  ;;  %v3678_v58 = vpop.xlane.xlu1 %3677 }
 0x4a9   : > { %v4301_v54 = vsel %vm4221_vm5, %v4300_v22, %v4296_v63  ;;  %v4513_v27 = vsel %vm4186_vm0, %v4512_v11, %v4508_v44  ;;  %v3898_v7 = vadd.f32 %v9467_v9, %v3678_v58  ;;  %v3305_v44 = vadd.f32 %v9442_v39, %v3087_v55 }
 0x4aa   : > { %v4777_v50 = vsel %vm10651_vm6, %v4301_v54, %v9642_v31  ;;  %v3419_v58 = vmax.f32 %v3291_v17, 0.0  ;;  %vm10652_vm6 = vcmask 1042434  }
 0x4ab   : > { %v4369_v43 = vrot.slane %v3898_v7, %v9562_v19  ;;  %3743 = vadd.xlane.f32.xlu0 %v3537_v60  ;;  %v3433_v63 = vmax.f32 %v3305_v44, 0.0  ;;  %v3104_v60 = vld [vmem:[#allocation4 + $0x310] sm:$0xff] }
 0x4ac   : > { %v3688_v59 = vpop.xlane.xlu0 %3687  ;;  %v3738_v21 = vpop.xlane.xlu1 %3737  ;;  %v3322_v7 = vadd.f32 %v9651_v8, %v3104_v60 }
 0x4ad   : > { %v4370_v30 = vsel %vm4207_vm3, %v4369_v43, %v4365_v48  ;;  %v3928_v62 = vadd.f32 %v9467_v9, %v3738_v21  ;;  %v3103_v48 = vld [vmem:[#allocation4 + $0x270] sm:$0xff]  ;;  %v3568_v47 = vmul.f32 %v9591_v28, %v3433_v63  ;;  %v3554_v43 = vmul.f32 %v9591_v28, %v3419_v58 }
 0x4ae   : > { %v3321_v24 = vadd.f32 %v9651_v8, %v3103_v48  ;;  %v3450_v8 = vmax.f32 %v3322_v7, 0.0 }
 0x4af   : > { %v4517_v41 = vrot.slane %v3928_v62, %v9518_v45  ;;  %3803 = vadd.xlane.f32.xlu0 %v3567_v33 }
 0x4b0   : > { %v3690_v31 = vpop.xlane.xlu0 %3689  ;;  %v3680_v15 = vpop.xlane.xlu1 %3679  ;;  %v3449_v21 = vmax.f32 %v3321_v24, 0.0 }
 0x4b1   : > { %v4518_v23 = vsel %vm4193_vm1, %v4517_v41, %v4513_v27  ;;  %v3899_v38 = vadd.f32 %v9467_v9, %v3680_v15  ;;  %v3902_v15 = vadd.f32 %v9467_v9, %v3686_v51  ;;  %v3904_v63 = vadd.f32 %v9467_v9, %v3690_v31 }
 0x4b2   : > { %v3584_v32 = vmul.f32 %v9591_v28, %v3449_v21 }
 0x4b3   : > { %v4374_v56 = vrot.slane %v3899_v38, %v9595_v52  ;;  %3745 = vadd.xlane.f32.xlu0 %v3538_v36  ;;  %v4398_v31 = vrot.slane %v3904_v63, %v9525_v25 }
 0x4b4   : > { %v3740_v39 = vpop.xlane.xlu1 %3739  ;;  %v3748_v35 = vpop.xlane.xlu0 %3747 }
 0x4b5   : > { %v4375_v22 = vsel %vm4214_vm4, %v4374_v56, %v4370_v30  ;;  %v3929_v11 = vadd.f32 %v9467_v9, %v3740_v39  ;;  %v3585_v39 = vmul.f32 %v9591_v28, %v3450_v8  ;;  %v3933_v51 = vadd.f32 %v9467_v9, %v3748_v35 }
 0x4b7   : > { %v4522_v57 = vrot.slane %v3929_v11, %v9542_v0  ;;  %3805 = vadd.xlane.f32.xlu0 %v3568_v47  ;;  %v4542_v28 = vrot.slane %v3933_v51, %v9487_v26 }
 0x4b8   : > { %v3682_v54 = vpop.xlane.xlu1 %3681  ;;  %v3780_v27 = vpop.xlane.xlu0 %3779 }
 0x4b9   : > { %v4523_v61 = vsel %vm4200_vm2, %v4522_v57, %v4518_v23  ;;  %v3900_v55 = vadd.f32 %v9467_v9, %v3682_v54  ;;  %v3903_v23 = vadd.f32 %v9467_v9, %v3688_v59 }
 0x4bb   : > { %v4379_v10 = vrot.slane %v3900_v55, %v9599_v18  ;;  %3777 = vadd.xlane.f32.xlu0 %v3554_v43  ;;  %v4393_v59 = vrot.slane %v3903_v23, %v9508_v34 }
 0x4bc   : > { %v3742_v30 = vpop.xlane.xlu1 %3741  ;;  %v3784_v62 = vpop.xlane.xlu0 %3783 }
 0x4bd   : > { %v4380_v33 = vsel %vm4221_vm5, %v4379_v10, %v4375_v22  ;;  %v3930_v44 = vadd.f32 %v9467_v9, %v3742_v30  ;;  %v3951_v8 = vadd.f32 %v9467_v9, %v3784_v62 }
 0x4be   : > { %v9861_v41 = vsel %vm10652_vm6, %v4380_v33, %v4777_v50  ;;  %v4388_v50 = vrot.slane %v3902_v15, %v9496_v37  ;;  %vm10655_vm6 = vcmask 1043459  }
 0x4bf   : > { %v4527_v17 = vrot.slane %v3930_v44, %v9562_v19  ;;  %3837 = vadd.xlane.f32.xlu0 %v3584_v32  ;;  %v3949_v44 = vadd.f32 %v9467_v9, %v3780_v27 }
 0x4c0   : > { %v3684_v38 = vpop.xlane.xlu1 %3683  ;;  %v3696_v36 = vpop.xlane.xlu0 %3695 }
 0x4c1   : > { %v9868_v48 = vsel %vm4207_vm3, %v4527_v17, %v4523_v61  ;;  %v3901_v56 = vadd.f32 %v9467_v9, %v3684_v38  ;;  %v4621_v63 = vrot.slane %v3949_v44, %v9487_v26 }
 0x4c3   : > { %v4384_v24 = vrot.slane %v3901_v56, %v9487_v26  ;;  %3839 = vadd.xlane.f32.xlu0 %v3585_v39  ;;  %v4630_v39 = vrot.slane %v3951_v8, %v9508_v34 }
 0x4c4   : > { %v3750_v22 = vpop.xlane.xlu1 %3749  ;;  %v3756_v11 = vpop.xlane.xlu0 %3755 }
 0x4c5   : > { %v4389_v47 = vsel %vm4123_vm7, %v4388_v50, %v4384_v24  ;;  %v3934_v58 = vadd.f32 %v9467_v9, %v3750_v22  ;;  %v3907_v50 = vadd.f32 %v9467_v9, %v3696_v36 }
 0x4c6   : > { %v4394_v60 = vsel %vm4130_vm8, %v4393_v59, %v4389_v47 }
 0x4c7   : > { %v4546_v57 = vrot.slane %v3934_v58, %v9496_v37  ;;  %v4399_v35 = vsel %vm4137_vm9, %v4398_v31, %v4394_v60  ;;  %v4413_v58 = vrot.slane %v3907_v50, %v9545_v29  ;;  %v3937_v60 = vadd.f32 %v9467_v9, %v3756_v11 }
 0x4c8   : > { %v3692_v54 = vpop.xlane.xlu1 %3691  ;;  %v3698_v7 = vpop.xlane.xlu0 %3697 }
 0x4c9   : > { %v4547_v61 = vsel %vm4123_vm7, %v4546_v57, %v4542_v28  ;;  %v3905_v55 = vadd.f32 %v9467_v9, %v3692_v54  ;;  %v3908_v24 = vadd.f32 %v9467_v9, %v3698_v7 }
 0x4cb   : > { %v4403_v43 = vrot.slane %v3905_v55, %v9477_v20  ;;  %v4418_v57 = vrot.slane %v3908_v24, %v9565_v13 }
 0x4cc   : > { %v3752_v21 = vpop.xlane.xlu1 %3751  ;;  %v3758_v10 = vpop.xlane.xlu0 %3757 }
 0x4cd   : > { %v4404_v30 = vsel %vm4144_vm10, %v4403_v43, %v4399_v35  ;;  %v3935_v33 = vadd.f32 %v9467_v9, %v3752_v21  ;;  %v3938_v35 = vadd.f32 %v9467_v9, %v3758_v10 }
 0x4cf   : > { %v4551_v32 = vrot.slane %v3935_v33, %v9508_v34  ;;  %v4561_v33 = vrot.slane %v3937_v60, %v9477_v20  ;;  %v4566_v8 = vrot.slane %v3938_v35, %v9490_v1 }
 0x4d0   : > { %v3782_v15 = vpop.xlane.xlu1 %3781  ;;  %v3788_v17 = vpop.xlane.xlu0 %3787 }
 0x4d1   : > { %v4552_v23 = vsel %vm4130_vm8, %v4551_v32, %v4547_v61  ;;  %v3950_v38 = vadd.f32 %v9467_v9, %v3782_v15  ;;  %v3953_v44 = vadd.f32 %v9467_v9, %v3788_v17 }
 0x4d3   : > { %v4625_v56 = vrot.slane %v3950_v38, %v9496_v37 }
 0x4d4   : > { %v3694_v51 = vpop.xlane.xlu1 %3693  ;;  %v3700_v27 = vpop.xlane.xlu0 %3699 }
 0x4d5   : > { %v4626_v62 = vsel %vm4123_vm7, %v4625_v56, %v4621_v63  ;;  %v3906_v59 = vadd.f32 %v9467_v9, %v3694_v51  ;;  %v3909_v22 = vadd.f32 %v9467_v9, %v3700_v27  ;;  %v4640_v27 = vrot.slane %v3953_v44, %v9477_v20 }
 0x4d6   : > { %v4631_v31 = vsel %vm4130_vm8, %v4630_v39, %v4626_v62 }
 0x4d7   : > { %v4408_v47 = vrot.slane %v3906_v59, %v9490_v1  ;;  %v4423_v55 = vrot.slane %v3909_v22, %v9505_v12 }
 0x4d8   : > { %v3754_v28 = vpop.xlane.xlu1 %3753  ;;  %v3760_v36 = vpop.xlane.xlu0 %3759 }
 0x4d9   : > { %v4409_v54 = vsel %vm4151_vm11, %v4408_v47, %v4404_v30  ;;  %v3936_v7 = vadd.f32 %v9467_v9, %v3754_v28  ;;  %v3939_v43 = vadd.f32 %v9467_v9, %v3760_v36 }
 0x4da   : > { %v4414_v61 = vsel %vm4158_vm12, %v4413_v58, %v4409_v54 }
 0x4db   : > { %v4419_v21 = vsel %vm4165_vm13, %v4418_v57, %v4414_v61  ;;  %v4556_v11 = vrot.slane %v3936_v7, %v9525_v25  ;;  %v4571_v39 = vrot.slane %v3939_v43, %v9545_v29 }
 0x4dc   : > { %v4424_v10 = vsel %vm4172_vm14, %v4423_v55, %v4419_v21  ;;  %v3786_v32 = vpop.xlane.xlu1 %3785  ;;  %v3702_v30 = vpop.xlane.xlu0 %3701 }
 0x4dd   : > { %v4557_v15 = vsel %vm4137_vm9, %v4556_v11, %v4552_v23  ;;  %v3952_v38 = vadd.f32 %v9467_v9, %v3786_v32  ;;  %v3910_v63 = vadd.f32 %v9467_v9, %v3702_v30 }
 0x4de   : > { %v4562_v56 = vsel %vm4144_vm10, %v4561_v33, %v4557_v15 }
 0x4df   : > { %v4567_v50 = vsel %vm4151_vm11, %v4566_v8, %v4562_v56  ;;  %v4635_v17 = vrot.slane %v3952_v38, %v9525_v25  ;;  %v4428_v51 = vrot.slane %v3910_v63, %v9583_v4 }
 0x4e0   : > { %v4572_v24 = vsel %vm4158_vm12, %v4571_v39, %v4567_v50  ;;  %v9928_v62 = vpop.xlane.xlu1 %3789  ;;  %v3762_v23 = vpop.xlane.xlu0 %3761 }
 0x4e1   : > { %v4636_v59 = vsel %vm4137_vm9, %v4635_v17, %v4631_v31  ;;  %v4429_v22 = vsel %vm4179_vm15, %v4428_v51, %v4424_v10  ;;  %v3940_v47 = vadd.f32 %v9467_v9, %v3762_v23 }
 0x4e2   : > { %v9934_v58 = vsel %vm4144_vm10, %v4640_v27, %v4636_v59 }
 0x4e3   : > { %v4576_v60 = vrot.slane %v3940_v47, %v9565_v13 }
 0x4e4   : > { %v9937_v28 = vpop.xlane.xlu1 %3791  ;;  %v3704_v36 = vpop.xlane.xlu0 %3703 }
 0x4e5   : > { %v4577_v57 = vsel %vm4165_vm13, %v4576_v60, %v4572_v24  ;;  %v3911_v35 = vadd.f32 %v9467_v9, %v3704_v36 }
 0x4e7   : > { %v4433_v54 = vrot.slane %v3911_v35, %v9602_v16 }
 0x4e8   : > { %v9942_v7 = vpop.xlane.xlu1 %3793  ;;  %v3764_v31 = vpop.xlane.xlu0 %3763 }
 0x4e9   : > { %v4434_v61 = vsel %vm4186_vm0, %v4433_v54, %v4429_v22  ;;  %v3941_v55 = vadd.f32 %v9467_v9, %v3764_v31 }
 0x4eb   : > { %v4581_v43 = vrot.slane %v3941_v55, %v9505_v12 }
 0x4ec   : > { %v3796_v21 = vpop.xlane.xlu1 %3795  ;;  %v3706_v11 = vpop.xlane.xlu0 %3705 }
 0x4ed   : > { %v4582_v33 = vsel %vm4172_vm14, %v4581_v43, %v4577_v57  ;;  %v3912_v44 = vadd.f32 %v9467_v9, %v3706_v11 }
 0x4ef   : > { %v4438_v10 = vrot.slane %v3912_v44, %v9518_v45 }
 0x4f0   : > { %v3798_v32 = vpop.xlane.xlu1 %3797  ;;  %v3766_v30 = vpop.xlane.xlu0 %3765 }
 0x4f1   : > { %v4439_v8 = vsel %vm4193_vm1, %v4438_v10, %v4434_v61  ;;  %v3942_v15 = vadd.f32 %v9467_v9, %v3766_v30 }
 0x4f3   : > { %v4586_v38 = vrot.slane %v3942_v15, %v9583_v4 }
 0x4f4   : > { %v3800_v63 = vpop.xlane.xlu1 %3799  ;;  %v3708_v56 = vpop.xlane.xlu0 %3707 }
 0x4f5   : > { %v4587_v39 = vsel %vm4179_vm15, %v4586_v38, %v4582_v33  ;;  %v3913_v50 = vadd.f32 %v9467_v9, %v3708_v56 }
 0x4f7   : > { %v4443_v17 = vrot.slane %v3913_v50, %v9542_v0 }
 0x4f8   : > { %v3802_v51 = vpop.xlane.xlu1 %3801  ;;  %v3768_v27 = vpop.xlane.xlu0 %3767 }
 0x4f9   : > { %v4444_v24 = vsel %vm4200_vm2, %v4443_v17, %v4439_v8  ;;  %v3943_v23 = vadd.f32 %v9467_v9, %v3768_v27 }
 0x4fb   : > { %v4591_v59 = vrot.slane %v3943_v23, %v9602_v16 }
 0x4fc   : > { %v3710_v22 = vpop.xlane.xlu0 %3709  ;;  %v3812_v47 = vpop.xlane.xlu1 %3811 }
 0x4fd   : > { %v4592_v60 = vsel %vm4186_vm0, %v4591_v59, %v4587_v39  ;;  %v3914_v36 = vadd.f32 %v9467_v9, %v3710_v22 }
 0x4ff   : > { %v4448_v57 = vrot.slane %v3914_v36, %v9562_v19 }
 0x500   : > { %v3770_v35 = vpop.xlane.xlu0 %3769  ;;  %v3714_v61 = vpop.xlane.xlu1 %3713 }
 0x501   : > { %v4449_v54 = vsel %vm4207_vm3, %v4448_v57, %v4444_v24  ;;  %v3944_v31 = vadd.f32 %v9467_v9, %v3770_v35  ;;  %v3916_v43 = vadd.f32 %v9467_v9, %v3714_v61  ;;  %v3954_v61 = vadd.f32 %v9467_v9, %v9928_v62 }
 0x503   : > { %v4596_v55 = vrot.slane %v3944_v31, %v9518_v45  ;;  %v4458_v30 = vrot.slane %v3916_v43, %v9599_v18  ;;  %v3956_v43 = vadd.f32 %v9467_v9, %v9942_v7 }
 0x504   : > { %v3712_v11 = vpop.xlane.xlu0 %3711  ;;  %v3774_v36 = vpop.xlane.xlu1 %3773 }
 0x505   : > { %v4597_v33 = vsel %vm4193_vm1, %v4596_v55, %v4592_v60  ;;  %v3915_v44 = vadd.f32 %v9467_v9, %v3712_v11  ;;  %v4655_v62 = vrot.slane %v3956_v43, %v9565_v13 }
 0x507   : > { %v4453_v10 = vrot.slane %v3915_v44, %v9595_v52  ;;  %v4645_v44 = vrot.slane %v3954_v61, %v9490_v1 }
 0x508   : > { %v3772_v8 = vpop.xlane.xlu0 %3771 }
 0x509   : > { %v4454_v15 = vsel %vm4214_vm4, %v4453_v10, %v4449_v54  ;;  %v3945_v38 = vadd.f32 %v9467_v9, %v3772_v8  ;;  %v9981_v54 = vpop.xlane.xlu1 %3833  ;;  %v3958_v10 = vadd.f32 %v9467_v9, %v3798_v32  ;;  %v3959_v8 = vadd.f32 %v9467_v9, %v3800_v63 }
 0x50a   : > { %v4459_v56 = vsel %vm4221_vm5, %v4458_v30, %v4454_v15  ;;  %v3960_v15 = vadd.f32 %v9467_v9, %v3802_v51  ;;  %v3965_v51 = vadd.f32 %v9467_v9, %v3812_v47 }
 0x50b   : > { %v4601_v39 = vrot.slane %v3945_v38, %v9542_v0  ;;  %v9976_v50 = vsel %vm10655_vm6, %v4459_v56, %v9861_v41  ;;  %v3955_v41 = vadd.f32 %v9467_v9, %v9937_v28  ;;  %v4665_v32 = vrot.slane %v3958_v10, %v9583_v4 }
 0x50c   : > { %v3814_v17 = vpop.xlane.xlu0 %3813  ;;  %v4670_v61 = vrot.slane %v3959_v8, %v9602_v16  ;;  %v4675_v43 = vrot.slane %v3960_v15, %v9518_v45  ;;  %v4700_v8 = vrot.slane %v3965_v51, %v9487_v26  ;;  %vm4782_vm6 = vcmask 1044484  }
 0x50d   : > { %v9979_v27 = vsel %vm4200_vm2, %v4601_v39, %v4597_v33  ;;  %v3776_v55 = vpop.xlane.xlu1 %3775  ;;  %v3957_v33 = vadd.f32 %v9467_v9, %v3796_v21  ;;  %v4650_v30 = vrot.slane %v3955_v41, %v9545_v29  ;;  %v3966_v7 = vadd.f32 %v9467_v9, %v3814_v17 }
 0x50e   : > { %v4646_v21 = vsel %vm4151_vm11, %v4645_v44, %v9934_v58  ;;  %v3946_v58 = vadd.f32 %v9467_v9, %v3774_v36 }
 0x50f   : > { %v4660_v38 = vrot.slane %v3957_v33, %v9505_v12  ;;  %v4651_v63 = vsel %vm4158_vm12, %v4650_v30, %v4646_v21  ;;  %v4704_v44 = vrot.slane %v3966_v7, %v9496_v37 }
 0x510   : > { %v3816_v24 = vpop.xlane.xlu0 %3815  ;;  %v4656_v41 = vsel %vm4165_vm13, %v4655_v62, %v4651_v63 }
 0x511   : > { %v9998_v56 = vpop.xlane.xlu1 %3835  ;;  %v3967_v39 = vadd.f32 %v9467_v9, %v3816_v24  ;;  %v4661_v53 = vsel %vm4172_vm14, %v4660_v38, %v4656_v41 }
 0x512   : > { %v4666_v24 = vsel %vm4179_vm15, %v4665_v32, %v4661_v53 }
 0x513   : > { %v4709_v10 = vrot.slane %v3967_v39, %v9508_v34  ;;  %v4671_v47 = vsel %vm4186_vm0, %v4670_v61, %v4666_v24  ;;  %v4606_v34 = vrot.slane %v3946_v58, %v9562_v19 }
 0x514   : > { %v3818_v23 = vpop.xlane.xlu0 %3817 }
 0x515   : > { %v3968_v30 = vadd.f32 %v9467_v9, %v3818_v23  ;;  %v3808_v62 = vpop.xlane.xlu1 %3807  ;;  %v4705_v23 = vsel %vm4123_vm7, %v4704_v44, %v4700_v8  ;;  %vm4784_vm7 = vcmask 1045509  }
 0x516   : > { %v4710_v21 = vsel %vm4130_vm8, %v4709_v10, %v4705_v23  ;;  %v3963_v39 = vadd.f32 %v9467_v9, %v3808_v62  ;;  %vm4786_vm8 = vcmask 1046534  }
 0x517   : > { %v4714_v32 = vrot.slane %v3968_v30, %v9525_v25 }
 0x518   : > { %v3820_v59 = vpop.xlane.xlu0 %3819  ;;  %v4690_v44 = vrot.slane %v3963_v39, %v9595_v52 }
 0x519   : > { %v3969_v15 = vadd.f32 %v9467_v9, %v3820_v59  ;;  %v3947_v59 = vadd.f32 %v9467_v9, %v3776_v55 }
 0x51b   : > { %v4719_v63 = vrot.slane %v3969_v15, %v9477_v20  ;;  %v4611_v58 = vrot.slane %v3947_v59, %v9595_v52 }
 0x51c   : > { %v3822_v22 = vpop.xlane.xlu0 %3821 }
 0x51d   : > { %v3970_v36 = vadd.f32 %v9467_v9, %v3822_v22 }
 0x520   : > { %v3824_v60 = vpop.xlane.xlu0 %3823 }
 0x521   : > { %v3971_v7 = vadd.f32 %v9467_v9, %v3824_v60  ;;  %v4724_v60 = vrot.slane %v3970_v36, %v9490_v1  ;;  %v4715_v1 = vsel %vm4137_vm9, %v4714_v32, %v4710_v21  ;;  %vm4788_vm9 = vcmask 1047559  }
 0x522   : > { %v4720_v24 = vsel %vm4144_vm10, %v4719_v63, %v4715_v1  ;;  %vm3983_vm10 = vcmp.lt.s32.totalorder %v9461_v40, 16  ;;  %v7437_v1 = vld [vmem:[#allocation19 + $0x128] ss:$24 sps:$4 sm:$0xff]  }
 0x523   : > { %v4725_v30 = vsel %vm4151_vm11, %v4724_v60, %v4720_v24  ;;  %v7438_v40 = vld [vmem:[#allocation19 + $0x130] ss:$24 sps:$4 sm:$0xff]   ;;  %v7444_v24 = vld [vmem:[#allocation19 + $0x100] ss:$24 sps:$4 sm:$0xff]   ;;  %vm7999_vm11 = vmmov 0  }
 0x524   : > { %v3826_v57 = vpop.xlane.xlu0 %3825 }
 0x525   : > { %v3972_v22 = vadd.f32 %v9467_v9, %v3826_v57  ;;  %v4729_v57 = vrot.slane %v3971_v7, %v9545_v29 }
 0x527   : > { %v4730_v62 = vsel %vm4158_vm12, %v4729_v57, %v4725_v30  ;;  %v7450_v30 = vld [vmem:[#allocation19 + $0xd0] ss:$24 sps:$4 sm:$0xff]  }
 0x528   : > { %v3828_v35 = vpop.xlane.xlu0 %3827 }
 0x529   : > { %v3973_v61 = vadd.f32 %v9467_v9, %v3828_v35 }
 0x52b   : > { %v4739_v29 = vrot.slane %v3973_v61, %v9505_v12  ;;  %v3976_v12 = vadd.f32 %v9467_v9, %v9981_v54  ;;  %v3977_v54 = vadd.f32 %v9467_v9, %v9998_v56 }
 0x52c   : > { %v3830_v31 = vpop.xlane.xlu0 %3829 }
 0x52d   : > { %v3974_v41 = vadd.f32 %v9467_v9, %v3830_v31  ;;  %v4734_v31 = vrot.slane %v3972_v22, %v9565_v13  ;;  %v4754_v32 = vrot.slane %v3976_v12, %v9518_v45  ;;  %v7462_v12 = vld [vmem:[#allocation19 + $0x70] ss:$24 sps:$4 sm:$0xff]  }
 0x530   : > { %v3832_v11 = vpop.xlane.xlu0 %3831 }
 0x534   : > { %v3744_v28 = vpop.xlane.xlu0 %3743 }
 0x535   : > { %v3931_v17 = vadd.f32 %v9467_v9, %v3744_v28  ;;  %v4676_v28 = vsel %vm4193_vm1, %v4675_v43, %v4671_v47  ;;  %v4744_v47 = vrot.slane %v3974_v41, %v9583_v4  ;;  %v4607_v4 = vsel %vm4207_vm3, %v4606_v34, %v9979_v27 }
 0x536   : > { %v4759_v41 = vrot.slane %v3977_v54, %v9542_v0  ;;  %v11205_v54 = vld [vmem:[#allocation46_spill] sm:$0xff] }
 0x537   : > { %v4532_v37 = vrot.slane %v3931_v17, %v9595_v52  ;;  %v3810_v17 = vpop.xlane.xlu1 %3809 }
 0x538   : > { %v3804_v33 = vpop.xlane.xlu0 %3803  ;;  %v3964_v10 = vadd.f32 %v9467_v9, %v3810_v17 }
 0x539   : > { %v3961_v53 = vadd.f32 %v9467_v9, %v3804_v33  ;;  %v4533_v55 = vsel %vm4214_vm4, %v4532_v37, %v9868_v48  ;;  %v3975_v33 = vadd.f32 %v9467_v9, %v3832_v11  ;;  %v4735_v37 = vsel %vm4165_vm13, %v4734_v31, %v4730_v62  ;;  %v7441_v31 = vld [vmem:[#allocation19 + $0xfc] ss:$24 sps:$4 sm:$0xff]   ;;  %v7456_v62 = vld [vmem:[#allocation19 + $0xa0] ss:$24 sps:$4 sm:$0xff]  }
 0x53a   : > { %v4695_v23 = vrot.slane %v3964_v10, %v9599_v18  ;;  %v7449_v10 = vld [vmem:[#allocation19 + $0xc8] ss:$24 sps:$4 sm:$0xff]   ;;  %vm11330_vm13 = vcmask 1041409  }
 0x53b   : > { %v4680_v43 = vrot.slane %v3961_v53, %v9542_v0  ;;  %v3842_v59 = vpop.xlane.xlu1 %3841 }
 0x53c   : > { %v3746_v38 = vpop.xlane.xlu0 %3745  ;;  %v3980_v61 = vadd.f32 %v9467_v9, %v3842_v59 }
 0x53d   : > { %v3932_v26 = vadd.f32 %v9467_v9, %v3746_v38  ;;  %v4681_v8 = vsel %vm4200_vm2, %v4680_v43, %v4676_v28  ;;  %v4740_v28 = vsel %vm4172_vm14, %v4739_v29, %v4735_v37  ;;  %v7447_v29 = vld [vmem:[#allocation19 + $0xcc] ss:$24 sps:$4 sm:$0xff]   ;;  %v7465_v37 = vld [vmem:[#allocation19 + $0x3c] ss:$24 sps:$4 sm:$0xff]   ;;  %vm11331_vm14 = vcmask 1042434  }
 0x53e   : > { %v4745_v7 = vsel %vm4179_vm15, %v4744_v47, %v4740_v28  ;;  %v7453_v47 = vld [vmem:[#allocation19 + $0x9c] ss:$24 sps:$4 sm:$0xff]   ;;  %v7467_v28 = vld [vmem:[#allocation19 + $0x38] ss:$24 sps:$4 sm:$0xff]   ;;  %vm11332_vm15 = vcmask 1043459  }
 0x53f   : > { %v4537_v51 = vrot.slane %v3932_v26, %v9599_v18 }
 0x540   : > { %v3806_v25 = vpop.xlane.xlu0 %3805 }
 0x541   : > { %v4538_v20 = vsel %vm4221_vm5, %v4537_v51, %v4533_v55  ;;  %v3962_v35 = vadd.f32 %v9467_v9, %v3806_v25  ;;  %v4774_v25 = vrot.slane %v3980_v61, %v9599_v18  ;;  %v11210_v61 = vld [vmem:[#allocation61_spill] sm:$0xff] }
 0x542   : > { %v4783_v48 = vsel %vm4782_vm6, %v4538_v20, %v9976_v50  ;;  %v4749_v50 = vrot.slane %v3975_v33, %v9602_v16  ;;  %v4612_v16 = vsel %vm4214_vm4, %v4611_v58, %v4607_v4  ;;  %v7431_v20 = vld [vmem:[#allocation19 + $0x158] ss:$24 sps:$4 sm:$0xff]   ;;  %v7440_v58 = vld [vmem:[#allocation19 + $0x134] ss:$24 sps:$4 sm:$0xff]   ;;  %v7470_v4 = vld [vmem:[#allocation19 + $0x44] ss:$24 sps:$4 sm:$0xff]  }
 0x543   : > { %v4685_v11 = vrot.slane %v3962_v35, %v9562_v19  ;;  %v7434_v35 = vld [vmem:[#allocation19 + $0x164] ss:$24 sps:$4 sm:$0xff]  }
 0x544   : > { %v3778_v13 = vpop.xlane.xlu0 %3777  ;;  %v4750_v27 = vsel %vm4186_vm0, %v4749_v50, %v4745_v7  ;;  %2931 = vmatprep.subr.bf16.mxu0 %v7434_v35  ;;  %v7459_v50 = vld [vmem:[#allocation19 + $0x6c] ss:$24 sps:$4 sm:$0xff]   ;;  %v7474_v7 = vld [vmem:[#allocation19 + $0x10] ss:$24 sps:$4 sm:$0xff]  }
 0x545   : > { %v4686_v15 = vsel %vm4207_vm3, %v4685_v11, %v4681_v8  ;;  %v3948_v36 = vadd.f32 %v9467_v9, %v3778_v13  ;;  %v4755_v51 = vsel %vm4193_vm1, %v4754_v32, %v4750_v27  ;;  %v7452_v11 = vld [vmem:[#allocation19 + $0xd4] ss:$24 sps:$4 sm:$0xff]   ;;  %v7458_v8 = vld [vmem:[#allocation19 + $0xa4] ss:$24 sps:$4 sm:$0xff]   ;;  %v7455_v13 = vld [vmem:[#allocation19 + $0x98] ss:$24 sps:$4 sm:$0xff]  }
 0x546   : > { %v4691_v53 = vsel %vm4214_vm4, %v4690_v44, %v4686_v15  ;;  %v4760_v43 = vsel %vm4200_vm2, %v4759_v41, %v4755_v51  ;;  %v7443_v44 = vld [vmem:[#allocation19 + $0xf8] ss:$24 sps:$4 sm:$0xff]   ;;  %v7464_v15 = vld [vmem:[#allocation19 + $0x74] ss:$24 sps:$4 sm:$0xff]   ;;  %v7998_v27 = vmov 0.0  }
 0x547   : > { %v4616_v38 = vrot.slane %v3948_v36, %v9599_v18  ;;  %v4696_v22 = vsel %vm4221_vm5, %v4695_v23, %v4691_v53  ;;  %v7435_v18 = vld [vmem:[#allocation19 + $0x12c] ss:$24 sps:$4 sm:$0xff]   ;;  %v7461_v36 = vld [vmem:[#allocation19 + $0x68] ss:$24 sps:$4 sm:$0xff]   ;;  %v11213_v41 = vld [vmem:[#allocation42_spill] sm:$0xff] }
 0x548   : > { %v3838_v26 = vpop.xlane.xlu0 %3837  ;;  %v7468_v53 = vld [vmem:[#allocation19 + $0x40] ss:$24 sps:$4 sm:$0xff]   ;;  %v11211_v51 = vld [vmem:[#allocation60_spill] sm:$0xff] }
 0x549   : > { %v4617_v34 = vsel %vm4221_vm5, %v4616_v38, %v4612_v16  ;;  %v3978_v21 = vadd.f32 %v9467_v9, %v3838_v26  ;;  %v7471_v38 = vld [vmem:[#allocation19 + $0xc] ss:$24 sps:$4 sm:$0xff]   ;;  %v7473_v23 = vld [vmem:[#allocation19 + $0x8] ss:$24 sps:$4 sm:$0xff]  }
 0x54a   : > { %v4785_v39 = vsel %vm4784_vm7, %v4617_v34, %v4783_v48  ;;  %v7446_v48 = vld [vmem:[#allocation19 + $0x104] ss:$24 sps:$4 sm:$0xff]   ;;  %v7476_v16 = vld [vmem:[#allocation19 + $0x14] ss:$24 sps:$4 sm:$0xff]  }
 0x54b   : > { %v4787_v63 = vsel %vm4786_vm8, %v4696_v22, %v4785_v39  ;;  %v4764_v56 = vrot.slane %v3978_v21, %v9562_v19  ;;  %v11204_v26 = vld [vmem:[#allocation47_spill] sm:$0xff]  ;;  %v11207_v21 = vld [vmem:[#allocation62_spill] sm:$0xff]  ;;  %v11208_v22 = vld [vmem:[#allocation45_spill] sm:$0xff] }
 0x54c   : > { %v3840_v60 = vpop.xlane.xlu0 %3839  ;;  %v6615_v59 = vcombine.low %v11205_v54, %v11204_v26  ;;  %v11206_v34 = vld [vmem:[#allocation63_spill] sm:$0xff]  ;;  %v11209_v39 = vld [vmem:[#allocation44_spill] sm:$0xff] }
 0x54d   : > { %v3979_v55 = vadd.f32 %v9467_v9, %v3840_v60  ;;  %v4765_v17 = vsel %vm4207_vm3, %v4764_v56, %v4760_v43  ;;  %v7429_v9 = vld [vmem:[#allocation19 + $0x15c] ss:$24 sps:$4 sm:$0xff]   ;;  %v6623_v32 = vcombine.low %v11207_v21, %v11206_v34  ;;  %v6622_v56 = vcombine.low %v11211_v51, %v11210_v61  ;;  %v11212_v60 = vld [vmem:[#allocation43_spill] sm:$0xff]  ;;  %v11219_v35 = vld [vmem:[#allocation56_spill] sm:$0xff] }
 0x54e   : > { %2890 = vmatprep.subr.bf16.mxu1 %v7429_v9  ;;  %v11217_v9 = vld [vmem:[#allocation40_spill] sm:$0xff] }
 0x54f   : > { %v4769_v45 = vrot.slane %v3979_v55, %v9595_v52  ;;  %v7432_v52 = vld [vmem:[#allocation19 + $0x160] ss:$24 sps:$4 sm:$0xff]   ;;  %2891 = vmatpush1.bf16.msra.mxu1 %v7431_v20  ;;  %v6613_v55 = vcombine.low %v11213_v41, %v11212_v60 }
 0x550   : > { %2932 = vmatpush1.bf16.msra.mxu0 %v7432_v52  ;;  %2892 = vmatprep.subr.bf16.mxu1 %v7435_v18  ;;  %v11218_v52 = vld [vmem:[#allocation57_spill] sm:$0xff]  ;;  %v11236_v60 = vld [vmem:[#allocation94_spill] sm:$0xff] }
 0x551   : > { %v4770_v57 = vsel %vm4214_vm4, %v4769_v45, %v4765_v17  ;;  %2933 = vmatprep.subr.bf16.mxu0 %v7440_v58  ;;  %v11214_v17 = vld [vmem:[#allocation59_spill] sm:$0xff]  ;;  %v6620_v18 = vcombine.low %v11219_v35, %v11218_v52  ;;  %v11244_v52 = vld [vmem:[#allocation90_spill] sm:$0xff] }
 0x552   : > { %v4775_v19 = vsel %vm4221_vm5, %v4774_v25, %v4770_v57  ;;  %v11215_v57 = vld [vmem:[#allocation58_spill] sm:$0xff]  ;;  %v11220_v58 = vld [vmem:[#allocation39_spill] sm:$0xff] }
 0x553   : > { %v4789_v33 = vsel %vm4788_vm9, %v4775_v19, %v4787_v63  ;;  %2893 = vmatpush1.bf16.msra.mxu1 %v7437_v1  ;;  %v6614_v63 = vcombine.low %v11209_v39, %v11208_v22  ;;  %v6621_v19 = vcombine.low %v11215_v57, %v11214_v17  ;;  %v11221_v1 = vld [vmem:[#allocation38_spill] sm:$0xff]  ;;  %v11233_v22 = vld [vmem:[#allocation79_spill] sm:$0xff]  ;;  %v11240_v17 = vld [vmem:[#allocation92_spill] sm:$0xff] }
 0x554   : > { %v10094_v0 = vsel %vm3983_vm10, %v4789_v33, -1e+30  ;;  %2934 = vmatpush1.bf16.msra.mxu0 %v7438_v40  ;;  %2894 = vmatprep.subr.bf16.mxu1 %v7441_v31  ;;  %v11216_v33 = vld [vmem:[#allocation41_spill] sm:$0xff]  ;;  %v6611_v40 = vcombine.low %v11221_v1, %v11220_v58  ;;  %v11223_v31 = vld [vmem:[#allocation54_spill] sm:$0xff]  ;;  %v11246_v58 = vld [vmem:[#allocation72_spill] sm:$0xff] }
 0x555   : > { %4792 = vmax.xlane.f32.xlu0 %v10094_v0  ;;  %2935 = vmatprep.subr.bf16.mxu0 %v7446_v48  ;;  %v6612_v20 = vcombine.low %v11217_v9, %v11216_v33  ;;  %v11234_v39 = vld [vmem:[#allocation78_spill] sm:$0xff] }
 0x556   : > { %v11242_v33 = vld [vmem:[#allocation74_spill] sm:$0xff] }
 0x557   : > { %2895 = vmatpush1.bf16.msra.mxu1 %v7443_v44  ;;  %v6610_v44 = vcombine.low %v8310_v5, %v8312_v6  ;;  %v11229_v5 = vld [vmem:[#allocation50_spill] sm:$0xff] }
 0x558   : > { %2936 = vmatpush1.bf16.msra.mxu0 %v7444_v24  ;;  %2896 = vmatprep.subr.bf16.mxu1 %v7447_v29  ;;  %v11224_v24 = vld [vmem:[#allocation53_spill] sm:$0xff]  ;;  %v11225_v29 = vld [vmem:[#allocation52_spill] sm:$0xff] }
 0x559   : > { %2937 = vmatprep.subr.bf16.mxu0 %v7452_v11  ;;  %v6618_v11 = vcombine.low %v11225_v29, %v11224_v24  ;;  %v11251_v29 = vld [vmem:[#allocation87_spill] sm:$0xff] }
 0x55b   : > { %2897 = vmatpush1.bf16.msra.mxu1 %v7449_v10  ;;  %v11226_v10 = vld [vmem:[#allocation37_spill] sm:$0xff] }
 0x55c   : > { %2938 = vmatpush1.bf16.msra.mxu0 %v7450_v30  ;;  %2898 = vmatprep.subr.bf16.mxu1 %v7453_v47  ;;  %v11227_v30 = vld [vmem:[#allocation36_spill] sm:$0xff] }
 0x55d   : > { %2939 = vmatprep.subr.bf16.mxu0 %v7458_v8  ;;  %v6609_v47 = vcombine.low %v11227_v30, %v11226_v10  ;;  %v11228_v8 = vld [vmem:[#allocation51_spill] sm:$0xff]  ;;  %v11253_v30 = vld [vmem:[#allocation69_spill] sm:$0xff] }
 0x55e   : > { %v6617_v6 = vcombine.low %v11229_v5, %v11228_v8  ;;  %v11255_v5 = vld [vmem:[#allocation85_spill] sm:$0xff] }
 0x55f   : > { %2899 = vmatpush1.bf16.msra.mxu1 %v7455_v13  ;;  %v11230_v13 = vld [vmem:[#allocation35_spill] sm:$0xff] }
 0x560   : > { %2940 = vmatpush1.bf16.msra.mxu0 %v7456_v62  ;;  %2900 = vmatprep.subr.bf16.mxu1 %v7459_v50  ;;  %v6608_v62 = vcombine.low %v11230_v13, %v8304_v2  ;;  %v11231_v50 = vld [vmem:[#allocation49_spill] sm:$0xff] }
 0x561   : > { %2941 = vmatprep.subr.bf16.mxu0 %v7464_v15  ;;  %v11232_v15 = vld [vmem:[#allocation48_spill] sm:$0xff] }
 0x563   : > { %2901 = vmatpush1.bf16.msra.mxu1 %v7461_v36  ;;  %v6616_v36 = vcombine.low %v11232_v15, %v11231_v50  ;;  %v11258_v50 = vld [vmem:[#allocation66_spill] sm:$0xff] }
 0x564   : > { %2942 = vmatpush1.bf16.msra.mxu0 %v7462_v12  ;;  %2902 = vmatprep.subr.bf16.mxu1 %v7465_v37 }
 0x565   : > { %2943 = vmatprep.subr.bf16.mxu0 %v7470_v4 }
 0x567   : > { %2903 = vmatpush1.bf16.msra.mxu1 %v7467_v28 }
 0x568   : > { %2944 = vmatpush1.bf16.msra.mxu0 %v7468_v53  ;;  %2904 = vmatprep.subr.bf16.mxu1 %v7471_v38 }
 0x569   : > { %2945 = vmatprep.subr.bf16.mxu0 %v7476_v16 }
 0x56b   : > { %2905 = vmatpush1.bf16.msra.mxu1 %v7473_v23 }
 0x56c   : > { %2946 = vmatpush1.bf16.msra.mxu0 %v7474_v7  ;;  %7033 = vmatprep.subr.bf16.mxu1 %v7998_v27  ;;  %v6205_v7 = vstv %s6199_s18  ;;  %s7847_s18 = sshll.u32 %s8000_s14, 4  ;;  %s7848_s18 = int_to_ptr.vmem [resolvable:$false] %s7847_s18 }
 0x56d   : > { %7053 = vmatprep.subr.bf16.mxu0 %v7998_v27  ;;  %vm6206_vm12 = vcmp.lt.s32.totalorder %v9253_v46, %v6205_v7  ;;  %p7850_p8 = scmp.lt.s32.totalorder %s6249_s28, %s7848_s18 }
 0x56e   : > { %2923 = vmatmul.mubr.bf16.vlgmr.msra.gmra.mxu1 %v9248_v3 }
 0x56f   : > { %2964 = vmatmul.mubr.bf16.vlgmr.msra.gmra.mxu0 %v9248_v3  ;;  %7034 = vmatpush3.bf16.msra.mxu1 %v6615_v59 }
 0x570   : > { %7054 = vmatpush3.bf16.msra.mxu0 %v6623_v32  ;;  %7035 = vmatprep.subr.bf16.mxu1 %v7998_v27 }
 0x571   : > { %7055 = vmatprep.subr.bf16.mxu0 %v7998_v27  ;;  %7049 = vmatprep.mubr.msk.bf16.mxu1 %vm7999_vm11, %v7998_v27 }
 0x572   : > { %7069 = vmatprep.mubr.msk.bf16.mxu0 %vm7999_vm11, %v7998_v27 }
 0x573   : > { %7036 = vmatpush3.bf16.msra.mxu1 %v6614_v63  ;;  %v6631_v63 = vcombine.low %v11234_v39, %v11233_v22  ;;  %v11265_v22 = vld [vmem:[#allocation111_spill] sm:$0xff]  ;;  %v11266_v39 = vld [vmem:[#allocation110_spill] sm:$0xff] }
 0x574   : > { %7056 = vmatpush3.bf16.msra.mxu0 %v6622_v56  ;;  %7037 = vmatprep.subr.bf16.mxu1 %v7998_v27  ;;  %v11235_v56 = vld [vmem:[#allocation95_spill] sm:$0xff] }
 0x575   : > { %7057 = vmatprep.subr.bf16.mxu0 %v7998_v27  ;;  %v6639_v41 = vcombine.low %v11236_v60, %v11235_v56  ;;  %v11267_v56 = vld [vmem:[#allocation127_spill] sm:$0xff]  ;;  %v11268_v60 = vld [vmem:[#allocation126_spill] sm:$0xff] }
 0x577   : > { %7038 = vmatpush3.bf16.msra.mxu1 %v6613_v55 }
 0x578   : > { %7039 = vmatprep.subr.bf16.mxu1 %v7998_v27  ;;  %7058 = vmatpush3.bf16.msra.mxu0 %v6621_v19  ;;  %v11241_v19 = vld [vmem:[#allocation75_spill] sm:$0xff] }
 0x579   : > { %7059 = vmatprep.subr.bf16.mxu0 %v7998_v27  ;;  %v6629_v9 = vcombine.low %v11242_v33, %v11241_v19  ;;  %v11275_v33 = vld [vmem:[#allocation123_spill] sm:$0xff] }
 0x57b   : > { %7040 = vmatpush3.bf16.msra.mxu1 %v6612_v20  ;;  %v11243_v20 = vld [vmem:[#allocation91_spill] sm:$0xff] }
 0x57c   : > { %7041 = vmatprep.subr.bf16.mxu1 %v7998_v27  ;;  %7060 = vmatpush3.bf16.msra.mxu0 %v6620_v18  ;;  %v6637_v35 = vcombine.low %v11244_v52, %v11243_v20  ;;  %v11245_v18 = vld [vmem:[#allocation73_spill] sm:$0xff] }
 0x57d   : > { %7061 = vmatprep.subr.bf16.mxu0 %v7998_v27  ;;  %v6628_v1 = vcombine.low %v11246_v58, %v11245_v18  ;;  %v11277_v52 = vld [vmem:[#allocation105_spill] sm:$0xff] }
 0x57e   : > { %v11279_v58 = vld [vmem:[#allocation121_spill] sm:$0xff] }
 0x57f   : > { %7042 = vmatpush3.bf16.msra.mxu1 %v6611_v40  ;;  %v11247_v40 = vld [vmem:[#allocation89_spill] sm:$0xff] }
 0x580   : > { %7043 = vmatprep.subr.bf16.mxu1 %v7998_v27 }
 0x583   : > { %7044 = vmatpush3.bf16.msra.mxu1 %v6610_v44  ;;  %v11250_v44 = vld [vmem:[#allocation70_spill] sm:$0xff] }
 0x584   : > { %7045 = vmatprep.subr.bf16.mxu1 %v7998_v27 }
 0x587   : > { %7046 = vmatpush3.bf16.msra.mxu1 %v6609_v47  ;;  %v11254_v47 = vld [vmem:[#allocation68_spill] sm:$0xff] }
 0x588   : > { %7047 = vmatprep.subr.bf16.mxu1 %v7998_v27  ;;  %v6626_v8 = vcombine.low %v11254_v47, %v11253_v30  ;;  %v11286_v30 = vld [vmem:[#allocation100_spill] sm:$0xff] }
 0x58b   : > { %7048 = vmatpush3.bf16.msra.mxu1 %v6608_v62  ;;  %v11257_v62 = vld [vmem:[#allocation67_spill] sm:$0xff] }
 0x58c   : > { %7073 = vmatprep.subr.bf16.mxu1 %v7998_v27  ;;  %v6625_v15 = vcombine.low %v11258_v50, %v11257_v62  ;;  %v11289_v62 = vld [vmem:[#allocation99_spill] sm:$0xff]  ;;  %v11290_v50 = vld [vmem:[#allocation98_spill] sm:$0xff] }
 0x5de   : > { %v4793_v3 = vpop.xlane.xlu0 %4792 }
 0x5df   : > { %v4794_v43 = vsub.f32 %v10094_v0, %v4793_v3  ;;  %v11222_v0 = vld [vmem:[#allocation55_spill] sm:$0xff]  ;;  %v11237_v3 = vld [vmem:[#allocation77_spill] sm:$0xff] }
 0x5e0   : > { %v6619_v48 = vcombine.low %v11223_v31, %v11222_v0  ;;  %v11248_v0 = vld [vmem:[#allocation88_spill] sm:$0xff] }
 0x5e1   : > { %v4795_v45 = vmul.f32 1.442695, %v4794_v43  ;;  %v11238_v43 = vld [vmem:[#allocation76_spill] sm:$0xff]  ;;  %v6636_v31 = vcombine.low %v11248_v0, %v11247_v40  ;;  %v11281_v0 = vld [vmem:[#allocation103_spill] sm:$0xff] }
 0x5e2   : > { %7062 = vmatpush3.bf16.msra.mxu0 %v6619_v48  ;;  %v11249_v48 = vld [vmem:[#allocation71_spill] sm:$0xff] }
 0x5e3   : > { %7573 = vpow2.f32 %v4795_v45  ;;  %7063 = vmatprep.subr.bf16.mxu0 %v7998_v27  ;;  %v6630_v45 = vcombine.low %v11238_v43, %v11237_v3  ;;  %v6627_v24 = vcombine.low %v11250_v44, %v11249_v48  ;;  %v11270_v3 = vld [vmem:[#allocation108_spill] sm:$0xff]  ;;  %v11283_v44 = vld [vmem:[#allocation119_spill] sm:$0xff] }
 0x5e6   : > { %7064 = vmatpush3.bf16.msra.mxu0 %v6618_v11  ;;  %v11252_v11 = vld [vmem:[#allocation86_spill] sm:$0xff] }
 0x5e7   : > { %7065 = vmatprep.subr.bf16.mxu0 %v7998_v27  ;;  %v6635_v10 = vcombine.low %v11252_v11, %v11251_v29 }
 0x5ea   : > { %7066 = vmatpush3.bf16.msra.mxu0 %v6617_v6  ;;  %v11256_v6 = vld [vmem:[#allocation84_spill] sm:$0xff] }
 0x5eb   : > { %7067 = vmatprep.subr.bf16.mxu0 %v7998_v27  ;;  %v6634_v13 = vcombine.low %v11256_v6, %v11255_v5  ;;  %v11288_v5 = vld [vmem:[#allocation116_spill] sm:$0xff] }
 0x5ee   : > { %7068 = vmatpush3.bf16.msra.mxu0 %v6616_v36  ;;  %v11259_v36 = vld [vmem:[#allocation83_spill] sm:$0xff] }
 0x5ef   : > { %7093 = vmatprep.subr.bf16.mxu0 %v7998_v27 }
 0x5f0   : > { %v7574_v25 = vpop.eup %7573 }
 0x5f1   : > { %4797 = vadd.xlane.f32.xlu1 %v7574_v25 }
 0x62e   : > { %v10154_v12 = vpop.f32.mrf.mxu1 }
 0x62f   : > { %v10156_v2 = vpop.f32.mrf.mxu0 }
 0x630   : > { %v10158_v37 = vpop.f32.mrf.mxu1 }
 0x631   : > { %v10160_v4 = vpop.f32.mrf.mxu0 }
 0x632   : > { %v2928_v28 = vpop.f32.mrf.mxu1 }
 0x633   : > { %v2969_v53 = vpop.f32.mrf.mxu0  ;;  %v11260_v28 = vld [vmem:[#allocation82_spill] sm:$0xff] }
 0x634   : > { %v2929_v38 = vpop.f32.mrf.mxu1  ;;  %v6633_v53 = vcombine.low %v11260_v28, %v11259_v36  ;;  %v11292_v36 = vld [vmem:[#allocation114_spill] sm:$0xff] }
 0x635   : > { %v2970_v16 = vpop.f32.mrf.mxu0  ;;  %v11261_v38 = vld [vmem:[#allocation65_spill] sm:$0xff] }
 0x636   : > { %v11262_v16 = vld [vmem:[#allocation64_spill] sm:$0xff] }
 0x67a   : > { %v4798_v23 = vpop.xlane.xlu1 %4797 }
 0x67b   : > { %7575 = vrcp.f32 %v4798_v23  ;;  %v6624_v23 = vcombine.low %v11262_v16, %v11261_v38  ;;  %v11293_v38 = vld [vmem:[#allocation97_spill] sm:$0xff]  ;;  %v11294_v16 = vld [vmem:[#allocation96_spill] sm:$0xff] }
 0x688   : > { %v7576_v26 = vpop.eup %7575 }
 0x689   : > { %v10164_v54 = vmul.f32 %v7576_v26, %v7574_v25  ;;  %v11239_v25 = vld [vmem:[#allocation93_spill] sm:$0xff] }
 0x68a   : > { %v6638_v57 = vcombine.low %v11240_v17, %v11239_v25  ;;  %v11263_v26 = vld [vmem:[#allocation81_spill] sm:$0xff]  ;;  %v11273_v17 = vld [vmem:[#allocation107_spill] sm:$0xff] }
 0x68b   : > { %v4809_v59 = vrot.slane %v10164_v54, %v9263_v42  ;;  %v6210_v34 = vsel %vm6206_vm12, %v10164_v54, 0.0  ;;  %v4802_v11 = vcombine.high %v10164_v54, %v10164_v54  ;;  %v11291_v54 = vld [vmem:[#allocation115_spill] sm:$0xff] }
 0x68c   : > { %6211 = vst [vmem:[%s8564_s27] sm:$0xff] %v6210_v34  ;;  %v6649_v28 = vcombine.low %v11292_v36, %v11291_v54  ;;  %v11325_v54 = vld [vmem:[#allocation129_spill] sm:$0xff]  ;;  %v11326_v36 = vld [vmem:[#allocation128_spill] sm:$0xff] }
 0x68d   : > { %v4825_v21 = vrot.slane %v4809_v59, %v9263_v42  ;;  %v4817_v32 = vcombine.high %v4809_v59, %v4809_v59  ;;  %v11264_v59 = vld [vmem:[#allocation80_spill] sm:$0xff] }
 0x68e   : > { %v6632_v34 = vcombine.low %v11264_v59, %v11263_v26  ;;  %v11295_v26 = vld [vmem:[#allocation113_spill] sm:$0xff]  ;;  %v11296_v59 = vld [vmem:[#allocation112_spill] sm:$0xff] }
 0x68f   : > { %v4859_v61 = vpack.c.bf16 %v4825_v21, %v4825_v21  ;;  %v4839_v51 = vrot.slane %v4817_v32, %v9263_v42  ;;  %v4847_v7 = vcombine.high %v4825_v21, %v4825_v21 }
 0x691   : > { %7050 = vmatmul.mubr.bf16.vlgmr.msra.gmra.mxu1 %v4859_v61  ;;  %v4860_v55 = vpack.c.bf16 %v4839_v51, %v4839_v51  ;;  %v4849_v32 = vcombine.high %v4839_v51, %v4839_v51  ;;  %v4861_v61 = vpack.c.bf16 %v4847_v7, %v4847_v7  ;;  %v11271_v51 = vld [vmem:[#allocation125_spill] sm:$0xff] }
 0x692   : > { %7074 = vmatpush3.bf16.msra.mxu1 %v6631_v63  ;;  %7089 = vmatprep.mubr.msk.bf16.mxu1 %vm7999_vm11, %v7998_v27  ;;  %v6647_v63 = vcombine.low %v11266_v39, %v11265_v22  ;;  %v11297_v22 = vld [vmem:[#allocation143_spill] sm:$0xff]  ;;  %v11298_v39 = vld [vmem:[#allocation142_spill] sm:$0xff] }
 0x693   : > { %7070 = vmatmul.mubr.bf16.vlgmr.msra.gmra.mxu0 %v4860_v55  ;;  %7075 = vmatprep.subr.bf16.mxu1 %v7998_v27  ;;  %v4862_v21 = vpack.c.bf16 %v4849_v32, %v4849_v32  ;;  %v11269_v55 = vld [vmem:[#allocation109_spill] sm:$0xff] }
 0x694   : > { %7094 = vmatpush3.bf16.msra.mxu0 %v6639_v41  ;;  %7109 = vmatprep.mubr.msk.bf16.mxu0 %vm7999_vm11, %v7998_v27  ;;  %v6655_v41 = vcombine.low %v11268_v60, %v11267_v56  ;;  %v6646_v43 = vcombine.low %v11270_v3, %v11269_v55  ;;  %v11299_v56 = vld [vmem:[#allocation159_spill] sm:$0xff]  ;;  %v11300_v60 = vld [vmem:[#allocation158_spill] sm:$0xff]  ;;  %v11301_v55 = vld [vmem:[#allocation141_spill] sm:$0xff] }
 0x695   : > { %7095 = vmatprep.subr.bf16.mxu0 %v7998_v27  ;;  %v11302_v3 = vld [vmem:[#allocation140_spill] sm:$0xff] }
 0x696   : > { %7076 = vmatpush3.bf16.msra.mxu1 %v6630_v45  ;;  %v11272_v45 = vld [vmem:[#allocation124_spill] sm:$0xff] }
 0x697   : > { %7077 = vmatprep.subr.bf16.mxu1 %v7998_v27  ;;  %v6654_v25 = vcombine.low %v11272_v45, %v11271_v51  ;;  %v11304_v51 = vld [vmem:[#allocation156_spill] sm:$0xff] }
 0x698   : > { %7096 = vmatpush3.bf16.msra.mxu0 %v6638_v57  ;;  %v11274_v57 = vld [vmem:[#allocation106_spill] sm:$0xff] }
 0x699   : > { %7097 = vmatprep.subr.bf16.mxu0 %v7998_v27  ;;  %v6645_v19 = vcombine.low %v11274_v57, %v11273_v17  ;;  %v11306_v17 = vld [vmem:[#allocation138_spill] sm:$0xff] }
 0x69a   : > { %7078 = vmatpush3.bf16.msra.mxu1 %v6629_v9  ;;  %v11276_v9 = vld [vmem:[#allocation122_spill] sm:$0xff] }
 0x69b   : > { %7079 = vmatprep.subr.bf16.mxu1 %v7998_v27  ;;  %v6653_v20 = vcombine.low %v11276_v9, %v11275_v33  ;;  %v11308_v33 = vld [vmem:[#allocation154_spill] sm:$0xff] }
 0x69c   : > { %7098 = vmatpush3.bf16.msra.mxu0 %v6637_v35  ;;  %v11278_v35 = vld [vmem:[#allocation104_spill] sm:$0xff] }
 0x69d   : > { %7099 = vmatprep.subr.bf16.mxu0 %v7998_v27  ;;  %v6644_v18 = vcombine.low %v11278_v35, %v11277_v52  ;;  %v11310_v52 = vld [vmem:[#allocation136_spill] sm:$0xff] }
 0x69e   : > { %7080 = vmatpush3.bf16.msra.mxu1 %v6628_v1  ;;  %v11280_v1 = vld [vmem:[#allocation120_spill] sm:$0xff] }
 0x69f   : > { %7081 = vmatprep.subr.bf16.mxu1 %v7998_v27  ;;  %v6652_v40 = vcombine.low %v11280_v1, %v11279_v58  ;;  %v11312_v58 = vld [vmem:[#allocation152_spill] sm:$0xff] }
 0x6a0   : > { %7100 = vmatpush3.bf16.msra.mxu0 %v6636_v31  ;;  %v11282_v31 = vld [vmem:[#allocation102_spill] sm:$0xff] }
 0x6a1   : > { %7101 = vmatprep.subr.bf16.mxu0 %v7998_v27  ;;  %v6643_v48 = vcombine.low %v11282_v31, %v11281_v0  ;;  %v11314_v0 = vld [vmem:[#allocation134_spill] sm:$0xff] }
 0x6a2   : > { %7082 = vmatpush3.bf16.msra.mxu1 %v6627_v24  ;;  %v11284_v24 = vld [vmem:[#allocation118_spill] sm:$0xff] }
 0x6a3   : > { %7083 = vmatprep.subr.bf16.mxu1 %v7998_v27  ;;  %v6651_v29 = vcombine.low %v11284_v24, %v11283_v44  ;;  %v11316_v44 = vld [vmem:[#allocation150_spill] sm:$0xff] }
 0x6a4   : > { %7102 = vmatpush3.bf16.msra.mxu0 %v6635_v10  ;;  %v11285_v10 = vld [vmem:[#allocation101_spill] sm:$0xff] }
 0x6a5   : > { %7103 = vmatprep.subr.bf16.mxu0 %v7998_v27  ;;  %v6642_v47 = vcombine.low %v11286_v30, %v11285_v10  ;;  %v11319_v30 = vld [vmem:[#allocation149_spill] sm:$0xff] }
 0x6a6   : > { %7084 = vmatpush3.bf16.msra.mxu1 %v6626_v8  ;;  %v11287_v8 = vld [vmem:[#allocation117_spill] sm:$0xff] }
 0x6a7   : > { %7085 = vmatprep.subr.bf16.mxu1 %v7998_v27  ;;  %v6650_v6 = vcombine.low %v11288_v5, %v11287_v8  ;;  %v11321_v5 = vld [vmem:[#allocation131_spill] sm:$0xff] }
 0x6a8   : > { %7104 = vmatpush3.bf16.msra.mxu0 %v6634_v13  ;;  %v4816_v13 = vrot.slane %v4802_v11, %v9263_v42  ;;  %v11318_v11 = vld [vmem:[#allocation132_spill] sm:$0xff] }
 0x6a9   : > { %7105 = vmatprep.subr.bf16.mxu0 %v7998_v27 }
 0x6aa   : > { %7086 = vmatpush3.bf16.msra.mxu1 %v6625_v15  ;;  %v6641_v15 = vcombine.low %v11290_v50, %v11289_v62  ;;  %v4832_v7 = vrot.slane %v4816_v13, %v9263_v42  ;;  %v11323_v62 = vld [vmem:[#allocation147_spill] sm:$0xff]  ;;  %v11324_v50 = vld [vmem:[#allocation146_spill] sm:$0xff] }
 0x6ab   : > { %7087 = vmatprep.subr.bf16.mxu1 %v7998_v27 }
 0x6ac   : > { %7106 = vmatpush3.bf16.msra.mxu0 %v6633_v53  ;;  %v4818_v53 = vcombine.high %v4816_v13, %v4816_v13 }
 0x6ad   : > { %7107 = vmatprep.subr.bf16.mxu0 %v7998_v27 }
 0x6ae   : > { %7088 = vmatpush3.bf16.msra.mxu1 %v6624_v23  ;;  %v6640_v23 = vcombine.low %v11294_v16, %v11293_v38  ;;  %v4846_v32 = vrot.slane %v4818_v53, %v9263_v42  ;;  %v11303_v42 = vld [vmem:[#allocation157_spill] sm:$0xff]  ;;  %v4848_v53 = vcombine.high %v4832_v7, %v4832_v7  ;;  %v11328_v16 = vld [vmem:[#allocation144_spill] sm:$0xff] }
 0x6af   : > { %7113 = vmatprep.subr.bf16.mxu1 %v7998_v27  ;;  %v6670_v45 = vcombine.low %v11304_v51, %v11303_v42  ;;  %v11327_v38 = vld [vmem:[#allocation145_spill] sm:$0xff]  ;;  %v7500_v42 = vld [vmem:[#allocation22 + $0x8c] ss:$16 sps:$4 sm:$0xff]  }
 0x6b0   : > { %7108 = vmatpush3.bf16.msra.mxu0 %v6632_v34  ;;  %v6648_v34 = vcombine.low %v11296_v59, %v11295_v26  ;;  %v4850_v26 = vcombine.high %v4846_v32, %v4846_v32  ;;  %v4865_v59 = vpack.c.bf16 %v4848_v53, %v4848_v53  ;;  %v7495_v51 = vld [vmem:[#allocation22 + $0x80] ss:$16 sps:$4 sm:$0xff]  }
 0x6b1   : > { %7090 = vmatmul.mubr.bf16.vlgmr.msra.gmra.mxu1 %v4861_v61  ;;  %7133 = vmatprep.subr.bf16.mxu0 %v7998_v27  ;;  %v4863_v61 = vpack.c.bf16 %v4832_v7, %v4832_v7  ;;  %v7480_v7 = vld [vmem:[#allocation22 + $0xe8] ss:$16 sps:$4 sm:$0xff]  }
 0x6b2   : > { %7114 = vmatpush3.bf16.msra.mxu1 %v6647_v63  ;;  %7129 = vmatprep.mubr.msk.bf16.mxu1 %vm7999_vm11, %v7998_v27  ;;  %v6663_v63 = vcombine.low %v11298_v39, %v11297_v22  ;;  %v11329_v22 = vmov 0   ;;  %v7477_v39 = vld [vmem:[#allocation22 + $0xe0] ss:$16 sps:$4 sm:$0xff]  }
 0x6b3   : > { %7110 = vmatmul.mubr.bf16.vlgmr.msra.gmra.mxu0 %v4862_v21  ;;  %7115 = vmatprep.subr.bf16.mxu1 %v7998_v27  ;;  %v4864_v21 = vpack.c.bf16 %v4846_v32, %v4846_v32  ;;  %v7486_v32 = vld [vmem:[#allocation22 + $0xc8] ss:$16 sps:$4 sm:$0xff]  }
 0x6b4   : > { %7134 = vmatpush3.bf16.msra.mxu0 %v6655_v41  ;;  %7149 = vmatprep.mubr.msk.bf16.mxu0 %vm7999_vm11, %v7998_v27  ;;  %v6671_v41 = vcombine.low %v11300_v60, %v11299_v56  ;;  %v7485_v56 = vld [vmem:[#allocation22 + $0xc4] ss:$16 sps:$4 sm:$0xff]   ;;  %v7488_v60 = vld [vmem:[#allocation22 + $0xcc] ss:$16 sps:$4 sm:$0xff]  }
 0x6b5   : > { %7135 = vmatprep.subr.bf16.mxu0 %v7998_v27 }
 0x6b6   : > { %7116 = vmatpush3.bf16.msra.mxu1 %v6646_v43  ;;  %v6662_v43 = vcombine.low %v11302_v3, %v11301_v55  ;;  %v7489_v55 = vld [vmem:[#allocation22 + $0xa0] ss:$16 sps:$4 sm:$0xff]   ;;  %v7492_v3 = vld [vmem:[#allocation22 + $0xa8] ss:$16 sps:$4 sm:$0xff]  }
 0x6b7   : > { %7117 = vmatprep.subr.bf16.mxu1 %v7998_v27 }
 0x6b8   : > { %7136 = vmatpush3.bf16.msra.mxu0 %v6654_v25  ;;  %v11305_v25 = vld [vmem:[#allocation139_spill] sm:$0xff] }
 0x6b9   : > { %7137 = vmatprep.subr.bf16.mxu0 %v7998_v27  ;;  %v6661_v57 = vcombine.low %v11306_v17, %v11305_v25  ;;  %v7503_v25 = vld [vmem:[#allocation22 + $0x64] ss:$16 sps:$4 sm:$0xff]   ;;  %v7506_v17 = vld [vmem:[#allocation22 + $0x6c] ss:$16 sps:$4 sm:$0xff]  }
 0x6ba   : > { %7118 = vmatpush3.bf16.msra.mxu1 %v6645_v19  ;;  %v11307_v19 = vld [vmem:[#allocation155_spill] sm:$0xff] }
 0x6bb   : > { %7119 = vmatprep.subr.bf16.mxu1 %v7998_v27  ;;  %v6669_v9 = vcombine.low %v11308_v33, %v11307_v19  ;;  %v7504_v19 = vld [vmem:[#allocation22 + $0x68] ss:$16 sps:$4 sm:$0xff]   ;;  %v7509_v33 = vld [vmem:[#allocation22 + $0x44] ss:$16 sps:$4 sm:$0xff]  }
 0x6bc   : > { %7138 = vmatpush3.bf16.msra.mxu0 %v6653_v20  ;;  %v11309_v20 = vld [vmem:[#allocation137_spill] sm:$0xff] }
 0x6bd   : > { %7139 = vmatprep.subr.bf16.mxu0 %v7998_v27  ;;  %v6660_v35 = vcombine.low %v11310_v52, %v11309_v20  ;;  %v7507_v20 = vld [vmem:[#allocation22 + $0x40] ss:$16 sps:$4 sm:$0xff]   ;;  %v7510_v52 = vld [vmem:[#allocation22 + $0x48] ss:$16 sps:$4 sm:$0xff]  }
 0x6be   : > { %7120 = vmatpush3.bf16.msra.mxu1 %v6644_v18  ;;  %v11311_v18 = vld [vmem:[#allocation153_spill] sm:$0xff] }
 0x6bf   : > { %7121 = vmatprep.subr.bf16.mxu1 %v7998_v27  ;;  %v6668_v1 = vcombine.low %v11312_v58, %v11311_v18  ;;  %v7515_v18 = vld [vmem:[#allocation22 + $0x24] ss:$16 sps:$4 sm:$0xff]   ;;  %v7516_v58 = vld [vmem:[#allocation22 + $0x28] ss:$16 sps:$4 sm:$0xff]  }
 0x6c0   : > { %7140 = vmatpush3.bf16.msra.mxu0 %v6652_v40  ;;  %v11313_v40 = vld [vmem:[#allocation135_spill] sm:$0xff] }
 0x6c1   : > { %7141 = vmatprep.subr.bf16.mxu0 %v7998_v27  ;;  %v6659_v31 = vcombine.low %v11314_v0, %v11313_v40  ;;  %v7519_v40 = vld [vmem:[#allocation22] ss:$16 sps:$4 sm:$0xff]   ;;  %v7521_v0 = vld [vmem:[#allocation22 + $0x4] ss:$16 sps:$4 sm:$0xff]  }
 0x6c2   : > { %7122 = vmatpush3.bf16.msra.mxu1 %v6643_v48  ;;  %v11315_v48 = vld [vmem:[#allocation151_spill] sm:$0xff] }
 0x6c3   : > { %7123 = vmatprep.subr.bf16.mxu1 %v7998_v27  ;;  %v6667_v24 = vcombine.low %v11316_v44, %v11315_v48  ;;  %v7524_v48 = vld [vmem:[#allocation22 + $0xc] ss:$16 sps:$4 sm:$0xff]   ;;  %v7527_v44 = vld [vmem:[#allocation20 + $0xe4] ss:$16 sps:$4 sm:$0xff]  }
 0x6c4   : > { %7142 = vmatpush3.bf16.msra.mxu0 %v6651_v29  ;;  %v11317_v29 = vld [vmem:[#allocation133_spill] sm:$0xff] }
 0x6c5   : > { %7143 = vmatprep.subr.bf16.mxu0 %v7998_v27  ;;  %v6658_v10 = vcombine.low %v11318_v11, %v11317_v29 }
 0x6c6   : > { %7124 = vmatpush3.bf16.msra.mxu1 %v6642_v47  ;;  %v11320_v47 = vld [vmem:[#allocation148_spill] sm:$0xff] }
 0x6c7   : > { %7125 = vmatprep.subr.bf16.mxu1 %v7998_v27  ;;  %v6666_v8 = vcombine.low %v11320_v47, %v11319_v30 }
 0x6c8   : > { %7144 = vmatpush3.bf16.msra.mxu0 %v6650_v6  ;;  %v11322_v6 = vld [vmem:[#allocation130_spill] sm:$0xff] }
 0x6c9   : > { %7145 = vmatprep.subr.bf16.mxu0 %v7998_v27  ;;  %v6657_v13 = vcombine.low %v11322_v6, %v11321_v5 }
 0x6ca   : > { %7126 = vmatpush3.bf16.msra.mxu1 %v6641_v15  ;;  %v6665_v15 = vcombine.low %v11324_v50, %v11323_v62 }
 0x6cb   : > { %7127 = vmatprep.subr.bf16.mxu1 %v7998_v27 }
 0x6cc   : > { %7146 = vmatpush3.bf16.msra.mxu0 %v6649_v28  ;;  %v6656_v28 = vcombine.low %v11326_v36, %v11325_v54 }
 0x6cd   : > { %7147 = vmatprep.subr.bf16.mxu0 %v7998_v27 }
 0x6ce   : > { %7128 = vmatpush3.bf16.msra.mxu1 %v6640_v23  ;;  %v6664_v23 = vcombine.low %v11328_v16, %v11327_v38 }
 0x6cf   : > { %7153 = vmatprep.subr.bf16.mxu1 %v7998_v27 }
 0x6d0   : > { %7148 = vmatpush3.bf16.msra.mxu0 %v6648_v34  ;;  %v4866_v34 = vpack.c.bf16 %v4850_v26, %v4850_v26  ;;  %v10338_v26 = vld [vmem:[%s11203_s19] sm:$0x3f] }
 0x6d1   : > { %7130 = vmatmul.mubr.bf16.vlgmr.msra.gmra.mxu1 %v4863_v61  ;;  %7173 = vmatprep.subr.bf16.mxu0 %v7998_v27  ;;  %v7482_v61 = vld [vmem:[#allocation22 + $0xec] ss:$16 sps:$4 sm:$0xff]  }
 0x6d2   : > { %7154 = vmatpush3.bf16.msra.mxu1 %v6663_v63  ;;  %7169 = vmatprep.mubr.msk.bf16.mxu1 %vm7999_vm11, %v7998_v27  ;;  %v7479_v63 = vld [vmem:[#allocation22 + $0xe4] ss:$16 sps:$4 sm:$0xff]  }
 0x6d3   : > { %7150 = vmatmul.mubr.bf16.vlgmr.msra.gmra.mxu0 %v4864_v21  ;;  %7155 = vmatprep.subr.bf16.mxu1 %v7998_v27  ;;  %v7494_v21 = vld [vmem:[#allocation22 + $0xac] ss:$16 sps:$4 sm:$0xff]  }
 0x6d4   : > { %7174 = vmatpush3.bf16.msra.mxu0 %v6671_v41  ;;  %7189 = vmatprep.mubr.msk.bf16.mxu0 %vm7999_vm11, %v7998_v27  ;;  %v7491_v41 = vld [vmem:[#allocation22 + $0xa4] ss:$16 sps:$4 sm:$0xff]  }
 0x6d5   : > { %7175 = vmatprep.subr.bf16.mxu0 %v7998_v27 }
 0x6d6   : > { %7156 = vmatpush3.bf16.msra.mxu1 %v6662_v43  ;;  %v7497_v43 = vld [vmem:[#allocation22 + $0x84] ss:$16 sps:$4 sm:$0xff]  }
 0x6d7   : > { %7157 = vmatprep.subr.bf16.mxu1 %v7998_v27 }
 0x6d8   : > { %7176 = vmatpush3.bf16.msra.mxu0 %v6670_v45  ;;  %v7498_v45 = vld [vmem:[#allocation22 + $0x88] ss:$16 sps:$4 sm:$0xff]  }
 0x6d9   : > { %7177 = vmatprep.subr.bf16.mxu0 %v7998_v27 }
 0x6da   : > { %7158 = vmatpush3.bf16.msra.mxu1 %v6661_v57  ;;  %v7501_v57 = vld [vmem:[#allocation22 + $0x60] ss:$16 sps:$4 sm:$0xff]  }
 0x6db   : > { %7159 = vmatprep.subr.bf16.mxu1 %v7998_v27 }
 0x6dc   : > { %7178 = vmatpush3.bf16.msra.mxu0 %v6669_v9  ;;  %v7512_v9 = vld [vmem:[#allocation22 + $0x4c] ss:$16 sps:$4 sm:$0xff]  }
 0x6dd   : > { %7179 = vmatprep.subr.bf16.mxu0 %v7998_v27 }
 0x6de   : > { %7160 = vmatpush3.bf16.msra.mxu1 %v6660_v35  ;;  %v7513_v35 = vld [vmem:[#allocation22 + $0x20] ss:$16 sps:$4 sm:$0xff]  }
 0x6df   : > { %7161 = vmatprep.subr.bf16.mxu1 %v7998_v27 }
 0x6e0   : > { %7180 = vmatpush3.bf16.msra.mxu0 %v6668_v1  ;;  %v7518_v1 = vld [vmem:[#allocation22 + $0x2c] ss:$16 sps:$4 sm:$0xff]  }
 0x6e1   : > { %7181 = vmatprep.subr.bf16.mxu0 %v7998_v27 }
 0x6e2   : > { %7162 = vmatpush3.bf16.msra.mxu1 %v6659_v31  ;;  %v7522_v31 = vld [vmem:[#allocation22 + $0x8] ss:$16 sps:$4 sm:$0xff]  }
 0x6e3   : > { %7163 = vmatprep.subr.bf16.mxu1 %v7998_v27 }
 0x6e4   : > { %7182 = vmatpush3.bf16.msra.mxu0 %v6667_v24  ;;  %v7530_v24 = vld [vmem:[#allocation20 + $0xec] ss:$16 sps:$4 sm:$0xff]  }
 0x6e5   : > { %7183 = vmatprep.subr.bf16.mxu0 %v7998_v27 }
 0x6e6   : > { %7164 = vmatpush3.bf16.msra.mxu1 %v6658_v10 }
 0x6e7   : > { %7165 = vmatprep.subr.bf16.mxu1 %v7998_v27 }
 0x6e8   : > { %7184 = vmatpush3.bf16.msra.mxu0 %v6666_v8 }
 0x6e9   : > { %7185 = vmatprep.subr.bf16.mxu0 %v7998_v27 }
 0x6ea   : > { %7166 = vmatpush3.bf16.msra.mxu1 %v6657_v13 }
 0x6eb   : > { %7167 = vmatprep.subr.bf16.mxu1 %v7998_v27 }
 0x6ec   : > { %7186 = vmatpush3.bf16.msra.mxu0 %v6665_v15 }
 0x6ed   : > { %7187 = vmatprep.subr.bf16.mxu0 %v7998_v27  ;;  %v7483_v27 = vld [vmem:[#allocation22 + $0xc0] ss:$16 sps:$4 sm:$0xff]  }
 0x6ee   : > { %7168 = vmatpush3.bf16.msra.mxu1 %v6656_v28 }
 0x6ef   : > { %5821 = vmatprep.subr.bf16.mxu1 %v7479_v63 }
 0x6f0   : > { %7188 = vmatpush3.bf16.msra.mxu0 %v6664_v23  ;;  %v2585_v23 = vsub.s32 1, %v9253_v46 }
 0x6f1   : > { %7170 = vmatmul.mubr.bf16.vlgmr.msra.gmra.mxu1 %v4865_v59  ;;  %5862 = vmatprep.subr.bf16.mxu0 %v7482_v61 }
 0x6f2   : > { %5853 = vmatprep.mubr.bf16.mxu1 %v11329_v22  ;;  %5822 = vmatpush1.bf16.msra.mxu1 %v7477_v39  ;;  %v2586_v59 = vrot.slane %v10338_v26, %v2585_v23 }
 0x6f3   : > { %7190 = vmatmul.mubr.bf16.vlgmr.msra.gmra.mxu0 %v4866_v34  ;;  %5823 = vmatprep.subr.bf16.mxu1 %v7485_v56 }
 0x6f4   : > { %5894 = vmatprep.mubr.bf16.mxu0 %v11329_v22  ;;  %5863 = vmatpush1.bf16.msra.mxu0 %v7480_v7  ;;  %v2886_v34 = vadd.f32 %v9267_v14, %v2586_v59  ;;  %v7555_v59 = vld [vmem:[#allocation20 + $0x40] ss:$16 sps:$4 sm:$0xff]  }
 0x6f5   : > { %5864 = vmatprep.subr.bf16.mxu0 %v7488_v60 }
 0x6f6   : > { %5824 = vmatpush1.bf16.msra.mxu1 %v7483_v27  ;;  %v6605_v39 = vmul.f32 -1.442695, %v2886_v34  ;;  %v7558_v34 = vld [vmem:[#allocation20 + $0x48] ss:$16 sps:$4 sm:$0xff]  }
 0x6f7   : > { %5825 = vmatprep.subr.bf16.mxu1 %v7491_v41 }
 0x6f8   : > { %5865 = vmatpush1.bf16.msra.mxu0 %v7486_v32  ;;  %7577 = vpow2.f32 %v6605_v39  ;;  %v7563_v39 = vld [vmem:[#allocation20 + $0x24] ss:$16 sps:$4 sm:$0xff]  }
 0x6f9   : > { %5866 = vmatprep.subr.bf16.mxu0 %v7494_v21 }
 0x6fa   : > { %5826 = vmatpush1.bf16.msra.mxu1 %v7489_v55 }
 0x6fb   : > { %5827 = vmatprep.subr.bf16.mxu1 %v7497_v43 }
 0x6fc   : > { %5867 = vmatpush1.bf16.msra.mxu0 %v7492_v3 }
 0x6fd   : > { %5868 = vmatprep.subr.bf16.mxu0 %v7500_v42 }
 0x6fe   : > { %5828 = vmatpush1.bf16.msra.mxu1 %v7495_v51 }
 0x6ff   : > { %5829 = vmatprep.subr.bf16.mxu1 %v7503_v25 }
 0x700   : > { %5869 = vmatpush1.bf16.msra.mxu0 %v7498_v45 }
 0x701   : > { %5870 = vmatprep.subr.bf16.mxu0 %v7506_v17 }
 0x702   : > { %5830 = vmatpush1.bf16.msra.mxu1 %v7501_v57 }
 0x703   : > { %5831 = vmatprep.subr.bf16.mxu1 %v7509_v33 }
 0x704   : > { %5871 = vmatpush1.bf16.msra.mxu0 %v7504_v19 }
 0x705   : > { %5872 = vmatprep.subr.bf16.mxu0 %v7512_v9  ;;  %v7578_v21 = vpop.eup %7577 }
 0x706   : > { %5832 = vmatpush1.bf16.msra.mxu1 %v7507_v20  ;;  %v2975_v55 = vadd.f32 1.0, %v7578_v21 }
 0x707   : > { %5833 = vmatprep.subr.bf16.mxu1 %v7515_v18 }
 0x708   : > { %5873 = vmatpush1.bf16.msra.mxu0 %v7510_v52  ;;  %7579 = vrcp.f32 %v2975_v55 }
 0x709   : > { %5874 = vmatprep.subr.bf16.mxu0 %v7518_v1 }
 0x70a   : > { %5834 = vmatpush1.bf16.msra.mxu1 %v7513_v35 }
 0x70b   : > { %5835 = vmatprep.subr.bf16.mxu1 %v7521_v0 }
 0x70c   : > { %5875 = vmatpush1.bf16.msra.mxu0 %v7516_v58 }
 0x70d   : > { %5876 = vmatprep.subr.bf16.mxu0 %v7524_v48  ;;  %v7525_v48 = vld [vmem:[#allocation20 + $0xe0] ss:$16 sps:$4 sm:$0xff]  }
 0x70e   : > { %5836 = vmatpush1.bf16.msra.mxu1 %v7519_v40 }
 0x70f   : > { %6063 = vmatprep.subr.bf16.mxu1 %v7527_v44  ;;  %v7528_v44 = vld [vmem:[#allocation20 + $0xe8] ss:$16 sps:$4 sm:$0xff]  }
 0x710   : > { %5877 = vmatpush1.bf16.msra.mxu0 %v7522_v31 }
 0x711   : > { %6104 = vmatprep.subr.bf16.mxu0 %v7530_v24 }
 0x715   : > { %v7580_v58 = vpop.eup %7579 }
 0x751   : > { %v4949_v29 = vpop.f32.mrf.mxu1 }
 0x753   : > { %v7051_v11 = vpop.f32.mrf.mxu1  ;;  %v5037_v10 = vpop.f32.mrf.mxu0 }
 0x754   : > { %v5579_v30 = vrot.slane %v5037_v10, 7  ;;  %v7533_v11 = vld [vmem:[#allocation20 + $0xc4] ss:$16 sps:$4 sm:$0xff]   ;;  %v7536_v10 = vld [vmem:[#allocation20 + $0xcc] ss:$16 sps:$4 sm:$0xff]  }
 0x755   : > { %v4952_v47 = vpop.f32.mrf.mxu1  ;;  %v7071_v8 = vpop.f32.mrf.mxu0 }
 0x756   : > { %v5580_v5 = vsel %vm11330_vm13, %v5579_v30, %v4949_v29  ;;  %v7531_v30 = vld [vmem:[#allocation20 + $0xc0] ss:$16 sps:$4 sm:$0xff]   ;;  %v7534_v47 = vld [vmem:[#allocation20 + $0xc8] ss:$16 sps:$4 sm:$0xff]   ;;  %v7539_v8 = vld [vmem:[#allocation20 + $0xa4] ss:$16 sps:$4 sm:$0xff]  }
 0x757   : > { %v7052_v6 = vpop.f32.mrf.mxu1  ;;  %v5040_v13 = vpop.f32.mrf.mxu0 }
 0x758   : > { %v7537_v6 = vld [vmem:[#allocation20 + $0xa0] ss:$16 sps:$4 sm:$0xff]   ;;  %v7540_v13 = vld [vmem:[#allocation20 + $0xa8] ss:$16 sps:$4 sm:$0xff]  }
 0x759   : > { %v7072_v62 = vpop.f32.mrf.mxu0 }
 0x75a   : > { %v7545_v62 = vld [vmem:[#allocation20 + $0x84] ss:$16 sps:$4 sm:$0xff]  }
 0x771   : > { %v5125_v50 = vpop.f32.mrf.mxu1 }
 0x772   : > { %v5581_v3 = vrot.slane %v5125_v50, 6  ;;  %v7548_v50 = vld [vmem:[#allocation20 + $0x8c] ss:$16 sps:$4 sm:$0xff]  }
 0x773   : > { %v7091_v15 = vpop.f32.mrf.mxu1  ;;  %v5213_v54 = vpop.f32.mrf.mxu0 }
 0x774   : > { %v5583_v43 = vrot.slane %v5213_v54, 5  ;;  %v5582_v42 = vsel %vm11331_vm14, %v5581_v3, %v5580_v5  ;;  %v7542_v5 = vld [vmem:[#allocation20 + $0xac] ss:$16 sps:$4 sm:$0xff]   ;;  %v7543_v15 = vld [vmem:[#allocation20 + $0x80] ss:$16 sps:$4 sm:$0xff]  }
 0x775   : > { %v5128_v36 = vpop.f32.mrf.mxu1  ;;  %v7111_v28 = vpop.f32.mrf.mxu0  ;;  %v7546_v54 = vld [vmem:[#allocation20 + $0x88] ss:$16 sps:$4 sm:$0xff]  }
 0x776   : > { %v5584_v14 = vsel %vm11332_vm15, %v5583_v43, %v5582_v42  ;;  %v7551_v36 = vld [vmem:[#allocation20 + $0x64] ss:$16 sps:$4 sm:$0xff]   ;;  %v7554_v28 = vld [vmem:[#allocation20 + $0x6c] ss:$16 sps:$4 sm:$0xff]  }
 0x777   : > { %v7092_v53 = vpop.f32.mrf.mxu1  ;;  %v5216_v38 = vpop.f32.mrf.mxu0 }
 0x778   : > { %v7549_v53 = vld [vmem:[#allocation20 + $0x60] ss:$16 sps:$4 sm:$0xff]   ;;  %v7557_v38 = vld [vmem:[#allocation20 + $0x44] ss:$16 sps:$4 sm:$0xff]  }
 0x779   : > { %v7112_v16 = vpop.f32.mrf.mxu0 }
 0x77a   : > { %v7560_v16 = vld [vmem:[#allocation20 + $0x4c] ss:$16 sps:$4 sm:$0xff]  }
 0x791   : > { %v5301_v63 = vpop.f32.mrf.mxu1 }
 0x792   : > { %v5585_v51 = vrot.slane %v5301_v63, 4  ;;  %v7566_v63 = vld [vmem:[#allocation20 + $0x2c] ss:$16 sps:$4 sm:$0xff]  }
 0x793   : > { %v7131_v7 = vpop.f32.mrf.mxu1  ;;  %v5389_v61 = vpop.f32.mrf.mxu0 }
 0x794   : > { %v5587_v45 = vrot.slane %v5389_v61, 3  ;;  %v5586_v25 = vsel %vm4782_vm6, %v5585_v51, %v5584_v14  ;;  %v7561_v7 = vld [vmem:[#allocation20 + $0x20] ss:$16 sps:$4 sm:$0xff]   ;;  %v7564_v61 = vld [vmem:[#allocation20 + $0x28] ss:$16 sps:$4 sm:$0xff]  }
 0x795   : > { %v5304_v56 = vpop.f32.mrf.mxu1  ;;  %v7151_v60 = vpop.f32.mrf.mxu0 }
 0x796   : > { %v5588_v19 = vsel %vm4784_vm7, %v5587_v45, %v5586_v25  ;;  %v7569_v56 = vld [vmem:[#allocation20 + $0x4] ss:$16 sps:$4 sm:$0xff]   ;;  %v7572_v60 = vld [vmem:[#allocation20 + $0xc] ss:$16 sps:$4 sm:$0xff]  }
 0x797   : > { %v7132_v27 = vpop.f32.mrf.mxu1  ;;  %v5392_v32 = vpop.f32.mrf.mxu0 }
 0x798   : > { %v7567_v27 = vld [vmem:[#allocation20] ss:$16 sps:$4 sm:$0xff]   ;;  %v7570_v32 = vld [vmem:[#allocation20 + $0x8] ss:$16 sps:$4 sm:$0xff]  }
 0x799   : > { %v7152_v41 = vpop.f32.mrf.mxu0 }
 0x79a   : > { %v5595_v41 = vld [vmem:[%s8279_s22] sm:$0xf]  ;;  %s7849_s22 = scalar_lea.vmem %s7848_s18, 256 }
 0x79b   : > { %p7851_p9 = scmp.lt.s32.totalorder %s7849_s22, %s7843_s15 }
 0x79d   : > { %p7852_p10 = por %p7851_p9, %p7850_p8 }
 0x79f   : > { %p7853_p12 = pnand %p7852_p10, %p7846_p6 }
 0x7b1   : > { %v5477_v17 = vpop.f32.mrf.mxu1 }
 0x7b2   : > { %v5589_v57 = vrot.slane %v5477_v17, 2 }
 0x7b3   : > { %v7171_v33 = vpop.f32.mrf.mxu1  ;;  %v5565_v9 = vpop.f32.mrf.mxu0 }
 0x7b4   : > { %v5590_v20 = vsel %vm4786_vm8, %v5589_v57, %v5588_v19  ;;  %v5591_v52 = vrot.slane %v5565_v9, 1 }
 0x7b5   : > { %v5480_v35 = vpop.f32.mrf.mxu1  ;;  %v7191_v18 = vpop.f32.mrf.mxu0 }
 0x7b6   : > { %v5592_v1 = vsel %vm4788_vm9, %v5591_v52, %v5590_v20 }
 0x7b7   : > { %v5594_v40 = vmul.f32 %v7580_v58, %v5592_v1  ;;  %v7172_v0 = vpop.f32.mrf.mxu1  ;;  %v5568_v31 = vpop.f32.mrf.mxu0 }
 0x7b9   : > { %v5628_v24 = vpack.c.bf16 %v5594_v40, %v5594_v40  ;;  %v7192_v29 = vpop.f32.mrf.mxu0 }
 0x7bb   : > { %5854 = vmatmul.mubr.bf16.vlgmr.msra.gmra.mxu1 %v5628_v24  ;;  %5895 = vmatmul.mubr.bf16.vlgmr.msra.gmra.mxu0 %v5628_v24 }
 0x7bc   : > { %6064 = vmatpush1.bf16.msra.mxu1 %v7525_v48  ;;  %6105 = vmatpush1.bf16.msra.mxu0 %v7528_v44 }
 0x7bd   : > { %6065 = vmatprep.subr.bf16.mxu1 %v7533_v11  ;;  %6106 = vmatprep.subr.bf16.mxu0 %v7536_v10 }
 0x7be   : > { %6095 = vmatprep.mubr.bf16.mxu1 %v11329_v22  ;;  %6136 = vmatprep.mubr.bf16.mxu0 %v11329_v22  ;;  %v7552_v22 = vld [vmem:[#allocation20 + $0x68] ss:$16 sps:$4 sm:$0xff]  }
 0x7c0   : > { %6066 = vmatpush1.bf16.msra.mxu1 %v7531_v30  ;;  %6107 = vmatpush1.bf16.msra.mxu0 %v7534_v47 }
 0x7c1   : > { %6067 = vmatprep.subr.bf16.mxu1 %v7539_v8  ;;  %6108 = vmatprep.subr.bf16.mxu0 %v7542_v5 }
 0x7c4   : > { %6068 = vmatpush1.bf16.msra.mxu1 %v7537_v6  ;;  %6109 = vmatpush1.bf16.msra.mxu0 %v7540_v13 }
 0x7c5   : > { %6069 = vmatprep.subr.bf16.mxu1 %v7545_v62  ;;  %6110 = vmatprep.subr.bf16.mxu0 %v7548_v50 }
 0x7c8   : > { %6070 = vmatpush1.bf16.msra.mxu1 %v7543_v15  ;;  %6111 = vmatpush1.bf16.msra.mxu0 %v7546_v54 }
 0x7c9   : > { %6071 = vmatprep.subr.bf16.mxu1 %v7551_v36  ;;  %6112 = vmatprep.subr.bf16.mxu0 %v7554_v28 }
 0x7cc   : > { %6072 = vmatpush1.bf16.msra.mxu1 %v7549_v53  ;;  %6113 = vmatpush1.bf16.msra.mxu0 %v7552_v22 }
 0x7cd   : > { %6073 = vmatprep.subr.bf16.mxu1 %v7557_v38  ;;  %6114 = vmatprep.subr.bf16.mxu0 %v7560_v16 }
 0x7d0   : > { %6074 = vmatpush1.bf16.msra.mxu1 %v7555_v59  ;;  %6115 = vmatpush1.bf16.msra.mxu0 %v7558_v34 }
 0x7d1   : > { %6075 = vmatprep.subr.bf16.mxu1 %v7563_v39  ;;  %6116 = vmatprep.subr.bf16.mxu0 %v7566_v63 }
 0x7d4   : > { %6076 = vmatpush1.bf16.msra.mxu1 %v7561_v7  ;;  %6117 = vmatpush1.bf16.msra.mxu0 %v7564_v61 }
 0x7d5   : > { %6077 = vmatprep.subr.bf16.mxu1 %v7569_v56  ;;  %6118 = vmatprep.subr.bf16.mxu0 %v7572_v60 }
 0x7d8   : > { %6078 = vmatpush1.bf16.msra.mxu1 %v7567_v27  ;;  %6119 = vmatpush1.bf16.msra.mxu0 %v7570_v32 }
 0x7db   : > { %6096 = vmatmul.mubr.bf16.vlgmr.msra.gmra.mxu1 %v5595_v41  ;;  %6137 = vmatmul.mubr.bf16.vlgmr.msra.gmra.mxu0 %v5595_v41 }
 0x7dc   : > { %7856 = shalt.err (!%p7853_p12)
}
 0x7dd   : > { %s7857_s29 = scalar_lea.hbm %s6246_s3, 128  ;;  %s7861_s4 = scalar_lea.hbm %s11333_s17, 896 }
 0x7de   : > { %p7858_p5 = scmp.ne.s32.totalorder %s6246_s3, %s7857_s29  ;;  %p7862_p0 = scmp.lt.s32.totalorder %s6246_s3, %s11333_s17 }
 0x7df   : > { %p7863_p7 = scmp.lt.s32.totalorder %s7861_s4, %s7857_s29 }
 0x7e0   : > { %p7859_p13 = pnand %p7858_p5, %p8240_p4 }
 0x7e1   : > { %p7864_p11 = por %p7863_p7, %p7862_p0 }
 0x7e2   : > { %p7860_p2 = pneg %p7859_p13 }
 0x7e4   : > { %p7865_p3 = pnand %p7864_p11, %p7860_p2 }
 0x7e6   : > { %7868 = shalt.err (!%p7865_p3)
}
 0x7e7   : > { %7244 = dma.vmem_to_hbm [thread:$0]  (%p8240_p4), %s6249_s28, 128, %s6246_s3, %s6220_s20   ;;  %v2589_v25 = vsub.s32 2, %v9253_v46  ;;  %v2593_v57 = vsub.s32 3, %v9253_v46  ;;  %v2601_v11 = vsub.s32 5, %v9253_v46  ;;  %v2597_v6 = vsub.s32 4, %v9253_v46 }
 0x7e8   : > { %s11334_s14 = sld [smem:[#allocation174_spill]]  ;;  %s6234_s3 = sshll.u32 %s8560_s5, 4  ;;  %s6235_s3 = int_to_ptr.vmem [resolvable:$true] %s6234_s3 }
 0x7e9   : > { %v2590_v19 = vrot.slane %v10338_v26, %v2589_v25  ;;  %v2594_v52 = vrot.slane %v10338_v26, %v2593_v57  ;;  %v2602_v13 = vrot.slane %v10338_v26, %v2601_v11  ;;  %v2598_v15 = vrot.slane %v10338_v26, %v2597_v6  ;;  %s11335_s28 = sshll.u32 %s7967_s6, 7  ;;  %s11336_s22 = sld [smem:[#allocation175_spill]] }
 0x7ea   : > { %s6215_s27 = scalar_lea.sflag [#allocation10], %s8276_s7  ;;  %s7869_s16 = scalar_lea.vmem %s6235_s3, 128 }
 0x7eb   : > { %v2925_v40 = vadd.f32 %v10154_v12, %v2590_v19  ;;  %v2927_v24 = vadd.f32 %v10158_v37, %v2594_v52  ;;  %v2968_v54 = vadd.f32 %v10160_v4, %v2602_v13  ;;  %v2966_v53 = vadd.f32 %v10156_v2, %v2598_v15  ;;  %v2527_v4 = vld [vmem:[#allocation3] sm:$0xff]  ;;  %p7870_p6 = scmp.ne.s32.totalorder %s6235_s3, %s7869_s16  ;;  %s8001_s4 = smov [#allocation23]  }
 0x7ec   : > { %s7873_s9 = sshll.u32 %s8001_s4, 4  ;;  %s7874_s9 = int_to_ptr.vmem [resolvable:$false] %s7873_s9 }
 0x7ed   : > { %p7871_p8 = pnand %p7870_p6, %p8240_p4  ;;  %s7875_s15 = scalar_lea.vmem %s7874_s9, 256 }
 0x7ee   : > { %v6145_v17 = vld [vmem:[%s11334_s14] sm:$0xf]  ;;  %p7876_p10 = scmp.lt.s32.totalorder %s6235_s3, %s7874_s9  ;;  %p7877_p12 = scmp.lt.s32.totalorder %s7875_s15, %s7869_s16 }
 0x7ef   : > { %v6150_v33 = vrot.slane %v6145_v17, %v9256_v49  ;;  %v6154_v18 = vrot.slane %v6145_v17, %v2585_v23  ;;  %v6162_v23 = vrot.slane %v6145_v17, %v2593_v57  ;;  %v6158_v50 = vrot.slane %v6145_v17, %v2589_v25  ;;  %s10397_s29 = scalar_lea.hbm %s11336_s22, %s11335_s28  ;;  %p7872_p9 = pneg %p7871_p8 }
 0x7f0   : > { %p7878_p5 = por %p7877_p12, %p7876_p10 }
 0x7f2   : > { %p7879_p13 = pnand %p7878_p5, %p7872_p9 }
 0x87b   : > { %v5855_v21 = vpop.f32.mrf.mxu1  ;;  %v5896_v55 = vpop.f32.mrf.mxu0 }
 0x87d   : > { %v5857_v3 = vpop.f32.mrf.mxu1  ;;  %v5898_v43 = vpop.f32.mrf.mxu0 }
 0x87f   : > { %v5859_v42 = vpop.f32.mrf.mxu1  ;;  %v5900_v51 = vpop.f32.mrf.mxu0 }
 0x881   : > { %v5860_v14 = vpop.f32.mrf.mxu1  ;;  %v5901_v45 = vpop.f32.mrf.mxu0 }
 0x89b   : > { %v6097_v9 = vpop.f32.mrf.mxu1  ;;  %v6138_v20 = vpop.f32.mrf.mxu0 }
 0x89c   : > { %v6098_v35 = vadd.f32 %v6097_v9, %v5855_v21  ;;  %v6139_v62 = vadd.f32 %v6138_v20, %v5896_v55 }
 0x89d   : > { %v6099_v58 = vpop.f32.mrf.mxu1  ;;  %v6140_v1 = vpop.f32.mrf.mxu0 }
 0x89e   : > { %v6167_v0 = vadd.f32 %v6150_v33, %v6098_v35  ;;  %v6100_v31 = vadd.f32 %v6099_v58, %v5857_v3  ;;  %v6141_v5 = vadd.f32 %v6140_v1, %v5898_v43  ;;  %v6169_v36 = vadd.f32 %v6158_v50, %v6139_v62 }
 0x89f   : > { %v6101_v48 = vpop.f32.mrf.mxu1  ;;  %v6142_v44 = vpop.f32.mrf.mxu0 }
 0x8a0   : > { %v6171_v29 = vadd.f32 %v6167_v0, %v2925_v40  ;;  %v6168_v49 = vadd.f32 %v6154_v18, %v6100_v31  ;;  %v6170_v37 = vadd.f32 %v6162_v23, %v6141_v5  ;;  %v6173_v22 = vadd.f32 %v6169_v36, %v2966_v53 }
 0x8a1   : > { %v6102_v10 = vpop.f32.mrf.mxu1  ;;  %v6143_v30 = vpop.f32.mrf.mxu0 }
 0x8a2   : > { %v6736_v47 = vmul.f32 -1.442695, %v6171_v29  ;;  %v6172_v8 = vadd.f32 %v6168_v49, %v2927_v24  ;;  %v6174_v28 = vadd.f32 %v6170_v37, %v2968_v54 }
 0x8a4   : > { %7581 = vpow2.f32 %v6736_v47  ;;  %v6737_v12 = vmul.f32 -1.442695, %v6172_v8  ;;  %v6738_v38 = vmul.f32 -1.442695, %v6174_v28 }
 0x8a6   : > { %7583 = vpow2.f32 %v6737_v12 }
 0x8a7   : > { %7585 = vtanh.f32 %v6173_v22 }
 0x8a8   : > { %7587 = vpow2.f32 %v6738_v38 }
 0x8b1   : > { %v7582_v16 = vpop.eup %7581 }
 0x8b2   : > { %v6178_v46 = vadd.f32 1.0, %v7582_v16 }
 0x8b3   : > { %v7584_v59 = vpop.eup %7583 }
 0x8b4   : > { %7589 = vrcp.f32 %v6178_v46  ;;  %v6184_v34 = vadd.f32 1.0, %v7584_v59  ;;  %v7586_v39 = vpop.eup %7585 }
 0x8b5   : > { %v7588_v26 = vpop.eup %7587 }
 0x8b6   : > { %7591 = vrcp.f32 %v6184_v34  ;;  %v6191_v61 = vadd.f32 1.0, %v7588_v26 }
 0x8b8   : > { %7593 = vrcp.f32 %v6191_v61 }
 0x8c1   : > { %v7590_v63 = vpop.eup %7589 }
 0x8c2   : > { %v6195_v7 = vmul.f32 %v7590_v63, %v7586_v39 }
 0x8c3   : > { %v7592_v2 = vpop.eup %7591 }
 0x8c4   : > { %v6194_v56 = vmul.f32 %v7592_v2, %v2527_v4 }
 0x8c5   : > { %v7594_v27 = vpop.eup %7593 }
 0x8c6   : > { %v6196_v60 = vadd.f32 %v6195_v7, %v6194_v56 }
 0x8c8   : > { %7595 = vtanh.f32 %v6196_v60  ;;  %6213 = vst [vmem:[#allocation3] sm:$0xff] %v6196_v60 }
 0x8d5   : > { %v7596_v32 = vpop.eup %7595 }
 0x8d6   : > { %v6198_v41 = vmul.f32 %v7596_v32, %v7594_v27 }
 0x8d8   : > { %6207 = vst [vmem:[%s8560_s5] sm:$0xff] %v6198_v41  ;;  %6212 = vst [vmem:[#allocation2] sm:$0xff] %v6198_v41 }
 0x8d9   : > { %7882 = shalt.err (!%p7879_p13)
}
 0x8da   : > { %s7883_s6 = scalar_lea.hbm %s10397_s29, 128  ;;  %s7887_s1 = scalar_lea.hbm %s11336_s22, 896 }
 0x8db   : > { %p7884_p2 = scmp.ne.s32.totalorder %s10397_s29, %s7883_s6  ;;  %p7888_p11 = scmp.lt.s32.totalorder %s10397_s29, %s11336_s22 }
 0x8dc   : > { %p7889_p3 = scmp.lt.s32.totalorder %s7887_s1, %s7883_s6 }
 0x8dd   : > { %p7885_p0 = pnand %p7884_p2, %p8240_p4 }
 0x8de   : > { %p7890_p6 = por %p7889_p3, %p7888_p11 }
 0x8df   : > { %p7886_p7 = pneg %p7885_p0 }
 0x8e1   : > { %p7891_p8 = pnand %p7890_p6, %p7886_p7 }
 0x8e3   : > { %7894 = shalt.err (!%p7891_p8)
}
 0x8e4   : > { %7243 = dma.vmem_to_hbm [thread:$0]  (%p8240_p4), %s6235_s3, 128, %s10397_s29, %s6215_s27  }
 0x8e5 PF: > { %p7300_p9 = scmp.ge.s32.totalorder %s7975_s26, 2  ;;  %s6260_s20 = sand.u32 1, %s7955_s23  }
 0x8e6   : > { %s6261_s18 = scalar_lea.sflag [#allocation10], %s6260_s20 }
 0x8e7   : > { %p7277_p10 = pnand %p7300_p9, %p8247_p1 }
 0x8e9   : > { %p7278_p12 = pneg %p7277_p10 }
 0x8eb   : > { %7946 = dma.done.wait (%p7278_p12), %s6261_s18, 128  }
 0x8ec   : > { %7948 = vsyncadd (%p7278_p12), %s6261_s18, 4294967168  ;;  %s6270_s16 = scalar_lea.sflag [#allocation25], %s6260_s20 }
 0x8ed   : > { %7950 = dma.done.wait (%p7278_p12), %s6270_s16, 128  }
 0x8ee   : > { %7952 = vsyncadd (%p7278_p12), %s6270_s16, 4294967168  ;;  %s45_s26 = sadd.s32 1, %s7975_s26   ;;  %s11337_s23 = smov %s7959_s0 }
 0x8ef   : > { %p42_p5 = scmp.ge.s32.totalorder %s45_s26, 9   ;;  %s11338_s0 = smov %s7963_s24 }
 0x8f0   : > { %s11339_s24 = smov %s8245_s10  ;;  %s11340_s6 = smov %s7971_s25 }
 0x8f1   : > { %s11341_s25 = smov %s11343_s21  ;;  %44 = sbr.rel (!%p42_p5) target bundleno = 27 (0x1b), region = 172 }
 0x8f6   :  { %6275 = vsyncpa [#allocation9], 1 }
 0x8f7   :  { %6277 = vsyncpa [#allocation9 + $0x1], 1 }
 0x8f8   :  { %6278 = vsyncpa [#allocation12], 1 }
 0x8f9   :  { %6280 = vsyncpa [#allocation12 + $0x1], 1 }
 0x8fa   :  { %6281 = vsyncpa [#allocation15], 1 }
 0x8fb   :  { %6282 = vsyncpa [#allocation18], 1 }
 0x8fc   :  { %6283 = vsyncpa [#allocation21], 1 }
 0x8fd   :  { %6284 = vsyncpa [#allocation10], 1 }
 0x8fe   :  { %6286 = vsyncpa [#allocation10 + $0x1], 1 }
 0x8ff   :  { %6287 = vsyncpa [#allocation25], 1 }
 0x900   :  { %6289 = vsyncpa [#allocation25 + $0x1], 1 }

</bundles_post_ra>
